<compile_context>
chip_gen: v7x
topology: tpu7x:2x2x1
jax: 0.10.0
libtpu: 0.0.40
codegen_flags: <defaults>
</compile_context>

<pallas_src>
import functools

import jax
import jax.numpy as jnp
from jax.experimental import pallas as pl
from jax.experimental.pallas import tpu as pltpu

# ----------------------------- small synthetic config -----------------------------
IMAGE_SZ      = 16          # titok_config.image_sz (small for the demo)
PATCH         = 4           # ViT patch size
C_IN          = 3           # RGB
N_EMBD        = 32          # ViT n_embd
N_HEAD        = 4
HEAD_DIM      = N_EMBD // N_HEAD
N_LAYER       = 2
MLP_DIM       = 4 * N_EMBD
LATENT_TOKENS = 16          # titok_config.latent_tokens (== ViT extra_tokens)
LATENT_DIM    = 8           # titok_config.latent_dim
N_PATCH       = (IMAGE_SZ // PATCH) ** 2
SEQ           = N_PATCH + LATENT_TOKENS
CPP           = C_IN * PATCH * PATCH
CPP_PAD       = 128         # lane-padded patch-row width (contraction dim of patch embed)
PROJ_PAD      = 128         # lane-dense padded output width for the final projection
EPS           = 1e-5
SCALE         = 1.0 / float(HEAD_DIM) ** 0.5
PREC          = jax.lax.Precision.HIGHEST   # only used by the pure-JAX reference
BF            = jnp.bfloat16


# ----------------------------- math helpers (shared) -------------------------------
def _layer_norm(x, g, b):
    mu = jnp.mean(x, axis=-1, keepdims=True)
    var = jnp.mean((x - mu) ** 2, axis=-1, keepdims=True)
    return (x - mu) * jax.lax.rsqrt(var + EPS) * g + b


def _gelu(x):
    # tanh-approximate GELU (EUP-friendly).
    return 0.5 * x * (1.0 + jnp.tanh(0.7978845608028654 * (x + 0.044715 * x * x * x)))


# ----------------------------- fused Pallas kernel ----------------------------------
def _encoder_kernel(chunk, xp_ref, wpe_ref, posb_ref, lat_ref,
                    ln1g_ref, ln1b_ref, wqkv_ref, bqkv_ref, wo_ref, bo_ref,
                    ln2g_ref, ln2b_ref, w1_ref, b1_ref, w2_ref, b2_ref,
                    lnfg_ref, lnfb_ref, pw_ref, pb_ref, o_ref, h_sc):
    M = chunk * SEQ

    # --- patch embed (lane-padded contraction) + pos-emb; latent tokens appended by
    # two stores into the persistent VMEM residual carrier (no concatenate). ---------
    xp2 = xp_ref[...].reshape(chunk * N_PATCH, CPP_PAD).astype(BF)
    patch = jnp.dot(xp2, wpe_ref[...], preferred_element_type=jnp.float32)
    h_sc[:, 0:N_PATCH, :] = patch.reshape(chunk, N_PATCH, N_EMBD) + posb_ref[...][None]
    h_sc[:, N_PATCH:, :] = jnp.broadcast_to(
        lat_ref[...][None], (chunk, LATENT_TOKENS, N_EMBD))
    h = h_sc[...]                                                 # (chunk, SEQ, D) f32

    def split_heads(x2d):   # (M, D) f32 -> (chunk*H, SEQ, K) bf16 (head-major lanes)
        x4 = x2d.reshape(chunk, SEQ, N_HEAD, HEAD_DIM).transpose(0, 2, 1, 3)
        return x4.reshape(chunk * N_HEAD, SEQ, HEAD_DIM).astype(BF)

    for l in range(N_LAYER):            # unrolled; static ref indices
        # ---------------- attention: one fused lane-dense QKV matmul -----------------
        xln = _layer_norm(h, ln1g_ref[l], ln1b_ref[l])
        qkv = jnp.dot(xln.reshape(M, N_EMBD).astype(BF), wqkv_ref[l],
                      preferred_element_type=jnp.float32) + bqkv_ref[l]   # (M, 3D) f32
        qh = split_heads(qkv[:, 0:N_EMBD])          # 1/sqrt(K) already folded into wq/bq
        kh = split_heads(qkv[:, N_EMBD:2 * N_EMBD])
        vh = split_heads(qkv[:, 2 * N_EMBD:])

        s = jnp.einsum('bqk,bvk->bqv', qh, kh,
                       preferred_element_type=jnp.float32)                # (cH, S, S) f32
        s = s - jnp.max(s, axis=-1, keepdims=True)
        pr = jnp.exp(s)
        pr = pr * pl.reciprocal(jnp.sum(pr, axis=-1, keepdims=True), approx=True)

        attn = jnp.einsum('bqv,bvk->bqk', pr.astype(BF), vh,
                          preferred_element_type=jnp.float32)             # (cH, S, K)
        attn2d = attn.reshape(chunk, N_HEAD, SEQ, HEAD_DIM) \
                     .transpose(0, 2, 1, 3).reshape(M, N_EMBD)            # head merge
        aout = jnp.dot(attn2d.astype(BF), wo_ref[l],
                       preferred_element_type=jnp.float32) + bo_ref[l]    # single (M,D)@(D,D)
        h = h + aout.reshape(chunk, SEQ, N_EMBD)

        # ------------------------------------ MLP ------------------------------------
        xln2 = _layer_norm(h, ln2g_ref[l], ln2b_ref[l])
        h1 = jnp.dot(xln2.reshape(M, N_EMBD).astype(BF), w1_ref[l],
                     preferred_element_type=jnp.float32) + b1_ref[l]
        h1 = _gelu(h1)
        h2 = jnp.dot(h1.astype(BF), w2_ref[l],
                     preferred_element_type=jnp.float32) + b2_ref[l]
        h = h + h2.reshape(chunk, SEQ, N_EMBD)

    # ---------- final LN + lane-dense padded projection of the latent tokens ----------
    z = _layer_norm(h[:, N_PATCH:, :].reshape(chunk * LATENT_TOKENS, N_EMBD),
                    lnfg_ref[...], lnfb_ref[...])
    o = jnp.dot(z.astype(BF), pw_ref[...],
                preferred_element_type=jnp.float32) + pb_ref[...]
    o_ref[...] = o.reshape(chunk, LATENT_TOKENS, PROJ_PAD)


# ----------------------------- pallas_call wrapper -----------------------------------
def _rep(shape):
    nd = len(shape)
    return pl.BlockSpec(shape, lambda b, _nd=nd: (0,) * _nd)


def pack_params(p):
    """One-time host-side packing: stack per-layer weights, fuse QKV, fold the
    attention scale into wq/bq, cast MXU weights to bf16, lane-pad patch-embed and
    the final projection.  Call ONCE outside the jitted forward and reuse."""
    stk = lambda xs: jnp.stack(xs, axis=0)
    blks = p["blocks"]

    def qkv_fold(w):    # fold 1/sqrt(K) into the q columns of the fused [q|k|v] tensor
        return jnp.concatenate([w[:, :N_EMBD] * SCALE, w[:, N_EMBD:]], axis=1)

    wqkv = stk([qkv_fold(b["wqkv"]).astype(BF) for b in blks])            # (L, D, 3D) bf16
    bqkv = stk([qkv_fold(b["bqkv"]) for b in blks])                       # (L, 1, 3D) f32
    wo = stk([b["wo"].astype(BF) for b in blks])                          # (L, D, D) bf16
    bo = stk([b["bo"] for b in blks])
    ln1g = stk([b["ln1_g"] for b in blks]); ln1b = stk([b["ln1_b"] for b in blks])
    ln2g = stk([b["ln2_g"] for b in blks]); ln2b = stk([b["ln2_b"] for b in blks])
    w1 = stk([b["w1"].astype(BF) for b in blks]); b1 = stk([b["b1"] for b in blks])
    w2 = stk([b["w2"].astype(BF) for b in blks]); b2 = stk([b["b2"] for b in blks])

    wpe = jnp.zeros((CPP_PAD, N_EMBD), jnp.float32).at[:CPP, :].set(
        p["patch_w"].reshape(N_EMBD, -1).T).astype(BF)                    # (CPP_PAD, D)
    posb = p["pos"][0] + p["patch_b"][None, :]                            # (Np, D)
    lat = p["latent"][0]                                                  # (LAT, D)
    pw = jnp.zeros((N_EMBD, PROJ_PAD), jnp.float32).at[:, :LATENT_DIM].set(
        p["proj_w"]).astype(BF)
    pb = jnp.zeros((1, PROJ_PAD), jnp.float32).at[:, :LATENT_DIM].set(p["proj_b"])

    return [wpe, posb, lat, ln1g, ln1b, wqkv, bqkv, wo, bo,
            ln2g, ln2b, w1, b1, w2, b2, p["lnf_g"], p["lnf_b"], pw, pb]


def titok_encoder(x, packed):
    """x: (B, C, H, W) NCHW image; packed: output of pack_params (pre-packed weights)."""
    B = x.shape[0]
    # >=2 grid steps keeps both v7x TensorCores busy; each step stacks a batch chunk
    # into the matmul M dimension (M = chunk*SEQ) for better MXU fill on v5e/v6e too.
    num_chunks = 2 if (B >= 2 and B % 2 == 0) else 1
    chunk = B // num_chunks

    xp = patchify(x)                                                      # (B, Np, CPP_PAD)
    out = pl.pallas_call(
        functools.partial(_encoder_kernel, chunk),
        out_shape=jax.ShapeDtypeStruct((B, LATENT_TOKENS, PROJ_PAD), jnp.float32),
        grid=(num_chunks,),
        in_specs=[pl.BlockSpec((chunk, N_PATCH, CPP_PAD), lambda b: (b, 0, 0))]
                 + [_rep(a.shape) for a in packed],
        out_specs=pl.BlockSpec((chunk, LATENT_TOKENS, PROJ_PAD), lambda b: (b, 0, 0)),
        scratch_shapes=[pltpu.VMEM((chunk, SEQ, N_EMBD), jnp.float32)],   # residual carrier
        compiler_params=pltpu.CompilerParams(
            dimension_semantics=("parallel",),
            vmem_limit_bytes=32 * 1024 * 1024),
    )(xp, *packed)
    return out[:, :, :LATENT_DIM]                       # un-pad the lane-dense projection


# ----------------------------- parameters & glue ------------------------------------
def init_params(key):
    keys = iter(jax.random.split(key, 128))

    def nrm(shape):
        return 0.02 * jax.random.normal(next(keys), shape, jnp.float32)

    p = {
        "patch_w": nrm((N_EMBD, C_IN, PATCH, PATCH)),          # torch Conv2d layout
        "patch_b": jnp.zeros((N_EMBD,), jnp.float32),
        "pos":     nrm((1, N_PATCH, N_EMBD)),
        "latent":  nrm((1, LATENT_TOKENS, N_EMBD)),
        "lnf_g":   jnp.ones((1, N_EMBD), jnp.float32),
        "lnf_b":   jnp.zeros((1, N_EMBD), jnp.float32),
        "proj_w":  nrm((N_EMBD, LATENT_DIM)),                  # transposed torch Linear
        "proj_b":  jnp.zeros((1, LATENT_DIM), jnp.float32),
        "blocks":  [],
    }
    for _ in range(N_LAYER):
        p["blocks"].append(dict(
            ln1_g=jnp.ones((1, N_EMBD), jnp.float32),
            ln1_b=jnp.zeros((1, N_EMBD), jnp.float32),
            wqkv=nrm((N_EMBD, 3 * N_EMBD)),
            bqkv=jnp.zeros((1, 3 * N_EMBD), jnp.float32),
            wo=nrm((N_EMBD, N_EMBD)),
            bo=jnp.zeros((1, N_EMBD), jnp.float32),
            ln2_g=jnp.ones((1, N_EMBD), jnp.float32),
            ln2_b=jnp.zeros((1, N_EMBD), jnp.float32),
            w1=nrm((N_EMBD, MLP_DIM)),
            b1=jnp.zeros((1, MLP_DIM), jnp.float32),
            w2=nrm((MLP_DIM, N_EMBD)),
            b2=jnp.zeros((1, N_EMBD), jnp.float32),
        ))
    return p


def patchify(x):
    # x: (B, C, H, W) NCHW -> (B, Np, CPP_PAD), flattened (c, p, q) like Conv2d weights,
    # zero-padded on the last dim to 128 lanes (wpe's contraction rows are padded to match).
    # TODO(synk): patchification kept as XLA reshape/transpose glue (pure layout, no FLOPs).
    B = x.shape[0]
    hn = IMAGE_SZ // PATCH
    xp = x.reshape(B, C_IN, hn, PATCH, hn, PATCH)
    xp = xp.transpose(0, 2, 4, 1, 3, 5)            # (B, hn, wn, C, P, P)
    xp = xp.reshape(B, N_PATCH, CPP)
    return jnp.pad(xp, ((0, 0), (0, 0), (0, CPP_PAD - CPP)))


# ----------------------------- pure-JAX reference (f32 HIGHEST) ----------------------
def titok_encoder_ref(x, p):
    B = x.shape[0]
    xp = patchify(x)[:, :, :CPP]                                   # (B, Np, CPP)
    w_pe = p["patch_w"].reshape(N_EMBD, -1).T
    h = jnp.dot(xp, w_pe, precision=PREC) + p["patch_b"]
    h = h + p["pos"]
    h = jnp.concatenate(
        [h, jnp.broadcast_to(p["latent"], (B, LATENT_TOKENS, N_EMBD))], axis=1)
    for blk in p["blocks"]:
        hn = _layer_norm(h, blk["ln1_g"], blk["ln1_b"])
        qkv = jnp.dot(hn, blk["wqkv"], precision=PREC) + blk["bqkv"]
        q, k, v = jnp.split(qkv, 3, axis=-1)
        S = h.shape[1]
        qh = q.reshape(B, S, N_HEAD, HEAD_DIM).transpose(0, 2, 1, 3)
        kh = k.reshape(B, S, N_HEAD, HEAD_DIM).transpose(0, 2, 1, 3)
        vh = v.reshape(B, S, N_HEAD, HEAD_DIM).transpose(0, 2, 1, 3)
        s = jnp.einsum("bhqd,bhkd->bhqk", qh, kh, precision=PREC) * SCALE
        a = jax.nn.softmax(s, axis=-1)
        o = jnp.einsum("bhqk,bhkd->bhqd", a, vh, precision=PREC)
        o = o.transpose(0, 2, 1, 3).reshape(B, S, N_EMBD)
        h = h + jnp.dot(o, blk["wo"], precision=PREC) + blk["bo"]
        hn2 = _layer_norm(h, blk["ln2_g"], blk["ln2_b"])
        m = _gelu(jnp.dot(hn2, blk["w1"], precision=PREC) + blk["b1"])
        h = h + jnp.dot(m, blk["w2"], precision=PREC) + blk["b2"]
    h_lat = h[:, N_PATCH:, :]
    hn = _layer_norm(h_lat, p["lnf_g"], p["lnf_b"])
    return jnp.dot(hn, p["proj_w"], precision=PREC) + p["proj_b"]


# ----------------------------- main ---------------------------------------------------
if __name__ == "__main__":
    key = jax.random.PRNGKey(0)
    k_x, k_p = jax.random.split(key)
    B = 4
    x = jax.random.normal(k_x, (B, C_IN, IMAGE_SZ, IMAGE_SZ), jnp.float32)  # NCHW
    params = init_params(k_p)

    # Pack / cast weights ONCE outside the per-call path (perf review item).
    packed = [jax.block_until_ready(a) for a in pack_params(params)]

    enc = jax.jit(titok_encoder)
    out = jax.block_until_ready(enc(x, packed))
    ref = jax.block_until_ready(titok_encoder_ref(x, params))

    assert out.shape == (B, LATENT_TOKENS, LATENT_DIM), out.shape
    # Tolerance loosened vs. the f32-HIGHEST reference because the kernel feeds the
    # MXU bf16 operands (f32 accumulation) per the performance review.
    max_err = float(jnp.max(jnp.abs(out - ref)))
    assert jnp.allclose(out, ref, rtol=2e-2, atol=2e-2), max_err
    print("KERNEL_OK")
</pallas_src>

<mosaic_0001>
module attributes {stable_mosaic.version = 11 : i64} {
  func.func @_encoder_kernel(%arg0: i32, %arg1: memref<2x16x128xf32, #tpu.memory_space<vmem>>, %arg2: memref<128x32xbf16, #tpu.memory_space<vmem>>, %arg3: memref<16x32xf32, #tpu.memory_space<vmem>>, %arg4: memref<16x32xf32, #tpu.memory_space<vmem>>, %arg5: memref<2x1x32xf32, #tpu.memory_space<vmem>>, %arg6: memref<2x1x32xf32, #tpu.memory_space<vmem>>, %arg7: memref<2x32x96xbf16, #tpu.memory_space<vmem>>, %arg8: memref<2x1x96xf32, #tpu.memory_space<vmem>>, %arg9: memref<2x32x32xbf16, #tpu.memory_space<vmem>>, %arg10: memref<2x1x32xf32, #tpu.memory_space<vmem>>, %arg11: memref<2x1x32xf32, #tpu.memory_space<vmem>>, %arg12: memref<2x1x32xf32, #tpu.memory_space<vmem>>, %arg13: memref<2x32x128xbf16, #tpu.memory_space<vmem>>, %arg14: memref<2x1x128xf32, #tpu.memory_space<vmem>>, %arg15: memref<2x128x32xbf16, #tpu.memory_space<vmem>>, %arg16: memref<2x1x32xf32, #tpu.memory_space<vmem>>, %arg17: memref<1x32xf32, #tpu.memory_space<vmem>>, %arg18: memref<1x32xf32, #tpu.memory_space<vmem>>, %arg19: memref<32x128xbf16, #tpu.memory_space<vmem>>, %arg20: memref<1x128xf32, #tpu.memory_space<vmem>>, %arg21: memref<2x16x128xf32, #tpu.memory_space<vmem>>, %arg22: memref<2x32x32xf32, #tpu.memory_space<vmem>>) attributes {dimension_semantics = [#tpu.dimension_semantics<parallel>], iteration_bounds = array<i64: 2>, scalar_prefetch = 0 : i64, scratch_operands = 1 : i64, tpu.core_type = #tpu.core_type<tc>, window_params = [{transform_indices = @transform_0, window_bounds = array<i64: 2, 16, 128>}, {pipeline_mode = #tpu.pipeline_mode<synchronous>, transform_indices = @transform_1, window_bounds = array<i64: 128, 32>}, {pipeline_mode = #tpu.pipeline_mode<synchronous>, transform_indices = @transform_2, window_bounds = array<i64: 16, 32>}, {pipeline_mode = #tpu.pipeline_mode<synchronous>, transform_indices = @transform_3, window_bounds = array<i64: 16, 32>}, {pipeline_mode = #tpu.pipeline_mode<synchronous>, transform_indices = @transform_4, window_bounds = array<i64: 2, 1, 32>}, {pipeline_mode = #tpu.pipeline_mode<synchronous>, transform_indices = @transform_5, window_bounds = array<i64: 2, 1, 32>}, {pipeline_mode = #tpu.pipeline_mode<synchronous>, transform_indices = @transform_6, window_bounds = array<i64: 2, 32, 96>}, {pipeline_mode = #tpu.pipeline_mode<synchronous>, transform_indices = @transform_7, window_bounds = array<i64: 2, 1, 96>}, {pipeline_mode = #tpu.pipeline_mode<synchronous>, transform_indices = @transform_8, window_bounds = array<i64: 2, 32, 32>}, {pipeline_mode = #tpu.pipeline_mode<synchronous>, transform_indices = @transform_9, window_bounds = array<i64: 2, 1, 32>}, {pipeline_mode = #tpu.pipeline_mode<synchronous>, transform_indices = @transform_10, window_bounds = array<i64: 2, 1, 32>}, {pipeline_mode = #tpu.pipeline_mode<synchronous>, transform_indices = @transform_11, window_bounds = array<i64: 2, 1, 32>}, {pipeline_mode = #tpu.pipeline_mode<synchronous>, transform_indices = @transform_12, window_bounds = array<i64: 2, 32, 128>}, {pipeline_mode = #tpu.pipeline_mode<synchronous>, transform_indices = @transform_13, window_bounds = array<i64: 2, 1, 128>}, {pipeline_mode = #tpu.pipeline_mode<synchronous>, transform_indices = @transform_14, window_bounds = array<i64: 2, 128, 32>}, {pipeline_mode = #tpu.pipeline_mode<synchronous>, transform_indices = @transform_15, window_bounds = array<i64: 2, 1, 32>}, {pipeline_mode = #tpu.pipeline_mode<synchronous>, transform_indices = @transform_16, window_bounds = array<i64: 1, 32>}, {pipeline_mode = #tpu.pipeline_mode<synchronous>, transform_indices = @transform_17, window_bounds = array<i64: 1, 32>}, {pipeline_mode = #tpu.pipeline_mode<synchronous>, transform_indices = @transform_18, window_bounds = array<i64: 32, 128>}, {pipeline_mode = #tpu.pipeline_mode<synchronous>, transform_indices = @transform_19, window_bounds = array<i64: 1, 128>}, {transform_indices = @transform_20, window_bounds = array<i64: 2, 16, 128>}]} {
    %c0 = arith.constant 0 : index
    %c0_0 = arith.constant 0 : index
    %c0_1 = arith.constant 0 : index
    %0 = vector.load %arg1[%c0, %c0_0, %c0_1] : memref<2x16x128xf32, #tpu.memory_space<vmem>>, vector<2x16x128xf32>
    %1 = vector.shape_cast %0 : vector<2x16x128xf32> to vector<32x128xf32>
    %2 = arith.truncf %1 : vector<32x128xf32> to vector<32x128xbf16>
    %c0_2 = arith.constant 0 : index
    %c0_3 = arith.constant 0 : index
    %3 = vector.load %arg2[%c0_2, %c0_3] : memref<128x32xbf16, #tpu.memory_space<vmem>>, vector<128x32xbf16>
    %cst = arith.constant dense<0.000000e+00> : vector<32x32xf32>
    %4 = tpu.matmul %2, %3, %cst {dimension_numbers = #tpu.dot_dimension_numbers<[1], [0], [0], [1], [0, 0, 1, 1], [], []>} : vector<32x128xbf16>, vector<128x32xbf16>, vector<32x32xf32> -> vector<32x32xf32>
    %5 = vector.shape_cast %4 : vector<32x32xf32> to vector<2x16x32xf32>
    %c0_4 = arith.constant 0 : index
    %c0_5 = arith.constant 0 : index
    %6 = vector.load %arg3[%c0_4, %c0_5] : memref<16x32xf32, #tpu.memory_space<vmem>>, vector<16x32xf32>
    %7 = vector.shape_cast %6 : vector<16x32xf32> to vector<1x16x32xf32>
    %8 = vector.broadcast %7 : vector<1x16x32xf32> to vector<2x16x32xf32>
    %9 = arith.addf %5, %8 : vector<2x16x32xf32>
    %c0_6 = arith.constant 0 : index
    %c0_7 = arith.constant 0 : index
    %c0_8 = arith.constant 0 : index
    %10 = vector.load %arg22[%c0_6, %c0_7, %c0_8] : memref<2x32x32xf32, #tpu.memory_space<vmem>>, vector<2x16x32xf32>
    tpu.vector_store %arg22[%c0_6, %c0_7, %c0_8], %9 {strides = array<i32>} : memref<2x32x32xf32, #tpu.memory_space<vmem>>, vector<2x16x32xf32>,
    %c0_9 = arith.constant 0 : index
    %c0_10 = arith.constant 0 : index
    %11 = vector.load %arg4[%c0_9, %c0_10] : memref<16x32xf32, #tpu.memory_space<vmem>>, vector<16x32xf32>
    %12 = vector.shape_cast %11 : vector<16x32xf32> to vector<1x16x32xf32>
    %13 = vector.shape_cast %12 : vector<1x16x32xf32> to vector<1x16x32xf32>
    %14 = vector.broadcast %13 : vector<1x16x32xf32> to vector<2x16x32xf32>
    %c0_11 = arith.constant 0 : index
    %c16 = arith.constant 16 : index
    %c0_12 = arith.constant 0 : index
    %15 = vector.load %arg22[%c0_11, %c16, %c0_12] : memref<2x32x32xf32, #tpu.memory_space<vmem>>, vector<2x16x32xf32>
    tpu.vector_store %arg22[%c0_11, %c16, %c0_12], %14 {strides = array<i32>} : memref<2x32x32xf32, #tpu.memory_space<vmem>>, vector<2x16x32xf32>,
    %c0_13 = arith.constant 0 : index
    %c0_14 = arith.constant 0 : index
    %c0_15 = arith.constant 0 : index
    %16 = vector.load %arg22[%c0_13, %c0_14, %c0_15] : memref<2x32x32xf32, #tpu.memory_space<vmem>>, vector<2x32x32xf32>
    %c0_16 = arith.constant 0 : index
    %c0_17 = arith.constant 0 : index
    %c0_18 = arith.constant 0 : index
    %17 = vector.load %arg5[%c0_16, %c0_17, %c0_18] : memref<2x1x32xf32, #tpu.memory_space<vmem>>, vector<1x1x32xf32>
    %18 = vector.shape_cast %17 : vector<1x1x32xf32> to vector<1x32xf32>
    %c0_19 = arith.constant 0 : index
    %c0_20 = arith.constant 0 : index
    %c0_21 = arith.constant 0 : index
    %19 = vector.load %arg6[%c0_19, %c0_20, %c0_21] : memref<2x1x32xf32, #tpu.memory_space<vmem>>, vector<1x1x32xf32>
    %20 = vector.shape_cast %19 : vector<1x1x32xf32> to vector<1x32xf32>
    %cst_22 = arith.constant dense<0.000000e+00> : vector<2x32xf32>
    %21 = vector.multi_reduction <add>, %16, %cst_22 [2] : vector<2x32x32xf32> to vector<2x32xf32>
    %22 = vector.shape_cast %21 : vector<2x32xf32> to vector<2x32x1xf32>
    %cst_23 = arith.constant 3.200000e+01 : f32
    %23 = vector.broadcast %cst_23 : f32 to vector<2x32x1xf32>
    %24 = arith.divf %22, %23 : vector<2x32x1xf32>
    %25 = vector.broadcast %24 : vector<2x32x1xf32> to vector<2x32x32xf32>
    %26 = arith.subf %16, %25 : vector<2x32x32xf32>
    %27 = arith.mulf %26, %26 : vector<2x32x32xf32>
    %cst_24 = arith.constant dense<0.000000e+00> : vector<2x32xf32>
    %28 = vector.multi_reduction <add>, %27, %cst_24 [2] : vector<2x32x32xf32> to vector<2x32xf32>
    %29 = vector.shape_cast %28 : vector<2x32xf32> to vector<2x32x1xf32>
    %cst_25 = arith.constant 3.200000e+01 : f32
    %30 = vector.broadcast %cst_25 : f32 to vector<2x32x1xf32>
    %31 = arith.divf %29, %30 : vector<2x32x1xf32>
    %32 = vector.broadcast %24 : vector<2x32x1xf32> to vector<2x32x32xf32>
    %33 = arith.subf %16, %32 : vector<2x32x32xf32>
    %cst_26 = arith.constant 9.99999974E-6 : f32
    %34 = vector.broadcast %cst_26 : f32 to vector<2x32x1xf32>
    %35 = arith.addf %31, %34 : vector<2x32x1xf32>
    %36 = math.rsqrt %35 : vector<2x32x1xf32>
    %37 = vector.broadcast %36 : vector<2x32x1xf32> to vector<2x32x32xf32>
    %38 = arith.mulf %33, %37 : vector<2x32x32xf32>
    %39 = vector.shape_cast %18 : vector<1x32xf32> to vector<1x1x32xf32>
    %40 = vector.broadcast %39 : vector<1x1x32xf32> to vector<2x32x32xf32>
    %41 = arith.mulf %38, %40 : vector<2x32x32xf32>
    %42 = vector.shape_cast %20 : vector<1x32xf32> to vector<1x1x32xf32>
    %43 = vector.broadcast %42 : vector<1x1x32xf32> to vector<2x32x32xf32>
    %44 = arith.addf %41, %43 : vector<2x32x32xf32>
    %45 = vector.shape_cast %44 : vector<2x32x32xf32> to vector<64x32xf32>
    %46 = arith.truncf %45 : vector<64x32xf32> to vector<64x32xbf16>
    %c0_27 = arith.constant 0 : index
    %c0_28 = arith.constant 0 : index
    %c0_29 = arith.constant 0 : index
    %47 = vector.load %arg7[%c0_27, %c0_28, %c0_29] : memref<2x32x96xbf16, #tpu.memory_space<vmem>>, vector<1x32x96xbf16>
    %48 = vector.shape_cast %47 : vector<1x32x96xbf16> to vector<32x96xbf16>
    %cst_30 = arith.constant dense<0.000000e+00> : vector<64x96xf32>
    %49 = tpu.matmul %46, %48, %cst_30 {dimension_numbers = #tpu.dot_dimension_numbers<[1], [0], [0], [1], [0, 0, 1, 1], [], []>} : vector<64x32xbf16>, vector<32x96xbf16>, vector<64x96xf32> -> vector<64x96xf32>
    %c0_31 = arith.constant 0 : index
    %c0_32 = arith.constant 0 : index
    %c0_33 = arith.constant 0 : index
    %50 = vector.load %arg8[%c0_31, %c0_32, %c0_33] : memref<2x1x96xf32, #tpu.memory_space<vmem>>, vector<1x1x96xf32>
    %51 = vector.shape_cast %50 : vector<1x1x96xf32> to vector<1x96xf32>
    %52 = vector.broadcast %51 : vector<1x96xf32> to vector<64x96xf32>
    %53 = arith.addf %49, %52 : vector<64x96xf32>
    %54 = vector.extract_strided_slice %53 {offsets = [0, 0], sizes = [64, 32], strides = [1, 1]} : vector<64x96xf32> to vector<64x32xf32>
    %55 = vector.shape_cast %54 : vector<64x32xf32> to vector<2x32x4x8xf32>
    %56 = tpu.transpose %55, [0, 2, 1, 3] : vector<2x32x4x8xf32> -> vector<2x4x32x8xf32>
    %57 = vector.shape_cast %56 : vector<2x4x32x8xf32> to vector<8x32x8xf32>
    %58 = arith.truncf %57 : vector<8x32x8xf32> to vector<8x32x8xbf16>
    %59 = vector.extract_strided_slice %53 {offsets = [0, 32], sizes = [64, 32], strides = [1, 1]} : vector<64x96xf32> to vector<64x32xf32>
    %60 = vector.shape_cast %59 : vector<64x32xf32> to vector<2x32x4x8xf32>
    %61 = tpu.transpose %60, [0, 2, 1, 3] : vector<2x32x4x8xf32> -> vector<2x4x32x8xf32>
    %62 = vector.shape_cast %61 : vector<2x4x32x8xf32> to vector<8x32x8xf32>
    %63 = arith.truncf %62 : vector<8x32x8xf32> to vector<8x32x8xbf16>
    %64 = vector.extract_strided_slice %53 {offsets = [0, 64], sizes = [64, 32], strides = [1, 1]} : vector<64x96xf32> to vector<64x32xf32>
    %65 = vector.shape_cast %64 : vector<64x32xf32> to vector<2x32x4x8xf32>
    %66 = tpu.transpose %65, [0, 2, 1, 3] : vector<2x32x4x8xf32> -> vector<2x4x32x8xf32>
    %67 = vector.shape_cast %66 : vector<2x4x32x8xf32> to vector<8x32x8xf32>
    %68 = arith.truncf %67 : vector<8x32x8xf32> to vector<8x32x8xbf16>
    "tpu.trace_start"() <{level = 10 : i32, message = "bqk,bvk->bqv"}> : () -> ()
    %cst_34 = arith.constant dense<0.000000e+00> : vector<8x32x32xf32>
    %69 = tpu.matmul %58, %63, %cst_34 {dimension_numbers = #tpu.dot_dimension_numbers<[2], [2], [1], [1], [0, 0, 0, 1, 1, 1], [0], [0]>} : vector<8x32x8xbf16>, vector<8x32x8xbf16>, vector<8x32x32xf32> -> vector<8x32x32xf32>
    "tpu.trace_stop"() : () -> ()
    %cst_35 = arith.constant dense<0xFF800000> : vector<8x32xf32>
    %70 = vector.multi_reduction <maximumf>, %69, %cst_35 [2] : vector<8x32x32xf32> to vector<8x32xf32>
    %71 = vector.shape_cast %70 : vector<8x32xf32> to vector<8x32x1xf32>
    %72 = vector.broadcast %71 : vector<8x32x1xf32> to vector<8x32x32xf32>
    %73 = arith.subf %69, %72 : vector<8x32x32xf32>
    %74 = math.exp %73 : vector<8x32x32xf32>
    %cst_36 = arith.constant dense<0.000000e+00> : vector<8x32xf32>
    %75 = vector.multi_reduction <add>, %74, %cst_36 [2] : vector<8x32x32xf32> to vector<8x32xf32>
    %76 = vector.shape_cast %75 : vector<8x32xf32> to vector<8x32x1xf32>
    %77 = tpu.reciprocal %76 {approx = true} : vector<8x32x1xf32> -> vector<8x32x1xf32>
    %78 = vector.broadcast %77 : vector<8x32x1xf32> to vector<8x32x32xf32>
    %79 = arith.mulf %74, %78 : vector<8x32x32xf32>
    %80 = arith.truncf %79 : vector<8x32x32xf32> to vector<8x32x32xbf16>
    "tpu.trace_start"() <{level = 10 : i32, message = "bqv,bvk->bqk"}> : () -> ()
    %cst_37 = arith.constant dense<0.000000e+00> : vector<8x32x8xf32>
    %81 = tpu.matmul %80, %68, %cst_37 {dimension_numbers = #tpu.dot_dimension_numbers<[2], [1], [1], [2], [0, 0, 0, 1, 1, 2], [0], [0]>} : vector<8x32x32xbf16>, vector<8x32x8xbf16>, vector<8x32x8xf32> -> vector<8x32x8xf32>
    "tpu.trace_stop"() : () -> ()
    %82 = vector.shape_cast %81 : vector<8x32x8xf32> to vector<2x4x32x8xf32>
    %83 = tpu.transpose %82, [0, 2, 1, 3] : vector<2x4x32x8xf32> -> vector<2x32x4x8xf32>
    %84 = vector.shape_cast %83 : vector<2x32x4x8xf32> to vector<64x32xf32>
    %85 = arith.truncf %84 : vector<64x32xf32> to vector<64x32xbf16>
    %c0_38 = arith.constant 0 : index
    %c0_39 = arith.constant 0 : index
    %c0_40 = arith.constant 0 : index
    %86 = vector.load %arg9[%c0_38, %c0_39, %c0_40] : memref<2x32x32xbf16, #tpu.memory_space<vmem>>, vector<1x32x32xbf16>
    %87 = vector.shape_cast %86 : vector<1x32x32xbf16> to vector<32x32xbf16>
    %cst_41 = arith.constant dense<0.000000e+00> : vector<64x32xf32>
    %88 = tpu.matmul %85, %87, %cst_41 {dimension_numbers = #tpu.dot_dimension_numbers<[1], [0], [0], [1], [0, 0, 1, 1], [], []>} : vector<64x32xbf16>, vector<32x32xbf16>, vector<64x32xf32> -> vector<64x32xf32>
    %c0_42 = arith.constant 0 : index
    %c0_43 = arith.constant 0 : index
    %c0_44 = arith.constant 0 : index
    %89 = vector.load %arg10[%c0_42, %c0_43, %c0_44] : memref<2x1x32xf32, #tpu.memory_space<vmem>>, vector<1x1x32xf32>
    %90 = vector.shape_cast %89 : vector<1x1x32xf32> to vector<1x32xf32>
    %91 = vector.broadcast %90 : vector<1x32xf32> to vector<64x32xf32>
    %92 = arith.addf %88, %91 : vector<64x32xf32>
    %93 = vector.shape_cast %92 : vector<64x32xf32> to vector<2x32x32xf32>
    %94 = arith.addf %16, %93 : vector<2x32x32xf32>
    %c0_45 = arith.constant 0 : index
    %c0_46 = arith.constant 0 : index
    %c0_47 = arith.constant 0 : index
    %95 = vector.load %arg11[%c0_45, %c0_46, %c0_47] : memref<2x1x32xf32, #tpu.memory_space<vmem>>, vector<1x1x32xf32>
    %96 = vector.shape_cast %95 : vector<1x1x32xf32> to vector<1x32xf32>
    %c0_48 = arith.constant 0 : index
    %c0_49 = arith.constant 0 : index
    %c0_50 = arith.constant 0 : index
    %97 = vector.load %arg12[%c0_48, %c0_49, %c0_50] : memref<2x1x32xf32, #tpu.memory_space<vmem>>, vector<1x1x32xf32>
    %98 = vector.shape_cast %97 : vector<1x1x32xf32> to vector<1x32xf32>
    %cst_51 = arith.constant dense<0.000000e+00> : vector<2x32xf32>
    %99 = vector.multi_reduction <add>, %94, %cst_51 [2] : vector<2x32x32xf32> to vector<2x32xf32>
    %100 = vector.shape_cast %99 : vector<2x32xf32> to vector<2x32x1xf32>
    %cst_52 = arith.constant 3.200000e+01 : f32
    %101 = vector.broadcast %cst_52 : f32 to vector<2x32x1xf32>
    %102 = arith.divf %100, %101 : vector<2x32x1xf32>
    %103 = vector.broadcast %102 : vector<2x32x1xf32> to vector<2x32x32xf32>
    %104 = arith.subf %94, %103 : vector<2x32x32xf32>
    %105 = arith.mulf %104, %104 : vector<2x32x32xf32>
    %cst_53 = arith.constant dense<0.000000e+00> : vector<2x32xf32>
    %106 = vector.multi_reduction <add>, %105, %cst_53 [2] : vector<2x32x32xf32> to vector<2x32xf32>
    %107 = vector.shape_cast %106 : vector<2x32xf32> to vector<2x32x1xf32>
    %cst_54 = arith.constant 3.200000e+01 : f32
    %108 = vector.broadcast %cst_54 : f32 to vector<2x32x1xf32>
    %109 = arith.divf %107, %108 : vector<2x32x1xf32>
    %110 = vector.broadcast %102 : vector<2x32x1xf32> to vector<2x32x32xf32>
    %111 = arith.subf %94, %110 : vector<2x32x32xf32>
    %cst_55 = arith.constant 9.99999974E-6 : f32
    %112 = vector.broadcast %cst_55 : f32 to vector<2x32x1xf32>
    %113 = arith.addf %109, %112 : vector<2x32x1xf32>
    %114 = math.rsqrt %113 : vector<2x32x1xf32>
    %115 = vector.broadcast %114 : vector<2x32x1xf32> to vector<2x32x32xf32>
    %116 = arith.mulf %111, %115 : vector<2x32x32xf32>
    %117 = vector.shape_cast %96 : vector<1x32xf32> to vector<1x1x32xf32>
    %118 = vector.broadcast %117 : vector<1x1x32xf32> to vector<2x32x32xf32>
    %119 = arith.mulf %116, %118 : vector<2x32x32xf32>
    %120 = vector.shape_cast %98 : vector<1x32xf32> to vector<1x1x32xf32>
    %121 = vector.broadcast %120 : vector<1x1x32xf32> to vector<2x32x32xf32>
    %122 = arith.addf %119, %121 : vector<2x32x32xf32>
    %123 = vector.shape_cast %122 : vector<2x32x32xf32> to vector<64x32xf32>
    %124 = arith.truncf %123 : vector<64x32xf32> to vector<64x32xbf16>
    %c0_56 = arith.constant 0 : index
    %c0_57 = arith.constant 0 : index
    %c0_58 = arith.constant 0 : index
    %125 = vector.load %arg13[%c0_56, %c0_57, %c0_58] : memref<2x32x128xbf16, #tpu.memory_space<vmem>>, vector<1x32x128xbf16>
    %126 = vector.shape_cast %125 : vector<1x32x128xbf16> to vector<32x128xbf16>
    %cst_59 = arith.constant dense<0.000000e+00> : vector<64x128xf32>
    %127 = tpu.matmul %124, %126, %cst_59 {dimension_numbers = #tpu.dot_dimension_numbers<[1], [0], [0], [1], [0, 0, 1, 1], [], []>} : vector<64x32xbf16>, vector<32x128xbf16>, vector<64x128xf32> -> vector<64x128xf32>
    %c0_60 = arith.constant 0 : index
    %c0_61 = arith.constant 0 : index
    %c0_62 = arith.constant 0 : index
    %128 = vector.load %arg14[%c0_60, %c0_61, %c0_62] : memref<2x1x128xf32, #tpu.memory_space<vmem>>, vector<1x1x128xf32>
    %129 = vector.shape_cast %128 : vector<1x1x128xf32> to vector<1x128xf32>
    %130 = vector.broadcast %129 : vector<1x128xf32> to vector<64x128xf32>
    %131 = arith.addf %127, %130 : vector<64x128xf32>
    %cst_63 = arith.constant 5.000000e-01 : f32
    %132 = vector.broadcast %cst_63 : f32 to vector<64x128xf32>
    %133 = arith.mulf %132, %131 : vector<64x128xf32>
    %cst_64 = arith.constant 4.471500e-02 : f32
    %134 = vector.broadcast %cst_64 : f32 to vector<64x128xf32>
    %135 = arith.mulf %134, %131 : vector<64x128xf32>
    %136 = arith.mulf %135, %131 : vector<64x128xf32>
    %137 = arith.mulf %136, %131 : vector<64x128xf32>
    %138 = arith.addf %131, %137 : vector<64x128xf32>
    %cst_65 = arith.constant 0.797884583 : f32
    %139 = vector.broadcast %cst_65 : f32 to vector<64x128xf32>
    %140 = arith.mulf %139, %138 : vector<64x128xf32>
    %141 = math.tanh %140 : vector<64x128xf32>
    %cst_66 = arith.constant 1.000000e+00 : f32
    %142 = vector.broadcast %cst_66 : f32 to vector<64x128xf32>
    %143 = arith.addf %142, %141 : vector<64x128xf32>
    %144 = arith.mulf %133, %143 : vector<64x128xf32>
    %145 = arith.truncf %144 : vector<64x128xf32> to vector<64x128xbf16>
    %c0_67 = arith.constant 0 : index
    %c0_68 = arith.constant 0 : index
    %c0_69 = arith.constant 0 : index
    %146 = vector.load %arg15[%c0_67, %c0_68, %c0_69] : memref<2x128x32xbf16, #tpu.memory_space<vmem>>, vector<1x128x32xbf16>
    %147 = vector.shape_cast %146 : vector<1x128x32xbf16> to vector<128x32xbf16>
    %cst_70 = arith.constant dense<0.000000e+00> : vector<64x32xf32>
    %148 = tpu.matmul %145, %147, %cst_70 {dimension_numbers = #tpu.dot_dimension_numbers<[1], [0], [0], [1], [0, 0, 1, 1], [], []>} : vector<64x128xbf16>, vector<128x32xbf16>, vector<64x32xf32> -> vector<64x32xf32>
    %c0_71 = arith.constant 0 : index
    %c0_72 = arith.constant 0 : index
    %c0_73 = arith.constant 0 : index
    %149 = vector.load %arg16[%c0_71, %c0_72, %c0_73] : memref<2x1x32xf32, #tpu.memory_space<vmem>>, vector<1x1x32xf32>
    %150 = vector.shape_cast %149 : vector<1x1x32xf32> to vector<1x32xf32>
    %151 = vector.broadcast %150 : vector<1x32xf32> to vector<64x32xf32>
    %152 = arith.addf %148, %151 : vector<64x32xf32>
    %153 = vector.shape_cast %152 : vector<64x32xf32> to vector<2x32x32xf32>
    %154 = arith.addf %94, %153 : vector<2x32x32xf32>
    %c1 = arith.constant 1 : index
    %c0_74 = arith.constant 0 : index
    %c0_75 = arith.constant 0 : index
    %155 = vector.load %arg5[%c1, %c0_74, %c0_75] : memref<2x1x32xf32, #tpu.memory_space<vmem>>, vector<1x1x32xf32>
    %156 = vector.shape_cast %155 : vector<1x1x32xf32> to vector<1x32xf32>
    %c1_76 = arith.constant 1 : index
    %c0_77 = arith.constant 0 : index
    %c0_78 = arith.constant 0 : index
    %157 = vector.load %arg6[%c1_76, %c0_77, %c0_78] : memref<2x1x32xf32, #tpu.memory_space<vmem>>, vector<1x1x32xf32>
    %158 = vector.shape_cast %157 : vector<1x1x32xf32> to vector<1x32xf32>
    %cst_79 = arith.constant dense<0.000000e+00> : vector<2x32xf32>
    %159 = vector.multi_reduction <add>, %154, %cst_79 [2] : vector<2x32x32xf32> to vector<2x32xf32>
    %160 = vector.shape_cast %159 : vector<2x32xf32> to vector<2x32x1xf32>
    %cst_80 = arith.constant 3.200000e+01 : f32
    %161 = vector.broadcast %cst_80 : f32 to vector<2x32x1xf32>
    %162 = arith.divf %160, %161 : vector<2x32x1xf32>
    %163 = vector.broadcast %162 : vector<2x32x1xf32> to vector<2x32x32xf32>
    %164 = arith.subf %154, %163 : vector<2x32x32xf32>
    %165 = arith.mulf %164, %164 : vector<2x32x32xf32>
    %cst_81 = arith.constant dense<0.000000e+00> : vector<2x32xf32>
    %166 = vector.multi_reduction <add>, %165, %cst_81 [2] : vector<2x32x32xf32> to vector<2x32xf32>
    %167 = vector.shape_cast %166 : vector<2x32xf32> to vector<2x32x1xf32>
    %cst_82 = arith.constant 3.200000e+01 : f32
    %168 = vector.broadcast %cst_82 : f32 to vector<2x32x1xf32>
    %169 = arith.divf %167, %168 : vector<2x32x1xf32>
    %170 = vector.broadcast %162 : vector<2x32x1xf32> to vector<2x32x32xf32>
    %171 = arith.subf %154, %170 : vector<2x32x32xf32>
    %cst_83 = arith.constant 9.99999974E-6 : f32
    %172 = vector.broadcast %cst_83 : f32 to vector<2x32x1xf32>
    %173 = arith.addf %169, %172 : vector<2x32x1xf32>
    %174 = math.rsqrt %173 : vector<2x32x1xf32>
    %175 = vector.broadcast %174 : vector<2x32x1xf32> to vector<2x32x32xf32>
    %176 = arith.mulf %171, %175 : vector<2x32x32xf32>
    %177 = vector.shape_cast %156 : vector<1x32xf32> to vector<1x1x32xf32>
    %178 = vector.broadcast %177 : vector<1x1x32xf32> to vector<2x32x32xf32>
    %179 = arith.mulf %176, %178 : vector<2x32x32xf32>
    %180 = vector.shape_cast %158 : vector<1x32xf32> to vector<1x1x32xf32>
    %181 = vector.broadcast %180 : vector<1x1x32xf32> to vector<2x32x32xf32>
    %182 = arith.addf %179, %181 : vector<2x32x32xf32>
    %183 = vector.shape_cast %182 : vector<2x32x32xf32> to vector<64x32xf32>
    %184 = arith.truncf %183 : vector<64x32xf32> to vector<64x32xbf16>
    %c1_84 = arith.constant 1 : index
    %c0_85 = arith.constant 0 : index
    %c0_86 = arith.constant 0 : index
    %185 = vector.load %arg7[%c1_84, %c0_85, %c0_86] : memref<2x32x96xbf16, #tpu.memory_space<vmem>>, vector<1x32x96xbf16>
    %186 = vector.shape_cast %185 : vector<1x32x96xbf16> to vector<32x96xbf16>
    %cst_87 = arith.constant dense<0.000000e+00> : vector<64x96xf32>
    %187 = tpu.matmul %184, %186, %cst_87 {dimension_numbers = #tpu.dot_dimension_numbers<[1], [0], [0], [1], [0, 0, 1, 1], [], []>} : vector<64x32xbf16>, vector<32x96xbf16>, vector<64x96xf32> -> vector<64x96xf32>
    %c1_88 = arith.constant 1 : index
    %c0_89 = arith.constant 0 : index
    %c0_90 = arith.constant 0 : index
    %188 = vector.load %arg8[%c1_88, %c0_89, %c0_90] : memref<2x1x96xf32, #tpu.memory_space<vmem>>, vector<1x1x96xf32>
    %189 = vector.shape_cast %188 : vector<1x1x96xf32> to vector<1x96xf32>
    %190 = vector.broadcast %189 : vector<1x96xf32> to vector<64x96xf32>
    %191 = arith.addf %187, %190 : vector<64x96xf32>
    %192 = vector.extract_strided_slice %191 {offsets = [0, 0], sizes = [64, 32], strides = [1, 1]} : vector<64x96xf32> to vector<64x32xf32>
    %193 = vector.shape_cast %192 : vector<64x32xf32> to vector<2x32x4x8xf32>
    %194 = tpu.transpose %193, [0, 2, 1, 3] : vector<2x32x4x8xf32> -> vector<2x4x32x8xf32>
    %195 = vector.shape_cast %194 : vector<2x4x32x8xf32> to vector<8x32x8xf32>
    %196 = arith.truncf %195 : vector<8x32x8xf32> to vector<8x32x8xbf16>
    %197 = vector.extract_strided_slice %191 {offsets = [0, 32], sizes = [64, 32], strides = [1, 1]} : vector<64x96xf32> to vector<64x32xf32>
    %198 = vector.shape_cast %197 : vector<64x32xf32> to vector<2x32x4x8xf32>
    %199 = tpu.transpose %198, [0, 2, 1, 3] : vector<2x32x4x8xf32> -> vector<2x4x32x8xf32>
    %200 = vector.shape_cast %199 : vector<2x4x32x8xf32> to vector<8x32x8xf32>
    %201 = arith.truncf %200 : vector<8x32x8xf32> to vector<8x32x8xbf16>
    %202 = vector.extract_strided_slice %191 {offsets = [0, 64], sizes = [64, 32], strides = [1, 1]} : vector<64x96xf32> to vector<64x32xf32>
    %203 = vector.shape_cast %202 : vector<64x32xf32> to vector<2x32x4x8xf32>
    %204 = tpu.transpose %203, [0, 2, 1, 3] : vector<2x32x4x8xf32> -> vector<2x4x32x8xf32>
    %205 = vector.shape_cast %204 : vector<2x4x32x8xf32> to vector<8x32x8xf32>
    %206 = arith.truncf %205 : vector<8x32x8xf32> to vector<8x32x8xbf16>
    "tpu.trace_start"() <{level = 10 : i32, message = "bqk,bvk->bqv"}> : () -> ()
    %cst_91 = arith.constant dense<0.000000e+00> : vector<8x32x32xf32>
    %207 = tpu.matmul %196, %201, %cst_91 {dimension_numbers = #tpu.dot_dimension_numbers<[2], [2], [1], [1], [0, 0, 0, 1, 1, 1], [0], [0]>} : vector<8x32x8xbf16>, vector<8x32x8xbf16>, vector<8x32x32xf32> -> vector<8x32x32xf32>
    "tpu.trace_stop"() : () -> ()
    %cst_92 = arith.constant dense<0xFF800000> : vector<8x32xf32>
    %208 = vector.multi_reduction <maximumf>, %207, %cst_92 [2] : vector<8x32x32xf32> to vector<8x32xf32>
    %209 = vector.shape_cast %208 : vector<8x32xf32> to vector<8x32x1xf32>
    %210 = vector.broadcast %209 : vector<8x32x1xf32> to vector<8x32x32xf32>
    %211 = arith.subf %207, %210 : vector<8x32x32xf32>
    %212 = math.exp %211 : vector<8x32x32xf32>
    %cst_93 = arith.constant dense<0.000000e+00> : vector<8x32xf32>
    %213 = vector.multi_reduction <add>, %212, %cst_93 [2] : vector<8x32x32xf32> to vector<8x32xf32>
    %214 = vector.shape_cast %213 : vector<8x32xf32> to vector<8x32x1xf32>
    %215 = tpu.reciprocal %214 {approx = true} : vector<8x32x1xf32> -> vector<8x32x1xf32>
    %216 = vector.broadcast %215 : vector<8x32x1xf32> to vector<8x32x32xf32>
    %217 = arith.mulf %212, %216 : vector<8x32x32xf32>
    %218 = arith.truncf %217 : vector<8x32x32xf32> to vector<8x32x32xbf16>
    "tpu.trace_start"() <{level = 10 : i32, message = "bqv,bvk->bqk"}> : () -> ()
    %cst_94 = arith.constant dense<0.000000e+00> : vector<8x32x8xf32>
    %219 = tpu.matmul %218, %206, %cst_94 {dimension_numbers = #tpu.dot_dimension_numbers<[2], [1], [1], [2], [0, 0, 0, 1, 1, 2], [0], [0]>} : vector<8x32x32xbf16>, vector<8x32x8xbf16>, vector<8x32x8xf32> -> vector<8x32x8xf32>
    "tpu.trace_stop"() : () -> ()
    %220 = vector.shape_cast %219 : vector<8x32x8xf32> to vector<2x4x32x8xf32>
    %221 = tpu.transpose %220, [0, 2, 1, 3] : vector<2x4x32x8xf32> -> vector<2x32x4x8xf32>
    %222 = vector.shape_cast %221 : vector<2x32x4x8xf32> to vector<64x32xf32>
    %223 = arith.truncf %222 : vector<64x32xf32> to vector<64x32xbf16>
    %c1_95 = arith.constant 1 : index
    %c0_96 = arith.constant 0 : index
    %c0_97 = arith.constant 0 : index
    %224 = vector.load %arg9[%c1_95, %c0_96, %c0_97] : memref<2x32x32xbf16, #tpu.memory_space<vmem>>, vector<1x32x32xbf16>
    %225 = vector.shape_cast %224 : vector<1x32x32xbf16> to vector<32x32xbf16>
    %cst_98 = arith.constant dense<0.000000e+00> : vector<64x32xf32>
    %226 = tpu.matmul %223, %225, %cst_98 {dimension_numbers = #tpu.dot_dimension_numbers<[1], [0], [0], [1], [0, 0, 1, 1], [], []>} : vector<64x32xbf16>, vector<32x32xbf16>, vector<64x32xf32> -> vector<64x32xf32>
    %c1_99 = arith.constant 1 : index
    %c0_100 = arith.constant 0 : index
    %c0_101 = arith.constant 0 : index
    %227 = vector.load %arg10[%c1_99, %c0_100, %c0_101] : memref<2x1x32xf32, #tpu.memory_space<vmem>>, vector<1x1x32xf32>
    %228 = vector.shape_cast %227 : vector<1x1x32xf32> to vector<1x32xf32>
    %229 = vector.broadcast %228 : vector<1x32xf32> to vector<64x32xf32>
    %230 = arith.addf %226, %229 : vector<64x32xf32>
    %231 = vector.shape_cast %230 : vector<64x32xf32> to vector<2x32x32xf32>
    %232 = arith.addf %154, %231 : vector<2x32x32xf32>
    %c1_102 = arith.constant 1 : index
    %c0_103 = arith.constant 0 : index
    %c0_104 = arith.constant 0 : index
    %233 = vector.load %arg11[%c1_102, %c0_103, %c0_104] : memref<2x1x32xf32, #tpu.memory_space<vmem>>, vector<1x1x32xf32>
    %234 = vector.shape_cast %233 : vector<1x1x32xf32> to vector<1x32xf32>
    %c1_105 = arith.constant 1 : index
    %c0_106 = arith.constant 0 : index
    %c0_107 = arith.constant 0 : index
    %235 = vector.load %arg12[%c1_105, %c0_106, %c0_107] : memref<2x1x32xf32, #tpu.memory_space<vmem>>, vector<1x1x32xf32>
    %236 = vector.shape_cast %235 : vector<1x1x32xf32> to vector<1x32xf32>
    %cst_108 = arith.constant dense<0.000000e+00> : vector<2x32xf32>
    %237 = vector.multi_reduction <add>, %232, %cst_108 [2] : vector<2x32x32xf32> to vector<2x32xf32>
    %238 = vector.shape_cast %237 : vector<2x32xf32> to vector<2x32x1xf32>
    %cst_109 = arith.constant 3.200000e+01 : f32
    %239 = vector.broadcast %cst_109 : f32 to vector<2x32x1xf32>
    %240 = arith.divf %238, %239 : vector<2x32x1xf32>
    %241 = vector.broadcast %240 : vector<2x32x1xf32> to vector<2x32x32xf32>
    %242 = arith.subf %232, %241 : vector<2x32x32xf32>
    %243 = arith.mulf %242, %242 : vector<2x32x32xf32>
    %cst_110 = arith.constant dense<0.000000e+00> : vector<2x32xf32>
    %244 = vector.multi_reduction <add>, %243, %cst_110 [2] : vector<2x32x32xf32> to vector<2x32xf32>
    %245 = vector.shape_cast %244 : vector<2x32xf32> to vector<2x32x1xf32>
    %cst_111 = arith.constant 3.200000e+01 : f32
    %246 = vector.broadcast %cst_111 : f32 to vector<2x32x1xf32>
    %247 = arith.divf %245, %246 : vector<2x32x1xf32>
    %248 = vector.broadcast %240 : vector<2x32x1xf32> to vector<2x32x32xf32>
    %249 = arith.subf %232, %248 : vector<2x32x32xf32>
    %cst_112 = arith.constant 9.99999974E-6 : f32
    %250 = vector.broadcast %cst_112 : f32 to vector<2x32x1xf32>
    %251 = arith.addf %247, %250 : vector<2x32x1xf32>
    %252 = math.rsqrt %251 : vector<2x32x1xf32>
    %253 = vector.broadcast %252 : vector<2x32x1xf32> to vector<2x32x32xf32>
    %254 = arith.mulf %249, %253 : vector<2x32x32xf32>
    %255 = vector.shape_cast %234 : vector<1x32xf32> to vector<1x1x32xf32>
    %256 = vector.broadcast %255 : vector<1x1x32xf32> to vector<2x32x32xf32>
    %257 = arith.mulf %254, %256 : vector<2x32x32xf32>
    %258 = vector.shape_cast %236 : vector<1x32xf32> to vector<1x1x32xf32>
    %259 = vector.broadcast %258 : vector<1x1x32xf32> to vector<2x32x32xf32>
    %260 = arith.addf %257, %259 : vector<2x32x32xf32>
    %261 = vector.shape_cast %260 : vector<2x32x32xf32> to vector<64x32xf32>
    %262 = arith.truncf %261 : vector<64x32xf32> to vector<64x32xbf16>
    %c1_113 = arith.constant 1 : index
    %c0_114 = arith.constant 0 : index
    %c0_115 = arith.constant 0 : index
    %263 = vector.load %arg13[%c1_113, %c0_114, %c0_115] : memref<2x32x128xbf16, #tpu.memory_space<vmem>>, vector<1x32x128xbf16>
    %264 = vector.shape_cast %263 : vector<1x32x128xbf16> to vector<32x128xbf16>
    %cst_116 = arith.constant dense<0.000000e+00> : vector<64x128xf32>
    %265 = tpu.matmul %262, %264, %cst_116 {dimension_numbers = #tpu.dot_dimension_numbers<[1], [0], [0], [1], [0, 0, 1, 1], [], []>} : vector<64x32xbf16>, vector<32x128xbf16>, vector<64x128xf32> -> vector<64x128xf32>
    %c1_117 = arith.constant 1 : index
    %c0_118 = arith.constant 0 : index
    %c0_119 = arith.constant 0 : index
    %266 = vector.load %arg14[%c1_117, %c0_118, %c0_119] : memref<2x1x128xf32, #tpu.memory_space<vmem>>, vector<1x1x128xf32>
    %267 = vector.shape_cast %266 : vector<1x1x128xf32> to vector<1x128xf32>
    %268 = vector.broadcast %267 : vector<1x128xf32> to vector<64x128xf32>
    %269 = arith.addf %265, %268 : vector<64x128xf32>
    %cst_120 = arith.constant 5.000000e-01 : f32
    %270 = vector.broadcast %cst_120 : f32 to vector<64x128xf32>
    %271 = arith.mulf %270, %269 : vector<64x128xf32>
    %cst_121 = arith.constant 4.471500e-02 : f32
    %272 = vector.broadcast %cst_121 : f32 to vector<64x128xf32>
    %273 = arith.mulf %272, %269 : vector<64x128xf32>
    %274 = arith.mulf %273, %269 : vector<64x128xf32>
    %275 = arith.mulf %274, %269 : vector<64x128xf32>
    %276 = arith.addf %269, %275 : vector<64x128xf32>
    %cst_122 = arith.constant 0.797884583 : f32
    %277 = vector.broadcast %cst_122 : f32 to vector<64x128xf32>
    %278 = arith.mulf %277, %276 : vector<64x128xf32>
    %279 = math.tanh %278 : vector<64x128xf32>
    %cst_123 = arith.constant 1.000000e+00 : f32
    %280 = vector.broadcast %cst_123 : f32 to vector<64x128xf32>
    %281 = arith.addf %280, %279 : vector<64x128xf32>
    %282 = arith.mulf %271, %281 : vector<64x128xf32>
    %283 = arith.truncf %282 : vector<64x128xf32> to vector<64x128xbf16>
    %c1_124 = arith.constant 1 : index
    %c0_125 = arith.constant 0 : index
    %c0_126 = arith.constant 0 : index
    %284 = vector.load %arg15[%c1_124, %c0_125, %c0_126] : memref<2x128x32xbf16, #tpu.memory_space<vmem>>, vector<1x128x32xbf16>
    %285 = vector.shape_cast %284 : vector<1x128x32xbf16> to vector<128x32xbf16>
    %cst_127 = arith.constant dense<0.000000e+00> : vector<64x32xf32>
    %286 = tpu.matmul %283, %285, %cst_127 {dimension_numbers = #tpu.dot_dimension_numbers<[1], [0], [0], [1], [0, 0, 1, 1], [], []>} : vector<64x128xbf16>, vector<128x32xbf16>, vector<64x32xf32> -> vector<64x32xf32>
    %c1_128 = arith.constant 1 : index
    %c0_129 = arith.constant 0 : index
    %c0_130 = arith.constant 0 : index
    %287 = vector.load %arg16[%c1_128, %c0_129, %c0_130] : memref<2x1x32xf32, #tpu.memory_space<vmem>>, vector<1x1x32xf32>
    %288 = vector.shape_cast %287 : vector<1x1x32xf32> to vector<1x32xf32>
    %289 = vector.broadcast %288 : vector<1x32xf32> to vector<64x32xf32>
    %290 = arith.addf %286, %289 : vector<64x32xf32>
    %291 = vector.shape_cast %290 : vector<64x32xf32> to vector<2x32x32xf32>
    %292 = arith.addf %232, %291 : vector<2x32x32xf32>
    %293 = vector.extract_strided_slice %292 {offsets = [0, 16, 0], sizes = [2, 16, 32], strides = [1, 1, 1]} : vector<2x32x32xf32> to vector<2x16x32xf32>
    %294 = vector.shape_cast %293 : vector<2x16x32xf32> to vector<32x32xf32>
    %c0_131 = arith.constant 0 : index
    %c0_132 = arith.constant 0 : index
    %295 = vector.load %arg17[%c0_131, %c0_132] : memref<1x32xf32, #tpu.memory_space<vmem>>, vector<1x32xf32>
    %c0_133 = arith.constant 0 : index
    %c0_134 = arith.constant 0 : index
    %296 = vector.load %arg18[%c0_133, %c0_134] : memref<1x32xf32, #tpu.memory_space<vmem>>, vector<1x32xf32>
    %cst_135 = arith.constant dense<0.000000e+00> : vector<32xf32>
    %297 = vector.multi_reduction <add>, %294, %cst_135 [1] : vector<32x32xf32> to vector<32xf32>
    %298 = vector.shape_cast %297 : vector<32xf32> to vector<32x1xf32>
    %cst_136 = arith.constant 3.200000e+01 : f32
    %299 = vector.broadcast %cst_136 : f32 to vector<32x1xf32>
    %300 = arith.divf %298, %299 : vector<32x1xf32>
    %301 = vector.broadcast %300 : vector<32x1xf32> to vector<32x32xf32>
    %302 = arith.subf %294, %301 : vector<32x32xf32>
    %303 = arith.mulf %302, %302 : vector<32x32xf32>
    %cst_137 = arith.constant dense<0.000000e+00> : vector<32xf32>
    %304 = vector.multi_reduction <add>, %303, %cst_137 [1] : vector<32x32xf32> to vector<32xf32>
    %305 = vector.shape_cast %304 : vector<32xf32> to vector<32x1xf32>
    %cst_138 = arith.constant 3.200000e+01 : f32
    %306 = vector.broadcast %cst_138 : f32 to vector<32x1xf32>
    %307 = arith.divf %305, %306 : vector<32x1xf32>
    %308 = vector.broadcast %300 : vector<32x1xf32> to vector<32x32xf32>
    %309 = arith.subf %294, %308 : vector<32x32xf32>
    %cst_139 = arith.constant 9.99999974E-6 : f32
    %310 = vector.broadcast %cst_139 : f32 to vector<32x1xf32>
    %311 = arith.addf %307, %310 : vector<32x1xf32>
    %312 = math.rsqrt %311 : vector<32x1xf32>
    %313 = vector.broadcast %312 : vector<32x1xf32> to vector<32x32xf32>
    %314 = arith.mulf %309, %313 : vector<32x32xf32>
    %315 = vector.broadcast %295 : vector<1x32xf32> to vector<32x32xf32>
    %316 = arith.mulf %314, %315 : vector<32x32xf32>
    %317 = vector.broadcast %296 : vector<1x32xf32> to vector<32x32xf32>
    %318 = arith.addf %316, %317 : vector<32x32xf32>
    %319 = arith.truncf %318 : vector<32x32xf32> to vector<32x32xbf16>
    %c0_140 = arith.constant 0 : index
    %c0_141 = arith.constant 0 : index
    %320 = vector.load %arg19[%c0_140, %c0_141] : memref<32x128xbf16, #tpu.memory_space<vmem>>, vector<32x128xbf16>
    %cst_142 = arith.constant dense<0.000000e+00> : vector<32x128xf32>
    %321 = tpu.matmul %319, %320, %cst_142 {dimension_numbers = #tpu.dot_dimension_numbers<[1], [0], [0], [1], [0, 0, 1, 1], [], []>} : vector<32x32xbf16>, vector<32x128xbf16>, vector<32x128xf32> -> vector<32x128xf32>
    %c0_143 = arith.constant 0 : index
    %c0_144 = arith.constant 0 : index
    %322 = vector.load %arg20[%c0_143, %c0_144] : memref<1x128xf32, #tpu.memory_space<vmem>>, vector<1x128xf32>
    %323 = vector.broadcast %322 : vector<1x128xf32> to vector<32x128xf32>
    %324 = arith.addf %321, %323 : vector<32x128xf32>
    %325 = vector.shape_cast %324 : vector<32x128xf32> to vector<2x16x128xf32>
    %c0_145 = arith.constant 0 : index
    %c0_146 = arith.constant 0 : index
    %c0_147 = arith.constant 0 : index
    %326 = vector.load %arg21[%c0_145, %c0_146, %c0_147] : memref<2x16x128xf32, #tpu.memory_space<vmem>>, vector<2x16x128xf32>
    tpu.vector_store %arg21[%c0_145, %c0_146, %c0_147], %325 {strides = array<i32>} : memref<2x16x128xf32, #tpu.memory_space<vmem>>, vector<2x16x128xf32>,
    return
  }
  func.func @transform_0(%arg0: i32) -> (i32, i32, i32) {
    %c0_i32 = arith.constant 0 : i32
    %c0_i32_0 = arith.constant 0 : i32
    %c0_i32_1 = arith.constant 0 : i32
    return %arg0, %c0_i32, %c0_i32_0 : i32, i32, i32
  }
  func.func @transform_1(%arg0: i32) -> (i32, i32) {
    %c0_i32 = arith.constant 0 : i32
    %c0_i32_0 = arith.constant 0 : i32
    %c0_i32_1 = arith.constant 0 : i32
    return %c0_i32, %c0_i32_0 : i32, i32
  }
  func.func @transform_2(%arg0: i32) -> (i32, i32) {
    %c0_i32 = arith.constant 0 : i32
    %c0_i32_0 = arith.constant 0 : i32
    %c0_i32_1 = arith.constant 0 : i32
    return %c0_i32, %c0_i32_0 : i32, i32
  }
  func.func @transform_3(%arg0: i32) -> (i32, i32) {
    %c0_i32 = arith.constant 0 : i32
    %c0_i32_0 = arith.constant 0 : i32
    %c0_i32_1 = arith.constant 0 : i32
    return %c0_i32, %c0_i32_0 : i32, i32
  }
  func.func @transform_4(%arg0: i32) -> (i32, i32, i32) {
    %c0_i32 = arith.constant 0 : i32
    %c0_i32_0 = arith.constant 0 : i32
    %c0_i32_1 = arith.constant 0 : i32
    %c0_i32_2 = arith.constant 0 : i32
    return %c0_i32, %c0_i32_0, %c0_i32_1 : i32, i32, i32
  }
  func.func @transform_5(%arg0: i32) -> (i32, i32, i32) {
    %c0_i32 = arith.constant 0 : i32
    %c0_i32_0 = arith.constant 0 : i32
    %c0_i32_1 = arith.constant 0 : i32
    %c0_i32_2 = arith.constant 0 : i32
    return %c0_i32, %c0_i32_0, %c0_i32_1 : i32, i32, i32
  }
  func.func @transform_6(%arg0: i32) -> (i32, i32, i32) {
    %c0_i32 = arith.constant 0 : i32
    %c0_i32_0 = arith.constant 0 : i32
    %c0_i32_1 = arith.constant 0 : i32
    %c0_i32_2 = arith.constant 0 : i32
    return %c0_i32, %c0_i32_0, %c0_i32_1 : i32, i32, i32
  }
  func.func @transform_7(%arg0: i32) -> (i32, i32, i32) {
    %c0_i32 = arith.constant 0 : i32
    %c0_i32_0 = arith.constant 0 : i32
    %c0_i32_1 = arith.constant 0 : i32
    %c0_i32_2 = arith.constant 0 : i32
    return %c0_i32, %c0_i32_0, %c0_i32_1 : i32, i32, i32
  }
  func.func @transform_8(%arg0: i32) -> (i32, i32, i32) {
    %c0_i32 = arith.constant 0 : i32
    %c0_i32_0 = arith.constant 0 : i32
    %c0_i32_1 = arith.constant 0 : i32
    %c0_i32_2 = arith.constant 0 : i32
    return %c0_i32, %c0_i32_0, %c0_i32_1 : i32, i32, i32
  }
  func.func @transform_9(%arg0: i32) -> (i32, i32, i32) {
    %c0_i32 = arith.constant 0 : i32
    %c0_i32_0 = arith.constant 0 : i32
    %c0_i32_1 = arith.constant 0 : i32
    %c0_i32_2 = arith.constant 0 : i32
    return %c0_i32, %c0_i32_0, %c0_i32_1 : i32, i32, i32
  }
  func.func @transform_10(%arg0: i32) -> (i32, i32, i32) {
    %c0_i32 = arith.constant 0 : i32
    %c0_i32_0 = arith.constant 0 : i32
    %c0_i32_1 = arith.constant 0 : i32
    %c0_i32_2 = arith.constant 0 : i32
    return %c0_i32, %c0_i32_0, %c0_i32_1 : i32, i32, i32
  }
  func.func @transform_11(%arg0: i32) -> (i32, i32, i32) {
    %c0_i32 = arith.constant 0 : i32
    %c0_i32_0 = arith.constant 0 : i32
    %c0_i32_1 = arith.constant 0 : i32
    %c0_i32_2 = arith.constant 0 : i32
    return %c0_i32, %c0_i32_0, %c0_i32_1 : i32, i32, i32
  }
  func.func @transform_12(%arg0: i32) -> (i32, i32, i32) {
    %c0_i32 = arith.constant 0 : i32
    %c0_i32_0 = arith.constant 0 : i32
    %c0_i32_1 = arith.constant 0 : i32
    %c0_i32_2 = arith.constant 0 : i32
    return %c0_i32, %c0_i32_0, %c0_i32_1 : i32, i32, i32
  }
  func.func @transform_13(%arg0: i32) -> (i32, i32, i32) {
    %c0_i32 = arith.constant 0 : i32
    %c0_i32_0 = arith.constant 0 : i32
    %c0_i32_1 = arith.constant 0 : i32
    %c0_i32_2 = arith.constant 0 : i32
    return %c0_i32, %c0_i32_0, %c0_i32_1 : i32, i32, i32
  }
  func.func @transform_14(%arg0: i32) -> (i32, i32, i32) {
    %c0_i32 = arith.constant 0 : i32
    %c0_i32_0 = arith.constant 0 : i32
    %c0_i32_1 = arith.constant 0 : i32
    %c0_i32_2 = arith.constant 0 : i32
    return %c0_i32, %c0_i32_0, %c0_i32_1 : i32, i32, i32
  }
  func.func @transform_15(%arg0: i32) -> (i32, i32, i32) {
    %c0_i32 = arith.constant 0 : i32
    %c0_i32_0 = arith.constant 0 : i32
    %c0_i32_1 = arith.constant 0 : i32
    %c0_i32_2 = arith.constant 0 : i32
    return %c0_i32, %c0_i32_0, %c0_i32_1 : i32, i32, i32
  }
  func.func @transform_16(%arg0: i32) -> (i32, i32) {
    %c0_i32 = arith.constant 0 : i32
    %c0_i32_0 = arith.constant 0 : i32
    %c0_i32_1 = arith.constant 0 : i32
    return %c0_i32, %c0_i32_0 : i32, i32
  }
  func.func @transform_17(%arg0: i32) -> (i32, i32) {
    %c0_i32 = arith.constant 0 : i32
    %c0_i32_0 = arith.constant 0 : i32
    %c0_i32_1 = arith.constant 0 : i32
    return %c0_i32, %c0_i32_0 : i32, i32
  }
  func.func @transform_18(%arg0: i32) -> (i32, i32) {
    %c0_i32 = arith.constant 0 : i32
    %c0_i32_0 = arith.constant 0 : i32
    %c0_i32_1 = arith.constant 0 : i32
    return %c0_i32, %c0_i32_0 : i32, i32
  }
  func.func @transform_19(%arg0: i32) -> (i32, i32) {
    %c0_i32 = arith.constant 0 : i32
    %c0_i32_0 = arith.constant 0 : i32
    %c0_i32_1 = arith.constant 0 : i32
    return %c0_i32, %c0_i32_0 : i32, i32
  }
  func.func @transform_20(%arg0: i32) -> (i32, i32, i32) {
    %c0_i32 = arith.constant 0 : i32
    %c0_i32_0 = arith.constant 0 : i32
    %c0_i32_1 = arith.constant 0 : i32
    return %arg0, %c0_i32, %c0_i32_0 : i32, i32, i32
  }
}

</mosaic_0001>

<bundles_post_ra>
// kernel: titok_encoder.1
= control target key start
LH: loop header
LB: loop body
LE: loop exit
PB: predicated region body
PF: predicated region fallthrough
CT: control target
= control target key end

     0   :  { %s21144_s0 = inlined_call_operand.vmem [shape: f32[4,16,128], index: 0, kind: input, shape index: {}]   ;;  %s21145_s1 = inlined_call_operand.vmem [shape: bf16[128,32], index: 1, kind: input, shape index: {}]   ;;  %s21146_s2 = inlined_call_operand.vmem [shape: f32[16,32], index: 2, kind: input, shape index: {}]   ;;  %s21147_s3 = inlined_call_operand.vmem [shape: f32[16,32], index: 3, kind: input, shape index: {}]   ;;  %s21148_s4 = inlined_call_operand.vmem [shape: f32[2,1,32], index: 4, kind: input, shape index: {}]   ;;  %s21149_s5 = inlined_call_operand.vmem [shape: f32[2,1,32], index: 5, kind: input, shape index: {}]   ;;  %s21150_s6 = inlined_call_operand.vmem [shape: bf16[2,32,96], index: 6, kind: input, shape index: {}]   ;;  %s21151_s7 = inlined_call_operand.vmem [shape: f32[2,1,96], index: 7, kind: input, shape index: {}]   ;;  %s21152_s8 = inlined_call_operand.vmem [shape: bf16[2,32,32], index: 8, kind: input, shape index: {}]   ;;  %s21153_s9 = inlined_call_operand.vmem [shape: f32[2,1,32], index: 9, kind: input, shape index: {}]   ;;  %s21154_s10 = inlined_call_operand.vmem [shape: f32[2,1,32], index: 10, kind: input, shape index: {}]   ;;  %s21155_s11 = inlined_call_operand.vmem [shape: f32[2,1,32], index: 11, kind: input, shape index: {}]   ;;  %s21156_s12 = inlined_call_operand.vmem [shape: bf16[2,32,128], index: 12, kind: input, shape index: {}]   ;;  %s21157_s13 = inlined_call_operand.vmem [shape: f32[2,1,128], index: 13, kind: input, shape index: {}]   ;;  %s21158_s14 = inlined_call_operand.vmem [shape: bf16[2,128,32], index: 14, kind: input, shape index: {}]   ;;  %s21159_s15 = inlined_call_operand.vmem [shape: f32[2,1,32], index: 15, kind: input, shape index: {}]   ;;  %s21160_s16 = inlined_call_operand.vmem [shape: f32[1,32], index: 16, kind: input, shape index: {}]   ;;  %s21161_s17 = inlined_call_operand.vmem [shape: f32[1,32], index: 17, kind: input, shape index: {}]   ;;  %s21162_s18 = inlined_call_operand.vmem [shape: bf16[32,128], index: 18, kind: input, shape index: {}]   ;;  %s21163_s19 = inlined_call_operand.vmem [shape: f32[1,128], index: 19, kind: input, shape index: {}]   ;;  %s21164_s20 = inlined_call_operand.vmem [shape: f32[4,16,128], index: 20, kind: output, shape index: {}]  }
   0x1   :  { %21209 = sst [smem:[#allocation21_spill]] %s21144_s0 }
   0x2   :  { %21210 = sst [smem:[#allocation22_spill]] %s21145_s1  ;;  %s16430_s1 = smov 0  }
   0x3   :  { %21211 = sst [smem:[#allocation23_spill]] %s21146_s2 }
   0x4   :  { %21212 = sst [smem:[#allocation24_spill]] %s21147_s3 }
   0x5   :  { %21213 = sst [smem:[#allocation25_spill]] %s21148_s4 }
   0x6 LB: > { %s14799_s22 = sadd.s32 4294967295, %s16313_s1   ;;  %p14803_p0 = scmp.ge.s32.totalorder %s16313_s1, 1  ;;  %s16313_s1 = sphi %s16430_s1, %s30_s1  }
   0x7   : > { %p564_p1 = scmp.lt.s32.totalorder %s16313_s1, 3 }
   0x9   : > { %p565_p2 = pnand %p14803_p0, %p564_p1 }
   0xb   : > { %568 = sbr.rel (%p565_p2) target bundleno = 6466 (0x1942), region = 100 }
  0x12   : > { %s21214_s2 = sld [smem:[#allocation22_spill]]  ;;  %s14804_s25 = sshll.u32 %s14799_s22, 1  ;;  %vm764_vm0 = vcmask 261120   ;;  %vm4606_vm1 = vcmask 64512   ;;  %vm7095_vm2 = vcmask 130048   ;;  %vm7104_vm3 = vcmask 195584  }
  0x13   : > { %p625_p3 = scmp.lt.s32.totalorder %s14804_s25, 3  ;;  %s21215_s0 = sld [smem:[#allocation21_spill]] }
  0x14   : > { %s21216_s24 = sld [smem:[#allocation24_spill]]  ;;  %s21217_s28 = sld [smem:[#allocation23_spill]] }
  0x15   : > { %s21290_s25 = smov (!%p625_p3, %s14804_s25), 3  ;;  %s21218_s27 = sld [smem:[#allocation25_spill]] }
  0x16   : > { %s21173_s4 = sshll.u32 %s21290_s25, 4  ;;  %s16315_s23 = smov 120  }
  0x17   : > { %s21186_s3 = smov 112   ;;  %s21184_s26 = smov 104  }
  0x18   : > { %v15901_v0 = vld [vmem:[%s21214_s2] sm:$0xff]   ;;  %v15902_v1 = vld [vmem:[%s21214_s2 + $0x8] sm:$0xff]   ;;  %v15903_v2 = vld [vmem:[%s21214_s2 + $0x10] sm:$0xff]   ;;  %s21174_s29 = smov 64   ;;  %s21180_s22 = smov 8  }
  0x19   : > { %15327 = vmatprep.subr.bf16.mxu0 %v15901_v0  ;;  %s629_s21 = scalar_lea.vmem %s21215_s0, %s21173_s4  ;;  %v15904_v3 = vld [vmem:[%s21214_s2 + $0x18] sm:$0xff]   ;;  %v15905_v7 = vld [vmem:[%s21214_s2 + $0x20] sm:$0xff]   ;;  %v15906_v8 = vld [vmem:[%s21214_s2 + $0x28] sm:$0xff]   ;;  %s21178_s4 = smov 16  }
  0x1a   : > { %15328 = vmatpush3.bf16.msra.mxu0 %v15901_v0  ;;  %v639_v4 = vld [vmem:[%s629_s21] sm:$0xff]  ;;  %v640_v5 = vld [vmem:[%s629_s21 + $0x8] sm:$0xff]  ;;  %v15907_v9 = vld [vmem:[%s21214_s2 + $0x30] sm:$0xff]   ;;  %s21288_s0 = sshll.u32 %s21290_s25, 4 }
  0x1b   : > { %15329 = vmatprep.subr.bf16.mxu0 %v15902_v1  ;;  %v643_v6 = vpack.c.bf16 %v640_v5, %v639_v4  ;;  %v15908_v10 = vld [vmem:[%s21214_s2 + $0x38] sm:$0xff]   ;;  %v641_v11 = vld [vmem:[%s629_s21 + $0x10] sm:$0xff]  ;;  %v769_v14 = vld [vmem:[%s21216_s24] sm:$0xff] }
  0x1c   : > { %v642_v12 = vld [vmem:[%s629_s21 + $0x18] sm:$0xff]  ;;  %771 = vst.msk [vmem:[#allocation2 + $0x10] sm:$0xff] %vm764_vm0, %v769_v14  ;;  %773 = vst.msk [vmem:[#allocation2 + $0x30] sm:$0xff] %vm764_vm0, %v769_v14  ;;  %v770_v15 = vld [vmem:[%s21216_s24 + $0x8] sm:$0xff]  ;;  %s21182_s21 = smov 96  }
  0x1d   : > { %15343 = vmatprep.mubr.bf16.mxu0 %v643_v6  ;;  %v644_v13 = vpack.c.bf16 %v642_v12, %v641_v11  ;;  %772 = vst.msk [vmem:[#allocation2 + $0x18] sm:$0xff] %vm764_vm0, %v770_v15  ;;  %774 = vst.msk [vmem:[#allocation2 + $0x38] sm:$0xff] %vm764_vm0, %v770_v15  ;;  %v758_v20 = vld [vmem:[%s21217_s28] sm:$0xff]  ;;  %v759_v22 = vld [vmem:[%s21217_s28 + $0x8] sm:$0xff] }
  0x1e   : > { %15330 = vmatpush3.bf16.msra.mxu0 %v15902_v1 }
  0x1f   : > { %15331 = vmatprep.subr.bf16.mxu0 %v15903_v2 }
  0x22   : > { %15332 = vmatpush3.bf16.msra.mxu0 %v15903_v2 }
  0x23   : > { %15333 = vmatprep.subr.bf16.mxu0 %v15904_v3  ;;  %v777_v16 = vld [vmem:[#allocation2 + $0x10] sm:$0xff] }
  0x24   : > { %v791_v17 = vsel %vm764_vm0, %v777_v16, 0.0  ;;  %v778_v18 = vld [vmem:[#allocation2 + $0x18] sm:$0xff]  ;;  %v781_v39 = vld [vmem:[#allocation2 + $0x30] sm:$0xff] }
  0x25   : > { %792 = vadd.xlane.f32.xlu1 %v791_v17  ;;  %v794_v19 = vsel %vm764_vm0, %v778_v18, 0.0  ;;  %v782_v33 = vld [vmem:[#allocation2 + $0x38] sm:$0xff]  ;;  %v803_v41 = vsel %vm764_vm0, %v781_v39, 0.0 }
  0x26   : > { %15334 = vmatpush3.bf16.msra.mxu0 %v15904_v3  ;;  %v806_v36 = vsel %vm764_vm0, %v782_v33, 0.0 }
  0x27   : > { %15335 = vmatprep.subr.bf16.mxu0 %v15905_v7 }
  0x29   : > { %795 = vadd.xlane.f32.xlu1 %v794_v19  ;;  %v15910_v19 = vld [vmem:[%s21150_s6 + $0x8] sm:$0xff]  }
  0x2a   : > { %15336 = vmatpush3.bf16.msra.mxu0 %v15905_v7 }
  0x2b   : > { %15337 = vmatprep.subr.bf16.mxu0 %v15906_v8 }
  0x2e   : > { %15338 = vmatpush3.bf16.msra.mxu0 %v15906_v8 }
  0x2f   : > { %15339 = vmatprep.subr.bf16.mxu0 %v15907_v9 }
  0x32   : > { %15340 = vmatpush3.bf16.msra.mxu0 %v15907_v9 }
  0x33   : > { %15341 = vmatprep.subr.bf16.mxu0 %v15908_v10 }
  0x36   : > { %15342 = vmatpush3.bf16.msra.mxu0 %v15908_v10 }
  0x39   : > { %15344 = vmatmul.mubr.bf16.vlgmr.msra.gmra.mrb[0].mxu0 %v644_v13 }
  0xb2   : > { %v793_v42 = vpop.xlane.xlu1 %792 }
  0xb3   : > { %v812_v43 = vmul.f32 0.03125, %v793_v42 }
  0xb5   : > { %v16498_v45 = vsub.f32 %v777_v16, %v812_v43 }
  0xb6   : > { %v796_v44 = vpop.xlane.xlu1 %795 }
  0xb7   : > { %v813_v47 = vmul.f32 0.03125, %v796_v44  ;;  %v828_v52 = vmul.f32 %v16498_v45, %v16498_v45  ;;  %v14818_v44 = vld [vmem:[%s21218_s27] ss:$0 sm:$0xff] }
  0xb9   : > { %v16504_v53 = vsub.f32 %v778_v18, %v813_v47  ;;  %v840_v61 = vsel %vm764_vm0, %v828_v52, 0.0  ;;  %v15909_v18 = vld [vmem:[%s21150_s6] sm:$0xff]  }
  0xba   : > { %15347 = vmatprep.subr.bf16.mxu0 %v15909_v18 }
  0xbb   : > { %v829_v1 = vmul.f32 %v16504_v53, %v16504_v53  ;;  %15348 = vmatpush3.bf16.msra.mxu0 %v15909_v18 }
  0xbc   : > { %15349 = vmatprep.subr.bf16.mxu0 %v15910_v19 }
  0xbd   : > { %v843_v8 = vsel %vm764_vm0, %v829_v1, 0.0 }
  0xbf   : > { %15350 = vmatpush3.bf16.msra.mxu0 %v15910_v19 }
 0x10c   : > { %v15345_v21 = vpop.f32.mrb[0].mxu0 }
 0x10d   : > { %v762_v23 = vadd.f32 %v15345_v21, %v758_v20  ;;  %v743_v24 = vpop.f32.mrb[1].mxu0 }
 0x10e   : > { %v760_v25 = vadd.f32 %v758_v20, %v743_v24  ;;  %v15346_v26 = vpop.f32.mrb[2].mxu0 }
 0x10f   : > { %767 = vst.msk [vmem:[#allocation2 + $0x20] sm:$0xff] %vm764_vm0, %v762_v23  ;;  %v763_v27 = vadd.f32 %v15346_v26, %v759_v22  ;;  %v746_v28 = vpop.f32.mrb[3].mxu0 }
 0x110   : > { %765 = vst.msk [vmem:[#allocation2] sm:$0xff] %vm764_vm0, %v760_v25  ;;  %v761_v29 = vadd.f32 %v759_v22, %v746_v28 }
 0x111   : > { %768 = vst.msk [vmem:[#allocation2 + $0x28] sm:$0xff] %vm764_vm0, %v763_v27 }
 0x112   : > { %766 = vst.msk [vmem:[#allocation2 + $0x8] sm:$0xff] %vm764_vm0, %v761_v29 }
 0x116   : > { %v779_v38 = vld [vmem:[#allocation2 + $0x20] sm:$0xff] }
 0x117   : > { %v775_v30 = vld [vmem:[#allocation2] sm:$0xff]  ;;  %v797_v40 = vsel %vm764_vm0, %v779_v38, 0.0 }
 0x118   : > { %v785_v31 = vsel %vm764_vm0, %v775_v30, 0.0  ;;  %v780_v32 = vld [vmem:[#allocation2 + $0x28] sm:$0xff] }
 0x119   : > { %786 = vadd.xlane.f32.xlu0 %v785_v31  ;;  %v800_v34 = vsel %vm764_vm0, %v780_v32, 0.0  ;;  %v776_v35 = vld [vmem:[#allocation2 + $0x8] sm:$0xff] }
 0x11a   : > { %801 = vadd.xlane.f32.xlu1 %v800_v34  ;;  %v788_v37 = vsel %vm764_vm0, %v776_v35, 0.0 }
 0x11d   : > { %789 = vadd.xlane.f32.xlu0 %v788_v37 }
 0x11e   : > { %807 = vadd.xlane.f32.xlu1 %v806_v36 }
 0x121   : > { %798 = vadd.xlane.f32.xlu0 %v797_v40 }
 0x125   : > { %804 = vadd.xlane.f32.xlu0 %v803_v41 }
 0x1a6   : > { %v787_v46 = vpop.xlane.xlu0 %786 }
 0x1a7   : > { %v810_v48 = vmul.f32 0.03125, %v787_v46  ;;  %v802_v49 = vpop.xlane.xlu1 %801 }
 0x1a8   : > { %v815_v57 = vmul.f32 0.03125, %v802_v49 }
 0x1a9   : > { %v16500_v50 = vsub.f32 %v775_v30, %v810_v48 }
 0x1aa   : > { %v790_v51 = vpop.xlane.xlu0 %789  ;;  %v16516_v2 = vsub.f32 %v780_v32, %v815_v57 }
 0x1ab   : > { %v811_v54 = vmul.f32 0.03125, %v790_v51  ;;  %v826_v55 = vmul.f32 %v16500_v50, %v16500_v50  ;;  %v808_v56 = vpop.xlane.xlu1 %807 }
 0x1ac   : > { %v817_v0 = vmul.f32 0.03125, %v808_v56  ;;  %v831_v12 = vmul.f32 %v16516_v2, %v16516_v2 }
 0x1ad   : > { %v16508_v58 = vsub.f32 %v776_v35, %v811_v54  ;;  %v834_v59 = vsel %vm764_vm0, %v826_v55, 0.0 }
 0x1ae   : > { %835 = vadd.xlane.f32.xlu0 %v834_v59  ;;  %v799_v60 = vpop.xlane.xlu0 %798  ;;  %v16521_v7 = vsub.f32 %v782_v33, %v817_v0  ;;  %v849_v15 = vsel %vm764_vm0, %v831_v12, 0.0 }
 0x1af   : > { %v814_v62 = vmul.f32 0.03125, %v799_v60  ;;  %v827_v63 = vmul.f32 %v16508_v58, %v16508_v58 }
 0x1b0   : > { %v833_v14 = vmul.f32 %v16521_v7, %v16521_v7 }
 0x1b1   : > { %v16518_v3 = vsub.f32 %v779_v38, %v814_v62  ;;  %v837_v4 = vsel %vm764_vm0, %v827_v63, 0.0 }
 0x1b2   : > { %841 = vadd.xlane.f32.xlu0 %v840_v61  ;;  %838 = vadd.xlane.f32.xlu1 %v837_v4  ;;  %v805_v5 = vpop.xlane.xlu0 %804  ;;  %v855_v17 = vsel %vm764_vm0, %v833_v14, 0.0 }
 0x1b3   : > { %v816_v6 = vmul.f32 0.03125, %v805_v5  ;;  %v830_v9 = vmul.f32 %v16518_v3, %v16518_v3 }
 0x1b5   : > { %v16526_v10 = vsub.f32 %v781_v39, %v816_v6  ;;  %v846_v11 = vsel %vm764_vm0, %v830_v9, 0.0 }
 0x1b6   : > { %844 = vadd.xlane.f32.xlu1 %v843_v8  ;;  %847 = vadd.xlane.f32.xlu0 %v846_v11 }
 0x1b7   : > { %v832_v13 = vmul.f32 %v16526_v10, %v16526_v10 }
 0x1b9   : > { %v852_v16 = vsel %vm764_vm0, %v832_v13, 0.0 }
 0x1ba   : > { %850 = vadd.xlane.f32.xlu1 %v849_v15  ;;  %853 = vadd.xlane.f32.xlu0 %v852_v16 }
 0x1be   : > { %856 = vadd.xlane.f32.xlu1 %v855_v17 }
 0x23b   : > { %v836_v20 = vpop.xlane.xlu0 %835 }
 0x23c   : > { %v858_v21 = vmul.f32 0.03125, %v836_v20 }
 0x23e   : > { %v866_v22 = vadd.f32 1e-05, %v858_v21 }
 0x23f   : > { %v839_v23 = vpop.xlane.xlu1 %838  ;;  %v842_v24 = vpop.xlane.xlu0 %841 }
 0x240   : > { %15939 = vrsqrt.f32 %v866_v22  ;;  %v859_v25 = vmul.f32 0.03125, %v839_v23  ;;  %v860_v26 = vmul.f32 0.03125, %v842_v24 }
 0x242   : > { %v867_v27 = vadd.f32 1e-05, %v859_v25  ;;  %v868_v28 = vadd.f32 1e-05, %v860_v26 }
 0x243   : > { %v845_v29 = vpop.xlane.xlu1 %844  ;;  %v848_v30 = vpop.xlane.xlu0 %847 }
 0x244   : > { %15941 = vrsqrt.f32 %v867_v27  ;;  %v861_v31 = vmul.f32 0.03125, %v845_v29  ;;  %v862_v32 = vmul.f32 0.03125, %v848_v30 }
 0x245   : > { %15943 = vrsqrt.f32 %v868_v28 }
 0x246   : > { %v869_v33 = vadd.f32 1e-05, %v861_v31  ;;  %v870_v34 = vadd.f32 1e-05, %v862_v32 }
 0x247   : > { %v851_v35 = vpop.xlane.xlu1 %850  ;;  %v854_v36 = vpop.xlane.xlu0 %853 }
 0x248   : > { %15945 = vrsqrt.f32 %v869_v33  ;;  %v863_v37 = vmul.f32 0.03125, %v851_v35  ;;  %v864_v38 = vmul.f32 0.03125, %v854_v36  ;;  %v16319_v35 = vmov 1983009808  }
 0x249   : > { %15947 = vrsqrt.f32 %v870_v34  ;;  %v1105_v36 = vunpack.c.l.s4 %v16319_v35 }
 0x24a   : > { %v15940_v39 = vpop.eup %15939  ;;  %v871_v40 = vadd.f32 1e-05, %v863_v37  ;;  %v872_v41 = vadd.f32 1e-05, %v864_v38  ;;  %v1107_v37 = vlaneseq }
 0x24b   : > { %v857_v42 = vpop.xlane.xlu1 %856  ;;  %v882_v43 = vmul.f32 %v15940_v39, %v16500_v50  ;;  %v14819_v50 = vld [vmem:[%s21149_s5] ss:$0 sm:$0xff] }
 0x24c   : > { %15949 = vrsqrt.f32 %v871_v40  ;;  %v865_v46 = vmul.f32 0.03125, %v857_v42  ;;  %v16320_v40 = vmov 1934713408   ;;  %v1106_v42 = vunpack.c.0.s8 %v1105_v36 }
 0x24d   : > { %15951 = vrsqrt.f32 %v872_v41  ;;  %v896_v52 = vmul.f32 %v14818_v44, %v882_v43  ;;  %v1137_v41 = vunpack.c.l.s4 %v16320_v40  ;;  %v1108_v43 = vshrl.u32 %v1107_v37, 7 }
 0x24e   : > { %v15942_v47 = vpop.eup %15941  ;;  %v873_v48 = vadd.f32 1e-05, %v865_v46 }
 0x24f   : > { %v15944_v49 = vpop.eup %15943  ;;  %v883_v51 = vmul.f32 %v15942_v47, %v16508_v58  ;;  %v910_v61 = vadd.f32 %v14819_v50, %v896_v52  ;;  %v1138_v47 = vunpack.c.0.s8 %v1137_v41 }
 0x250   : > { %v884_v54 = vmul.f32 %v15944_v49, %v16498_v45  ;;  %15953 = vrsqrt.f32 %v873_v48  ;;  %v16651_v48 = vsub.s32 %v1106_v42, %v1108_v43 }
 0x251   : > { %v897_v55 = vmul.f32 %v14818_v44, %v883_v51 }
 0x252   : > { %v15946_v56 = vpop.eup %15945  ;;  %v898_v59 = vmul.f32 %v14818_v44, %v884_v54 }
 0x253   : > { %v15948_v57 = vpop.eup %15947  ;;  %v885_v60 = vmul.f32 %v15946_v56, %v16504_v53  ;;  %v911_v62 = vadd.f32 %v14819_v50, %v897_v55  ;;  %v16669_v56 = vsub.s32 %v1138_v47, %v1108_v43 }
 0x254   : > { %v886_v63 = vmul.f32 %v15948_v57, %v16518_v3  ;;  %v912_v45 = vadd.f32 %v14819_v50, %v898_v59 }
 0x255   : > { %v899_v0 = vmul.f32 %v14818_v44, %v885_v60  ;;  %v918_v58 = vpack.c.bf16 %v911_v62, %v910_v61 }
 0x256   : > { %v15950_v1 = vpop.eup %15949  ;;  %v900_v8 = vmul.f32 %v14818_v44, %v886_v63 }
 0x257   : > { %v15952_v4 = vpop.eup %15951  ;;  %15351 = vmatprep.mubr.msk.bf16.mxu0 %vm764_vm0, %v918_v58  ;;  %v913_v5 = vadd.f32 %v14819_v50, %v899_v0  ;;  %v887_v6 = vmul.f32 %v15950_v1, %v16516_v2 }
 0x258   : > { %v888_v9 = vmul.f32 %v15952_v4, %v16526_v10  ;;  %v914_v13 = vadd.f32 %v14819_v50, %v900_v8  ;;  %v14820_v10 = vld [vmem:[%s21151_s7] ss:$0 sm:$0xff] }
 0x259   : > { %v919_v11 = vpack.c.bf16 %v913_v5, %v912_v45  ;;  %v901_v12 = vmul.f32 %v14818_v44, %v887_v6 }
 0x25a   : > { %v15954_v53 = vpop.eup %15953  ;;  %v902_v15 = vmul.f32 %v14818_v44, %v888_v9 }
 0x25b   : > { %15352 = vmatmul.mubr.msk.bf16.vlgmr.msra.gmra.mrb[4].mxu0 %vm764_vm0, %v919_v11  ;;  %v915_v3 = vadd.f32 %v14819_v50, %v901_v12  ;;  %v889_v14 = vmul.f32 %v15954_v53, %v16521_v7 }
 0x25c   : > { %v916_v18 = vadd.f32 %v14819_v50, %v902_v15 }
 0x25d   : > { %v920_v16 = vpack.c.bf16 %v915_v3, %v914_v13  ;;  %v903_v17 = vmul.f32 %v14818_v44, %v889_v14 }
 0x25f   : > { %15355 = vmatprep.mubr.msk.bf16.mxu0 %vm764_vm0, %v920_v16  ;;  %v917_v19 = vadd.f32 %v14819_v50, %v903_v17 }
 0x261   : > { %v921_v2 = vpack.c.bf16 %v917_v19, %v916_v18 }
 0x263   : > { %15356 = vmatmul.mubr.msk.bf16.gmra.mrb[8].mxu0 %vm764_vm0, %v921_v2 }
 0x32e   : > { %v15353_v20 = vpop.f32.mrb[4].mxu0 }
 0x32f   : > { %v16565_v21 = vadd.f32 %v15353_v20, %v14820_v10  ;;  %v991_v22 = vpop.f32.mrb[5].mxu0 }
 0x330   : > { %v16567_v23 = vadd.f32 %v14820_v10, %v991_v22  ;;  %v15354_v7 = vpop.f32.mrb[6].mxu0 }
 0x331   : > { %1034 = vrot.lane.b32.xlu0 %v16565_v21, %s16315_s23  ;;  %v994_v24 = vpop.f32.mrb[7].mxu0  ;;  %v16573_v25 = vadd.f32 %v15354_v7, %v14820_v10 }
 0x332   : > { %1054 = vrot.lane.b32.xlu1 %v16567_v23, %s21186_s3  ;;  %v16579_v28 = vadd.f32 %v14820_v10, %v994_v24 }
 0x335   : > { %1030 = vrot.lane.b32.xlu0 %v16567_v23, %s16315_s23 }
 0x336   : > { %1036 = vrot.lane.b32.xlu1 %v16573_v25, %s16315_s23  ;;  %v15357_v26 = vpop.f32.mrb[8].mxu0 }
 0x337   : > { %v1007_v27 = vpop.f32.mrb[9].mxu0  ;;  %v16601_v31 = vadd.f32 %v15357_v26, %v14820_v10 }
 0x338   : > { %v15358_v29 = vpop.f32.mrb[10].mxu0  ;;  %v16617_v33 = vadd.f32 %v14820_v10, %v1007_v27 }
 0x339   : > { %1078 = vrot.lane.b32.xlu0 %v16567_v23, %s21184_s26  ;;  %v1010_v30 = vpop.f32.mrb[11].mxu0  ;;  %v16611_v32 = vadd.f32 %v15358_v29, %v14820_v10 }
 0x33a   : > { %1032 = vrot.lane.b32.xlu1 %v16579_v28, %s16315_s23  ;;  %v16627_v34 = vadd.f32 %v14820_v10, %v1010_v30 }
 0x33d   : > { %1058 = vrot.lane.b32.xlu0 %v16565_v21, %s21186_s3 }
 0x33e   : > { %1056 = vrot.lane.b32.xlu1 %v16579_v28, %s21186_s3 }
 0x341   : > { %1082 = vrot.lane.b32.xlu0 %v16565_v21, %s21184_s26 }
 0x342   : > { %1080 = vrot.lane.b32.xlu1 %v16579_v28, %s21184_s26 }
 0x345   : > { %2206 = vrot.lane.b32.xlu0 %v16567_v23, %s21182_s21 }
 0x346   : > { %1060 = vrot.lane.b32.xlu1 %v16573_v25, %s21186_s3 }
 0x349   : > { %2210 = vrot.lane.b32.xlu0 %v16565_v21, %s21182_s21 }
 0x34a   : > { %1084 = vrot.lane.b32.xlu1 %v16573_v25, %s21184_s26 }
 0x34d   : > { %1042 = vrot.lane.b32.xlu0 %v16601_v31, %s16315_s23 }
 0x34e   : > { %2212 = vrot.lane.b32.xlu1 %v16573_v25, %s21182_s21 }
 0x351   : > { %1066 = vrot.lane.b32.xlu0 %v16601_v31, %s21186_s3 }
 0x352   : > { %2208 = vrot.lane.b32.xlu1 %v16579_v28, %s21182_s21 }
 0x355   : > { %1090 = vrot.lane.b32.xlu0 %v16601_v31, %s21184_s26 }
 0x356   : > { %1044 = vrot.lane.b32.xlu1 %v16611_v32, %s16315_s23 }
 0x359   : > { %1038 = vrot.lane.b32.xlu0 %v16617_v33, %s16315_s23 }
 0x35a   : > { %1068 = vrot.lane.b32.xlu1 %v16611_v32, %s21186_s3 }
 0x35d   : > { %1062 = vrot.lane.b32.xlu0 %v16617_v33, %s21186_s3 }
 0x35e   : > { %1092 = vrot.lane.b32.xlu1 %v16611_v32, %s21184_s26 }
 0x361   : > { %1086 = vrot.lane.b32.xlu0 %v16617_v33, %s21184_s26 }
 0x362   : > { %1040 = vrot.lane.b32.xlu1 %v16627_v34, %s16315_s23 }
 0x366   : > { %1064 = vrot.lane.b32.xlu1 %v16627_v34, %s21186_s3  ;;  %s21240_s3 = smov 112  }
 0x36a   : > { %1088 = vrot.lane.b32.xlu1 %v16627_v34, %s21184_s26  ;;  %s21241_s26 = smov 104  }
 0x3a3   : > { %v16637_v38 = vpop.permute.xlu0 %1034 }
 0x3a4   : > { %v16639_v39 = vpop.permute.xlu1 %1054  ;;  %2226 = vrot.lane.b32.xlu0 %v16637_v38, %s21182_s21 }
 0x3a5   : > { %v1102_v49 = vcombine.low %v16567_v23, %v16639_v39  ;;  %v1103_v51 = vcombine.high %v16567_v23, %v16639_v39 }
 0x3a7   : > { %v16643_v44 = vpop.permute.xlu0 %1030  ;;  %v1110_v57 = vrot.slane %v1102_v49, %v16651_v48  ;;  %v1117_v59 = vrot.slane %v1103_v51, %v16651_v48 }
 0x3a8   : > { %v16645_v46 = vpop.permute.xlu1 %1036  ;;  %2222 = vrot.lane.b32.xlu0 %v16643_v44, %s21182_s21 }
 0x3a9   : > { %2228 = vrot.lane.b32.xlu1 %v16645_v46, %s21182_s21 }
 0x3ab   : > { %v16657_v52 = vpop.permute.xlu0 %1078 }
 0x3ac   : > { %v1118_v54 = vcombine.low %v16643_v44, %v16657_v52  ;;  %v1119_v50 = vcombine.high %v16643_v44, %v16657_v52  ;;  %v16663_v55 = vpop.permute.xlu1 %1032  ;;  %2238 = vrot.lane.b32.xlu0 %v16639_v39, %s21182_s21 }
 0x3ad   : > { %2224 = vrot.lane.b32.xlu1 %v16663_v55, %s21182_s21 }
 0x3ae   : > { %v1126_v60 = vrot.slane %v1118_v54, %v16651_v48  ;;  %v1133_v61 = vrot.slane %v1119_v50, %v16651_v48 }
 0x3af   : > { %v16675_v62 = vpop.permute.xlu0 %1058 }
 0x3b0   : > { %v1134_v63 = vcombine.low %v1110_v57, %v1126_v60  ;;  %v1135_v0 = vcombine.high %v1110_v57, %v1126_v60  ;;  %v1150_v58 = vcombine.low %v1117_v59, %v1133_v61  ;;  %v1151_v1 = vcombine.high %v1117_v59, %v1133_v61  ;;  %v16677_v4 = vpop.permute.xlu1 %1056  ;;  %2254 = vrot.lane.b32.xlu0 %v16657_v52, %s21182_s21 }
 0x3b1   : > { %2240 = vrot.lane.b32.xlu1 %v16677_v4, %s21182_s21  ;;  %v1170_v45 = vcombine.low %v16579_v28, %v16677_v4  ;;  %v1171_v12 = vcombine.high %v16579_v28, %v16677_v4 }
 0x3b2   : > { %v1142_v5 = vrot.slane %v1134_v63, %v16669_v56  ;;  %v1149_v6 = vrot.slane %v1135_v0, %v16669_v56  ;;  %v1158_v9 = vrot.slane %v1150_v58, %v16669_v56  ;;  %v1165_v11 = vrot.slane %v1151_v1, %v16669_v56 }
 0x3b3   : > { %v16687_v8 = vpop.permute.xlu0 %1082  ;;  %v1178_v14 = vrot.slane %v1170_v45, %v16651_v48  ;;  %v1185_v20 = vrot.slane %v1171_v12, %v16651_v48 }
 0x3b4   : > { %v16693_v53 = vpop.permute.xlu1 %1080  ;;  %2242 = vrot.lane.b32.xlu0 %v16675_v62, %s21182_s21  ;;  %v1646_v15 = vcombine.low %v1142_v5, %v1149_v6  ;;  %v14827_v16 = vcombine.high %v1142_v5, %v1149_v6  ;;  %v1662_v2 = vcombine.low %v1158_v9, %v1165_v11  ;;  %v14828_v10 = vcombine.high %v1158_v9, %v1165_v11 }
 0x3b5   : > { %v1186_v13 = vcombine.low %v16663_v55, %v16693_v53  ;;  %v1187_v3 = vcombine.high %v16663_v55, %v16693_v53  ;;  %2256 = vrot.lane.b32.xlu1 %v16693_v53, %s21182_s21 }
 0x3b6   : > { %v1653_v29 = vrot.slane %v1646_v15, %v16651_v48  ;;  %v1661_v30 = vrot.slane %v14827_v16, %v16651_v48  ;;  %v1669_v36 = vrot.slane %v1662_v2, %v16651_v48  ;;  %v1677_v37 = vrot.slane %v14828_v10, %v16651_v48 }
 0x3b7   : > { %v1194_v17 = vrot.slane %v1186_v13, %v16651_v48  ;;  %v1201_v18 = vrot.slane %v1187_v3, %v16651_v48  ;;  %v16706_v19 = vpop.permute.xlu0 %2206 }
 0x3b8   : > { %v16709_v22 = vpop.permute.xlu1 %1060  ;;  %2258 = vrot.lane.b32.xlu0 %v16687_v8, %s21182_s21  ;;  %v1678_v49 = vcombine.low %v1653_v29, %v1661_v30  ;;  %v1694_v54 = vcombine.low %v1669_v36, %v1677_v37  ;;  %v1679_v12 = vcombine.high %v1653_v29, %v1661_v30  ;;  %v1695_v13 = vcombine.high %v1669_v36, %v1677_v37 }
 0x3b9   : > { %v1202_v7 = vcombine.low %v1178_v14, %v1194_v17  ;;  %v1203_v24 = vcombine.high %v1178_v14, %v1194_v17  ;;  %2244 = vrot.lane.b32.xlu1 %v16709_v22, %s21182_s21  ;;  %v1218_v26 = vcombine.low %v1185_v20, %v1201_v18  ;;  %v1219_v27 = vcombine.high %v1185_v20, %v1201_v18 }
 0x3ba   : > { %v1686_v57 = vrot.slane %v1678_v49, %v16669_v56  ;;  %v1702_v61 = vrot.slane %v1694_v54, %v16669_v56  ;;  %v16761_v10 = vrot.slane %v1679_v12, %v16669_v56  ;;  %v16764_v20 = vrot.slane %v1695_v13, %v16669_v56 }
 0x3bb   : > { %v16717_v35 = vpop.permute.xlu0 %2210  ;;  %v1210_v41 = vrot.slane %v1202_v7, %v16669_v56  ;;  %v1217_v42 = vrot.slane %v1203_v24, %v16669_v56  ;;  %v1226_v43 = vrot.slane %v1218_v26, %v16669_v56  ;;  %v1233_v47 = vrot.slane %v1219_v27, %v16669_v56 }
 0x3bc   : > { %v16721_v40 = vpop.permute.xlu1 %1084  ;;  %2214 = vrot.lane.b32.xlu0 %v16617_v33, %s21182_s21  ;;  %v1711_v5 = vcombine.high %v1686_v57, %v1702_v61  ;;  %v1710_v30 = vcombine.low %v1686_v57, %v1702_v61 }
 0x3bd   : > { %2260 = vrot.lane.b32.xlu1 %v16721_v40, %s21182_s21  ;;  %v1714_v59 = vcombine.low %v1210_v41, %v1217_v42  ;;  %v14829_v60 = vcombine.high %v1210_v41, %v1217_v42  ;;  %v1730_v63 = vcombine.low %v1226_v43, %v1233_v47  ;;  %v14830_v9 = vcombine.high %v1226_v43, %v1233_v47 }
 0x3be   : > { %v1712_v41 = vcombine.low %v16761_v10, %v16764_v20 }
 0x3bf   : > { %v16731_v51 = vpop.permute.xlu0 %1042  ;;  %v1721_v58 = vrot.slane %v1714_v59, %v16651_v48  ;;  %v1729_v1 = vrot.slane %v14829_v60, %v16651_v48  ;;  %v1737_v6 = vrot.slane %v1730_v63, %v16651_v48  ;;  %v1745_v16 = vrot.slane %v14830_v9, %v16651_v48 }
 0x3c0   : > { %v16733_v50 = vpop.permute.xlu1 %2212  ;;  %2218 = vrot.lane.b32.xlu0 %v16601_v31, %s21182_s21  ;;  %v1254_v63 = vcombine.low %v16637_v38, %v16687_v8 }
 0x3c1   : > { %2216 = vrot.lane.b32.xlu1 %v16627_v34, %s21182_s21  ;;  %v1746_v3 = vcombine.low %v1721_v58, %v1729_v1  ;;  %v1747_v14 = vcombine.high %v1721_v58, %v1729_v1  ;;  %v1762_v17 = vcombine.low %v1737_v6, %v1745_v16  ;;  %v1763_v18 = vcombine.high %v1737_v6, %v1745_v16 }
 0x3c2   : > { %v1238_v1 = vcombine.low %v16565_v21, %v16675_v62  ;;  %v1255_v6 = vcombine.high %v16637_v38, %v16687_v8  ;;  %v1262_v9 = vrot.slane %v1254_v63, %v16651_v48 }
 0x3c3   : > { %v16741_v0 = vpop.permute.xlu0 %1066  ;;  %v1754_v2 = vrot.slane %v1746_v3, %v16669_v56  ;;  %v16767_v7 = vrot.slane %v1747_v14, %v16669_v56  ;;  %v1770_v27 = vrot.slane %v1762_v17, %v16669_v56  ;;  %v1777_v29 = vrot.slane %v1763_v18, %v16669_v56 }
 0x3c4   : > { %v16745_v45 = vpop.permute.xlu1 %2208  ;;  %2234 = vrot.lane.b32.xlu0 %v16731_v51, %s21182_s21  ;;  %v1246_v12 = vrot.slane %v1238_v1, %v16651_v48  ;;  %v1269_v13 = vrot.slane %v1255_v6, %v16651_v48  ;;  %v1323_v3 = vcombine.high %v16645_v46, %v16721_v40  ;;  %v1307_v18 = vcombine.high %v16573_v25, %v16709_v22 }
 0x3c5   : > { %2220 = vrot.lane.b32.xlu1 %v16611_v32, %s21182_s21  ;;  %v1778_v36 = vcombine.low %v1754_v2, %v1770_v27  ;;  %v1779_v37 = vcombine.high %v1754_v2, %v1770_v27  ;;  %v1780_v42 = vcombine.low %v16767_v7, %v1777_v29 }
 0x3c6   : > { %v1270_v16 = vcombine.low %v1246_v12, %v1262_v9  ;;  %v1271_v17 = vcombine.high %v1246_v12, %v1262_v9 }
 0x3c7   : > { %v16752_v11 = vpop.permute.xlu0 %1090  ;;  %v2190_v49 = vpack.c.bf16 %v1778_v36, %v1710_v30  ;;  %v2194_v54 = vpack.c.bf16 %v1780_v42, %v1712_v41  ;;  %v16814_v58 = vpack.c.bf16 %v1779_v37, %v1711_v5  ;;  %v1322_v5 = vcombine.low %v16645_v46, %v16721_v40 }
 0x3c8   : > { %21219 = vst [vmem:[#allocation3_spill] sm:$0xff] %v16752_v11  ;;  %v16754_v15 = vpop.permute.xlu1 %1044  ;;  %v1781_v36 = vcombine.high %v16767_v7, %v1777_v29  ;;  %v1337_v37 = vrot.slane %v1323_v3, %v16651_v48  ;;  %v1278_v41 = vrot.slane %v1270_v16, %v16669_v56  ;;  %v1285_v42 = vrot.slane %v1271_v17, %v16669_v56 }
 0x3c9   : > { %2236 = vrot.lane.b32.xlu1 %v16754_v15, %s21182_s21  ;;  %15363 = vmatprep.mubr.msk.bf16.mxu1 %vm4606_vm1, %v2190_v49  ;;  %v1330_v2 = vrot.slane %v1322_v5, %v16651_v48  ;;  %v1527_v63 = vcombine.high %v16731_v51, %v16752_v11 }
 0x3ca   : > { %15379 = vmatprep.mubr.msk.bf16.mxu0 %vm4606_vm1, %v2194_v54  ;;  %v1782_v9 = vcombine.low %v1278_v41, %v1285_v42  ;;  %v14831_v5 = vcombine.high %v1278_v41, %v1285_v42 }
 0x3cb   : > { %v16769_v24 = vpop.permute.xlu0 %1038 }
 0x3cc   : > { %v16771_v26 = vpop.permute.xlu1 %1068  ;;  %2230 = vrot.lane.b32.xlu0 %v16769_v24, %s21182_s21 }
 0x3cf   : > { %v16780_v43 = vpop.permute.xlu0 %1062 }
 0x3d0   : > { %v16782_v47 = vpop.permute.xlu1 %1092  ;;  %2246 = vrot.lane.b32.xlu0 %v16780_v43, %s21182_s21 }
 0x3d3   : > { %v16788_v57 = vpop.permute.xlu0 %1086 }
 0x3d4   : > { %v16790_v59 = vpop.permute.xlu1 %1040  ;;  %2262 = vrot.lane.b32.xlu0 %v16788_v57, %s21182_s21 }
 0x3d5   : > { %2232 = vrot.lane.b32.xlu1 %v16790_v59, %s21182_s21 }
 0x3d8   : > { %v16796_v60 = vpop.permute.xlu1 %1064  ;;  %2250 = vrot.lane.b32.xlu0 %v16741_v0, %s21182_s21 }
 0x3d9   : > { %2248 = vrot.lane.b32.xlu1 %v16796_v60, %s21182_s21 }
 0x3dc   : > { %v16802_v61 = vpop.permute.xlu1 %1088  ;;  %2266 = vrot.lane.b32.xlu0 %v16752_v11, %s21182_s21 }
 0x3dd   : > { %2264 = vrot.lane.b32.xlu1 %v16802_v61, %s21182_s21 }
 0x3e0   : > { %3406 = vrot.lane.b32.xlu0 %v16567_v23, %s21174_s29  ;;  %v1239_v23 = vcombine.high %v16565_v21, %v16675_v62 }
 0x3e1   : > { %2252 = vrot.lane.b32.xlu1 %v16771_v26, %s21182_s21 }
 0x3e2   : > { %v1253_v14 = vrot.slane %v1239_v23, %v16651_v48  ;;  %v1511_v23 = vcombine.high %v16601_v31, %v16741_v0 }
 0x3e4   : > { %3438 = vrot.lane.b32.xlu0 %v16639_v39, %s21174_s29  ;;  %v1306_v39 = vcombine.low %v16573_v25, %v16709_v22  ;;  %v1286_v27 = vcombine.low %v1253_v14, %v1269_v13  ;;  %v1287_v30 = vcombine.high %v1253_v14, %v1269_v13  ;;  %v1541_v14 = vrot.slane %v1527_v63, %v16651_v48 }
 0x3e5   : > { %2268 = vrot.lane.b32.xlu1 %v16782_v47, %s21182_s21 }
 0x3e6   : > { %v1294_v29 = vrot.slane %v1286_v27, %v16669_v56  ;;  %v1301_v54 = vrot.slane %v1287_v30, %v16669_v56  ;;  %v16892_v27 = vrot.slane %v1782_v9, %v16651_v48  ;;  %v16895_v30 = vrot.slane %v14831_v5, %v16651_v48 }
 0x3e7   : > { %v1579_v9 = vcombine.high %v16611_v32, %v16771_v26  ;;  %v1374_v5 = vcombine.low %v16617_v33, %v16780_v43 }
 0x3e8   : > { %3454 = vrot.lane.b32.xlu0 %v16657_v52, %s21174_s29  ;;  %v1713_v52 = vcombine.high %v16761_v10, %v16764_v20  ;;  %v1526_v10 = vcombine.low %v16731_v51, %v16752_v11  ;;  %v1798_v3 = vcombine.low %v1294_v29, %v1301_v54  ;;  %v14832_v16 = vcombine.high %v1294_v29, %v1301_v54 }
 0x3e9   : > { %3408 = vrot.lane.b32.xlu1 %v16579_v28, %s21174_s29  ;;  %v1314_v28 = vrot.slane %v1306_v39, %v16651_v48  ;;  %v1578_v29 = vcombine.low %v16611_v32, %v16771_v26  ;;  %v1391_v54 = vcombine.high %v16769_v24, %v16788_v57  ;;  %v1382_v41 = vrot.slane %v1374_v5, %v16651_v48 }
 0x3ea   : > { %v16856_v20 = vpack.c.bf16 %v1781_v36, %v1713_v52  ;;  %v1534_v12 = vrot.slane %v1526_v10, %v16651_v48  ;;  %v16910_v42 = vrot.slane %v1798_v3, %v16651_v48  ;;  %v16913_v10 = vrot.slane %v14832_v16, %v16651_v48 }
 0x3eb   : > { %v1338_v49 = vcombine.low %v1314_v28, %v1330_v2  ;;  %v1339_v7 = vcombine.high %v1314_v28, %v1330_v2  ;;  %v1594_v3 = vcombine.low %v16754_v15, %v16782_v47  ;;  %v1442_v16 = vcombine.low %v16627_v34, %v16796_v60 }
 0x3ec   : > { %3410 = vrot.lane.b32.xlu0 %v16565_v21, %s21174_s29  ;;  %v1321_v21 = vrot.slane %v1307_v18, %v16651_v48  ;;  %v1525_v18 = vrot.slane %v1511_v23, %v16651_v48  ;;  %v1459_v23 = vcombine.high %v16790_v59, %v16802_v61 }
 0x3ed   : > { %3422 = vrot.lane.b32.xlu1 %v16643_v44, %s21174_s29  ;;  %v1510_v44 = vcombine.low %v16601_v31, %v16741_v0  ;;  %v16873_v13 = vrot.slane %v1338_v49, %v16669_v56  ;;  %v16876_v39 = vrot.slane %v1339_v7, %v16669_v56 }
 0x3ee   : > { %v1354_v1 = vcombine.low %v1321_v21, %v1337_v37  ;;  %v1355_v6 = vcombine.high %v1321_v21, %v1337_v37  ;;  %v1558_v28 = vcombine.low %v1525_v18, %v1541_v14  ;;  %v1559_v37 = vcombine.high %v1525_v18, %v1541_v14 }
 0x3ef   : > { %v14833_v36 = vcombine.high %v16873_v13, %v16876_v39  ;;  %v1595_v14 = vcombine.high %v16754_v15, %v16782_v47  ;;  %v1443_v18 = vcombine.high %v16627_v34, %v16796_v60  ;;  %v1473_v7 = vrot.slane %v1459_v23, %v16651_v48 }
 0x3f0   : > { %3426 = vrot.lane.b32.xlu0 %v16637_v38, %s21174_s29  ;;  %v1518_v38 = vrot.slane %v1510_v44, %v16651_v48  ;;  %v16886_v17 = vrot.slane %v1355_v6, %v16669_v56  ;;  %v1566_v63 = vrot.slane %v1558_v28, %v16669_v56  ;;  %v1458_v6 = vcombine.low %v16790_v59, %v16802_v61 }
 0x3f1   : > { %3424 = vrot.lane.b32.xlu1 %v16663_v55, %s21174_s29  ;;  %v16883_v55 = vrot.slane %v1354_v1, %v16669_v56  ;;  %v1573_v1 = vrot.slane %v1559_v37, %v16669_v56 }
 0x3f2   : > { %v1542_v2 = vcombine.low %v1518_v38, %v1534_v12  ;;  %v1543_v52 = vcombine.high %v1518_v38, %v1534_v12  ;;  %v1375_v12 = vcombine.high %v16617_v33, %v16780_v43 }
 0x3f3   : > { %v2070_v28 = vcombine.low %v1566_v63, %v1573_v1  ;;  %v14840_v37 = vcombine.high %v1566_v63, %v1573_v1 }
 0x3f4   : > { %3442 = vrot.lane.b32.xlu0 %v16675_v62, %s21174_s29  ;;  %v1850_v62 = vcombine.low %v16873_v13, %v16876_v39  ;;  %v1550_v21 = vrot.slane %v1542_v2, %v16669_v56  ;;  %v1557_v49 = vrot.slane %v1543_v52, %v16669_v56  ;;  %v1586_v52 = vrot.slane %v1578_v29, %v16651_v48 }
 0x3f5   : > { %3440 = vrot.lane.b32.xlu1 %v16677_v4, %s21174_s29  ;;  %v1866_v4 = vcombine.low %v16883_v55, %v16886_v17 }
 0x3f6   : > { %v16928_v44 = vrot.slane %v1850_v62, %v16651_v48  ;;  %v2054_v38 = vcombine.low %v1550_v21, %v1557_v49  ;;  %v14839_v2 = vcombine.high %v1550_v21, %v1557_v49  ;;  %v1405_v62 = vrot.slane %v1391_v54, %v16651_v48 }
 0x3f7   : > { %v1389_v21 = vrot.slane %v1375_v12, %v16651_v48  ;;  %v1602_v49 = vrot.slane %v1594_v3, %v16651_v48  ;;  %v1450_v54 = vrot.slane %v1442_v16, %v16651_v48 }
 0x3f8   : > { %3458 = vrot.lane.b32.xlu0 %v16687_v8, %s21174_s29  ;;  %v1593_v8 = vrot.slane %v1579_v9, %v16651_v48  ;;  %v16968_v29 = vrot.slane %v2054_v38, %v16651_v48  ;;  %v16979_v38 = vrot.slane %v2070_v28, %v16651_v48 }
 0x3f9   : > { %3456 = vrot.lane.b32.xlu1 %v16693_v53, %s21174_s29  ;;  %v1390_v53 = vcombine.low %v16769_v24, %v16788_v57  ;;  %v1423_v23 = vcombine.high %v1389_v21, %v1405_v62  ;;  %v1611_v16 = vcombine.high %v1586_v52, %v1602_v49 }
 0x3fb   : > { %v1625_v39 = vrot.slane %v1611_v16, %v16669_v56 }
 0x3fc   : > { %3414 = vrot.lane.b32.xlu0 %v16617_v33, %s21174_s29  ;;  %v1398_v33 = vrot.slane %v1390_v53, %v16651_v48  ;;  %v1609_v53 = vrot.slane %v1595_v14, %v16651_v48  ;;  %v1610_v14 = vcombine.low %v1586_v52, %v1602_v49  ;;  %v1437_v52 = vrot.slane %v1423_v23, %v16669_v56 }
 0x3fd   : > { %3412 = vrot.lane.b32.xlu1 %v16573_v25, %s21174_s29  ;;  %v1466_v25 = vrot.slane %v1458_v6, %v16651_v48  ;;  %v1422_v6 = vcombine.low %v1389_v21, %v1405_v62 }
 0x3fe   : > { %v1406_v63 = vcombine.low %v1382_v41, %v1398_v33  ;;  %v1407_v1 = vcombine.high %v1382_v41, %v1398_v33  ;;  %v16984_v41 = vrot.slane %v14840_v37, %v16651_v48  ;;  %v1627_v33 = vcombine.high %v1593_v8, %v1609_v53 }
 0x3ff   : > { %v1474_v9 = vcombine.low %v1450_v54, %v1466_v25  ;;  %v1475_v5 = vcombine.high %v1450_v54, %v1466_v25  ;;  %v1430_v62 = vrot.slane %v1422_v6, %v16669_v56  ;;  %v1618_v13 = vrot.slane %v1610_v14, %v16669_v56 }
 0x400   : > { %3446 = vrot.lane.b32.xlu0 %v16780_v43, %s21174_s29  ;;  %v1457_v43 = vrot.slane %v1443_v18, %v16651_v48  ;;  %v1626_v18 = vcombine.low %v1593_v8, %v1609_v53  ;;  %v21220_v25 = vcombine.high %v16883_v55, %v16886_v17  ;;  %v1830_v53 = vcombine.low %v16910_v42, %v16913_v10 }
 0x401   : > { %3428 = vrot.lane.b32.xlu1 %v16645_v46, %s21174_s29  ;;  %v16976_v46 = vrot.slane %v14839_v2, %v16651_v48  ;;  %v1421_v2 = vrot.slane %v1407_v1, %v16669_v56  ;;  %v1489_v28 = vrot.slane %v1475_v5, %v16669_v56  ;;  %v14836_v1 = vcombine.high %v1430_v62, %v1437_v52 }
 0x402   : > { %v1490_v12 = vcombine.low %v1457_v43, %v1473_v7  ;;  %v1491_v3 = vcombine.high %v1457_v43, %v1473_v7  ;;  %v1414_v7 = vrot.slane %v1406_v63, %v16669_v56  ;;  %v1881_v21 = vrot.slane %v21220_v25, %v16651_v48 }
 0x403   : > { %v1634_v49 = vrot.slane %v1626_v18, %v16669_v56  ;;  %v1934_v63 = vcombine.low %v1430_v62, %v1437_v52  ;;  %v2122_v55 = vcombine.low %v1618_v13, %v1625_v39  ;;  %v14841_v17 = vcombine.high %v1618_v13, %v1625_v39 }
 0x404   : > { %3462 = vrot.lane.b32.xlu0 %v16788_v57, %s21174_s29  ;;  %v1865_v57 = vrot.slane %v14833_v36, %v16651_v48  ;;  %v1498_v37 = vrot.slane %v1490_v12, %v16669_v56  ;;  %v1505_v8 = vrot.slane %v1491_v3, %v16669_v56  ;;  %v1873_v36 = vrot.slane %v1866_v4, %v16651_v48 }
 0x405   : > { %3444 = vrot.lane.b32.xlu1 %v16709_v22, %s21174_s29  ;;  %v1482_v22 = vrot.slane %v1474_v9, %v16669_v56  ;;  %v1918_v54 = vcombine.low %v1414_v7, %v1421_v2  ;;  %v14835_v43 = vcombine.high %v1414_v7, %v1421_v2  ;;  %v21221_v2 = vcombine.low %v16892_v27, %v16895_v30 }
 0x406   : > { %v2002_v23 = vcombine.low %v1498_v37, %v1505_v8  ;;  %v14838_v9 = vcombine.high %v1498_v37, %v1505_v8  ;;  %v1882_v5 = vcombine.low %v16928_v44, %v1865_v57  ;;  %v1898_v12 = vcombine.low %v1873_v36, %v1881_v21 }
 0x407   : > { %v1986_v4 = vcombine.low %v1482_v22, %v1489_v28  ;;  %v14837_v6 = vcombine.high %v1482_v22, %v1489_v28  ;;  %v1883_v3 = vcombine.high %v16928_v44, %v1865_v57  ;;  %v1899_v14 = vcombine.high %v1873_v36, %v1881_v21 }
 0x408   : > { %3418 = vrot.lane.b32.xlu0 %v16601_v31, %s21174_s29  ;;  %v1641_v31 = vrot.slane %v1627_v33, %v16669_v56  ;;  %v17025_v16 = vrot.slane %v1918_v54, %v16651_v48  ;;  %v17028_v18 = vrot.slane %v14835_v43, %v16651_v48  ;;  %v1949_v33 = vrot.slane %v14836_v1, %v16651_v48 }
 0x409   : > { %3460 = vrot.lane.b32.xlu1 %v16721_v40, %s21174_s29  ;;  %v1831_v40 = vcombine.high %v16910_v42, %v16913_v10  ;;  %v2001_v7 = vrot.slane %v14837_v6, %v16651_v48  ;;  %v2009_v44 = vrot.slane %v2002_v23, %v16651_v48  ;;  %v2017_v57 = vrot.slane %v14838_v9, %v16651_v48 }
 0x40a   : > { %v2138_v42 = vcombine.low %v1634_v49, %v1641_v31  ;;  %v14842_v10 = vcombine.high %v1634_v49, %v1641_v31  ;;  %v1822_v62 = vrot.slane %v21221_v2, %v16669_v56  ;;  %v1890_v22 = vrot.slane %v1882_v5, %v16669_v56 }
 0x40b   : > { %v1906_v28 = vrot.slane %v1898_v12, %v16669_v56  ;;  %v1838_v37 = vrot.slane %v1830_v53, %v16669_v56  ;;  %v1845_v8 = vrot.slane %v1831_v40, %v16669_v56  ;;  %v1913_v13 = vrot.slane %v1899_v14, %v16669_v56 }
 0x40c   : > { %3434 = vrot.lane.b32.xlu0 %v16731_v51, %s21174_s29  ;;  %v17031_v51 = vrot.slane %v1934_v63, %v16651_v48  ;;  %v17057_v39 = vrot.slane %v2122_v55, %v16651_v48  ;;  %v17060_v36 = vrot.slane %v14841_v17, %v16651_v48  ;;  %v1950_v25 = vcombine.low %v17025_v16, %v17028_v18 }
 0x40d   : > { %3416 = vrot.lane.b32.xlu1 %v16627_v34, %s21174_s29  ;;  %v1993_v34 = vrot.slane %v1986_v4, %v16651_v48  ;;  %v2034_v31 = vcombine.low %v2009_v44, %v2017_v57  ;;  %v1914_v53 = vcombine.low %v1890_v22, %v1906_v28  ;;  %v1846_v54 = vcombine.low %v1822_v62, %v1838_v37 }
 0x40e   : > { %v1966_v21 = vcombine.low %v17031_v51, %v1949_v33  ;;  %v1915_v43 = vcombine.high %v1890_v22, %v1906_v28  ;;  %v2086_v4 = vcombine.low %v16968_v29, %v16976_v46  ;;  %v2102_v6 = vcombine.low %v16979_v38, %v16984_v41 }
 0x40f   : > { %v2018_v49 = vcombine.low %v1993_v34, %v2001_v7  ;;  %v2154_v23 = vcombine.low %v17057_v39, %v17060_v36  ;;  %v2042_v5 = vrot.slane %v2034_v31, %v16669_v56  ;;  %v1847_v12 = vcombine.high %v1822_v62, %v1838_v37 }
 0x410   : > { %3450 = vrot.lane.b32.xlu0 %v16741_v0, %s21174_s29  ;;  %v21222_v0 = vcombine.high %v16892_v27, %v16895_v30  ;;  %v17063_v27 = vrot.slane %v2138_v42, %v16651_v48  ;;  %v17066_v30 = vrot.slane %v14842_v10, %v16651_v48  ;;  %v1974_v55 = vrot.slane %v1966_v21, %v16669_v56 }
 0x411   : > { %3430 = vrot.lane.b32.xlu1 %v16769_v24, %s21174_s29  ;;  %v1897_v24 = vrot.slane %v1883_v3, %v16669_v56  ;;  %v2026_v17 = vrot.slane %v2018_v49, %v16669_v56  ;;  %v17089_v42 = vpack.c.bf16 %v1914_v53, %v1846_v54  ;;  %v1951_v10 = vcombine.high %v17025_v16, %v17028_v18 }
 0x412   : > { %v1829_v52 = vrot.slane %v21222_v0, %v16669_v56  ;;  %v2170_v9 = vcombine.low %v17063_v27, %v17066_v30  ;;  %v1967_v3 = vcombine.high %v17031_v51, %v1949_v33  ;;  %v2019_v22 = vcombine.high %v1993_v34, %v2001_v7 }
 0x413   : > { %v1916_v1 = vcombine.low %v1897_v24, %v1913_v13  ;;  %v1917_v0 = vcombine.high %v1897_v24, %v1913_v13  ;;  %v2035_v28 = vcombine.high %v2009_v44, %v2017_v57  ;;  %v2094_v21 = vrot.slane %v2086_v4, %v16669_v56 }
 0x414   : > { %v1848_v63 = vcombine.low %v1829_v52, %v1845_v8  ;;  %v2162_v62 = vrot.slane %v2154_v23, %v16669_v56  ;;  %v2178_v37 = vrot.slane %v2170_v9, %v16669_v56  ;;  %v2050_v16 = vcombine.low %v2026_v17, %v2042_v5 }
 0x415   : > { %3420 = vrot.lane.b32.xlu1 %v16611_v32, %s21174_s29  ;;  %v1958_v32 = vrot.slane %v1950_v25, %v16669_v56  ;;  %v17102_v18 = vpack.c.bf16 %v1915_v43, %v1847_v12  ;;  %v1849_v51 = vcombine.high %v1829_v52, %v1845_v8  ;;  %v2051_v34 = vcombine.high %v2026_v17, %v2042_v5 }
 0x416   : > { %v17073_v40 = vpop.permute.xlu0 %2226  ;;  %v17094_v2 = vpack.c.bf16 %v1916_v1, %v1848_v63  ;;  %v1965_v7 = vrot.slane %v1951_v10, %v16669_v56  ;;  %v1981_v44 = vrot.slane %v1967_v3, %v16669_v56  ;;  %v2033_v24 = vrot.slane %v2019_v22, %v16669_v56 }
 0x417   : > { %v1982_v49 = vcombine.low %v1958_v32, %v1974_v55  ;;  %v1983_v33 = vcombine.high %v1958_v32, %v1974_v55  ;;  %v2049_v13 = vrot.slane %v2035_v28, %v16669_v56  ;;  %v2087_v31 = vcombine.high %v16968_v29, %v16976_v46 }
 0x418   : > { %v2103_v52 = vcombine.high %v16979_v38, %v16984_v41  ;;  %v17114_v53 = vpack.c.bf16 %v1917_v0, %v1849_v51  ;;  %v2186_v54 = vcombine.low %v2162_v62, %v2178_v37  ;;  %v2187_v43 = vcombine.high %v2162_v62, %v2178_v37 }
 0x419   : > { %3436 = vrot.lane.b32.xlu1 %v16754_v15, %s21174_s29  ;;  %v2110_v15 = vrot.slane %v2102_v6, %v16669_v56  ;;  %v17118_v4 = vpack.c.bf16 %v2050_v16, %v1982_v49  ;;  %v2155_v6 = vcombine.high %v17057_v39, %v17060_v36  ;;  %v17124_v29 = vpack.c.bf16 %v2051_v34, %v1983_v33 }
 0x41a   : > { %v2223_v14 = vpop.permute.xlu0 %2222  ;;  %v1984_v46 = vcombine.low %v1965_v7, %v1981_v44  ;;  %v1985_v41 = vcombine.high %v1965_v7, %v1981_v44  ;;  %v2052_v9 = vcombine.low %v2033_v24, %v2049_v13  ;;  %v2053_v32 = vcombine.high %v2033_v24, %v2049_v13 }
 0x41b   : > { %v17096_v25 = vpop.permute.xlu1 %2228  ;;  %v2119_v38 = vcombine.high %v2094_v21, %v2110_v15  ;;  %v17127_v55 = vrot.slane %v2087_v31, %v16669_v56  ;;  %v17139_v3 = vrot.slane %v2155_v6, %v16669_v56  ;;  %v2171_v0 = vcombine.high %v17063_v27, %v17066_v30 }
 0x41c   : > { %v17149_v62 = vpack.c.bf16 %v2052_v9, %v1984_v46  ;;  %v17151_v37 = vpack.c.bf16 %v2053_v32, %v1985_v41 }
 0x41d   : > { %3452 = vrot.lane.b32.xlu1 %v16771_v26, %s21174_s29  ;;  %v2118_v26 = vcombine.low %v2094_v21, %v2110_v15 }
 0x41e   : > { %v2239_v57 = vpop.permute.xlu0 %2238 }
 0x41f   : > { %v2225_v8 = vpop.permute.xlu1 %2224  ;;  %v2302_v63 = vcombine.low %v16706_v19, %v2239_v57  ;;  %v2303_v1 = vcombine.high %v16706_v19, %v2239_v57  ;;  %v17130_v19 = vrot.slane %v2103_v52, %v16669_v56  ;;  %v17132_v36 = vpack.c.bf16 %v2186_v54, %v2118_v26 }
 0x421   : > { %3432 = vrot.lane.b32.xlu1 %v16790_v59, %s21174_s29  ;;  %v17134_v59 = vpack.c.bf16 %v2187_v43, %v2119_v38  ;;  %v2310_v12 = vrot.slane %v2302_v63, %v16651_v48  ;;  %v2317_v10 = vrot.slane %v2303_v1, %v16651_v48 }
 0x422   : > { %v2255_v23 = vpop.permute.xlu0 %2254 }
 0x423   : > { %v2318_v17 = vcombine.low %v2223_v14, %v2255_v23  ;;  %v2319_v5 = vcombine.high %v2223_v14, %v2255_v23  ;;  %v2241_v39 = vpop.permute.xlu1 %2240 }
 0x424   : > { %v2370_v14 = vcombine.low %v16745_v45, %v2241_v39  ;;  %v2371_v21 = vcombine.high %v16745_v45, %v2241_v39 }
 0x425   : > { %v2326_v22 = vrot.slane %v2318_v17, %v16651_v48  ;;  %v2333_v28 = vrot.slane %v2319_v5, %v16651_v48  ;;  %3448 = vrot.lane.b32.xlu1 %v16796_v60, %s21174_s29 }
 0x426   : > { %v2243_v15 = vpop.permute.xlu0 %2242  ;;  %v2378_v52 = vrot.slane %v2370_v14, %v16651_v48  ;;  %v2385_v26 = vrot.slane %v2371_v21, %v16651_v48 }
 0x427   : > { %v2334_v51 = vcombine.low %v2310_v12, %v2326_v22  ;;  %v2335_v33 = vcombine.high %v2310_v12, %v2326_v22  ;;  %v2350_v34 = vcombine.low %v2317_v10, %v2333_v28  ;;  %v2351_v7 = vcombine.high %v2317_v10, %v2333_v28  ;;  %v2257_v44 = vpop.permute.xlu1 %2256 }
 0x428   : > { %v2438_v45 = vcombine.low %v16717_v35, %v2243_v15  ;;  %v2439_v60 = vcombine.high %v16717_v35, %v2243_v15  ;;  %v2386_v57 = vcombine.low %v2225_v8, %v2257_v44  ;;  %v2387_v24 = vcombine.high %v2225_v8, %v2257_v44 }
 0x429   : > { %v2342_v13 = vrot.slane %v2334_v51, %v16669_v56  ;;  %v2349_v31 = vrot.slane %v2335_v33, %v16669_v56  ;;  %3464 = vrot.lane.b32.xlu1 %v16802_v61, %s21174_s29  ;;  %v17166_v54 = vrot.slane %v2350_v34, %v16669_v56  ;;  %v17169_v43 = vrot.slane %v2351_v7, %v16669_v56 }
 0x42a   : > { %v2394_v35 = vrot.slane %v2386_v57, %v16651_v48  ;;  %v2401_v8 = vrot.slane %v2387_v24, %v16651_v48  ;;  %v2259_v63 = vpop.permute.xlu0 %2258  ;;  %v2446_v1 = vrot.slane %v2438_v45, %v16651_v48  ;;  %v2453_v6 = vrot.slane %v2439_v60, %v16651_v48 }
 0x42b   : > { %v2454_v46 = vcombine.low %v17073_v40, %v2259_v63  ;;  %v2455_v38 = vcombine.high %v17073_v40, %v2259_v63  ;;  %v2245_v61 = vpop.permute.xlu1 %2244  ;;  %v2846_v9 = vcombine.low %v2342_v13, %v2349_v31  ;;  %v14843_v32 = vcombine.high %v2342_v13, %v2349_v31 }
 0x42c   : > { %v2402_v41 = vcombine.low %v2378_v52, %v2394_v35  ;;  %v2403_v23 = vcombine.high %v2378_v52, %v2394_v35  ;;  %v2506_v39 = vcombine.low %v16733_v50, %v2245_v61  ;;  %v2507_v12 = vcombine.high %v16733_v50, %v2245_v61 }
 0x42d   : > { %v2462_v17 = vrot.slane %v2454_v46, %v16651_v48  ;;  %v2469_v5 = vrot.slane %v2455_v38, %v16651_v48  ;;  %v2418_v40 = vcombine.low %v2385_v26, %v2401_v8  ;;  %v2419_v28 = vcombine.high %v2385_v26, %v2401_v8 }
 0x42e   : > { %v17182_v10 = vrot.slane %v2402_v41, %v16669_v56  ;;  %v17185_v22 = vrot.slane %v2403_v23, %v16669_v56  ;;  %v17187_v14 = vpop.permute.xlu0 %2214  ;;  %v2514_v7 = vrot.slane %v2506_v39, %v16651_v48  ;;  %v2521_v44 = vrot.slane %v2507_v12, %v16651_v48 }
 0x42f   : > { %v2470_v21 = vcombine.low %v2446_v1, %v2462_v17  ;;  %v2471_v15 = vcombine.high %v2446_v1, %v2462_v17  ;;  %v2486_v51 = vcombine.low %v2453_v6, %v2469_v5  ;;  %v2487_v33 = vcombine.high %v2453_v6, %v2469_v5  ;;  %v2261_v34 = vpop.permute.xlu1 %2260 }
 0x430   : > { %v2522_v50 = vcombine.low %v17096_v25, %v2261_v34  ;;  %v2523_v45 = vcombine.high %v17096_v25, %v2261_v34  ;;  %v2853_v26 = vrot.slane %v2846_v9, %v16651_v48  ;;  %v2861_v35 = vrot.slane %v14843_v32, %v16651_v48 }
 0x431   : > { %v2478_v60 = vrot.slane %v2470_v21, %v16669_v56  ;;  %v2485_v57 = vrot.slane %v2471_v15, %v16669_v56  ;;  %v2494_v24 = vrot.slane %v2486_v51, %v16669_v56  ;;  %v2501_v13 = vrot.slane %v2487_v33, %v16669_v56 }
 0x432   : > { %v2530_v31 = vrot.slane %v2522_v50, %v16651_v48  ;;  %v2537_v52 = vrot.slane %v2523_v45, %v16651_v48  ;;  %v17201_v41 = vpop.permute.xlu0 %2218  ;;  %v2426_v23 = vrot.slane %v2418_v40, %v16669_v56  ;;  %v2433_v17 = vrot.slane %v2419_v28, %v16669_v56 }
 0x433   : > { %v2982_v8 = vcombine.low %v2478_v60, %v2485_v57  ;;  %v14847_v63 = vcombine.high %v2478_v60, %v2485_v57  ;;  %v2998_v1 = vcombine.low %v2494_v24, %v2501_v13  ;;  %v14848_v25 = vcombine.high %v2494_v24, %v2501_v13  ;;  %v17221_v28 = vpop.permute.xlu1 %2216 }
 0x434   : > { %v2538_v6 = vcombine.low %v2514_v7, %v2530_v31  ;;  %v2539_v46 = vcombine.high %v2514_v7, %v2530_v31  ;;  %v2554_v38 = vcombine.low %v2521_v44, %v2537_v52  ;;  %v2555_v61 = vcombine.high %v2521_v44, %v2537_v52 }
 0x435   : > { %v17206_v5 = vrot.slane %v2982_v8, %v16651_v48  ;;  %v17209_v9 = vrot.slane %v14847_v63, %v16651_v48  ;;  %v17216_v15 = vrot.slane %v2998_v1, %v16651_v48  ;;  %v17219_v40 = vrot.slane %v14848_v25, %v16651_v48 }
 0x436   : > { %v2546_v32 = vrot.slane %v2538_v6, %v16669_v56  ;;  %v2553_v39 = vrot.slane %v2539_v46, %v16669_v56  ;;  %v2562_v12 = vrot.slane %v2554_v38, %v16669_v56  ;;  %v2569_v21 = vrot.slane %v2555_v61, %v16669_v56  ;;  %v17237_v52 = vpop.permute.xlu0 %2234 }
 0x437   : > { %v2862_v51 = vcombine.low %v17166_v54, %v17169_v43  ;;  %v14844_v33 = vcombine.high %v17166_v54, %v17169_v43  ;;  %v2878_v50 = vcombine.low %v2853_v26, %v2861_v35  ;;  %v2914_v24 = vcombine.low %v17182_v10, %v17185_v22  ;;  %v17255_v30 = vpop.permute.xlu1 %2220 }
 0x438   : > { %v3050_v34 = vcombine.low %v2546_v32, %v2553_v39  ;;  %v14849_v7 = vcombine.high %v2546_v32, %v2553_v39  ;;  %v3066_v44 = vcombine.low %v2562_v12, %v2569_v21  ;;  %v14850_v45 = vcombine.high %v2562_v12, %v2569_v21 }
 0x439   : > { %v2869_v60 = vrot.slane %v2862_v51, %v16651_v48  ;;  %v2877_v57 = vrot.slane %v14844_v33, %v16651_v48  ;;  %v2879_v54 = vcombine.high %v2853_v26, %v2861_v35  ;;  %v17243_v43 = vrot.slane %v2171_v0, %v16669_v56 }
 0x43a   : > { %v17232_v13 = vrot.slane %v3050_v34, %v16651_v48  ;;  %v17235_v31 = vrot.slane %v14849_v7, %v16651_v48  ;;  %v2921_v1 = vrot.slane %v2914_v24, %v16651_v48  ;;  %v14845_v25 = vcombine.high %v17182_v10, %v17185_v22 }
 0x43b   : > { %v2894_v8 = vcombine.low %v2869_v60, %v2877_v57  ;;  %v2895_v63 = vcombine.high %v2869_v60, %v2877_v57  ;;  %v17249_v6 = vrot.slane %v2878_v50, %v16669_v56  ;;  %v2930_v46 = vcombine.low %v2426_v23, %v2433_v17 }
 0x43c   : > { %v14846_v38 = vcombine.high %v2426_v23, %v2433_v17  ;;  %v3014_v26 = vcombine.low %v17206_v5, %v17209_v9  ;;  %v3073_v35 = vrot.slane %v3066_v44, %v16651_v48  ;;  %v3081_v27 = vrot.slane %v14850_v45, %v16651_v48 }
 0x43d   : > { %v2929_v0 = vrot.slane %v14845_v25, %v16651_v48  ;;  %v3030_v61 = vcombine.low %v17216_v15, %v17219_v40  ;;  %v2937_v10 = vrot.slane %v2930_v46, %v16651_v48  ;;  %v17263_v23 = vrot.slane %v2879_v54, %v16669_v56  ;;  %v17294_v25 = vpop.permute.xlu1 %2236 }
 0x43e   : > { %v2945_v22 = vrot.slane %v14846_v38, %v16651_v48  ;;  %v2231_v17 = vpop.permute.xlu0 %2230  ;;  %v3082_v32 = vcombine.low %v17232_v13, %v17235_v31  ;;  %v17268_v39 = vrot.slane %v2894_v8, %v16669_v56  ;;  %v17271_v51 = vrot.slane %v2895_v63, %v16669_v56 }
 0x43f   : > { %v2946_v12 = vcombine.low %v2921_v1, %v2929_v0  ;;  %v2947_v21 = vcombine.high %v2921_v1, %v2929_v0  ;;  %v17274_v7 = vrot.slane %v3014_v26, %v16669_v56  ;;  %v17277_v44 = vrot.slane %v3030_v61, %v16669_v56 }
 0x440   : > { %v2962_v33 = vcombine.low %v2937_v10, %v2945_v22  ;;  %v2963_v34 = vcombine.high %v2937_v10, %v2945_v22  ;;  %v17284_v60 = vrot.slane %v3082_v32, %v16669_v56  ;;  %v3098_v57 = vcombine.low %v3073_v35, %v3081_v27 }
 0x441   : > { %v2954_v50 = vrot.slane %v2946_v12, %v16669_v56  ;;  %v17281_v45 = vrot.slane %v2947_v21, %v16669_v56  ;;  %v3015_v63 = vcombine.high %v17206_v5, %v17209_v9  ;;  %v2188_v1 = vcombine.low %v17139_v3, %v17243_v43 }
 0x442   : > { %v2970_v24 = vrot.slane %v2962_v33, %v16669_v56  ;;  %v17288_v54 = vrot.slane %v2963_v34, %v16669_v56  ;;  %v2247_v8 = vpop.permute.xlu0 %2246  ;;  %v2910_v46 = vcombine.low %v17249_v6, %v17268_v39  ;;  %v17299_v38 = vrot.slane %v3098_v57, %v16669_v56 }
 0x443   : > { %v3031_v26 = vcombine.high %v17216_v15, %v17219_v40  ;;  %v2189_v0 = vcombine.high %v17139_v3, %v17243_v43  ;;  %v2912_v5 = vcombine.low %v17263_v23, %v17271_v51  ;;  %v3046_v10 = vcombine.low %v17274_v7, %v17277_v44 }
 0x444   : > { %v2978_v61 = vcombine.low %v2954_v50, %v2970_v24  ;;  %v2980_v9 = vcombine.low %v17281_v45, %v17288_v54  ;;  %v2574_v22 = vcombine.low %v17187_v14, %v2247_v8  ;;  %v3114_v32 = vcombine.low %v17284_v60, %v17299_v38 }
 0x445   : > { %v17315_v15 = vrot.slane %v3015_v63, %v16669_v56  ;;  %v17318_v3 = vrot.slane %v3031_v26, %v16669_v56  ;;  %v3083_v12 = vcombine.high %v17232_v13, %v17235_v31  ;;  %v3099_v21 = vcombine.high %v3073_v35, %v3081_v27 }
 0x446   : > { %v3390_v40 = vpack.c.bf16 %v2978_v61, %v2910_v46  ;;  %v3394_v43 = vpack.c.bf16 %v2980_v9, %v2912_v5  ;;  %v2263_v33 = vpop.permute.xlu0 %2262  ;;  %v2979_v34 = vcombine.high %v2954_v50, %v2970_v24  ;;  %v2575_v57 = vcombine.high %v17187_v14, %v2247_v8 }
 0x447   : > { %v3391_v16 = vpack.c.bf16 %v3114_v32, %v3046_v10  ;;  %v2590_v49 = vcombine.low %v2231_v17, %v2263_v33  ;;  %v17323_v11 = vpop.permute.xlu1 %2232  ;;  %v17330_v26 = vrot.slane %v3083_v12, %v16669_v56  ;;  %v17333_v13 = vrot.slane %v3099_v21, %v16669_v56 }
 0x448   : > { %15731 = vmatprep.subr.msk.bf16.mxu1 %vm4606_vm1, %v3390_v40  ;;  %15735 = vmatprep.subr.msk.bf16.mxu0 %vm4606_vm1, %v3394_v43  ;;  %v4614_v63 = vsel %vm4606_vm1, %v3390_v40, 0  ;;  %v4736_v46 = vsel %vm4606_vm1, %v3394_v43, 0  ;;  %v2582_v14 = vrot.slane %v2574_v22, %v16651_v48  ;;  %v2591_v31 = vcombine.high %v2231_v17, %v2263_v33 }
 0x449   : > { %15360 = vmatpush3.bf16.xpose.msra.mxu1 %v4614_v63  ;;  %15376 = vmatpush3.bf16.xpose.msra.mxu0 %v4736_v46  ;;  %v2598_v35 = vrot.slane %v2590_v49, %v16651_v48  ;;  %v2911_v27 = vcombine.high %v17249_v6, %v17268_v39  ;;  %v3048_v50 = vcombine.low %v17315_v15, %v17318_v3 }
 0x44a   : > { %15732 = vmatprep.subr.msk.bf16.mxu1 %vm4606_vm1, %v3391_v16  ;;  %v3116_v24 = vcombine.low %v17330_v26, %v17333_v13  ;;  %v2251_v8 = vpop.permute.xlu0 %2250  ;;  %v21223_v61 = vcombine.low %v17127_v55, %v17130_v19  ;;  %v2589_v17 = vrot.slane %v2575_v57, %v16651_v48  ;;  %v2605_v49 = vrot.slane %v2591_v31, %v16651_v48 }
 0x44b   : > { %v2606_v9 = vcombine.low %v2582_v14, %v2598_v35  ;;  %v2607_v6 = vcombine.high %v2582_v14, %v2598_v35  ;;  %v2249_v39 = vpop.permute.xlu1 %2248  ;;  %v3392_v22 = vpack.c.bf16 %v2979_v34, %v2911_v27  ;;  %v2710_v32 = vcombine.low %v17201_v41, %v2251_v8 }
 0x44c   : > { %v17347_v5 = vpack.c.bf16 %v2188_v1, %v21223_v61  ;;  %v3395_v10 = vpack.c.bf16 %v3116_v24, %v3048_v50  ;;  %v21224_v40 = vcombine.high %v17127_v55, %v17130_v19  ;;  %v2622_v21 = vcombine.low %v2589_v17, %v2605_v49 }
 0x44d   : > { %v2614_v12 = vrot.slane %v2606_v9, %v16669_v56  ;;  %v2621_v1 = vrot.slane %v2607_v6, %v16669_v56  ;;  %v2711_v33 = vcombine.high %v17201_v41, %v2251_v8  ;;  %v4617_v57 = vsel %vm4606_vm1, %v3391_v16, 0 }
 0x44e   : > { %v17355_v43 = vpack.c.bf16 %v2189_v0, %v21224_v40  ;;  %15736 = vmatprep.subr.msk.bf16.mxu0 %vm4606_vm1, %v3395_v10  ;;  %v4739_v34 = vsel %vm4606_vm1, %v3395_v10, 0  ;;  %v2623_v63 = vcombine.high %v2589_v17, %v2605_v49  ;;  %v3047_v46 = vcombine.high %v17274_v7, %v17277_v44  ;;  %v2267_v55 = vpop.permute.xlu0 %2266 }
 0x44f   : > { %v2642_v19 = vcombine.low %v17221_v28, %v2249_v39  ;;  %v2643_v0 = vcombine.high %v17221_v28, %v2249_v39  ;;  %v3115_v14 = vcombine.high %v17284_v60, %v17299_v38  ;;  %v2265_v31 = vpop.permute.xlu1 %2264  ;;  %v2913_v41 = vcombine.high %v17263_v23, %v17271_v51 }
 0x450   : > { %v3118_v35 = vcombine.low %v2614_v12, %v2621_v1  ;;  %v2718_v16 = vrot.slane %v2710_v32, %v16651_v48  ;;  %v2726_v27 = vcombine.low %v17237_v52, %v2267_v55  ;;  %v2727_v50 = vcombine.high %v17237_v52, %v2267_v55 }
 0x451   : > { %15362 = vmatpush3.bf16.xpose.msra.mxu1 %v4617_v57  ;;  %15378 = vmatpush3.bf16.xpose.msra.mxu0 %v4739_v34  ;;  %v2630_v7 = vrot.slane %v2622_v21, %v16669_v56  ;;  %v14851_v44 = vcombine.high %v2614_v12, %v2621_v1  ;;  %v2725_v28 = vrot.slane %v2711_v33, %v16651_v48 }
 0x452   : > { %15733 = vmatprep.subr.msk.bf16.mxu1 %vm4606_vm1, %v3392_v22  ;;  %v2637_v60 = vrot.slane %v2623_v63, %v16669_v56  ;;  %v2734_v38 = vrot.slane %v2726_v27, %v16651_v48  ;;  %v2741_v24 = vrot.slane %v2727_v50, %v16651_v48  ;;  %v2658_v8 = vcombine.low %v17323_v11, %v2265_v31  ;;  %v17381_v61 = vpop.permute.xlu0 %3406 }
 0x453   : > { %v2650_v52 = vrot.slane %v2642_v19, %v16651_v48  ;;  %v2657_v17 = vrot.slane %v2643_v0, %v16651_v48  ;;  %v3393_v49 = vpack.c.bf16 %v3115_v14, %v3047_v46  ;;  %v2659_v9 = vcombine.high %v17323_v11, %v2265_v31  ;;  %v2253_v6 = vpop.permute.xlu1 %2252 }
 0x454   : > { %v17387_v39 = vrot.slane %v3118_v35, %v16651_v48  ;;  %v2742_v10 = vcombine.low %v2718_v16, %v2734_v38  ;;  %v2743_v32 = vcombine.high %v2718_v16, %v2734_v38  ;;  %v2758_v40 = vcombine.low %v2725_v28, %v2741_v24 }
 0x455   : > { %v17390_v12 = vrot.slane %v14851_v44, %v16651_v48  ;;  %v2759_v1 = vcombine.high %v2725_v28, %v2741_v24  ;;  %v2666_v21 = vrot.slane %v2658_v8, %v16651_v48  ;;  %v2673_v33 = vrot.slane %v2659_v9, %v16651_v48 }
 0x456   : > { %v3134_v57 = vcombine.low %v2630_v7, %v2637_v60  ;;  %v2750_v34 = vrot.slane %v2742_v10, %v16669_v56  ;;  %v2757_v11 = vrot.slane %v2743_v32, %v16669_v56  ;;  %v2766_v63 = vrot.slane %v2758_v40, %v16669_v56  ;;  %v3439_v46 = vpop.permute.xlu0 %3438 }
 0x457   : > { %v2773_v55 = vrot.slane %v2759_v1, %v16669_v56  ;;  %v2674_v19 = vcombine.low %v2650_v52, %v2666_v21  ;;  %v2675_v0 = vcombine.high %v2650_v52, %v2666_v21  ;;  %v2690_v14 = vcombine.low %v2657_v17, %v2673_v33  ;;  %v2269_v31 = vpop.permute.xlu1 %2268 }
 0x458   : > { %v14852_v35 = vcombine.high %v2630_v7, %v2637_v60  ;;  %15364 = vmatmul.mubr.msk.bf16.vlgmr.msra.gmra.mrb[0].mxu1 %vm4606_vm1, %v17089_v42  ;;  %15380 = vmatmul.mubr.msk.bf16.vlgmr.msra.gmra.mrb[12].mxu0 %vm4606_vm1, %v17094_v2  ;;  %v4675_v16 = vsel %vm4606_vm1, %v3392_v22, 0  ;;  %v3254_v27 = vcombine.low %v2750_v34, %v2757_v11  ;;  %v2691_v50 = vcombine.high %v2657_v17, %v2673_v33 }
 0x459   : > { %15368 = vmatpush3.bf16.xpose.msra.mxu1 %v4675_v16  ;;  %15371 = vmatprep.mubr.msk.bf16.mxu1 %vm4606_vm1, %v16814_v58  ;;  %v14855_v44 = vcombine.high %v2750_v34, %v2757_v11  ;;  %v3270_v28 = vcombine.low %v2766_v63, %v2773_v55  ;;  %v17406_v38 = vrot.slane %v2674_v19, %v16669_v56  ;;  %v4678_v9 = vsel %vm4606_vm1, %v3393_v49, 0 }
 0x45a   : > { %v17409_v7 = vrot.slane %v3134_v57, %v16651_v48  ;;  %15395 = vmatprep.mubr.msk.bf16.mxu0 %vm4606_vm1, %v17118_v4  ;;  %15734 = vmatprep.subr.msk.bf16.mxu1 %vm4606_vm1, %v3393_v49  ;;  %v14856_v42 = vcombine.high %v2766_v63, %v2773_v55  ;;  %v2689_v2 = vrot.slane %v2675_v0, %v16669_v56  ;;  %v3455_v22 = vpop.permute.xlu0 %3454 }
 0x45b   : > { %v2698_v60 = vrot.slane %v2690_v14, %v16669_v56  ;;  %v2705_v58 = vrot.slane %v2691_v50, %v16669_v56  ;;  %v2778_v24 = vcombine.low %v17255_v30, %v2253_v6  ;;  %v2779_v8 = vcombine.high %v17255_v30, %v2253_v6  ;;  %v17419_v52 = vpop.permute.xlu1 %3408 }
 0x45c   : > { %v17422_v17 = vrot.slane %v14852_v35, %v16651_v48  ;;  %v3186_v4 = vcombine.low %v17406_v38, %v2689_v2  ;;  %v2981_v10 = vcombine.high %v17281_v45, %v17288_v54  ;;  %v17429_v32 = vrot.slane %v3254_v27, %v16651_v48 }
 0x45d   : > { %v17432_v40 = vrot.slane %v14855_v44, %v16651_v48  ;;  %v17435_v30 = vrot.slane %v3270_v28, %v16651_v48  ;;  %v3502_v6 = vcombine.low %v17381_v61, %v3439_v46  ;;  %v17439_v1 = vrot.slane %v14856_v42, %v16651_v48 }
 0x45e   : > { %v14853_v21 = vcombine.high %v17406_v38, %v2689_v2  ;;  %v3503_v49 = vcombine.high %v17381_v61, %v3439_v46  ;;  %v2794_v45 = vcombine.low %v17294_v25, %v2269_v31  ;;  %v17444_v54 = vpop.permute.xlu0 %3410  ;;  %v3202_v33 = vcombine.low %v2698_v60, %v2705_v58 }
 0x45f   : > { %v2786_v57 = vrot.slane %v2778_v24, %v16651_v48  ;;  %v2793_v34 = vrot.slane %v2779_v8, %v16651_v48  ;;  %v2795_v11 = vcombine.high %v17294_v25, %v2269_v31  ;;  %v3423_v63 = vpop.permute.xlu1 %3422  ;;  %v17450_v55 = vrot.slane %v3186_v4, %v16651_v48 }
 0x460   : > { %v14854_v19 = vcombine.high %v2698_v60, %v2705_v58  ;;  %v3396_v61 = vpack.c.bf16 %v2981_v10, %v2913_v41  ;;  %v2802_v46 = vrot.slane %v2794_v45, %v16651_v48  ;;  %v3510_v0 = vrot.slane %v3502_v6, %v16651_v48 }
 0x461   : > { %15370 = vmatpush3.bf16.xpose.msra.mxu1 %v4678_v9  ;;  %v2809_v14 = vrot.slane %v2795_v11, %v16651_v48  ;;  %v3518_v35 = vcombine.low %v3423_v63, %v3455_v22  ;;  %v3519_v16 = vcombine.high %v3423_v63, %v3455_v22  ;;  %v3517_v25 = vrot.slane %v3503_v49, %v16651_v48 }
 0x462   : > { %15737 = vmatprep.subr.msk.bf16.mxu1 %vm4606_vm1, %v3396_v61  ;;  %v2810_v31 = vcombine.low %v2786_v57, %v2802_v46  ;;  %v2811_v27 = vcombine.high %v2786_v57, %v2802_v46  ;;  %v3049_v50 = vcombine.high %v17315_v15, %v17318_v3  ;;  %v17462_v23 = vpop.permute.xlu0 %3426  ;;  %v3117_v44 = vcombine.high %v17330_v26, %v17333_v13 }
 0x463   : > { %v2826_v51 = vcombine.low %v2793_v34, %v2809_v14  ;;  %v2827_v41 = vcombine.high %v2793_v34, %v2809_v14  ;;  %v3526_v28 = vrot.slane %v3518_v35, %v16651_v48  ;;  %v17467_v38 = vpop.permute.xlu1 %3424  ;;  %v3533_v22 = vrot.slane %v3519_v16, %v16651_v48 }
 0x464   : > { %v2818_v42 = vrot.slane %v2810_v31, %v16669_v56  ;;  %v2825_v2 = vrot.slane %v2811_v27, %v16669_v56  ;;  %v3150_v15 = vcombine.low %v17387_v39, %v17390_v12  ;;  %v3166_v4 = vcombine.low %v17409_v7, %v17422_v17 }
 0x465   : > { %v17475_v3 = vrot.slane %v2826_v51, %v16669_v56  ;;  %v17478_v60 = vrot.slane %v2827_v41, %v16669_v56  ;;  %v3534_v26 = vcombine.low %v3510_v0, %v3526_v28  ;;  %v3535_v13 = vcombine.high %v3510_v0, %v3526_v28 }
 0x466   : > { %v3322_v58 = vcombine.low %v2818_v42, %v2825_v2  ;;  %v14857_v24 = vcombine.high %v2818_v42, %v2825_v2  ;;  %v3550_v8 = vcombine.low %v3517_v25, %v3533_v22  ;;  %v3443_v9 = vpop.permute.xlu0 %3442  ;;  %v17483_v10 = vrot.slane %v14853_v21, %v16651_v48 }
 0x467   : > { %v17486_v6 = vrot.slane %v3202_v33, %v16651_v48  ;;  %v17489_v49 = vrot.slane %v14854_v19, %v16651_v48  ;;  %v4797_v45 = vsel %vm4606_vm1, %v3396_v61, 0  ;;  %v3441_v57 = vpop.permute.xlu1 %3440  ;;  %v3338_v34 = vcombine.low %v17475_v3, %v17478_v60 }
 0x468   : > { %15372 = vmatmul.mubr.msk.bf16.vlgmr.msra.gmra.mrb[4].mxu1 %vm4606_vm1, %v17102_v18  ;;  %v3397_v11 = vpack.c.bf16 %v3117_v44, %v3049_v50  ;;  %v3551_v63 = vcombine.high %v3517_v25, %v3533_v22  ;;  %v3158_v21 = vrot.slane %v3150_v15, %v16669_v56  ;;  %v14858_v33 = vcombine.high %v17475_v3, %v17478_v60 }
 0x469   : > { %15384 = vmatpush3.bf16.xpose.msra.mxu1 %v4797_v45  ;;  %15387 = vmatprep.mubr.msk.bf16.mxu1 %vm4606_vm1, %v16856_v20  ;;  %v17502_v19 = vrot.slane %v3534_v26, %v16669_v56  ;;  %v17505_v61 = vrot.slane %v3535_v13, %v16669_v56  ;;  %v17508_v46 = vrot.slane %v3322_v58, %v16651_v48 }
 0x46a   : > { %v17511_v18 = vrot.slane %v14857_v24, %v16651_v48  ;;  %15738 = vmatprep.subr.msk.bf16.mxu1 %vm4606_vm1, %v3397_v11  ;;  %v17515_v0 = vrot.slane %v3550_v8, %v16669_v56  ;;  %v3174_v14 = vrot.slane %v3166_v4, %v16669_v56  ;;  %v3218_v20 = vcombine.low %v17450_v55, %v17483_v10  ;;  %v3459_v31 = vpop.permute.xlu0 %3458 }
 0x46b   : > { %v3234_v35 = vcombine.low %v17486_v6, %v17489_v49  ;;  %v3638_v16 = vcombine.low %v17444_v54, %v3443_v9  ;;  %v3639_v25 = vcombine.high %v17444_v54, %v3443_v9  ;;  %v3457_v27 = vpop.permute.xlu1 %3456  ;;  %v17525_v50 = vrot.slane %v3551_v63, %v16669_v56 }
 0x46c   : > { %v4800_v51 = vsel %vm4606_vm1, %v3397_v11, 0  ;;  %v3570_v41 = vcombine.low %v17419_v52, %v3441_v57  ;;  %v3571_v44 = vcombine.high %v17419_v52, %v3441_v57  ;;  %v3182_v28 = vcombine.low %v3158_v21, %v3174_v14 }
 0x46d   : > { %v3226_v42 = vrot.slane %v3218_v20, %v16669_v56  ;;  %v3242_v2 = vrot.slane %v3234_v35, %v16669_v56  ;;  %v3183_v22 = vcombine.high %v3158_v21, %v3174_v14  ;;  %v3646_v15 = vrot.slane %v3638_v16, %v16651_v48 }
 0x46e   : > { %v3653_v54 = vrot.slane %v3639_v25, %v16651_v48  ;;  %v3654_v3 = vcombine.low %v17462_v23, %v3459_v31  ;;  %v3655_v60 = vcombine.high %v17462_v23, %v3459_v31  ;;  %v3586_v58 = vcombine.low %v17467_v38, %v3457_v27 }
 0x46f   : > { %v3250_v26 = vcombine.low %v3226_v42, %v3242_v2  ;;  %v3251_v13 = vcombine.high %v3226_v42, %v3242_v2  ;;  %v3587_v52 = vcombine.high %v17467_v38, %v3457_v27  ;;  %v17538_v24 = vpop.permute.xlu1 %3412  ;;  %v3578_v8 = vrot.slane %v3570_v41, %v16651_v48 }
 0x470   : > { %v17542_v4 = vrot.slane %v3571_v44, %v16651_v48  ;;  %v3662_v9 = vrot.slane %v3654_v3, %v16651_v48  ;;  %v3669_v45 = vrot.slane %v3655_v60, %v16651_v48  ;;  %v3594_v11 = vrot.slane %v3586_v58, %v16651_v48 }
 0x471   : > { %v3398_v57 = vpack.c.bf16 %v3250_v26, %v3182_v28  ;;  %15386 = vmatpush3.bf16.xpose.msra.mxu1 %v4800_v51  ;;  %v3400_v23 = vpack.c.bf16 %v3251_v13, %v3183_v22  ;;  %v3601_v63 = vrot.slane %v3587_v52, %v16651_v48  ;;  %v3286_v31 = vcombine.low %v17429_v32, %v17432_v40 }
 0x472   : > { %v3670_v21 = vcombine.low %v3646_v15, %v3662_v9  ;;  %v3671_v38 = vcombine.high %v3646_v15, %v3662_v9  ;;  %v3686_v14 = vcombine.low %v3653_v54, %v3669_v45  ;;  %v3687_v20 = vcombine.high %v3653_v54, %v3669_v45 }
 0x473   : > { %15739 = vmatprep.subr.msk.bf16.mxu0 %vm4606_vm1, %v3398_v57  ;;  %v4858_v35 = vsel %vm4606_vm1, %v3398_v57, 0  ;;  %15741 = vmatprep.subr.msk.bf16.mxu1 %vm4606_vm1, %v3400_v23  ;;  %v3602_v16 = vcombine.low %v3578_v8, %v3594_v11  ;;  %v3603_v25 = vcombine.high %v3578_v8, %v3594_v11  ;;  %v17553_v27 = vpop.permute.xlu1 %3428  ;;  %v17556_v51 = vrot.slane %v3338_v34, %v16651_v48 }
 0x474   : > { %v17559_v41 = vrot.slane %v14858_v33, %v16651_v48  ;;  %v4046_v44 = vcombine.low %v17502_v19, %v17505_v61  ;;  %15392 = vmatpush3.bf16.xpose.msra.mxu0 %v4858_v35  ;;  %v3302_v28 = vcombine.low %v17435_v30, %v17439_v1  ;;  %v14859_v42 = vcombine.high %v17502_v19, %v17505_v61 }
 0x475   : > { %v17568_v2 = vrot.slane %v3670_v21, %v16669_v56  ;;  %v17571_v22 = vrot.slane %v3671_v38, %v16669_v56  ;;  %v3618_v34 = vcombine.low %v17542_v4, %v3601_v63  ;;  %v4062_v33 = vcombine.low %v17515_v0, %v17525_v50 }
 0x476   : > { %v14860_v15 = vcombine.high %v17515_v0, %v17525_v50  ;;  %v17579_v54 = vrot.slane %v3686_v14, %v16669_v56  ;;  %v17582_v3 = vrot.slane %v3687_v20, %v16669_v56  ;;  %v17585_v60 = vrot.slane %v3602_v16, %v16669_v56  ;;  %v17617_v14 = vpop.permute.xlu0 %3414 }
 0x477   : > { %v17588_v26 = vrot.slane %v3603_v25, %v16669_v56  ;;  %v3619_v13 = vcombine.high %v17542_v4, %v3601_v63  ;;  %v3294_v58 = vrot.slane %v3286_v31, %v16669_v56  ;;  %v17592_v52 = vpop.permute.xlu1 %3444  ;;  %v3310_v8 = vrot.slane %v3302_v28, %v16669_v56 }
 0x478   : > { %15388 = vmatmul.mubr.msk.bf16.vlgmr.msra.gmra.mrb[8].mxu1 %vm4606_vm1, %v17114_v53  ;;  %v3354_v9 = vcombine.low %v17508_v46, %v17511_v18  ;;  %v3370_v45 = vcombine.low %v17556_v51, %v17559_v41  ;;  %v4919_v57 = vsel %vm4606_vm1, %v3400_v23, 0  ;;  %v4182_v4 = vcombine.low %v17568_v2, %v17571_v22 }
 0x479   : > { %v17605_v11 = vrot.slane %v3618_v34, %v16669_v56  ;;  %15400 = vmatpush3.bf16.xpose.msra.mxu1 %v4919_v57  ;;  %15403 = vmatprep.mubr.msk.bf16.mxu1 %vm4606_vm1, %v17124_v29  ;;  %v3151_v53 = vcombine.high %v17387_v39, %v17390_v12  ;;  %v14863_v63 = vcombine.high %v17568_v2, %v17571_v22 }
 0x47a   : > { %v4198_v21 = vcombine.low %v17579_v54, %v17582_v3  ;;  %v3362_v23 = vrot.slane %v3354_v9, %v16669_v56  ;;  %v3378_v38 = vrot.slane %v3370_v45, %v16669_v56  ;;  %v3167_v29 = vcombine.high %v17409_v7, %v17422_v17 }
 0x47b   : > { %v3165_v20 = vrot.slane %v3151_v53, %v16669_v56  ;;  %v3219_v39 = vcombine.high %v17450_v55, %v17483_v10  ;;  %v3235_v12 = vcombine.high %v17486_v6, %v17489_v49  ;;  %v3461_v35 = vpop.permute.xlu1 %3460  ;;  %v3318_v16 = vcombine.low %v3294_v58, %v3310_v8 }
 0x47c   : > { %v3386_v25 = vcombine.low %v3362_v23, %v3378_v38  ;;  %v3319_v31 = vcombine.high %v3294_v58, %v3310_v8  ;;  %v3387_v28 = vcombine.high %v3362_v23, %v3378_v38  ;;  %v3181_v34 = vrot.slane %v3167_v29, %v16669_v56 }
 0x47d   : > { %v3233_v9 = vrot.slane %v3219_v39, %v16669_v56  ;;  %v3249_v45 = vrot.slane %v3235_v12, %v16669_v56  ;;  %v3287_v7 = vcombine.high %v17429_v32, %v17432_v40  ;;  %v14864_v17 = vcombine.high %v17579_v54, %v17582_v3  ;;  %v3447_v40 = vpop.permute.xlu0 %3446 }
 0x47e   : > { %v17634_v55 = vrot.slane %v3619_v13, %v16669_v56  ;;  %v3399_v10 = vpack.c.bf16 %v3386_v25, %v3318_v16  ;;  %v3401_v6 = vpack.c.bf16 %v3387_v28, %v3319_v31  ;;  %v3184_v49 = vcombine.low %v3165_v20, %v3181_v34 }
 0x47f   : > { %v3252_v58 = vcombine.low %v3233_v9, %v3249_v45  ;;  %v3301_v8 = vrot.slane %v3287_v7, %v16669_v56  ;;  %v3303_v57 = vcombine.high %v17435_v30, %v17439_v1  ;;  %v17639_v53 = vpop.permute.xlu1 %3416  ;;  %v3355_v23 = vcombine.high %v17508_v46, %v17511_v18 }
 0x480   : > { %15740 = vmatprep.subr.msk.bf16.mxu0 %vm4606_vm1, %v3399_v10  ;;  %v4861_v32 = vsel %vm4606_vm1, %v3399_v10, 0  ;;  %15742 = vmatprep.subr.msk.bf16.mxu1 %vm4606_vm1, %v3401_v6  ;;  %v4922_v13 = vsel %vm4606_vm1, %v3401_v6, 0  ;;  %v3371_v38 = vcombine.high %v17556_v51, %v17559_v41  ;;  %v3185_v1 = vcombine.high %v3165_v20, %v3181_v34 }
 0x481   : > { %15394 = vmatpush3.bf16.xpose.msra.mxu0 %v4861_v32  ;;  %v3402_v29 = vpack.c.bf16 %v3252_v58, %v3184_v49  ;;  %15402 = vmatpush3.bf16.xpose.msra.mxu1 %v4922_v13  ;;  %v3317_v30 = vrot.slane %v3303_v57, %v16669_v56  ;;  %v3369_v39 = vrot.slane %v3355_v23, %v16669_v56 }
 0x482   : > { %v3385_v12 = vrot.slane %v3371_v38, %v16669_v56  ;;  %v3253_v16 = vcombine.high %v3233_v9, %v3249_v45  ;;  %v3706_v25 = vcombine.low %v17538_v24, %v17592_v52  ;;  %v4114_v46 = vcombine.low %v17585_v60, %v17588_v26  ;;  %v3463_v38 = vpop.permute.xlu0 %3462 }
 0x483   : > { %v14861_v18 = vcombine.high %v17585_v60, %v17588_v26  ;;  %15743 = vmatprep.subr.msk.bf16.mxu0 %vm4606_vm1, %v3402_v29  ;;  %v3774_v51 = vcombine.low %v17617_v14, %v3447_v40  ;;  %v3722_v41 = vcombine.low %v17553_v27, %v3461_v35  ;;  %v17661_v20 = vpop.permute.xlu1 %3430  ;;  %v4130_v31 = vcombine.low %v17605_v11, %v17634_v55 }
 0x484   : > { %v3388_v28 = vcombine.low %v3369_v39, %v3385_v12  ;;  %v3404_v34 = vpack.c.bf16 %v3253_v16, %v3185_v1  ;;  %v3723_v9 = vcombine.high %v17553_v27, %v3461_v35  ;;  %v14862_v45 = vcombine.high %v17605_v11, %v17634_v55 }
 0x485   : > { %v3707_v60 = vcombine.high %v17538_v24, %v17592_v52  ;;  %v3730_v26 = vrot.slane %v3722_v41, %v16651_v48  ;;  %v3389_v7 = vcombine.high %v3369_v39, %v3385_v12  ;;  %v3775_v10 = vcombine.high %v17617_v14, %v3447_v40 }
 0x486   : > { %v3320_v6 = vcombine.low %v3301_v8, %v3317_v30  ;;  %15745 = vmatprep.subr.msk.bf16.mxu1 %vm4606_vm1, %v3404_v34  ;;  %v3714_v49 = vrot.slane %v3706_v25, %v16651_v48  ;;  %v4053_v27 = vrot.slane %v4046_v44, %v16651_v48  ;;  %v17679_v11 = vrot.slane %v3774_v51, %v16651_v48 }
 0x487   : > { %v3737_v24 = vrot.slane %v3723_v9, %v16651_v48  ;;  %v3321_v52 = vcombine.high %v3301_v8, %v3317_v30  ;;  %v4061_v14 = vrot.slane %v14859_v42, %v16651_v48  ;;  %v17686_v35 = vpop.permute.xlu1 %3420  ;;  %v4980_v55 = vsel %vm4606_vm1, %v3402_v29, 0 }
 0x488   : > { %15396 = vmatmul.mubr.msk.bf16.vlgmr.msra.gmra.mrb[16].mxu0 %vm4606_vm1, %v17132_v36  ;;  %v3403_v58 = vpack.c.bf16 %v3388_v28, %v3320_v6  ;;  %v3738_v44 = vcombine.low %v3714_v49, %v3730_v26  ;;  %15404 = vmatmul.mubr.msk.bf16.vlgmr.msra.gmra.mrb[12].mxu1 %vm4606_vm1, %v17134_v59  ;;  %v4069_v8 = vrot.slane %v4062_v33, %v16651_v48  ;;  %v5041_v36 = vsel %vm4606_vm1, %v3404_v34, 0 }
 0x489   : > { %15408 = vmatpush3.bf16.xpose.msra.mxu0 %v4980_v55  ;;  %15411 = vmatprep.mubr.msk.bf16.mxu0 %vm4606_vm1, %v17149_v62  ;;  %v3721_v19 = vrot.slane %v3707_v60, %v16651_v48  ;;  %v3405_v61 = vpack.c.bf16 %v3389_v7, %v3321_v52  ;;  %v4077_v42 = vrot.slane %v14860_v15, %v16651_v48 }
 0x48a   : > { %v3789_v59 = vrot.slane %v3775_v10, %v16651_v48  ;;  %15744 = vmatprep.subr.msk.bf16.mxu0 %vm4606_vm1, %v3403_v58  ;;  %v3739_v57 = vcombine.high %v3714_v49, %v3730_v26  ;;  %15416 = vmatpush3.bf16.xpose.msra.mxu1 %v5041_v36  ;;  %v4078_v33 = vcombine.low %v4053_v27, %v4061_v14  ;;  %v4983_v50 = vsel %vm4606_vm1, %v3403_v58, 0 }
 0x48b   : > { %v3754_v32 = vcombine.low %v3721_v19, %v3737_v24  ;;  %v3755_v40 = vcombine.high %v3721_v19, %v3737_v24  ;;  %15419 = vmatprep.mubr.msk.bf16.mxu1 %vm4606_vm1, %v17151_v37  ;;  %15746 = vmatprep.subr.msk.bf16.mxu1 %vm4606_vm1, %v3405_v61  ;;  %v4094_v62 = vcombine.low %v4069_v8, %v4077_v42  ;;  %v17710_v13 = vpop.permute.xlu1 %3436  ;;  %v5044_v25 = vsel %vm4606_vm1, %v3405_v61, 0 }
 0x48c   : > { %v17713_v0 = vrot.slane %v3738_v44, %v16669_v56  ;;  %v17717_v15 = vrot.slane %v4078_v33, %v16669_v56  ;;  %v4121_v23 = vrot.slane %v4114_v46, %v16651_v48  ;;  %v4129_v37 = vrot.slane %v14861_v18, %v16651_v48 }
 0x48d   : > { %v17721_v29 = vrot.slane %v4094_v62, %v16669_v56  ;;  %v4137_v30 = vrot.slane %v4130_v31, %v16651_v48  ;;  %v4145_v1 = vrot.slane %v14862_v45, %v16651_v48  ;;  %v3753_v39 = vrot.slane %v3739_v57, %v16669_v56 }
 0x48e   : > { %v3790_v12 = vcombine.low %v17661_v20, %v3463_v38  ;;  %v3791_v16 = vcombine.high %v17661_v20, %v3463_v38  ;;  %v3762_v46 = vrot.slane %v3754_v32, %v16669_v56  ;;  %v4146_v51 = vcombine.low %v4121_v23, %v4129_v37 }
 0x48f   : > { %v4162_v41 = vcombine.low %v4137_v30, %v4145_v1  ;;  %v4079_v28 = vcombine.high %v4053_v27, %v4061_v14  ;;  %v17731_v34 = vpop.permute.xlu1 %3452  ;;  %v3769_v18 = vrot.slane %v3755_v40, %v16669_v56  ;;  %v4110_v31 = vcombine.low %v17717_v15, %v17721_v29 }
 0x490   : > { %v3798_v9 = vrot.slane %v3790_v12, %v16651_v48  ;;  %v3805_v45 = vrot.slane %v3791_v16, %v16651_v48  ;;  %v17739_v20 = vrot.slane %v4146_v51, %v16669_v56  ;;  %v4095_v7 = vcombine.high %v4069_v8, %v4077_v42 }
 0x491   : > { %15410 = vmatpush3.bf16.xpose.msra.mxu0 %v4983_v50  ;;  %v17742_v60 = vrot.slane %v4162_v41, %v16669_v56  ;;  %v17745_v26 = vrot.slane %v4079_v28, %v16669_v56  ;;  %v4147_v14 = vcombine.high %v4121_v23, %v4129_v37  ;;  %v4163_v55 = vcombine.high %v4137_v30, %v4145_v1 }
 0x492   : > { %v3806_v10 = vcombine.low %v17679_v11, %v3798_v9  ;;  %v3807_v6 = vcombine.high %v17679_v11, %v3798_v9  ;;  %v3822_v49 = vcombine.low %v3789_v59, %v3805_v45  ;;  %v3823_v27 = vcombine.high %v3789_v59, %v3805_v45  ;;  %15418 = vmatpush3.bf16.xpose.msra.mxu1 %v5044_v25 }
 0x493   : > { %v4178_v24 = vcombine.low %v17739_v20, %v17742_v60  ;;  %v17752_v52 = vrot.slane %v4095_v7, %v16669_v56  ;;  %v17754_v58 = vpop.permute.xlu1 %3432  ;;  %v4250_v44 = vcombine.low %v17713_v0, %v3753_v39  ;;  %v17770_v42 = vrot.slane %v4147_v14, %v16669_v56 }
 0x494   : > { %v17758_v8 = vrot.slane %v3806_v10, %v16669_v56  ;;  %v17761_v11 = vrot.slane %v3807_v6, %v16669_v56  ;;  %v17764_v19 = vrot.slane %v3822_v49, %v16669_v56  ;;  %v17767_v61 = vrot.slane %v3823_v27, %v16669_v56 }
 0x495   : > { %v4590_v36 = vpack.c.bf16 %v4178_v24, %v4110_v31  ;;  %v17773_v59 = vrot.slane %v4163_v55, %v16669_v56  ;;  %v14865_v57 = vcombine.high %v17713_v0, %v3753_v39  ;;  %v4266_v33 = vcombine.low %v3762_v46, %v3769_v18 }
 0x496   : > { %v14866_v32 = vcombine.high %v3762_v46, %v3769_v18  ;;  %v4112_v40 = vcombine.low %v17745_v26, %v17752_v52  ;;  %v4318_v62 = vcombine.low %v17758_v8, %v17761_v11  ;;  %v14867_v50 = vcombine.high %v17758_v8, %v17761_v11 }
 0x497   : > { %15423 = vmatprep.subr.bf16.mxu0 %v4590_v36  ;;  %v4180_v23 = vcombine.low %v17770_v42, %v17773_v59  ;;  %v4189_v0 = vrot.slane %v4182_v4, %v16651_v48  ;;  %v3449_v38 = vpop.permute.xlu1 %3448  ;;  %v4197_v37 = vrot.slane %v14863_v63, %v16651_v48  ;;  %v4205_v30 = vrot.slane %v4198_v21, %v16651_v48 }
 0x498   : > { %15412 = vmatmul.mubr.msk.bf16.vlgmr.msra.gmra.mrb[20].mxu0 %vm4606_vm1, %v17347_v5  ;;  %v4213_v1 = vrot.slane %v14864_v17, %v16651_v48  ;;  %v4257_v4 = vrot.slane %v4250_v44, %v16651_v48  ;;  %v4334_v5 = vcombine.low %v17764_v19, %v17767_v61  ;;  %v14868_v39 = vcombine.high %v17764_v19, %v17767_v61 }
 0x499   : > { %15424 = vmatpush3.bf16.msra.mxu0 %v4590_v36  ;;  %v4594_v2 = vpack.c.bf16 %v4180_v23, %v4112_v40  ;;  %15420 = vmatmul.mubr.msk.bf16.vlgmr.msra.gmra.mrb[16].mxu1 %vm4606_vm1, %v17355_v43  ;;  %v4214_v22 = vcombine.low %v4189_v0, %v4197_v37  ;;  %v4265_v21 = vrot.slane %v14865_v57, %v16651_v48 }
 0x49a   : > { %v4230_v63 = vcombine.low %v4205_v30, %v4213_v1  ;;  %v4273_v54 = vrot.slane %v4266_v33, %v16651_v48  ;;  %v4281_v3 = vrot.slane %v14866_v32, %v16651_v48  ;;  %v4215_v17 = vcombine.high %v4189_v0, %v4197_v37 }
 0x49b   : > { %15439 = vmatprep.subr.bf16.mxu1 %v4594_v2  ;;  %v4231_v12 = vcombine.high %v4205_v30, %v4213_v1  ;;  %v4111_v16 = vcombine.high %v17717_v15, %v17721_v29  ;;  %v4222_v25 = vrot.slane %v4214_v22, %v16669_v56  ;;  %v4282_v43 = vcombine.low %v4257_v4, %v4265_v21  ;;  %v3465_v9 = vpop.permute.xlu1 %3464 }
 0x49c   : > { %15440 = vmatpush3.bf16.msra.mxu1 %v4594_v2  ;;  %v4238_v46 = vrot.slane %v4230_v63, %v16669_v56  ;;  %v4283_v51 = vcombine.high %v4257_v4, %v4265_v21  ;;  %v4298_v41 = vcombine.low %v4273_v54, %v4281_v3  ;;  %v17817_v28 = vrot.slane %v4215_v17, %v16669_v56 }
 0x49d   : > { %v17820_v18 = vrot.slane %v4231_v12, %v16669_v56  ;;  %v4299_v31 = vcombine.high %v4273_v54, %v4281_v3  ;;  %v4290_v7 = vrot.slane %v4282_v43, %v16669_v56  ;;  %v4179_v29 = vcombine.high %v17739_v20, %v17742_v60 }
 0x49e   : > { %v4246_v45 = vcombine.low %v4222_v25, %v4238_v46  ;;  %v4297_v15 = vrot.slane %v4283_v51, %v16669_v56  ;;  %v4306_v10 = vrot.slane %v4298_v41, %v16669_v56  ;;  %v3842_v27 = vcombine.low %v17639_v53, %v3449_v38 }
 0x49f   : > { %v4248_v6 = vcombine.low %v17817_v28, %v17820_v18  ;;  %v4313_v49 = vrot.slane %v4299_v31, %v16669_v56  ;;  %v17831_v24 = vpack.c.bf16 %v4179_v29, %v4111_v16  ;;  %v3843_v14 = vcombine.high %v17639_v53, %v3449_v38 }
 0x4a0   : > { %v3858_v55 = vcombine.low %v17754_v58, %v3465_v9  ;;  %v3859_v44 = vcombine.high %v17754_v58, %v3465_v9  ;;  %v4314_v8 = vcombine.low %v4290_v7, %v4306_v10  ;;  %v3850_v20 = vrot.slane %v3842_v27, %v16651_v48 }
 0x4a1   : > { %v4316_v11 = vcombine.low %v4297_v15, %v4313_v49  ;;  %v4325_v60 = vrot.slane %v4318_v62, %v16651_v48  ;;  %v3857_v19 = vrot.slane %v3843_v14, %v16651_v48  ;;  %v4333_v57 = vrot.slane %v14867_v50, %v16651_v48 }
 0x4a2   : > { %v3866_v36 = vrot.slane %v3858_v55, %v16651_v48  ;;  %v3873_v61 = vrot.slane %v3859_v44, %v16651_v48  ;;  %v4591_v33 = vpack.c.bf16 %v4314_v8, %v4246_v45  ;;  %v4341_v32 = vrot.slane %v4334_v5, %v16651_v48 }
 0x4a3   : > { %v4595_v53 = vpack.c.bf16 %v4316_v11, %v4248_v6  ;;  %v4349_v58 = vrot.slane %v14868_v39, %v16651_v48  ;;  %v4350_v62 = vcombine.low %v4325_v60, %v4333_v57  ;;  %v4247_v30 = vcombine.high %v4222_v25, %v4238_v46 }
 0x4a4   : > { %v3874_v40 = vcombine.low %v3850_v20, %v3866_v36  ;;  %v3875_v23 = vcombine.high %v3850_v20, %v3866_v36  ;;  %v3890_v0 = vcombine.low %v3857_v19, %v3873_v61  ;;  %v3891_v38 = vcombine.high %v3857_v19, %v3873_v61  ;;  %15425 = vmatprep.subr.bf16.mxu0 %v4591_v33 }
 0x4a5   : > { %15441 = vmatprep.subr.bf16.mxu1 %v4595_v53  ;;  %v4366_v37 = vcombine.low %v4341_v32, %v4349_v58  ;;  %15426 = vmatpush3.bf16.msra.mxu0 %v4591_v33  ;;  %v4358_v39 = vrot.slane %v4350_v62, %v16669_v56  ;;  %v4315_v22 = vcombine.high %v4290_v7, %v4306_v10 }
 0x4a6   : > { %15442 = vmatpush3.bf16.msra.mxu1 %v4595_v53  ;;  %v3882_v1 = vrot.slane %v3874_v40, %v16669_v56  ;;  %v3889_v50 = vrot.slane %v3875_v23, %v16669_v56  ;;  %v3898_v4 = vrot.slane %v3890_v0, %v16669_v56  ;;  %15431 = vmatprep.subr.bf16.mxu0 %v17831_v24 }
 0x4a7   : > { %v3905_v5 = vrot.slane %v3891_v38, %v16669_v56  ;;  %v4374_v2 = vrot.slane %v4366_v37, %v16669_v56  ;;  %v4113_v54 = vcombine.high %v17745_v26, %v17752_v52  ;;  %v4181_v3 = vcombine.high %v17770_v42, %v17773_v59 }
 0x4a8   : > { %v4386_v63 = vcombine.low %v3882_v1, %v3889_v50  ;;  %v14869_v21 = vcombine.high %v3882_v1, %v3889_v50  ;;  %v17855_v16 = vpack.c.bf16 %v4315_v22, %v4247_v30  ;;  %v4249_v51 = vcombine.high %v17817_v28, %v17820_v18 }
 0x4a9   : > { %v4402_v17 = vcombine.low %v3898_v4, %v3905_v5  ;;  %v14870_v12 = vcombine.high %v3898_v4, %v3905_v5  ;;  %v17859_v43 = vpack.c.bf16 %v4181_v3, %v4113_v54  ;;  %v4317_v52 = vcombine.high %v4297_v15, %v4313_v49 }
 0x4aa   : > { %v4393_v25 = vrot.slane %v4386_v63, %v16651_v48  ;;  %v4401_v46 = vrot.slane %v14869_v21, %v16651_v48  ;;  %v4383_v31 = vcombine.high %v4358_v39, %v4374_v2  ;;  %v4351_v59 = vcombine.high %v4325_v60, %v4333_v57 }
 0x4ab   : > { %v4409_v41 = vrot.slane %v4402_v17, %v16651_v48  ;;  %v4417_v26 = vrot.slane %v14870_v12, %v16651_v48  ;;  %v4367_v9 = vcombine.high %v4341_v32, %v4349_v58  ;;  %v17865_v29 = vpack.c.bf16 %v4317_v52, %v4249_v51 }
 0x4ac   : > { %v4418_v42 = vcombine.low %v4393_v25, %v4401_v46  ;;  %v4419_v45 = vcombine.high %v4393_v25, %v4401_v46  ;;  %v4365_v27 = vrot.slane %v4351_v59, %v16669_v56  ;;  %v4382_v49 = vcombine.low %v4358_v39, %v4374_v2 }
 0x4ad   : > { %v4434_v7 = vcombine.low %v4409_v41, %v4417_v26  ;;  %v4435_v10 = vcombine.high %v4409_v41, %v4417_v26  ;;  %v4381_v28 = vrot.slane %v4367_v9, %v16669_v56 }
 0x4ae   : > { %v4426_v6 = vrot.slane %v4418_v42, %v16669_v56  ;;  %v4433_v18 = vrot.slane %v4419_v45, %v16669_v56 }
 0x4af   : > { %v4442_v14 = vrot.slane %v4434_v7, %v16669_v56  ;;  %v4449_v15 = vrot.slane %v4435_v10, %v16669_v56  ;;  %v4384_v55 = vcombine.low %v4365_v27, %v4381_v28  ;;  %v4385_v44 = vcombine.high %v4365_v27, %v4381_v28 }
 0x4b1   : > { %v4450_v8 = vcombine.low %v4426_v6, %v4442_v14  ;;  %v4451_v11 = vcombine.high %v4426_v6, %v4442_v14  ;;  %v4452_v20 = vcombine.low %v4433_v18, %v4449_v15  ;;  %v4453_v60 = vcombine.high %v4433_v18, %v4449_v15 }
 0x4b3   : > { %v17873_v19 = vpack.c.bf16 %v4450_v8, %v4382_v49  ;;  %v17875_v36 = vpack.c.bf16 %v4451_v11, %v4383_v31  ;;  %v17877_v61 = vpack.c.bf16 %v4452_v20, %v4384_v55  ;;  %v17879_v57 = vpack.c.bf16 %v4453_v60, %v4385_v44 }
 0x4b5   : > { %21225 = vst [vmem:[#allocation4_spill] sm:$0xff] %v17877_v61  ;;  %21226 = vst [vmem:[#allocation5_spill] sm:$0xff] %v17879_v57  ;;  %15455 = vmatprep.subr.bf16.mxu1 %v17873_v19 }
 0x52b   : > { %v17882_v33 = vpop.f32.mrb[0].mxu1  ;;  %v17884_v53 = vpop.f32.mrb[12].mxu0 }
 0x52c   : > { %v17886_v32 = vpop.f32.mrb[1].mxu1  ;;  %v17888_v58 = vpop.f32.mrb[13].mxu0  ;;  %v5101_v40 = vsel %vm764_vm0, %v17882_v33, -inf  ;;  %v5125_v30 = vsel %vm764_vm0, %v17884_v53, -inf }
 0x52d   : > { %v17892_v23 = vpop.f32.mrb[14].mxu0  ;;  %5102 = vmax.xlane.f32.xlu0 %v5101_v40  ;;  %v17894_v0 = vpop.f32.mrb[2].mxu1  ;;  %v5095_v50 = vsel %vm764_vm0, %v17886_v32, -inf  ;;  %v5119_v5 = vsel %vm764_vm0, %v17888_v58, -inf }
 0x52e   : > { %v17896_v38 = vpop.f32.mrb[3].mxu1  ;;  %v17898_v62 = vpop.f32.mrb[15].mxu0  ;;  %v5128_v37 = vsel %vm764_vm0, %v17892_v23, -inf  ;;  %v5104_v22 = vsel %vm764_vm0, %v17894_v0, -inf }
 0x52f   : > { %5129 = vmax.xlane.f32.xlu1 %v5128_v37  ;;  %v5098_v1 = vsel %vm764_vm0, %v17896_v38, -inf  ;;  %v5122_v4 = vsel %vm764_vm0, %v17898_v62, -inf }
 0x531   : > { %5126 = vmax.xlane.f32.xlu0 %v5125_v30 }
 0x533   : > { %5099 = vmax.xlane.f32.xlu1 %v5098_v1 }
 0x535   : > { %5096 = vmax.xlane.f32.xlu0 %v5095_v50 }
 0x537   : > { %5123 = vmax.xlane.f32.xlu1 %v5122_v4 }
 0x539   : > { %5120 = vmax.xlane.f32.xlu0 %v5119_v5 }
 0x53b   : > { %v17912_v39 = vpop.f32.mrb[4].mxu1 }
 0x53c   : > { %v17914_v2 = vpop.f32.mrb[5].mxu1  ;;  %v5113_v3 = vsel %vm764_vm0, %v17912_v39, -inf }
 0x53d   : > { %5105 = vmax.xlane.f32.xlu0 %v5104_v22  ;;  %v17918_v63 = vpop.f32.mrb[6].mxu1  ;;  %v5107_v10 = vsel %vm764_vm0, %v17914_v2, -inf }
 0x53e   : > { %v17920_v21 = vpop.f32.mrb[7].mxu1  ;;  %v5116_v54 = vsel %vm764_vm0, %v17918_v63, -inf }
 0x53f   : > { %5117 = vmax.xlane.f32.xlu1 %v5116_v54  ;;  %v5110_v6 = vsel %vm764_vm0, %v17920_v21, -inf }
 0x541   : > { %5114 = vmax.xlane.f32.xlu0 %v5113_v3 }
 0x54b   : > { %v17926_v17 = vpop.f32.mrb[8].mxu1 }
 0x54c   : > { %v17928_v12 = vpop.f32.mrb[9].mxu1  ;;  %v5137_v18 = vsel %vm764_vm0, %v17926_v17, -inf }
 0x54d   : > { %v17930_v25 = vpop.f32.mrb[10].mxu1  ;;  %v5131_v30 = vsel %vm764_vm0, %v17928_v12, -inf }
 0x54e   : > { %v17932_v46 = vpop.f32.mrb[11].mxu1  ;;  %v5140_v14 = vsel %vm764_vm0, %v17930_v25, -inf }
 0x54f   : > { %v5134_v1 = vsel %vm764_vm0, %v17932_v46, -inf }
 0x55b   : > { %v17934_v51 = vpop.f32.mrb[16].mxu0  ;;  %v17936_v41 = vpop.f32.mrb[12].mxu1 }
 0x55c   : > { %v17938_v26 = vpop.f32.mrb[17].mxu0  ;;  %v5149_v52 = vsel %vm764_vm0, %v17934_v51, -inf  ;;  %v17942_v31 = vpop.f32.mrb[13].mxu1  ;;  %v5161_v5 = vsel %vm764_vm0, %v17936_v41, -inf }
 0x55d   : > { %5150 = vmax.xlane.f32.xlu0 %v5149_v52  ;;  %v17944_v42 = vpop.f32.mrb[18].mxu0  ;;  %v17946_v59 = vpop.f32.mrb[14].mxu1  ;;  %v5143_v27 = vsel %vm764_vm0, %v17938_v26, -inf  ;;  %v5155_v54 = vsel %vm764_vm0, %v17942_v31, -inf }
 0x55e   : > { %v17948_v9 = vpop.f32.mrb[19].mxu0  ;;  %v5152_v45 = vsel %vm764_vm0, %v17944_v42, -inf  ;;  %v17952_v7 = vpop.f32.mrb[15].mxu1  ;;  %v5164_v22 = vsel %vm764_vm0, %v17946_v59, -inf }
 0x55f   : > { %5153 = vmax.xlane.f32.xlu1 %v5152_v45  ;;  %v5146_v28 = vsel %vm764_vm0, %v17948_v9, -inf  ;;  %v5158_v3 = vsel %vm764_vm0, %v17952_v7, -inf }
 0x561   : > { %5108 = vmax.xlane.f32.xlu0 %v5107_v10 }
 0x563   : > { %5111 = vmax.xlane.f32.xlu1 %v5110_v6 }
 0x565   : > { %5144 = vmax.xlane.f32.xlu0 %v5143_v27  ;;  %v18010_v27 = vpop.permute.xlu0 %3418 }
 0x567   : > { %5147 = vmax.xlane.f32.xlu1 %v5146_v28 }
 0x569   : > { %5138 = vmax.xlane.f32.xlu0 %v5137_v18  ;;  %v18012_v28 = vpop.permute.xlu0 %3434 }
 0x56b   : > { %5141 = vmax.xlane.f32.xlu1 %v5140_v14  ;;  %v17966_v15 = vpop.f32.mrb[20].mxu0 }
 0x56c   : > { %v17968_v49 = vpop.f32.mrb[21].mxu0  ;;  %v5173_v55 = vsel %vm764_vm0, %v17966_v15, -inf  ;;  %v17972_v44 = vpop.f32.mrb[16].mxu1 }
 0x56d   : > { %5174 = vmax.xlane.f32.xlu0 %v5173_v55  ;;  %v17974_v8 = vpop.f32.mrb[22].mxu0  ;;  %v17976_v11 = vpop.f32.mrb[17].mxu1  ;;  %v5167_v50 = vsel %vm764_vm0, %v17968_v49, -inf  ;;  %v5185_v52 = vsel %vm764_vm0, %v17972_v44, -inf }
 0x56e   : > { %v17978_v20 = vpop.f32.mrb[23].mxu0  ;;  %v5176_v60 = vsel %vm764_vm0, %v17974_v8, -inf  ;;  %v17982_v40 = vpop.f32.mrb[18].mxu1  ;;  %v5179_v10 = vsel %vm764_vm0, %v17976_v11, -inf }
 0x56f   : > { %5177 = vmax.xlane.f32.xlu1 %v5176_v60  ;;  %v17984_v37 = vpop.f32.mrb[19].mxu1  ;;  %v5170_v4 = vsel %vm764_vm0, %v17978_v20, -inf  ;;  %v5188_v45 = vsel %vm764_vm0, %v17982_v40, -inf  ;;  %v18014_v18 = vpop.permute.xlu0 %3450 }
 0x570   : > { %v5182_v6 = vsel %vm764_vm0, %v17984_v37, -inf }
 0x571   : > { %5132 = vmax.xlane.f32.xlu0 %v5131_v30 }
 0x573   : > { %5135 = vmax.xlane.f32.xlu1 %v5134_v1 }
 0x575   : > { %5168 = vmax.xlane.f32.xlu0 %v5167_v50 }
 0x577   : > { %5171 = vmax.xlane.f32.xlu1 %v5170_v4 }
 0x579   : > { %5162 = vmax.xlane.f32.xlu0 %v5161_v5 }
 0x57b   : > { %5165 = vmax.xlane.f32.xlu1 %v5164_v22 }
 0x57d   : > { %5156 = vmax.xlane.f32.xlu0 %v5155_v54 }
 0x57f   : > { %5159 = vmax.xlane.f32.xlu1 %v5158_v3 }
 0x581   : > { %5186 = vmax.xlane.f32.xlu0 %v5185_v52 }
 0x583   : > { %5189 = vmax.xlane.f32.xlu1 %v5188_v45 }
 0x585   : > { %5180 = vmax.xlane.f32.xlu0 %v5179_v10 }
 0x587   : > { %5183 = vmax.xlane.f32.xlu1 %v5182_v6 }
 0x5ba   : > { %v5103_v14 = vpop.xlane.xlu0 %5102 }
 0x5bb   : > { %v5193_v55 = vsub.f32 %v17882_v33, %v5103_v14 }
 0x5bc   : > { %v5130_v4 = vpop.xlane.xlu1 %5129 }
 0x5bd   : > { %v5227_v60 = vmul.f32 1.442695, %v5193_v55  ;;  %v5202_v33 = vsub.f32 %v17892_v23, %v5130_v4 }
 0x5be   : > { %v5127_v30 = vpop.xlane.xlu0 %5126 }
 0x5bf   : > { %15955 = vpow2.f32 %v5227_v60  ;;  %v5201_v1 = vsub.f32 %v17884_v53, %v5127_v30  ;;  %v5245_v60 = vmul.f32 1.442695, %v5202_v33 }
 0x5c0   : > { %v5100_v45 = vpop.xlane.xlu1 %5099 }
 0x5c1   : > { %v5243_v50 = vmul.f32 1.442695, %v5201_v1  ;;  %v5192_v30 = vsub.f32 %v17896_v38, %v5100_v45 }
 0x5c2   : > { %v5097_v5 = vpop.xlane.xlu0 %5096 }
 0x5c3   : > { %15957 = vpow2.f32 %v5243_v50  ;;  %v5191_v22 = vsub.f32 %v17886_v32, %v5097_v5 }
 0x5c4   : > { %v5124_v1 = vpop.xlane.xlu1 %5123 }
 0x5c5   : > { %v5223_v54 = vmul.f32 1.442695, %v5191_v22  ;;  %v5200_v22 = vsub.f32 %v17898_v62, %v5124_v1 }
 0x5c6   : > { %v5121_v3 = vpop.xlane.xlu0 %5120 }
 0x5c7   : > { %15959 = vpow2.f32 %v5223_v54  ;;  %v5199_v52 = vsub.f32 %v17888_v58, %v5121_v3 }
 0x5c9   : > { %v18020_v10 = vpop.eup %15955  ;;  %v5239_v6 = vmul.f32 1.442695, %v5199_v52  ;;  %v5241_v52 = vmul.f32 1.442695, %v5200_v22 }
 0x5ca   : > { %v5106_v14 = vpop.xlane.xlu0 %5105  ;;  %v5293_v53 = vsel %vm764_vm0, %v18020_v10, 0.0 }
 0x5cb   : > { %15961 = vpow2.f32 %v5239_v6  ;;  %v5194_v55 = vsub.f32 %v17894_v0, %v5106_v14  ;;  %5294 = vadd.xlane.f32.xlu0 %v5293_v53  ;;  %v5225_v0 = vmul.f32 1.442695, %v5192_v30 }
 0x5cc   : > { %v5118_v1 = vpop.xlane.xlu1 %5117 }
 0x5cd   : > { %v18026_v32 = vpop.eup %15957  ;;  %v5229_v58 = vmul.f32 1.442695, %v5194_v55 }
 0x5ce   : > { %v5115_v50 = vpop.xlane.xlu0 %5114  ;;  %v5317_v23 = vsel %vm764_vm0, %v18026_v32, 0.0 }
 0x5cf   : > { %15963 = vpow2.f32 %v5229_v58  ;;  %v5197_v4 = vsub.f32 %v17912_v39, %v5115_v50  ;;  %5318 = vadd.xlane.f32.xlu0 %v5317_v23 }
 0x5d0   : > { %15965 = vpow2.f32 %v5245_v60 }
 0x5d1   : > { %v18032_v5 = vpop.eup %15959  ;;  %v5235_v54 = vmul.f32 1.442695, %v5197_v4 }
 0x5d2   : > { %v5287_v38 = vsel %vm764_vm0, %v18032_v5, 0.0 }
 0x5d3   : > { %15967 = vpow2.f32 %v5235_v54  ;;  %5288 = vadd.xlane.f32.xlu0 %v5287_v38 }
 0x5d4   : > { %15969 = vpow2.f32 %v5225_v0 }
 0x5d5   : > { %v18037_v3 = vpop.eup %15961  ;;  %15971 = vpow2.f32 %v5241_v52 }
 0x5d6   : > { %v5311_v39 = vsel %vm764_vm0, %v18037_v3, 0.0 }
 0x5d7   : > { %5312 = vadd.xlane.f32.xlu0 %v5311_v39  ;;  %v5198_v39 = vsub.f32 %v17918_v63, %v5118_v1 }
 0x5d9   : > { %v18041_v45 = vpop.eup %15963 }
 0x5da   : > { %v5296_v62 = vsel %vm764_vm0, %v18041_v45, 0.0  ;;  %v18045_v33 = vpop.eup %15965 }
 0x5db   : > { %5297 = vadd.xlane.f32.xlu1 %v5296_v62  ;;  %v5320_v14 = vsel %vm764_vm0, %v18045_v33, 0.0 }
 0x5dd   : > { %v18047_v6 = vpop.eup %15967 }
 0x5de   : > { %v5305_v53 = vsel %vm764_vm0, %v18047_v6, 0.0  ;;  %v18053_v55 = vpop.eup %15969 }
 0x5df   : > { %5321 = vadd.xlane.f32.xlu1 %v5320_v14  ;;  %5306 = vadd.xlane.f32.xlu0 %v5305_v53  ;;  %v5290_v60 = vsel %vm764_vm0, %v18053_v55, 0.0  ;;  %v18057_v30 = vpop.eup %15971 }
 0x5e0   : > { %v5314_v58 = vsel %vm764_vm0, %v18057_v30, 0.0 }
 0x5e3   : > { %5291 = vadd.xlane.f32.xlu1 %v5290_v60 }
 0x5e7   : > { %5315 = vadd.xlane.f32.xlu1 %v5314_v58 }
 0x5ea   : > { %v5151_v50 = vpop.xlane.xlu0 %5150 }
 0x5eb   : > { %v5209_v23 = vsub.f32 %v17934_v51, %v5151_v50  ;;  %v5237_v50 = vmul.f32 1.442695, %v5198_v39 }
 0x5ec   : > { %v5154_v4 = vpop.xlane.xlu1 %5153 }
 0x5ed   : > { %v5259_v0 = vmul.f32 1.442695, %v5209_v23  ;;  %v5210_v22 = vsub.f32 %v17944_v42, %v5154_v4 }
 0x5ee   : > { %v5109_v54 = vpop.xlane.xlu0 %5108 }
 0x5ef   : > { %15973 = vpow2.f32 %v5259_v0  ;;  %v5261_v38 = vmul.f32 1.442695, %v5210_v22  ;;  %v5195_v52 = vsub.f32 %v17914_v2, %v5109_v54 }
 0x5f0   : > { %v5112_v62 = vpop.xlane.xlu1 %5111 }
 0x5f1   : > { %15975 = vpow2.f32 %v5261_v38  ;;  %v5231_v14 = vmul.f32 1.442695, %v5195_v52  ;;  %v5196_v53 = vsub.f32 %v17920_v21, %v5112_v62 }
 0x5f2   : > { %v5145_v60 = vpop.xlane.xlu0 %5144 }
 0x5f3   : > { %15977 = vpow2.f32 %v5231_v14  ;;  %v5233_v58 = vmul.f32 1.442695, %v5196_v53  ;;  %v5207_v51 = vsub.f32 %v17938_v26, %v5145_v60 }
 0x5f4   : > { %v5148_v23 = vpop.xlane.xlu1 %5147 }
 0x5f5   : > { %15979 = vpow2.f32 %v5233_v58  ;;  %v5255_v42 = vmul.f32 1.442695, %v5207_v51  ;;  %v5208_v4 = vsub.f32 %v17948_v9, %v5148_v23 }
 0x5f6   : > { %v5139_v0 = vpop.xlane.xlu0 %5138 }
 0x5f7   : > { %15981 = vpow2.f32 %v5255_v42  ;;  %v5257_v2 = vmul.f32 1.442695, %v5208_v4  ;;  %v5205_v63 = vsub.f32 %v17926_v17, %v5139_v0 }
 0x5f8   : > { %15983 = vpow2.f32 %v5237_v50  ;;  %v5142_v1 = vpop.xlane.xlu1 %5141 }
 0x5f9   : > { %v18069_v22 = vpop.eup %15973  ;;  %15985 = vpow2.f32 %v5257_v2  ;;  %v5251_v21 = vmul.f32 1.442695, %v5205_v63  ;;  %v5206_v54 = vsub.f32 %v17930_v25, %v5142_v1 }
 0x5fa   : > { %21227 = vst [vmem:[#allocation6_spill] sm:$0xff] %v18069_v22  ;;  %v18072_v26 = vpop.xlane.xlu0 %5174  ;;  %v5341_v38 = vsel %vm764_vm0, %v18069_v22, 0.0 }
 0x5fb   : > { %v18076_v52 = vpop.eup %15975  ;;  %v5253_v9 = vmul.f32 1.442695, %v5206_v54  ;;  %5342 = vadd.xlane.f32.xlu0 %v5341_v38  ;;  %15987 = vpow2.f32 %v5251_v21 }
 0x5fc   : > { %v18078_v39 = vpop.xlane.xlu1 %5177  ;;  %v5344_v17 = vsel %vm764_vm0, %v18076_v52, 0.0 }
 0x5fd   : > { %v18082_v62 = vpop.eup %15977  ;;  %15989 = vpow2.f32 %v5253_v9  ;;  %5345 = vadd.xlane.f32.xlu1 %v5344_v17 }
 0x5fe   : > { %v5133_v25 = vpop.xlane.xlu0 %5132  ;;  %v5299_v14 = vsel %vm764_vm0, %v18082_v62, 0.0 }
 0x5ff   : > { %v18086_v53 = vpop.eup %15979  ;;  %v5203_v60 = vsub.f32 %v17928_v12, %v5133_v25  ;;  %5300 = vadd.xlane.f32.xlu0 %v5299_v14 }
 0x600   : > { %v5136_v58 = vpop.xlane.xlu1 %5135  ;;  %v5302_v51 = vsel %vm764_vm0, %v18086_v53, 0.0 }
 0x601   : > { %v18091_v50 = vpop.eup %15981  ;;  %v5247_v23 = vmul.f32 1.442695, %v5203_v60  ;;  %v5204_v42 = vsub.f32 %v17932_v46, %v5136_v58  ;;  %5303 = vadd.xlane.f32.xlu1 %v5302_v51  ;;  %v21228_v51 = vld [vmem:[#allocation3_spill] sm:$0xff] }
 0x602   : > { %v18094_v4 = vpop.eup %15983  ;;  %v5335_v0 = vsel %vm764_vm0, %v18091_v50, 0.0  ;;  %v5169_v60 = vpop.xlane.xlu0 %5168 }
 0x603   : > { %v18098_v2 = vpop.eup %15985  ;;  %15991 = vpow2.f32 %v5247_v23  ;;  %v5249_v12 = vmul.f32 1.442695, %v5204_v42  ;;  %5336 = vadd.xlane.f32.xlu0 %v5335_v0  ;;  %v5308_v46 = vsel %vm764_vm0, %v18094_v4, 0.0  ;;  %v5215_v0 = vsub.f32 %v17968_v49, %v5169_v60 }
 0x604   : > { %v5338_v63 = vsel %vm764_vm0, %v18098_v2, 0.0  ;;  %v5172_v58 = vpop.xlane.xlu1 %5171 }
 0x605   : > { %15993 = vpow2.f32 %v5249_v12  ;;  %5339 = vadd.xlane.f32.xlu1 %v5338_v63  ;;  %v18102_v1 = vpop.eup %15987 }
 0x606   : > { %v5329_v38 = vsel %vm764_vm0, %v18102_v1, 0.0  ;;  %v5163_v23 = vpop.xlane.xlu0 %5162 }
 0x607   : > { %v18106_v21 = vpop.eup %15989  ;;  %5309 = vadd.xlane.f32.xlu0 %v5308_v46 }
 0x608   : > { %v5332_v54 = vsel %vm764_vm0, %v18106_v21, 0.0  ;;  %v5166_v42 = vpop.xlane.xlu1 %5165 }
 0x609   : > { %5333 = vadd.xlane.f32.xlu1 %v5332_v54  ;;  %v5214_v63 = vsub.f32 %v17946_v59, %v5166_v42  ;;  %v5271_v54 = vmul.f32 1.442695, %v5215_v0  ;;  %v5217_v59 = vsub.f32 %v17966_v15, %v18072_v26 }
 0x60a   : > { %v5157_v12 = vpop.xlane.xlu0 %5156 }
 0x60b   : > { %5330 = vadd.xlane.f32.xlu0 %v5329_v38  ;;  %v5213_v38 = vsub.f32 %v17936_v41, %v5163_v23  ;;  %15995 = vpow2.f32 %v5271_v54  ;;  %v5211_v61 = vsub.f32 %v17942_v31, %v5157_v12  ;;  %v5218_v41 = vsub.f32 %v17974_v8, %v18078_v39 }
 0x60c   : > { %v5160_v46 = vpop.xlane.xlu1 %5159  ;;  %v5275_v23 = vmul.f32 1.442695, %v5217_v59 }
 0x60d   : > { %v18112_v9 = vpop.eup %15991  ;;  %v5267_v57 = vmul.f32 1.442695, %v5213_v38  ;;  %v5263_v60 = vmul.f32 1.442695, %v5211_v61 }
 0x60e   : > { %v5323_v17 = vsel %vm764_vm0, %v18112_v9, 0.0 }
 0x60f   : > { %v18116_v25 = vpop.eup %15993  ;;  %5324 = vadd.xlane.f32.xlu0 %v5323_v17  ;;  %v5269_v17 = vmul.f32 1.442695, %v5214_v63 }
 0x610   : > { %v5326_v14 = vsel %vm764_vm0, %v18116_v25, 0.0  ;;  %v5190_v49 = vpop.xlane.xlu1 %5189 }
 0x611   : > { %5327 = vadd.xlane.f32.xlu1 %v5326_v14  ;;  %v5212_v14 = vsub.f32 %v17952_v7, %v5160_v46  ;;  %15997 = vpow2.f32 %v5269_v17  ;;  %v5222_v12 = vsub.f32 %v17982_v40, %v5190_v49 }
 0x612   : > { %15999 = vpow2.f32 %v5267_v57 }
 0x613   : > { %v5265_v22 = vmul.f32 1.442695, %v5212_v14 }
 0x614   : > { %v5184_v0 = vpop.xlane.xlu1 %5183 }
 0x615   : > { %16001 = vpow2.f32 %v5265_v22  ;;  %v5220_v57 = vsub.f32 %v17984_v37, %v5184_v0 }
 0x616   : > { %16003 = vpow2.f32 %v5263_v60 }
 0x617   : > { %v5281_v63 = vmul.f32 1.442695, %v5220_v57 }
 0x622   : > { %3468 = vrot.lane.b32.xlu1 %v16782_v47, %s21174_s29  ;;  %v5187_v47 = vpop.xlane.xlu0 %5186 }
 0x623   : > { %v5221_v40 = vsub.f32 %v17972_v44, %v5187_v47 }
 0x625   : > { %3466 = vrot.lane.b32.xlu0 %v21228_v51, %s21174_s29  ;;  %v5216_v51 = vsub.f32 %v17978_v20, %v5172_v58  ;;  %v18135_v20 = vpop.eup %15995  ;;  %v5277_v58 = vmul.f32 1.442695, %v5218_v41  ;;  %v5283_v17 = vmul.f32 1.442695, %v5221_v40  ;;  %s21176_s29 = smov 24  }
 0x626   : > { %v5181_v42 = vpop.xlane.xlu0 %5180  ;;  %v18138_v15 = vpop.eup %15997  ;;  %v5359_v8 = vsel %vm764_vm0, %v18135_v20, 0.0 }
 0x627   : > { %v5273_v7 = vmul.f32 1.442695, %v5216_v51  ;;  %v5219_v31 = vsub.f32 %v17976_v11, %v5181_v42  ;;  %v18143_v22 = vpop.eup %15999  ;;  %v5285_v11 = vmul.f32 1.442695, %v5222_v12  ;;  %v5356_v26 = vsel %vm764_vm0, %v18138_v15, 0.0 }
 0x628   : > { %v18147_v39 = vpop.eup %16001  ;;  %v5353_v37 = vsel %vm764_vm0, %v18143_v22, 0.0 }
 0x629   : > { %16005 = vpow2.f32 %v5273_v7  ;;  %v5279_v61 = vmul.f32 1.442695, %v5219_v31  ;;  %v18152_v46 = vpop.eup %16003  ;;  %v5350_v54 = vsel %vm764_vm0, %v18147_v39, 0.0 }
 0x62a   : > { %16007 = vpow2.f32 %v5275_v23  ;;  %v5347_v44 = vsel %vm764_vm0, %v18152_v46, 0.0 }
 0x62b   : > { %16009 = vpow2.f32 %v5277_v58 }
 0x62c   : > { %16011 = vpow2.f32 %v5279_v61 }
 0x62d   : > { %16013 = vpow2.f32 %v5285_v11 }
 0x62e   : > { %16015 = vpow2.f32 %v5281_v63 }
 0x62f   : > { %16017 = vpow2.f32 %v5283_v17 }
 0x633   : > { %v18156_v38 = vpop.eup %16005 }
 0x634   : > { %v18160_v14 = vpop.eup %16007  ;;  %v5362_v47 = vsel %vm764_vm0, %v18156_v38, 0.0 }
 0x635   : > { %v18164_v51 = vpop.eup %16009  ;;  %v5365_v49 = vsel %vm764_vm0, %v18160_v14, 0.0 }
 0x636   : > { %v18168_v59 = vpop.eup %16011  ;;  %v5368_v60 = vsel %vm764_vm0, %v18164_v51, 0.0 }
 0x637   : > { %v18172_v42 = vpop.eup %16013  ;;  %v5371_v41 = vsel %vm764_vm0, %v18168_v59, 0.0 }
 0x638   : > { %v18176_v7 = vpop.eup %16015  ;;  %v5380_v23 = vsel %vm764_vm0, %v18172_v42, 0.0 }
 0x639   : > { %v5374_v31 = vsel %vm764_vm0, %v18176_v7, 0.0  ;;  %v18182_v0 = vpop.eup %16017 }
 0x63a   : > { %v5377_v58 = vsel %vm764_vm0, %v18182_v0, 0.0 }
 0x644   : > { %5360 = vadd.xlane.f32.xlu0 %v5359_v8 }
 0x646   : > { %5357 = vadd.xlane.f32.xlu1 %v5356_v26 }
 0x648   : > { %5354 = vadd.xlane.f32.xlu0 %v5353_v37 }
 0x64a   : > { %5351 = vadd.xlane.f32.xlu1 %v5350_v54 }
 0x64c   : > { %5348 = vadd.xlane.f32.xlu0 %v5347_v44 }
 0x64e   : > { %5363 = vadd.xlane.f32.xlu1 %v5362_v47 }
 0x650   : > { %5366 = vadd.xlane.f32.xlu0 %v5365_v49 }
 0x652   : > { %5369 = vadd.xlane.f32.xlu1 %v5368_v60 }
 0x654   : > { %5372 = vadd.xlane.f32.xlu0 %v5371_v41 }
 0x656   : > { %5381 = vadd.xlane.f32.xlu1 %v5380_v23 }
 0x658   : > { %5375 = vadd.xlane.f32.xlu0 %v5374_v31  ;;  %v5295_v12 = vpop.xlane.xlu0 %5294 }
 0x65c   : > { %5378 = vadd.xlane.f32.xlu0 %v5377_v58  ;;  %v5319_v61 = vpop.xlane.xlu0 %5318 }
 0x660   : > { %v5289_v8 = vpop.xlane.xlu0 %5288 }
 0x664   : > { %v5313_v26 = vpop.xlane.xlu0 %5312 }
 0x668   : > { %v5298_v57 = vpop.xlane.xlu1 %5297 }
 0x669   : > { %16019 = vrcp.f32 %v5298_v57 }
 0x66a   : > { %16021 = vrcp.f32 %v5289_v8 }
 0x66b   : > { %16023 = vrcp.f32 %v5295_v12 }
 0x66c   : > { %v5322_v11 = vpop.xlane.xlu1 %5321 }
 0x670   : > { %v5292_v40 = vpop.xlane.xlu1 %5291 }
 0x671   : > { %16025 = vrcp.f32 %v5292_v40 }
 0x672   : > { %16027 = vrcp.f32 %v5322_v11 }
 0x673   : > { %16029 = vrcp.f32 %v5313_v26  ;;  %v16020_v37 = vpop.eup %16019 }
 0x674   : > { %16031 = vrcp.f32 %v5319_v61  ;;  %v5316_v63 = vpop.xlane.xlu1 %5315  ;;  %v16022_v54 = vpop.eup %16021  ;;  %v5418_v47 = vmul.f32 %v16020_v37, %v18041_v45 }
 0x675   : > { %16033 = vrcp.f32 %v5316_v63  ;;  %v16024_v17 = vpop.eup %16023  ;;  %v5415_v60 = vmul.f32 %v16022_v54, %v18032_v5 }
 0x676   : > { %v5417_v31 = vmul.f32 %v16024_v17, %v18020_v10 }
 0x678   : > { %v5448_v8 = vpack.c.bf16 %v5418_v47, %v5417_v31  ;;  %v3910_v31 = vcombine.low %v18010_v27, %v18014_v18 }
 0x67b   : > { %v16026_v44 = vpop.eup %16025 }
 0x67c   : > { %v16028_v49 = vpop.eup %16027  ;;  %v5416_v41 = vmul.f32 %v16026_v44, %v18053_v55  ;;  %v5307_v55 = vpop.xlane.xlu0 %5306 }
 0x67d   : > { %v16030_v23 = vpop.eup %16029  ;;  %v5426_v61 = vmul.f32 %v16028_v49, %v18045_v33 }
 0x67e   : > { %v16032_v58 = vpop.eup %16031  ;;  %v5447_v12 = vpack.c.bf16 %v5416_v41, %v5415_v60  ;;  %v5423_v11 = vmul.f32 %v16030_v23, %v18037_v3 }
 0x67f   : > { %v16034_v57 = vpop.eup %16033  ;;  %v5425_v26 = vmul.f32 %v16032_v58, %v18026_v32  ;;  %v3911_v58 = vcombine.high %v18010_v27, %v18014_v18 }
 0x680   : > { %15427 = vmatprep.mubr.msk.bf16.mxu0 %vm764_vm0, %v5447_v12  ;;  %v5424_v45 = vmul.f32 %v16034_v57, %v18057_v30  ;;  %v3978_v12 = vcombine.low %v17686_v35, %v17731_v34 }
 0x681   : > { %15428 = vmatmul.mubr.msk.bf16.vlgmr.msra.gmra.mrb[24].mxu0 %vm764_vm0, %v5448_v8  ;;  %v5452_v10 = vpack.c.bf16 %v5426_v61, %v5425_v26  ;;  %v3979_v8 = vcombine.high %v17686_v35, %v17731_v34 }
 0x682   : > { %15432 = vmatpush3.bf16.msra.mxu0 %v17831_v24  ;;  %v5451_v5 = vpack.c.bf16 %v5424_v45, %v5423_v11 }
 0x683   : > { %15433 = vmatprep.subr.bf16.mxu0 %v17855_v16 }
 0x684   : > { %15443 = vmatprep.mubr.msk.bf16.mxu1 %vm764_vm0, %v5451_v5 }
 0x685   : > { %15444 = vmatmul.mubr.msk.bf16.vlgmr.msra.gmra.mrb[20].mxu1 %vm764_vm0, %v5452_v10 }
 0x686   : > { %15434 = vmatpush3.bf16.msra.mxu0 %v17855_v16  ;;  %15456 = vmatpush3.bf16.msra.mxu1 %v17873_v19 }
 0x687   : > { %15447 = vmatprep.subr.bf16.mxu0 %v17859_v43 }
 0x688   : > { %v5343_v32 = vpop.xlane.xlu0 %5342 }
 0x68a   : > { %v18203_v3 = vpop.xlane.xlu1 %5345 }
 0x68c   : > { %v5301_v33 = vpop.xlane.xlu0 %5300 }
 0x68d   : > { %16035 = vrcp.f32 %v5301_v33 }
 0x68e   : > { %v5304_v24 = vpop.xlane.xlu1 %5303 }
 0x68f   : > { %16037 = vrcp.f32 %v5304_v24 }
 0x690   : > { %v5337_v30 = vpop.xlane.xlu0 %5336 }
 0x691   : > { %16039 = vrcp.f32 %v5337_v30 }
 0x692   : > { %16041 = vrcp.f32 %v5307_v55  ;;  %v5340_v40 = vpop.xlane.xlu1 %5339  ;;  %v3986_v55 = vrot.slane %v3978_v12, %v16651_v48 }
 0x693   : > { %16043 = vrcp.f32 %v5340_v40 }
 0x694   : > { %v5310_v63 = vpop.xlane.xlu0 %5309 }
 0x695   : > { %16045 = vrcp.f32 %v5310_v63 }
 0x696   : > { %v5334_v37 = vpop.xlane.xlu1 %5333 }
 0x697   : > { %v16036_v16 = vpop.eup %16035  ;;  %16047 = vrcp.f32 %v5334_v37 }
 0x698   : > { %v5331_v19 = vpop.xlane.xlu0 %5330  ;;  %v5419_v17 = vmul.f32 %v16036_v16, %v18082_v62 }
 0x699   : > { %v16038_v54 = vpop.eup %16037  ;;  %16049 = vrcp.f32 %v5331_v19 }
 0x69a   : > { %v5420_v44 = vmul.f32 %v16038_v54, %v18086_v53 }
 0x69b   : > { %v16040_v47 = vpop.eup %16039 }
 0x69c   : > { %v16042_v49 = vpop.eup %16041  ;;  %v5325_v60 = vpop.xlane.xlu0 %5324  ;;  %v5449_v41 = vpack.c.bf16 %v5420_v44, %v5419_v17  ;;  %v5431_v62 = vmul.f32 %v16040_v47, %v18091_v50  ;;  %v3918_v50 = vrot.slane %v3910_v31, %v16651_v48 }
 0x69d   : > { %v16044_v23 = vpop.eup %16043  ;;  %16051 = vrcp.f32 %v5325_v60  ;;  %v5421_v11 = vmul.f32 %v16042_v49, %v18047_v6 }
 0x69e   : > { %v5328_v57 = vpop.xlane.xlu1 %5327  ;;  %15435 = vmatprep.mubr.msk.bf16.mxu0 %vm764_vm0, %v5449_v41  ;;  %v5432_v53 = vmul.f32 %v16044_v23, %v18098_v2  ;;  %v3925_v2 = vrot.slane %v3911_v58, %v16651_v48 }
 0x69f   : > { %v16046_v61 = vpop.eup %16045  ;;  %16053 = vrcp.f32 %v5328_v57 }
 0x6a0   : > { %v5422_v27 = vmul.f32 %v16046_v61, %v18094_v4  ;;  %v3467_v18 = vpop.permute.xlu0 %3466  ;;  %v5455_v45 = vpack.c.bf16 %v5432_v53, %v5431_v62  ;;  %16055 = vrcp.f32 %v5343_v32 }
 0x6a1   : > { %v16048_v26 = vpop.eup %16047  ;;  %v3926_v5 = vcombine.low %v18012_v28, %v3467_v18  ;;  %v3927_v10 = vcombine.high %v18012_v28, %v3467_v18  ;;  %v3993_v28 = vrot.slane %v3979_v8, %v16651_v48  ;;  %16057 = vrcp.f32 %v18203_v3 }
 0x6a2   : > { %v3469_v33 = vpop.permute.xlu1 %3468  ;;  %15459 = vmatprep.mubr.msk.bf16.mxu1 %vm764_vm0, %v5455_v45  ;;  %v5450_v35 = vpack.c.bf16 %v5422_v27, %v5421_v11  ;;  %v5430_v40 = vmul.f32 %v16048_v26, %v18106_v21 }
 0x6a3   : > { %v16050_v34 = vpop.eup %16049  ;;  %v3934_v6 = vrot.slane %v3926_v5, %v16651_v48  ;;  %v3941_v4 = vrot.slane %v3927_v10, %v16651_v48  ;;  %v3994_v24 = vcombine.low %v17710_v13, %v3469_v33  ;;  %v3995_v30 = vcombine.high %v17710_v13, %v3469_v33 }
 0x6a4   : > { %v5429_v63 = vmul.f32 %v16050_v34, %v18102_v1  ;;  %15436 = vmatmul.mubr.msk.bf16.vlgmr.msra.gmra.mrb[28].mxu0 %vm764_vm0, %v5450_v35 }
 0x6a5   : > { %v3942_v37 = vcombine.low %v3918_v50, %v3934_v6  ;;  %v3943_v16 = vcombine.high %v3918_v50, %v3934_v6  ;;  %v3958_v19 = vcombine.low %v3925_v2, %v3941_v4  ;;  %v3959_v54 = vcombine.high %v3925_v2, %v3941_v4  ;;  %15448 = vmatpush3.bf16.msra.mxu0 %v17859_v43 }
 0x6a6   : > { %v4002_v17 = vrot.slane %v3994_v24, %v16651_v48  ;;  %v4009_v13 = vrot.slane %v3995_v30, %v16651_v48  ;;  %15449 = vmatprep.subr.bf16.mxu0 %v17865_v29  ;;  %v5454_v32 = vpack.c.bf16 %v5430_v40, %v5429_v63 }
 0x6a7   : > { %v3950_v21 = vrot.slane %v3942_v37, %v16669_v56  ;;  %v3957_v1 = vrot.slane %v3943_v16, %v16669_v56  ;;  %v3966_v44 = vrot.slane %v3958_v19, %v16669_v56  ;;  %v3973_v47 = vrot.slane %v3959_v54, %v16669_v56  ;;  %v16052_v49 = vpop.eup %16051 }
 0x6a8   : > { %v4010_v60 = vcombine.low %v3986_v55, %v4002_v17  ;;  %v4011_v43 = vcombine.high %v3986_v55, %v4002_v17  ;;  %v4026_v41 = vcombine.low %v3993_v28, %v4009_v13  ;;  %v4027_v3 = vcombine.high %v3993_v28, %v4009_v13 }
 0x6a9   : > { %v16054_v23 = vpop.eup %16053  ;;  %v4454_v31 = vcombine.low %v3950_v21, %v3957_v1  ;;  %v14871_v58 = vcombine.high %v3950_v21, %v3957_v1  ;;  %v4470_v12 = vcombine.low %v3966_v44, %v3973_v47  ;;  %v14872_v57 = vcombine.high %v3966_v44, %v3973_v47  ;;  %15450 = vmatpush3.bf16.msra.mxu0 %v17865_v29 }
 0x6aa   : > { %v4018_v62 = vrot.slane %v4010_v60, %v16669_v56  ;;  %v4025_v53 = vrot.slane %v4011_v43, %v16669_v56  ;;  %v4034_v61 = vrot.slane %v4026_v41, %v16669_v56  ;;  %v4041_v8 = vrot.slane %v4027_v3, %v16669_v56  ;;  %15463 = vmatprep.subr.bf16.mxu0 %v17875_v36  ;;  %v16056_v35 = vpop.eup %16055 }
 0x6ab   : > { %v5427_v11 = vmul.f32 %v16052_v49, %v18112_v9  ;;  %v5428_v27 = vmul.f32 %v16054_v23, %v18116_v25  ;;  %v4461_v18 = vrot.slane %v4454_v31, %v16651_v48  ;;  %v4469_v45 = vrot.slane %v14871_v58, %v16651_v48  ;;  %v16058_v30 = vpop.eup %16057  ;;  %v21229_v23 = vld [vmem:[#allocation6_spill] sm:$0xff] }
 0x6ac   : > { %v4522_v26 = vcombine.low %v4018_v62, %v4025_v53  ;;  %v14873_v29 = vcombine.high %v4018_v62, %v4025_v53  ;;  %v4538_v5 = vcombine.low %v4034_v61, %v4041_v8  ;;  %v14874_v10 = vcombine.high %v4034_v61, %v4041_v8 }
 0x6ad   : > { %v5453_v50 = vpack.c.bf16 %v5428_v27, %v5427_v11  ;;  %v4477_v2 = vrot.slane %v4470_v12, %v16651_v48  ;;  %v4485_v55 = vrot.slane %v14872_v57, %v16651_v48  ;;  %v4486_v33 = vcombine.low %v4461_v18, %v4469_v45  ;;  %v21230_v12 = vld [vmem:[#allocation4_spill] sm:$0xff]  ;;  %v21231_v57 = vld [vmem:[#allocation5_spill] sm:$0xff] }
 0x6ae   : > { %v4529_v34 = vrot.slane %v4522_v26, %v16651_v48  ;;  %v4537_v9 = vrot.slane %v14873_v29, %v16651_v48  ;;  %v4545_v25 = vrot.slane %v4538_v5, %v16651_v48  ;;  %v4553_v6 = vrot.slane %v14874_v10, %v16651_v48 }
 0x6af   : > { %15451 = vmatprep.mubr.msk.bf16.mxu0 %vm764_vm0, %v5453_v50  ;;  %v4494_v4 = vrot.slane %v4486_v33, %v16669_v56  ;;  %v4502_v24 = vcombine.low %v4477_v2, %v4485_v55  ;;  %v4487_v17 = vcombine.high %v4461_v18, %v4469_v45  ;;  %v4503_v13 = vcombine.high %v4477_v2, %v4485_v55 }
 0x6b0   : > { %15452 = vmatmul.mubr.msk.bf16.vlgmr.msra.gmra.mrb[32].mxu0 %vm764_vm0, %v5454_v32  ;;  %v4554_v28 = vcombine.low %v4529_v34, %v4537_v9  ;;  %v4570_v40 = vcombine.low %v4545_v25, %v4553_v6  ;;  %v4555_v63 = vcombine.high %v4529_v34, %v4537_v9  ;;  %v4571_v37 = vcombine.high %v4545_v25, %v4553_v6 }
 0x6b1   : > { %15464 = vmatpush3.bf16.msra.mxu0 %v17875_v36  ;;  %v4510_v16 = vrot.slane %v4502_v24, %v16669_v56  ;;  %v5434_v36 = vmul.f32 %v16058_v30, %v18076_v52  ;;  %v18274_v41 = vrot.slane %v4487_v17, %v16669_v56  ;;  %v4517_v3 = vrot.slane %v4503_v13, %v16669_v56 }
 0x6b2   : > { %v4562_v19 = vrot.slane %v4554_v28, %v16669_v56  ;;  %v4578_v54 = vrot.slane %v4570_v40, %v16669_v56  ;;  %v18267_v21 = vrot.slane %v4555_v63, %v16669_v56  ;;  %v18270_v1 = vrot.slane %v4571_v37, %v16669_v56 }
 0x6b3   : > { %v4518_v32 = vcombine.low %v4494_v4, %v4510_v16  ;;  %v4519_v47 = vcombine.high %v4494_v4, %v4510_v16  ;;  %v5433_v31 = vmul.f32 %v16056_v35, %v21229_v23  ;;  %v4520_v62 = vcombine.low %v18274_v41, %v4517_v3 }
 0x6b4   : > { %v4586_v44 = vcombine.low %v4562_v19, %v4578_v54  ;;  %v4587_v49 = vcombine.high %v4562_v19, %v4578_v54  ;;  %v4588_v58 = vcombine.low %v18267_v21, %v18270_v1  ;;  %v4589_v30 = vcombine.high %v18267_v21, %v18270_v1 }
 0x6b5   : > { %v5456_v52 = vpack.c.bf16 %v5434_v36, %v5433_v31  ;;  %v4521_v16 = vcombine.high %v18274_v41, %v4517_v3 }
 0x6b6   : > { %v4599_v60 = vpack.c.bf16 %v4586_v44, %v4518_v32  ;;  %v4601_v43 = vpack.c.bf16 %v4587_v49, %v4519_v47  ;;  %v4603_v53 = vpack.c.bf16 %v4588_v58, %v4520_v62 }
 0x6b8   : > { %15457 = vmatprep.subr.bf16.mxu1 %v4599_v60  ;;  %15465 = vmatprep.subr.bf16.mxu0 %v4601_v43 }
 0x6b9   : > { %15458 = vmatpush3.bf16.msra.mxu1 %v4599_v60  ;;  %15466 = vmatpush3.bf16.msra.mxu0 %v4601_v43 }
 0x6ba   : > { %15471 = vmatprep.subr.bf16.mxu1 %v21230_v12  ;;  %15479 = vmatprep.subr.bf16.mxu0 %v21231_v57 }
 0x6bc   : > { %15460 = vmatmul.mubr.msk.bf16.vlgmr.msra.gmra.mrb[24].mxu1 %vm764_vm0, %v5456_v52 }
 0x6bd   : > { %15472 = vmatpush3.bf16.msra.mxu1 %v21230_v12 }
 0x6be   : > { %15473 = vmatprep.subr.bf16.mxu1 %v4603_v53 }
 0x6c1   : > { %15474 = vmatpush3.bf16.msra.mxu1 %v4603_v53 }
 0x6d1   : > { %v5361_v61 = vpop.xlane.xlu0 %5360 }
 0x6d2   : > { %16059 = vrcp.f32 %v5361_v61 }
 0x6d3   : > { %v5358_v8 = vpop.xlane.xlu1 %5357 }
 0x6d5   : > { %v5355_v11 = vpop.xlane.xlu0 %5354 }
 0x6d6   : > { %16061 = vrcp.f32 %v5355_v11 }
 0x6d7   : > { %v5352_v27 = vpop.xlane.xlu1 %5351 }
 0x6d8   : > { %16063 = vrcp.f32 %v5352_v27 }
 0x6d9   : > { %16065 = vrcp.f32 %v5358_v8  ;;  %v5349_v18 = vpop.xlane.xlu0 %5348 }
 0x6da   : > { %16067 = vrcp.f32 %v5349_v18 }
 0x6db   : > { %v5364_v45 = vpop.xlane.xlu1 %5363 }
 0x6dc   : > { %16069 = vrcp.f32 %v5364_v45  ;;  %v16060_v5 = vpop.eup %16059 }
 0x6dd   : > { %v5367_v26 = vpop.xlane.xlu0 %5366  ;;  %v5439_v40 = vmul.f32 %v16060_v5, %v18135_v20 }
 0x6de   : > { %16071 = vrcp.f32 %v5367_v26 }
 0x6df   : > { %v5370_v29 = vpop.xlane.xlu1 %5369 }
 0x6e0   : > { %16073 = vrcp.f32 %v5370_v29  ;;  %v16062_v10 = vpop.eup %16061 }
 0x6e1   : > { %v5373_v50 = vpop.xlane.xlu0 %5372  ;;  %v5437_v35 = vmul.f32 %v16062_v10, %v18143_v22 }
 0x6e2   : > { %v16064_v2 = vpop.eup %16063  ;;  %16075 = vrcp.f32 %v5373_v50 }
 0x6e3   : > { %v16066_v55 = vpop.eup %16065  ;;  %v5382_v34 = vpop.xlane.xlu1 %5381  ;;  %v5436_v6 = vmul.f32 %v16064_v2, %v18147_v39 }
 0x6e4   : > { %v16068_v33 = vpop.eup %16067  ;;  %v5438_v24 = vmul.f32 %v16066_v55, %v18138_v15  ;;  %v4605_v15 = vpack.c.bf16 %v4589_v30, %v4521_v16 }
 0x6e5   : > { %v5376_v9 = vpop.xlane.xlu0 %5375  ;;  %v5435_v25 = vmul.f32 %v16068_v33, %v18152_v46 }
 0x6e6   : > { %v16070_v4 = vpop.eup %16069  ;;  %16077 = vrcp.f32 %v5376_v9  ;;  %v5458_v37 = vpack.c.bf16 %v5438_v24, %v5437_v35 }
 0x6e7   : > { %v5457_v28 = vpack.c.bf16 %v5436_v6, %v5435_v25  ;;  %v5440_v63 = vmul.f32 %v16070_v4, %v18156_v38  ;;  %16079 = vrcp.f32 %v5382_v34 }
 0x6e8   : > { %v16072_v22 = vpop.eup %16071 }
 0x6e9   : > { %15467 = vmatprep.mubr.msk.bf16.mxu0 %vm764_vm0, %v5457_v28  ;;  %v5379_v39 = vpop.xlane.xlu0 %5378  ;;  %v5459_v46 = vpack.c.bf16 %v5440_v63, %v5439_v40  ;;  %v5441_v54 = vmul.f32 %v16072_v22, %v18160_v14 }
 0x6ea   : > { %v16074_v19 = vpop.eup %16073  ;;  %16081 = vrcp.f32 %v5379_v39  ;;  %15468 = vmatmul.mubr.msk.bf16.vlgmr.msra.gmra.mrb[36].mxu0 %vm764_vm0, %v5458_v37 }
 0x6eb   : > { %v5442_v20 = vmul.f32 %v16074_v19, %v18164_v51  ;;  %15480 = vmatpush3.bf16.msra.mxu0 %v21231_v57  ;;  %15475 = vmatprep.mubr.msk.bf16.mxu1 %vm764_vm0, %v5459_v46 }
 0x6ec   : > { %15481 = vmatprep.subr.bf16.mxu0 %v4605_v15  ;;  %v16076_v17 = vpop.eup %16075 }
 0x6ed   : > { %v5460_v38 = vpack.c.bf16 %v5442_v20, %v5441_v54  ;;  %v5443_v21 = vmul.f32 %v16076_v17, %v18168_v59 }
 0x6ef   : > { %15482 = vmatpush3.bf16.msra.mxu0 %v4605_v15  ;;  %15476 = vmatmul.mubr.msk.bf16.vlgmr.msra.gmra.mrb[28].mxu1 %vm764_vm0, %v5460_v38 }
 0x6f0   : > { %v16078_v13 = vpop.eup %16077 }
 0x6f1   : > { %v5444_v1 = vmul.f32 %v16078_v13, %v18176_v7  ;;  %v16080_v32 = vpop.eup %16079 }
 0x6f2   : > { %v5446_v51 = vmul.f32 %v16080_v32, %v18172_v42 }
 0x6f3   : > { %v5461_v44 = vpack.c.bf16 %v5444_v1, %v5443_v21 }
 0x6f4   : > { %v16082_v14 = vpop.eup %16081 }
 0x6f5   : > { %v5445_v47 = vmul.f32 %v16082_v14, %v18182_v0  ;;  %15483 = vmatprep.mubr.msk.bf16.mxu0 %vm764_vm0, %v5461_v44 }
 0x6f7   : > { %v5462_v49 = vpack.c.bf16 %v5446_v51, %v5445_v47 }
 0x6f9   : > { %15484 = vmatmul.mubr.msk.bf16.vlgmr.msra.gmra.mrb[40].mxu0 %vm764_vm0, %v5462_v49 }
 0x754   : > { %v15429_v36 = vpop.f32.mrb[24].mxu0 }
 0x755   : > { %v5503_v60 = vpop.f32.mrb[25].mxu0 }
 0x756   : > { %v15430_v43 = vpop.f32.mrb[26].mxu0 }
 0x757   : > { %v5506_v41 = vpop.f32.mrb[27].mxu0 }
 0x758   : > { %v15445_v3 = vpop.f32.mrb[20].mxu1 }
 0x759   : > { %v6039_v59 = vcombine.low %v15429_v36, %v15445_v3  ;;  %v6040_v23 = vcombine.high %v15429_v36, %v15445_v3  ;;  %v5613_v7 = vpop.f32.mrb[21].mxu1 }
 0x75a   : > { %v5903_v31 = vcombine.low %v5503_v60, %v5613_v7  ;;  %v5904_v58 = vcombine.high %v5503_v60, %v5613_v7  ;;  %v15446_v12 = vpop.f32.mrb[22].mxu1 }
 0x75b   : > { %v6107_v57 = vcombine.low %v15430_v43, %v15446_v12  ;;  %v6108_v42 = vcombine.high %v15430_v43, %v15446_v12  ;;  %v5616_v52 = vpop.f32.mrb[23].mxu1  ;;  %v6047_v27 = vrot.slane %v6039_v59, %v16651_v48  ;;  %v6054_v18 = vrot.slane %v6040_v23, %v16651_v48 }
 0x75c   : > { %v5971_v0 = vcombine.low %v5506_v41, %v5616_v52  ;;  %v5972_v62 = vcombine.high %v5506_v41, %v5616_v52  ;;  %v5911_v45 = vrot.slane %v5903_v31, %v16651_v48  ;;  %v5918_v26 = vrot.slane %v5904_v58, %v16651_v48 }
 0x75d   : > { %v18312_v5 = vrot.slane %v6107_v57, %v16651_v48  ;;  %v18315_v10 = vrot.slane %v6108_v42, %v16651_v48 }
 0x75e   : > { %v18318_v33 = vrot.slane %v5971_v0, %v16651_v48  ;;  %v18321_v35 = vrot.slane %v5972_v62, %v16651_v48 }
 0x777   : > { %v15437_v53 = vpop.f32.mrb[28].mxu0 }
 0x778   : > { %v5558_v61 = vpop.f32.mrb[29].mxu0 }
 0x779   : > { %v15438_v8 = vpop.f32.mrb[30].mxu0 }
 0x77a   : > { %v5561_v11 = vpop.f32.mrb[31].mxu0 }
 0x783   : > { %v15453_v29 = vpop.f32.mrb[32].mxu0 }
 0x784   : > { %v6055_v50 = vcombine.low %v15437_v53, %v15453_v29  ;;  %v6056_v2 = vcombine.high %v15437_v53, %v15453_v29  ;;  %v5668_v55 = vpop.f32.mrb[33].mxu0 }
 0x785   : > { %v5919_v34 = vcombine.low %v5558_v61, %v5668_v55  ;;  %v5920_v9 = vcombine.high %v5558_v61, %v5668_v55  ;;  %v15454_v25 = vpop.f32.mrb[34].mxu0 }
 0x786   : > { %v6063_v6 = vrot.slane %v6055_v50, %v16651_v48  ;;  %v6070_v4 = vrot.slane %v6056_v2, %v16651_v48  ;;  %v6123_v24 = vcombine.low %v15438_v8, %v15454_v25  ;;  %v6124_v30 = vcombine.high %v15438_v8, %v15454_v25  ;;  %v5671_v28 = vpop.f32.mrb[35].mxu0 }
 0x787   : > { %v5927_v40 = vrot.slane %v5919_v34, %v16651_v48  ;;  %v5934_v63 = vrot.slane %v5920_v9, %v16651_v48  ;;  %v5987_v22 = vcombine.low %v5561_v11, %v5671_v28  ;;  %v5988_v37 = vcombine.high %v5561_v11, %v5671_v28 }
 0x788   : > { %v6071_v16 = vcombine.low %v6047_v27, %v6063_v6  ;;  %v6072_v39 = vcombine.high %v6047_v27, %v6063_v6  ;;  %v6087_v46 = vcombine.low %v6054_v18, %v6070_v4  ;;  %v6088_v19 = vcombine.high %v6054_v18, %v6070_v4 }
 0x789   : > { %v5935_v15 = vcombine.low %v5911_v45, %v5927_v40  ;;  %v5936_v54 = vcombine.high %v5911_v45, %v5927_v40  ;;  %v5951_v20 = vcombine.low %v5918_v26, %v5934_v63  ;;  %v5952_v38 = vcombine.high %v5918_v26, %v5934_v63 }
 0x78a   : > { %v6079_v17 = vrot.slane %v6071_v16, %v16669_v56  ;;  %v6086_v13 = vrot.slane %v6072_v39, %v16669_v56  ;;  %v6095_v21 = vrot.slane %v6087_v46, %v16669_v56  ;;  %v6102_v1 = vrot.slane %v6088_v19, %v16669_v56 }
 0x78b   : > { %v5943_v32 = vrot.slane %v5935_v15, %v16669_v56  ;;  %v5950_v44 = vrot.slane %v5936_v54, %v16669_v56  ;;  %v5959_v14 = vrot.slane %v5951_v20, %v16669_v56  ;;  %v5966_v51 = vrot.slane %v5952_v38, %v16669_v56 }
 0x78c   : > { %v6583_v47 = vcombine.low %v6079_v17, %v6086_v13  ;;  %v14911_v49 = vcombine.high %v6079_v17, %v6086_v13  ;;  %v6599_v36 = vcombine.low %v6095_v21, %v6102_v1  ;;  %v14912_v60 = vcombine.high %v6095_v21, %v6102_v1 }
 0x78d   : > { %v6447_v43 = vcombine.low %v5943_v32, %v5950_v44  ;;  %v14907_v41 = vcombine.high %v5943_v32, %v5950_v44  ;;  %v6463_v3 = vcombine.low %v5959_v14, %v5966_v51  ;;  %v14908_v59 = vcombine.high %v5959_v14, %v5966_v51 }
 0x78e   : > { %v18336_v23 = vrot.slane %v6583_v47, %v16651_v48  ;;  %v18339_v7 = vrot.slane %v14911_v49, %v16651_v48  ;;  %v18342_v31 = vrot.slane %v6599_v36, %v16651_v48  ;;  %v18345_v58 = vrot.slane %v14912_v60, %v16651_v48 }
 0x78f   : > { %v18348_v12 = vrot.slane %v6447_v43, %v16651_v48  ;;  %v18351_v57 = vrot.slane %v14907_v41, %v16651_v48  ;;  %v18354_v42 = vrot.slane %v6463_v3, %v16651_v48  ;;  %v18357_v52 = vrot.slane %v14908_v59, %v16651_v48  ;;  %v18359_v0 = vpop.f32.mrb[24].mxu1 }
 0x790   : > { %v6131_v62 = vrot.slane %v6123_v24, %v16651_v48  ;;  %v6138_v53 = vrot.slane %v6124_v30, %v16651_v48  ;;  %v5995_v61 = vrot.slane %v5987_v22, %v16651_v48  ;;  %v6002_v8 = vrot.slane %v5988_v37, %v16651_v48  ;;  %v18365_v11 = vpop.f32.mrb[25].mxu1 }
 0x791   : > { %v18367_v27 = vpop.f32.mrb[26].mxu1  ;;  %v6615_v18 = vcombine.low %v18336_v23, %v18339_v7  ;;  %v6631_v45 = vcombine.low %v18342_v31, %v18345_v58  ;;  %v6479_v26 = vcombine.low %v18348_v12, %v18351_v57  ;;  %v6495_v29 = vcombine.low %v18354_v42, %v18357_v52 }
 0x792   : > { %v6139_v50 = vcombine.low %v18312_v5, %v6131_v62  ;;  %v6140_v2 = vcombine.high %v18312_v5, %v6131_v62  ;;  %v6155_v55 = vcombine.low %v18315_v10, %v6138_v53  ;;  %v6156_v34 = vcombine.high %v18315_v10, %v6138_v53  ;;  %v18381_v9 = vpop.f32.mrb[27].mxu1 }
 0x793   : > { %v6003_v25 = vcombine.low %v18318_v33, %v5995_v61  ;;  %v6004_v6 = vcombine.high %v18318_v33, %v5995_v61  ;;  %v6019_v4 = vcombine.low %v18321_v35, %v6002_v8  ;;  %v6020_v24 = vcombine.high %v18321_v35, %v6002_v8 }
 0x794   : > { %v6147_v30 = vrot.slane %v6139_v50, %v16669_v56  ;;  %v6154_v28 = vrot.slane %v6140_v2, %v16669_v56  ;;  %v6163_v5 = vrot.slane %v6155_v55, %v16669_v56  ;;  %v6170_v40 = vrot.slane %v6156_v34, %v16669_v56 }
 0x795   : > { %v6011_v10 = vrot.slane %v6003_v25, %v16669_v56  ;;  %v6018_v63 = vrot.slane %v6004_v6, %v16669_v56  ;;  %v6027_v22 = vrot.slane %v6019_v4, %v16669_v56  ;;  %v6034_v33 = vrot.slane %v6020_v24, %v16669_v56 }
 0x796   : > { %v6651_v37 = vcombine.low %v6147_v30, %v6154_v28  ;;  %v14913_v16 = vcombine.high %v6147_v30, %v6154_v28  ;;  %v6667_v39 = vcombine.low %v6163_v5, %v6170_v40  ;;  %v14914_v35 = vcombine.high %v6163_v5, %v6170_v40 }
 0x797   : > { %v6515_v46 = vcombine.low %v6011_v10, %v6018_v63  ;;  %v14909_v19 = vcombine.high %v6011_v10, %v6018_v63  ;;  %v6531_v15 = vcombine.low %v6027_v22, %v6034_v33  ;;  %v14910_v54 = vcombine.high %v6027_v22, %v6034_v33 }
 0x798   : > { %v6658_v20 = vrot.slane %v6651_v37, %v16651_v48  ;;  %v6666_v38 = vrot.slane %v14913_v16, %v16651_v48  ;;  %v6674_v17 = vrot.slane %v6667_v39, %v16651_v48  ;;  %v6682_v13 = vrot.slane %v14914_v35, %v16651_v48  ;;  %v15912_v35 = vld [vmem:[%s21152_s8 + $0x8] sm:$0xff]  }
 0x799   : > { %v6522_v21 = vrot.slane %v6515_v46, %v16651_v48  ;;  %v6530_v1 = vrot.slane %v14909_v19, %v16651_v48  ;;  %v6538_v32 = vrot.slane %v6531_v15, %v16651_v48  ;;  %v6546_v44 = vrot.slane %v14910_v54, %v16651_v48 }
 0x79a   : > { %v18404_v14 = vrot.slane %v6615_v18, %v16669_v56  ;;  %v18407_v51 = vrot.slane %v6631_v45, %v16669_v56  ;;  %v6683_v47 = vcombine.low %v6658_v20, %v6666_v38  ;;  %v6699_v49 = vcombine.low %v6674_v17, %v6682_v13 }
 0x79b   : > { %v18410_v36 = vrot.slane %v6479_v26, %v16669_v56  ;;  %v18413_v60 = vrot.slane %v6495_v29, %v16669_v56  ;;  %v6547_v43 = vcombine.low %v6522_v21, %v6530_v1  ;;  %v6563_v41 = vcombine.low %v6538_v32, %v6546_v44 }
 0x79c   : > { %v6648_v3 = vcombine.high %v18404_v14, %v18407_v51  ;;  %v18418_v59 = vrot.slane %v6683_v47, %v16669_v56  ;;  %v18421_v62 = vrot.slane %v6699_v49, %v16669_v56  ;;  %v6616_v53 = vcombine.high %v18336_v23, %v18339_v7 }
 0x79d   : > { %v6512_v61 = vcombine.high %v18410_v36, %v18413_v60  ;;  %v18428_v8 = vrot.slane %v6547_v43, %v16669_v56  ;;  %v18431_v18 = vrot.slane %v6563_v41, %v16669_v56  ;;  %v6632_v45 = vcombine.high %v18342_v31, %v18345_v58  ;;  %v15911_v31 = vld [vmem:[%s21152_s8] sm:$0xff]  }
 0x79e   : > { %v6716_v26 = vcombine.high %v18418_v59, %v18421_v62  ;;  %v6630_v29 = vrot.slane %v6616_v53, %v16669_v56  ;;  %v6684_v50 = vcombine.high %v6658_v20, %v6666_v38  ;;  %v6700_v2 = vcombine.high %v6674_v17, %v6682_v13  ;;  %15487 = vmatprep.subr.bf16.mxu1 %v15911_v31 }
 0x79f   : > { %v6580_v23 = vcombine.high %v18428_v8, %v18431_v18  ;;  %v6646_v7 = vrot.slane %v6632_v45, %v16669_v56  ;;  %v6480_v55 = vcombine.high %v18348_v12, %v18351_v57  ;;  %v6496_v34 = vcombine.high %v18354_v42, %v18357_v52  ;;  %15488 = vmatpush3.bf16.msra.mxu1 %v15911_v31 }
 0x7a0   : > { %v15781_v58 = vpack.i.bf16 %v6716_v26, %v6648_v3  ;;  %v6698_v25 = vrot.slane %v6684_v50, %v16669_v56  ;;  %v6714_v6 = vrot.slane %v6700_v2, %v16669_v56  ;;  %v6548_v4 = vcombine.high %v6522_v21, %v6530_v1  ;;  %15489 = vmatprep.subr.bf16.mxu1 %v15912_v35 }
 0x7a1   : > { %v15791_v24 = vpack.i.bf16 %v6580_v23, %v6512_v61  ;;  %v6649_v30 = vcombine.low %v6630_v29, %v6646_v7  ;;  %v6494_v28 = vrot.slane %v6480_v55, %v16669_v56  ;;  %v6510_v5 = vrot.slane %v6496_v34, %v16669_v56 }
 0x7a2   : > { %15782 = vrot.lane.b32.xlu1 %v15781_v58, %s21180_s22  ;;  %v6717_v12 = vcombine.low %v6698_v25, %v6714_v6  ;;  %v6562_v57 = vrot.slane %v6548_v4, %v16669_v56  ;;  %v6564_v42 = vcombine.high %v6538_v32, %v6546_v44  ;;  %v6650_v52 = vcombine.high %v6630_v29, %v6646_v7 }
 0x7a3   : > { %15792 = vrot.lane.b32.xlu0 %v15791_v24, %s21180_s22  ;;  %v6514_v40 = vcombine.high %v6494_v28, %v6510_v5  ;;  %v6513_v10 = vcombine.low %v6494_v28, %v6510_v5  ;;  %v6718_v63 = vcombine.high %v6698_v25, %v6714_v6  ;;  %v6647_v22 = vcombine.low %v18404_v14, %v18407_v51 }
 0x7a4   : > { %v15786_v33 = vpack.i.bf16 %v6717_v12, %v6649_v30  ;;  %v6578_v37 = vrot.slane %v6564_v42, %v16669_v56  ;;  %v6715_v16 = vcombine.low %v18418_v59, %v18421_v62  ;;  %v6511_v39 = vcombine.low %v18410_v36, %v18413_v60  ;;  %15490 = vmatpush3.bf16.msra.mxu1 %v15912_v35 }
 0x7a5   : > { %v15806_v46 = vpack.i.bf16 %v6718_v63, %v6650_v52  ;;  %v6579_v19 = vcombine.low %v18428_v8, %v18431_v18 }
 0x7a6   : > { %15787 = vrot.lane.b32.xlu1 %v15786_v33, %s21178_s4  ;;  %v6582_v15 = vcombine.high %v6562_v57, %v6578_v37  ;;  %v6581_v54 = vcombine.low %v6562_v57, %v6578_v37 }
 0x7a8   : > { %v15801_v20 = vpack.i.bf16 %v6582_v15, %v6514_v40  ;;  %v15796_v38 = vpack.i.bf16 %v6581_v54, %v6513_v10 }
 0x7aa   : > { %15802 = vrot.lane.b32.xlu0 %v15801_v20, %s21176_s29  ;;  %15797 = vrot.lane.b32.xlu1 %v15796_v38, %s21178_s4 }
 0x7ae   : > { %15807 = vrot.lane.b32.xlu1 %v15806_v46, %s21176_s29 }
 0x7bd   : > { %v15469_v17 = vpop.f32.mrb[36].mxu0 }
 0x7be   : > { %v5778_v13 = vpop.f32.mrb[37].mxu0 }
 0x7bf   : > { %v18471_v21 = vpop.f32.mrb[38].mxu0 }
 0x7c0   : > { %v18473_v1 = vpop.f32.mrb[39].mxu0 }
 0x7c2   : > { %v15477_v32 = vpop.f32.mrb[28].mxu1 }
 0x7c3   : > { %v6311_v44 = vcombine.low %v18359_v0, %v15477_v32  ;;  %v6312_v47 = vcombine.high %v18359_v0, %v15477_v32  ;;  %v5833_v49 = vpop.f32.mrb[29].mxu1 }
 0x7c4   : > { %v6175_v43 = vcombine.low %v18365_v11, %v5833_v49  ;;  %v6176_v41 = vcombine.high %v18365_v11, %v5833_v49  ;;  %v15478_v3 = vpop.f32.mrb[30].mxu1 }
 0x7c5   : > { %v6379_v53 = vcombine.low %v18367_v27, %v15478_v3  ;;  %v6380_v61 = vcombine.high %v18367_v27, %v15478_v3  ;;  %v5836_v45 = vpop.f32.mrb[31].mxu1  ;;  %v6319_v50 = vrot.slane %v6311_v44, %v16651_v48  ;;  %v6326_v2 = vrot.slane %v6312_v47, %v16651_v48 }
 0x7c6   : > { %v6243_v26 = vcombine.low %v18381_v9, %v5836_v45  ;;  %v6244_v29 = vcombine.high %v18381_v9, %v5836_v45  ;;  %v6183_v0 = vrot.slane %v6175_v43, %v16651_v48  ;;  %v6190_v23 = vrot.slane %v6176_v41, %v16651_v48 }
 0x7c7   : > { %v18488_v11 = vrot.slane %v6379_v53, %v16651_v48  ;;  %v18491_v55 = vrot.slane %v6380_v61, %v16651_v48 }
 0x7c8   : > { %v18494_v9 = vrot.slane %v6243_v26, %v16651_v48  ;;  %v18497_v58 = vrot.slane %v6244_v29, %v16651_v48 }
 0x7cc   : > { %v15485_v7 = vpop.f32.mrb[40].mxu0 }
 0x7cd   : > { %v6327_v27 = vcombine.low %v15469_v17, %v15485_v7  ;;  %v6328_v34 = vcombine.high %v15469_v17, %v15485_v7  ;;  %v5888_v31 = vpop.f32.mrb[41].mxu0 }
 0x7ce   : > { %v6191_v25 = vcombine.low %v5778_v13, %v5888_v31  ;;  %v6192_v6 = vcombine.high %v5778_v13, %v5888_v31  ;;  %v15486_v4 = vpop.f32.mrb[42].mxu0 }
 0x7cf   : > { %v6335_v24 = vrot.slane %v6327_v27, %v16651_v48  ;;  %v6342_v30 = vrot.slane %v6328_v34, %v16651_v48  ;;  %v6395_v28 = vcombine.low %v18471_v21, %v15486_v4  ;;  %v6396_v5 = vcombine.high %v18471_v21, %v15486_v4  ;;  %v5891_v12 = vpop.f32.mrb[43].mxu0 }
 0x7d0   : > { %v6199_v57 = vrot.slane %v6191_v25, %v16651_v48  ;;  %v6206_v42 = vrot.slane %v6192_v6, %v16651_v48  ;;  %v6259_v52 = vcombine.low %v18473_v1, %v5891_v12  ;;  %v6260_v40 = vcombine.high %v18473_v1, %v5891_v12 }
 0x7d1   : > { %v6343_v10 = vcombine.low %v6319_v50, %v6335_v24  ;;  %v6344_v63 = vcombine.high %v6319_v50, %v6335_v24  ;;  %v6359_v33 = vcombine.low %v6326_v2, %v6342_v30  ;;  %v6360_v37 = vcombine.high %v6326_v2, %v6342_v30 }
 0x7d2   : > { %v6207_v35 = vcombine.low %v6183_v0, %v6199_v57  ;;  %v6208_v46 = vcombine.high %v6183_v0, %v6199_v57  ;;  %v6223_v15 = vcombine.low %v6190_v23, %v6206_v42  ;;  %v6224_v54 = vcombine.high %v6190_v23, %v6206_v42 }
 0x7d3   : > { %v6351_v20 = vrot.slane %v6343_v10, %v16669_v56  ;;  %v6358_v38 = vrot.slane %v6344_v63, %v16669_v56  ;;  %v6367_v17 = vrot.slane %v6359_v33, %v16669_v56  ;;  %v6374_v13 = vrot.slane %v6360_v37, %v16669_v56 }
 0x7d4   : > { %v6215_v21 = vrot.slane %v6207_v35, %v16669_v56  ;;  %v6222_v1 = vrot.slane %v6208_v46, %v16669_v56  ;;  %v6231_v32 = vrot.slane %v6223_v15, %v16669_v56  ;;  %v6238_v44 = vrot.slane %v6224_v54, %v16669_v56 }
 0x7d5   : > { %v6855_v47 = vcombine.low %v6351_v20, %v6358_v38  ;;  %v14919_v49 = vcombine.high %v6351_v20, %v6358_v38  ;;  %v6871_v43 = vcombine.low %v6367_v17, %v6374_v13  ;;  %v14920_v41 = vcombine.high %v6367_v17, %v6374_v13 }
 0x7d6   : > { %v6719_v3 = vcombine.low %v6215_v21, %v6222_v1  ;;  %v14915_v53 = vcombine.high %v6215_v21, %v6222_v1  ;;  %v6735_v61 = vcombine.low %v6231_v32, %v6238_v44  ;;  %v14916_v45 = vcombine.high %v6231_v32, %v6238_v44 }
 0x7d7   : > { %v18516_v26 = vrot.slane %v6855_v47, %v16651_v48  ;;  %v18519_v29 = vrot.slane %v14919_v49, %v16651_v48  ;;  %v18522_v50 = vrot.slane %v6871_v43, %v16651_v48  ;;  %v18525_v2 = vrot.slane %v14920_v41, %v16651_v48 }
 0x7d8   : > { %v18528_v0 = vrot.slane %v6719_v3, %v16651_v48  ;;  %v18531_v23 = vrot.slane %v14915_v53, %v16651_v48  ;;  %v18534_v7 = vrot.slane %v6735_v61, %v16651_v48  ;;  %v18537_v27 = vrot.slane %v14916_v45, %v16651_v48 }
 0x7d9   : > { %v6403_v34 = vrot.slane %v6395_v28, %v16651_v48  ;;  %v6410_v31 = vrot.slane %v6396_v5, %v16651_v48  ;;  %v6267_v25 = vrot.slane %v6259_v52, %v16651_v48  ;;  %v6274_v6 = vrot.slane %v6260_v40, %v16651_v48 }
 0x7da   : > { %v6887_v4 = vcombine.low %v18516_v26, %v18519_v29  ;;  %v6903_v24 = vcombine.low %v18522_v50, %v18525_v2  ;;  %v6751_v30 = vcombine.low %v18528_v0, %v18531_v23  ;;  %v6767_v12 = vcombine.low %v18534_v7, %v18537_v27 }
 0x7db   : > { %v6411_v28 = vcombine.low %v18488_v11, %v6403_v34  ;;  %v6412_v5 = vcombine.high %v18488_v11, %v6403_v34  ;;  %v6427_v57 = vcombine.low %v18491_v55, %v6410_v31  ;;  %v6428_v42 = vcombine.high %v18491_v55, %v6410_v31 }
 0x7dc   : > { %v6275_v52 = vcombine.low %v18494_v9, %v6267_v25  ;;  %v6276_v40 = vcombine.high %v18494_v9, %v6267_v25  ;;  %v6291_v10 = vcombine.low %v18497_v58, %v6274_v6  ;;  %v6292_v63 = vcombine.high %v18497_v58, %v6274_v6 }
 0x7dd   : > { %v6419_v33 = vrot.slane %v6411_v28, %v16669_v56  ;;  %v6426_v37 = vrot.slane %v6412_v5, %v16669_v56  ;;  %v6435_v35 = vrot.slane %v6427_v57, %v16669_v56  ;;  %v6442_v11 = vrot.slane %v6428_v42, %v16669_v56 }
 0x7de   : > { %v6283_v46 = vrot.slane %v6275_v52, %v16669_v56  ;;  %v6290_v55 = vrot.slane %v6276_v40, %v16669_v56  ;;  %v6299_v15 = vrot.slane %v6291_v10, %v16669_v56  ;;  %v6306_v9 = vrot.slane %v6292_v63, %v16669_v56 }
 0x7df   : > { %v6923_v54 = vcombine.low %v6419_v33, %v6426_v37  ;;  %v14921_v20 = vcombine.high %v6419_v33, %v6426_v37  ;;  %v6939_v38 = vcombine.low %v6435_v35, %v6442_v11  ;;  %v14922_v58 = vcombine.high %v6435_v35, %v6442_v11 }
 0x7e0   : > { %v6787_v17 = vcombine.low %v6283_v46, %v6290_v55  ;;  %v14917_v13 = vcombine.high %v6283_v46, %v6290_v55  ;;  %v6803_v21 = vcombine.low %v6299_v15, %v6306_v9  ;;  %v14918_v1 = vcombine.high %v6299_v15, %v6306_v9 }
 0x7e1   : > { %v6930_v32 = vrot.slane %v6923_v54, %v16651_v48  ;;  %v6938_v44 = vrot.slane %v14921_v20, %v16651_v48  ;;  %v6946_v47 = vrot.slane %v6939_v38, %v16651_v48  ;;  %v6954_v49 = vrot.slane %v14922_v58, %v16651_v48 }
 0x7e2   : > { %v6794_v43 = vrot.slane %v6787_v17, %v16651_v48  ;;  %v6802_v41 = vrot.slane %v14917_v13, %v16651_v48  ;;  %v6810_v3 = vrot.slane %v6803_v21, %v16651_v48  ;;  %v6818_v53 = vrot.slane %v14918_v1, %v16651_v48 }
 0x7e3   : > { %v18576_v61 = vrot.slane %v6887_v4, %v16669_v56  ;;  %v18579_v45 = vrot.slane %v6903_v24, %v16669_v56  ;;  %v6955_v34 = vcombine.low %v6930_v32, %v6938_v44  ;;  %v6971_v31 = vcombine.low %v6946_v47, %v6954_v49 }
 0x7e4   : > { %v18582_v25 = vrot.slane %v6751_v30, %v16669_v56  ;;  %v18585_v6 = vrot.slane %v6767_v12, %v16669_v56  ;;  %v6819_v28 = vcombine.low %v6794_v43, %v6802_v41  ;;  %v6835_v5 = vcombine.low %v6810_v3, %v6818_v53 }
 0x7e5   : > { %v6920_v57 = vcombine.high %v18576_v61, %v18579_v45  ;;  %v18590_v42 = vrot.slane %v6955_v34, %v16669_v56  ;;  %v18593_v4 = vrot.slane %v6971_v31, %v16669_v56  ;;  %v6888_v24 = vcombine.high %v18516_v26, %v18519_v29 }
 0x7e6   : > { %v6784_v30 = vcombine.high %v18582_v25, %v18585_v6  ;;  %v18600_v12 = vrot.slane %v6819_v28, %v16669_v56  ;;  %v18603_v52 = vrot.slane %v6835_v5, %v16669_v56  ;;  %v6904_v40 = vcombine.high %v18522_v50, %v18525_v2 }
 0x7e7   : > { %v6988_v10 = vcombine.high %v18590_v42, %v18593_v4  ;;  %v6902_v63 = vrot.slane %v6888_v24, %v16669_v56  ;;  %v6956_v33 = vcombine.high %v6930_v32, %v6938_v44  ;;  %v6972_v37 = vcombine.high %v6946_v47, %v6954_v49 }
 0x7e8   : > { %v6852_v26 = vcombine.high %v18600_v12, %v18603_v52  ;;  %v6918_v29 = vrot.slane %v6904_v40, %v16669_v56  ;;  %v6752_v35 = vcombine.high %v18528_v0, %v18531_v23  ;;  %v6768_v11 = vcombine.high %v18534_v7, %v18537_v27 }
 0x7e9   : > { %v15811_v46 = vpack.i.bf16 %v6988_v10, %v6920_v57  ;;  %v6970_v50 = vrot.slane %v6956_v33, %v16669_v56  ;;  %v6986_v2 = vrot.slane %v6972_v37, %v16669_v56  ;;  %v6820_v55 = vcombine.high %v6794_v43, %v6802_v41 }
 0x7ea   : > { %v15821_v15 = vpack.i.bf16 %v6852_v26, %v6784_v30  ;;  %v6921_v9 = vcombine.low %v6902_v63, %v6918_v29  ;;  %v6766_v54 = vrot.slane %v6752_v35, %v16669_v56  ;;  %v6782_v20 = vrot.slane %v6768_v11, %v16669_v56 }
 0x7eb   : > { %15812 = vrot.lane.b32.xlu1 %v15811_v46, %s21180_s22  ;;  %v6989_v38 = vcombine.low %v6970_v50, %v6986_v2  ;;  %v6834_v0 = vrot.slane %v6820_v55, %v16669_v56  ;;  %v6836_v23 = vcombine.high %v6810_v3, %v6818_v53  ;;  %v6922_v58 = vcombine.high %v6902_v63, %v6918_v29 }
 0x7ec   : > { %15822 = vrot.lane.b32.xlu0 %v15821_v15, %s21180_s22  ;;  %v6785_v7 = vcombine.low %v6766_v54, %v6782_v20  ;;  %v6990_v27 = vcombine.high %v6970_v50, %v6986_v2  ;;  %v6786_v17 = vcombine.high %v6766_v54, %v6782_v20  ;;  %v6919_v13 = vcombine.low %v18576_v61, %v18579_v45 }
 0x7ed   : > { %v15816_v21 = vpack.i.bf16 %v6989_v38, %v6921_v9  ;;  %v6850_v1 = vrot.slane %v6836_v23, %v16669_v56  ;;  %v6987_v32 = vcombine.low %v18590_v42, %v18593_v4  ;;  %v6783_v44 = vcombine.low %v18582_v25, %v18585_v6  ;;  %v14923_v25 = vld [vmem:[%s21153_s9] ss:$0 sm:$0xff] }
 0x7ee   : > { %v15836_v47 = vpack.i.bf16 %v6990_v27, %v6922_v58  ;;  %v6851_v49 = vcombine.low %v18600_v12, %v18603_v52 }
 0x7ef   : > { %15817 = vrot.lane.b32.xlu1 %v15816_v21, %s21178_s4  ;;  %v6853_v43 = vcombine.low %v6834_v0, %v6850_v1  ;;  %v6854_v41 = vcombine.high %v6834_v0, %v6850_v1 }
 0x7f1   : > { %v15826_v3 = vpack.i.bf16 %v6853_v43, %v6785_v7  ;;  %v15831_v53 = vpack.i.bf16 %v6854_v41, %v6786_v17 }
 0x7f3   : > { %15827 = vrot.lane.b32.xlu0 %v15826_v3, %s21178_s4  ;;  %15837 = vrot.lane.b32.xlu1 %v15836_v47, %s21176_s29  ;;  %s21242_s4 = smov 96  }
 0x7f7   : > { %15832 = vrot.lane.b32.xlu0 %v15831_v53, %s21176_s29  ;;  %s21277_s29 = smov 8  }
 0x814   : > { %v15783_v34 = vpop.permute.xlu1 %15782 }
 0x815   : > { %v15793_v31 = vpop.permute.xlu0 %15792  ;;  %v15785_v42 = vunpack.i.h.bf16 %v15783_v34  ;;  %v15784_v4 = vunpack.i.l.bf16 %v15783_v34 }
 0x816   : > { %v15795_v5 = vunpack.i.h.bf16 %v15793_v31  ;;  %v15794_v57 = vunpack.i.l.bf16 %v15793_v31 }
 0x817   : > { %v7089_v8 = vsel %vm4606_vm1, %v6647_v22, %v15784_v4 }
 0x818   : > { %v15788_v28 = vpop.permute.xlu1 %15787  ;;  %v7088_v40 = vsel %vm4606_vm1, %v6579_v19, %v15795_v5  ;;  %v7087_v10 = vsel %vm4606_vm1, %v6511_v39, %v15794_v57  ;;  %v7090_v39 = vsel %vm4606_vm1, %v6715_v16, %v15785_v42 }
 0x819   : > { %v15790_v37 = vunpack.i.h.bf16 %v15788_v28  ;;  %v15789_v26 = vunpack.i.l.bf16 %v15788_v28 }
 0x81b   : > { %v7098_v55 = vsel %vm7095_vm2, %v7089_v8, %v15789_v26  ;;  %v7099_v15 = vsel %vm7095_vm2, %v7090_v39, %v15790_v37  ;;  %v16302_v8 = vld [vmem:[#allocation2 + $0x18] sm:$0xff] }
 0x81c   : > { %v15803_v24 = vpop.permute.xlu0 %15802  ;;  %v15798_v30 = vpop.permute.xlu1 %15797 }
 0x81d   : > { %v15800_v63 = vunpack.i.h.bf16 %v15798_v30  ;;  %v15799_v33 = vunpack.i.l.bf16 %v15798_v30  ;;  %v15805_v29 = vunpack.i.h.bf16 %v15803_v24  ;;  %v15804_v35 = vunpack.i.l.bf16 %v15803_v24 }
 0x81f   : > { %v7096_v11 = vsel %vm7095_vm2, %v7087_v10, %v15799_v33  ;;  %v7097_v46 = vsel %vm7095_vm2, %v7088_v40, %v15800_v63  ;;  %v16299_v40 = vld [vmem:[#allocation2] sm:$0xff]  ;;  %v16300_v33 = vld [vmem:[#allocation2 + $0x10] sm:$0xff] }
 0x820   : > { %v15808_v18 = vpop.permute.xlu1 %15807  ;;  %v7105_v36 = vsel %vm7104_vm3, %v7096_v11, %v15804_v35  ;;  %v7106_v60 = vsel %vm7104_vm3, %v7097_v46, %v15805_v29  ;;  %v16301_v29 = vld [vmem:[#allocation2 + $0x8] sm:$0xff] }
 0x821   : > { %v15810_v19 = vunpack.i.h.bf16 %v15808_v18  ;;  %v15809_v50 = vunpack.i.l.bf16 %v15808_v18  ;;  %v7113_v2 = vpack.c.bf16 %v7106_v60, %v7105_v36 }
 0x823   : > { %v7108_v14 = vsel %vm7104_vm3, %v7099_v15, %v15810_v19  ;;  %v7107_v51 = vsel %vm7104_vm3, %v7098_v55, %v15809_v50  ;;  %15491 = vmatprep.mubr.msk.bf16.mxu1 %vm764_vm0, %v7113_v2 }
 0x824   : > { %v7114_v22 = vpack.c.bf16 %v7108_v14, %v7107_v51  ;;  %v16303_v14 = vld [vmem:[#allocation2 + $0x20] sm:$0xff] }
 0x826   : > { %15492 = vmatmul.mubr.msk.bf16.vlgmr.msra.gmra.mrb[32].mxu1 %vm764_vm0, %v7114_v22 }
 0x85d   : > { %v15813_v9 = vpop.permute.xlu1 %15812 }
 0x85e   : > { %v15823_v59 = vpop.permute.xlu0 %15822  ;;  %v15815_v16 = vunpack.i.h.bf16 %v15813_v9  ;;  %v15814_v54 = vunpack.i.l.bf16 %v15813_v9 }
 0x85f   : > { %v15825_v0 = vunpack.i.h.bf16 %v15823_v59  ;;  %v15824_v23 = vunpack.i.l.bf16 %v15823_v59  ;;  %v16304_v59 = vld [vmem:[#allocation2 + $0x30] sm:$0xff] }
 0x860   : > { %v7093_v27 = vsel %vm4606_vm1, %v6919_v13, %v15814_v54  ;;  %v7094_v17 = vsel %vm4606_vm1, %v6987_v32, %v15815_v16  ;;  %v16305_v16 = vld [vmem:[#allocation2 + $0x28] sm:$0xff] }
 0x861   : > { %v15818_v62 = vpop.permute.xlu1 %15817  ;;  %v7092_v61 = vsel %vm4606_vm1, %v6851_v49, %v15825_v0  ;;  %v7091_v45 = vsel %vm4606_vm1, %v6783_v44, %v15824_v23 }
 0x862   : > { %v15820_v20 = vunpack.i.h.bf16 %v15818_v62  ;;  %v15819_v38 = vunpack.i.l.bf16 %v15818_v62 }
 0x864   : > { %v7102_v47 = vsel %vm7095_vm2, %v7093_v27, %v15819_v38  ;;  %v7103_v43 = vsel %vm7095_vm2, %v7094_v17, %v15820_v20  ;;  %v16306_v38 = vld [vmem:[#allocation2 + $0x38] sm:$0xff] }
 0x865   : > { %v15828_v58 = vpop.permute.xlu0 %15827  ;;  %v15838_v7 = vpop.permute.xlu1 %15837 }
 0x866   : > { %v15840_v21 = vunpack.i.h.bf16 %v15838_v7  ;;  %v15839_v1 = vunpack.i.l.bf16 %v15838_v7  ;;  %v15830_v41 = vunpack.i.h.bf16 %v15828_v58  ;;  %v15829_v3 = vunpack.i.l.bf16 %v15828_v58 }
 0x868   : > { %v7111_v53 = vsel %vm7104_vm3, %v7102_v47, %v15839_v1  ;;  %v7112_v34 = vsel %vm7104_vm3, %v7103_v43, %v15840_v21  ;;  %v7100_v5 = vsel %vm7095_vm2, %v7091_v45, %v15829_v3  ;;  %v7101_v57 = vsel %vm7095_vm2, %v7092_v61, %v15830_v41 }
 0x869   : > { %v15833_v31 = vpop.permute.xlu0 %15832  ;;  %v7116_v28 = vpack.c.bf16 %v7112_v34, %v7111_v53 }
 0x86a   : > { %v15835_v13 = vunpack.i.h.bf16 %v15833_v31  ;;  %v15834_v32 = vunpack.i.l.bf16 %v15833_v31 }
 0x86c   : > { %v7109_v42 = vsel %vm7104_vm3, %v7100_v5, %v15834_v32  ;;  %v7110_v4 = vsel %vm7104_vm3, %v7101_v57, %v15835_v13 }
 0x86d   : > { %v7115_v24 = vpack.c.bf16 %v7110_v4, %v7109_v42 }
 0x86f   : > { %15495 = vmatprep.mubr.msk.bf16.mxu1 %vm764_vm0, %v7115_v24  ;;  %v15913_v24 = vld [vmem:[%s21156_s12] sm:$0xff]  }
 0x870   : > { %15496 = vmatmul.mubr.msk.bf16.gmra.mrb[36].mxu1 %vm764_vm0, %v7116_v28  ;;  %15499 = vmatprep.subr.bf16.mxu0 %v15913_v24 }
 0x871   : > { %15500 = vmatpush3.bf16.msra.mxu0 %v15913_v24 }
 0x8f9   : > { %v15493_v6 = vpop.f32.mrb[32].mxu1 }
 0x8fa   : > { %v7186_v12 = vpop.f32.mrb[33].mxu1  ;;  %v7195_v52 = vadd.f32 %v15493_v6, %v14923_v25 }
 0x8fb   : > { %v7187_v44 = vadd.f32 %v14923_v25, %v7186_v12  ;;  %v15494_v49 = vpop.f32.mrb[34].mxu1 }
 0x8fc   : > { %v7189_v30 = vpop.f32.mrb[35].mxu1  ;;  %v18691_v37 = vadd.f32 %v16300_v33, %v7195_v52  ;;  %v7198_v26 = vadd.f32 %v15494_v49, %v14923_v25 }
 0x8fd   : > { %v18689_v10 = vadd.f32 %v16299_v40, %v7187_v44  ;;  %v7190_v63 = vadd.f32 %v14923_v25, %v7189_v30 }
 0x8fe   : > { %v18699_v18 = vadd.f32 %v16302_v8, %v7198_v26  ;;  %v7233_v36 = vsel %vm764_vm0, %v18691_v37, 0.0 }
 0x8ff   : > { %v18693_v35 = vadd.f32 %v16301_v29, %v7190_v63  ;;  %v7227_v11 = vsel %vm764_vm0, %v18689_v10, 0.0 }
 0x900   : > { %7228 = vadd.xlane.f32.xlu0 %v7227_v11  ;;  %v7236_v60 = vsel %vm764_vm0, %v18699_v18, 0.0 }
 0x901   : > { %v7230_v46 = vsel %vm764_vm0, %v18693_v35, 0.0 }
 0x902   : > { %7231 = vadd.xlane.f32.xlu1 %v7230_v46 }
 0x904   : > { %7234 = vadd.xlane.f32.xlu0 %v7233_v36 }
 0x908   : > { %7237 = vadd.xlane.f32.xlu0 %v7236_v60 }
 0x943   : > { %v15497_v39 = vpop.f32.mrb[36].mxu1 }
 0x944   : > { %v7202_v19 = vpop.f32.mrb[37].mxu1  ;;  %v7211_v50 = vadd.f32 %v15497_v39, %v14923_v25 }
 0x945   : > { %v7203_v2 = vadd.f32 %v14923_v25, %v7202_v19  ;;  %v15498_v55 = vpop.f32.mrb[38].mxu1 }
 0x946   : > { %v7205_v15 = vpop.f32.mrb[39].mxu1  ;;  %v7214_v22 = vadd.f32 %v15498_v55, %v14923_v25  ;;  %v18707_v62 = vadd.f32 %v16304_v59, %v7211_v50 }
 0x947   : > { %v18705_v51 = vadd.f32 %v16303_v14, %v7203_v2  ;;  %v7206_v9 = vadd.f32 %v14923_v25, %v7205_v15  ;;  %v15914_v25 = vld [vmem:[%s21156_s12 + $0x8] sm:$0xff]  }
 0x948   : > { %v18713_v0 = vadd.f32 %v16306_v38, %v7214_v22  ;;  %v7245_v58 = vsel %vm764_vm0, %v18707_v62, 0.0  ;;  %15501 = vmatprep.subr.bf16.mxu0 %v15914_v25 }
 0x949   : > { %v18709_v54 = vadd.f32 %v16305_v16, %v7206_v9  ;;  %v7239_v20 = vsel %vm764_vm0, %v18705_v51, 0.0  ;;  %15502 = vmatpush3.bf16.msra.mxu0 %v15914_v25 }
 0x94a   : > { %7240 = vadd.xlane.f32.xlu0 %v7239_v20  ;;  %v7248_v7 = vsel %vm764_vm0, %v18713_v0, 0.0 }
 0x94b   : > { %v7242_v23 = vsel %vm764_vm0, %v18709_v54, 0.0 }
 0x94c   : > { %7243 = vadd.xlane.f32.xlu1 %v7242_v23 }
 0x94e   : > { %7246 = vadd.xlane.f32.xlu0 %v7245_v58 }
 0x950   : > { %7249 = vadd.xlane.f32.xlu1 %v7248_v7 }
 0x98d   : > { %v7229_v27 = vpop.xlane.xlu0 %7228 }
 0x98e   : > { %v7251_v17 = vmul.f32 0.03125, %v7229_v27 }
 0x98f   : > { %v7232_v21 = vpop.xlane.xlu1 %7231 }
 0x990   : > { %v18722_v1 = vsub.f32 %v18689_v10, %v7251_v17  ;;  %v7252_v47 = vmul.f32 0.03125, %v7232_v21  ;;  %v14930_v17 = vld [vmem:[%s21154_s10] ss:$0 sm:$0xff] }
 0x991   : > { %v7235_v43 = vpop.xlane.xlu0 %7234 }
 0x992   : > { %v18725_v41 = vsub.f32 %v18693_v35, %v7252_v47  ;;  %v7253_v3 = vmul.f32 0.03125, %v7235_v43  ;;  %v7267_v53 = vmul.f32 %v18722_v1, %v18722_v1 }
 0x994   : > { %v18730_v34 = vsub.f32 %v18691_v37, %v7253_v3  ;;  %v7275_v31 = vsel %vm764_vm0, %v7267_v53, 0.0  ;;  %v7268_v28 = vmul.f32 %v18725_v41, %v18725_v41 }
 0x995   : > { %7276 = vadd.xlane.f32.xlu0 %v7275_v31  ;;  %v7238_v61 = vpop.xlane.xlu0 %7237  ;;  %v14931_v31 = vld [vmem:[%s21155_s11] ss:$0 sm:$0xff] }
 0x996   : > { %v7254_v45 = vmul.f32 0.03125, %v7238_v61  ;;  %v7278_v13 = vsel %vm764_vm0, %v7268_v28, 0.0  ;;  %v7269_v32 = vmul.f32 %v18730_v34, %v18730_v34 }
 0x997   : > { %7279 = vadd.xlane.f32.xlu1 %v7278_v13 }
 0x998   : > { %v18739_v5 = vsub.f32 %v18699_v18, %v7254_v45  ;;  %v7281_v57 = vsel %vm764_vm0, %v7269_v32, 0.0 }
 0x999   : > { %7282 = vadd.xlane.f32.xlu0 %v7281_v57 }
 0x99a   : > { %v7270_v42 = vmul.f32 %v18739_v5, %v18739_v5 }
 0x99c   : > { %v7284_v4 = vsel %vm764_vm0, %v7270_v42, 0.0 }
 0x99d   : > { %7285 = vadd.xlane.f32.xlu1 %v7284_v4 }
 0x9d7   : > { %v7241_v6 = vpop.xlane.xlu0 %7240 }
 0x9d8   : > { %v7255_v12 = vmul.f32 0.03125, %v7241_v6 }
 0x9d9   : > { %v7244_v52 = vpop.xlane.xlu1 %7243 }
 0x9da   : > { %v18752_v44 = vsub.f32 %v18705_v51, %v7255_v12  ;;  %v7256_v49 = vmul.f32 0.03125, %v7244_v52 }
 0x9db   : > { %v7247_v30 = vpop.xlane.xlu0 %7246 }
 0x9dc   : > { %v18755_v40 = vsub.f32 %v18709_v54, %v7256_v49  ;;  %v7257_v63 = vmul.f32 0.03125, %v7247_v30  ;;  %v7271_v33 = vmul.f32 %v18752_v44, %v18752_v44 }
 0x9dd   : > { %v7250_v26 = vpop.xlane.xlu1 %7249 }
 0x9de   : > { %v18760_v29 = vsub.f32 %v18707_v62, %v7257_v63  ;;  %v7258_v11 = vmul.f32 0.03125, %v7250_v26  ;;  %v7287_v46 = vsel %vm764_vm0, %v7271_v33, 0.0  ;;  %v7272_v8 = vmul.f32 %v18755_v40, %v18755_v40 }
 0x9df   : > { %7288 = vadd.xlane.f32.xlu0 %v7287_v46 }
 0x9e0   : > { %v18766_v36 = vsub.f32 %v18713_v0, %v7258_v11  ;;  %v7290_v60 = vsel %vm764_vm0, %v7272_v8, 0.0  ;;  %v7273_v39 = vmul.f32 %v18760_v29, %v18760_v29 }
 0x9e1   : > { %7291 = vadd.xlane.f32.xlu1 %v7290_v60 }
 0x9e2   : > { %v7293_v19 = vsel %vm764_vm0, %v7273_v39, 0.0  ;;  %v7274_v50 = vmul.f32 %v18766_v36, %v18766_v36 }
 0x9e3   : > { %7294 = vadd.xlane.f32.xlu0 %v7293_v19 }
 0x9e4   : > { %v7296_v2 = vsel %vm764_vm0, %v7274_v50, 0.0 }
 0x9e5   : > { %7297 = vadd.xlane.f32.xlu1 %v7296_v2 }
 0xa22   : > { %v7277_v55 = vpop.xlane.xlu0 %7276 }
 0xa23   : > { %v7299_v15 = vmul.f32 0.03125, %v7277_v55 }
 0xa24   : > { %v7280_v14 = vpop.xlane.xlu1 %7279 }
 0xa25   : > { %v7307_v22 = vadd.f32 1e-05, %v7299_v15  ;;  %v7300_v9 = vmul.f32 0.03125, %v7280_v14 }
 0xa26   : > { %v7283_v59 = vpop.xlane.xlu0 %7282 }
 0xa27   : > { %16083 = vrsqrt.f32 %v7307_v22  ;;  %v7308_v16 = vadd.f32 1e-05, %v7300_v9  ;;  %v7301_v20 = vmul.f32 0.03125, %v7283_v59 }
 0xa29   : > { %16085 = vrsqrt.f32 %v7308_v16  ;;  %v7309_v38 = vadd.f32 1e-05, %v7301_v20 }
 0xa2a   : > { %v7286_v23 = vpop.xlane.xlu1 %7285 }
 0xa2b   : > { %16087 = vrsqrt.f32 %v7309_v38  ;;  %v7302_v58 = vmul.f32 0.03125, %v7286_v23 }
 0xa2d   : > { %v7310_v7 = vadd.f32 1e-05, %v7302_v58 }
 0xa2f   : > { %16089 = vrsqrt.f32 %v7310_v7  ;;  %v15918_v7 = vld [vmem:[%s21158_s14 + $0x18] sm:$0xff]  }
 0xa31   : > { %v16084_v27 = vpop.eup %16083 }
 0xa32   : > { %v7323_v21 = vmul.f32 %v16084_v27, %v18722_v1  ;;  %v15919_v27 = vld [vmem:[%s21158_s14 + $0x20] sm:$0xff]  }
 0xa33   : > { %v16086_v47 = vpop.eup %16085 }
 0xa34   : > { %v7324_v43 = vmul.f32 %v16086_v47, %v18725_v41  ;;  %v7337_v3 = vmul.f32 %v14930_v17, %v7323_v21  ;;  %v15921_v21 = vld [vmem:[%s21158_s14 + $0x30] sm:$0xff]   ;;  %v15922_v47 = vld [vmem:[%s21158_s14 + $0x38] sm:$0xff]  }
 0xa35   : > { %v16088_v53 = vpop.eup %16087 }
 0xa36   : > { %v7325_v28 = vmul.f32 %v16088_v53, %v18730_v34  ;;  %v7338_v61 = vmul.f32 %v14930_v17, %v7324_v43  ;;  %v7351_v45 = vadd.f32 %v14931_v31, %v7337_v3  ;;  %v14932_v43 = vld [vmem:[%s21157_s13] ss:$0 sm:$0xff] }
 0xa38   : > { %v7352_v13 = vadd.f32 %v14931_v31, %v7338_v61  ;;  %v7339_v57 = vmul.f32 %v14930_v17, %v7325_v28 }
 0xa39   : > { %v16090_v32 = vpop.eup %16089 }
 0xa3a   : > { %v7326_v42 = vmul.f32 %v16090_v32, %v18739_v5  ;;  %v7359_v4 = vpack.c.bf16 %v7352_v13, %v7351_v45  ;;  %v7353_v41 = vadd.f32 %v14931_v31, %v7339_v57 }
 0xa3c   : > { %v7340_v1 = vmul.f32 %v14930_v17, %v7326_v42  ;;  %15503 = vmatprep.mubr.msk.bf16.mxu0 %vm764_vm0, %v7359_v4 }
 0xa3e   : > { %v7354_v24 = vadd.f32 %v14931_v31, %v7340_v1 }
 0xa40   : > { %v7360_v25 = vpack.c.bf16 %v7354_v24, %v7353_v41 }
 0xa42   : > { %15504 = vmatmul.mubr.msk.bf16.vlgmr.msra.gmra.mrb[44].mxu0 %vm764_vm0, %v7360_v25 }
 0xa6c   : > { %v7289_v6 = vpop.xlane.xlu0 %7288 }
 0xa6d   : > { %v7303_v12 = vmul.f32 0.03125, %v7289_v6 }
 0xa6e   : > { %v7292_v52 = vpop.xlane.xlu1 %7291 }
 0xa6f   : > { %v7311_v34 = vadd.f32 1e-05, %v7303_v12  ;;  %v7304_v49 = vmul.f32 0.03125, %v7292_v52 }
 0xa70   : > { %v7295_v30 = vpop.xlane.xlu0 %7294 }
 0xa71   : > { %16091 = vrsqrt.f32 %v7311_v34  ;;  %v7312_v63 = vadd.f32 1e-05, %v7304_v49  ;;  %v7305_v33 = vmul.f32 0.03125, %v7295_v30 }
 0xa72   : > { %v7298_v26 = vpop.xlane.xlu1 %7297 }
 0xa73   : > { %16093 = vrsqrt.f32 %v7312_v63  ;;  %v7313_v5 = vadd.f32 1e-05, %v7305_v33  ;;  %v7306_v11 = vmul.f32 0.03125, %v7298_v26 }
 0xa75   : > { %16095 = vrsqrt.f32 %v7313_v5  ;;  %v7314_v46 = vadd.f32 1e-05, %v7306_v11 }
 0xa77   : > { %16097 = vrsqrt.f32 %v7314_v46 }
 0xa7b   : > { %v16092_v8 = vpop.eup %16091 }
 0xa7c   : > { %v7327_v60 = vmul.f32 %v16092_v8, %v18752_v44 }
 0xa7d   : > { %v16094_v39 = vpop.eup %16093 }
 0xa7e   : > { %v7328_v19 = vmul.f32 %v16094_v39, %v18755_v40  ;;  %v7341_v50 = vmul.f32 %v14930_v17, %v7327_v60  ;;  %v15915_v40 = vld [vmem:[%s21158_s14] sm:$0xff]  }
 0xa7f   : > { %v16096_v2 = vpop.eup %16095  ;;  %15511 = vmatprep.subr.bf16.mxu1 %v15915_v40 }
 0xa80   : > { %v7342_v55 = vmul.f32 %v14930_v17, %v7328_v19  ;;  %v7329_v15 = vmul.f32 %v16096_v2, %v18760_v29  ;;  %v7355_v22 = vadd.f32 %v14931_v31, %v7341_v50  ;;  %v15916_v29 = vld [vmem:[%s21158_s14 + $0x8] sm:$0xff]   ;;  %15512 = vmatpush3.bf16.msra.mxu1 %v15915_v40 }
 0xa81   : > { %v16098_v14 = vpop.eup %16097  ;;  %15513 = vmatprep.subr.bf16.mxu1 %v15916_v29 }
 0xa82   : > { %v7356_v9 = vadd.f32 %v14931_v31, %v7342_v55  ;;  %v7330_v59 = vmul.f32 %v16098_v14, %v18766_v36  ;;  %v7343_v16 = vmul.f32 %v14930_v17, %v7329_v15  ;;  %v15917_v36 = vld [vmem:[%s21158_s14 + $0x10] sm:$0xff]  }
 0xa84   : > { %v7361_v20 = vpack.c.bf16 %v7356_v9, %v7355_v22  ;;  %v7344_v38 = vmul.f32 %v14930_v17, %v7330_v59  ;;  %v7357_v23 = vadd.f32 %v14931_v31, %v7343_v16  ;;  %15514 = vmatpush3.bf16.msra.mxu1 %v15916_v29  ;;  %v15920_v17 = vld [vmem:[%s21158_s14 + $0x28] sm:$0xff]  }
 0xa85   : > { %15515 = vmatprep.subr.bf16.mxu1 %v15917_v36 }
 0xa86   : > { %15507 = vmatprep.mubr.msk.bf16.mxu0 %vm764_vm0, %v7361_v20  ;;  %v7358_v44 = vadd.f32 %v14931_v31, %v7344_v38 }
 0xa88   : > { %v7362_v58 = vpack.c.bf16 %v7358_v44, %v7357_v23  ;;  %15516 = vmatpush3.bf16.msra.mxu1 %v15917_v36 }
 0xa89   : > { %15517 = vmatprep.subr.bf16.mxu1 %v15918_v7 }
 0xa8a   : > { %15508 = vmatmul.mubr.msk.bf16.gmra.mrb[48].mxu0 %vm764_vm0, %v7362_v58 }
 0xa8c   : > { %15518 = vmatpush3.bf16.msra.mxu1 %v15918_v7 }
 0xa8d   : > { %15519 = vmatprep.subr.bf16.mxu1 %v15919_v27 }
 0xa90   : > { %15520 = vmatpush3.bf16.msra.mxu1 %v15919_v27 }
 0xa91   : > { %15521 = vmatprep.subr.bf16.mxu1 %v15920_v17 }
 0xa94   : > { %15522 = vmatpush3.bf16.msra.mxu1 %v15920_v17 }
 0xa95   : > { %15523 = vmatprep.subr.bf16.mxu1 %v15921_v21 }
 0xa98   : > { %15524 = vmatpush3.bf16.msra.mxu1 %v15921_v21 }
 0xa99   : > { %15525 = vmatprep.subr.bf16.mxu1 %v15922_v47 }
 0xa9c   : > { %15526 = vmatpush3.bf16.msra.mxu1 %v15922_v47 }
 0xb15   : > { %v15505_v3 = vpop.f32.mrb[44].mxu0 }
 0xb16   : > { %v7441_v53 = vadd.f32 %v15505_v3, %v14932_v43  ;;  %v7432_v31 = vpop.f32.mrb[45].mxu0 }
 0xb17   : > { %v7433_v28 = vadd.f32 %v14932_v43, %v7432_v31  ;;  %v15506_v61 = vpop.f32.mrb[46].mxu0 }
 0xb18   : > { %v7473_v45 = vmul.f32 0.044715, %v7441_v53  ;;  %v7444_v13 = vadd.f32 %v15506_v61, %v14932_v43  ;;  %v7435_v32 = vpop.f32.mrb[47].mxu0  ;;  %v7465_v15 = vmul.f32 0.5, %v7441_v53 }
 0xb19   : > { %v7471_v57 = vmul.f32 0.044715, %v7433_v28  ;;  %v7436_v42 = vadd.f32 %v14932_v43, %v7435_v32  ;;  %v7463_v9 = vmul.f32 0.5, %v7433_v28 }
 0xb1a   : > { %v7481_v4 = vmul.f32 %v7473_v45, %v7441_v53  ;;  %v7474_v1 = vmul.f32 0.044715, %v7444_v13  ;;  %v7466_v14 = vmul.f32 0.5, %v7444_v13 }
 0xb1b   : > { %v7479_v41 = vmul.f32 %v7471_v57, %v7433_v28  ;;  %v7472_v24 = vmul.f32 0.044715, %v7436_v42  ;;  %v7464_v59 = vmul.f32 0.5, %v7436_v42 }
 0xb1c   : > { %v7489_v25 = vmul.f32 %v7481_v4, %v7441_v53  ;;  %v7482_v6 = vmul.f32 %v7474_v1, %v7444_v13 }
 0xb1d   : > { %v7487_v12 = vmul.f32 %v7479_v41, %v7433_v28  ;;  %v7480_v52 = vmul.f32 %v7472_v24, %v7436_v42 }
 0xb1e   : > { %v7497_v34 = vadd.f32 %v7489_v25, %v7441_v53  ;;  %v7490_v49 = vmul.f32 %v7482_v6, %v7444_v13 }
 0xb1f   : > { %v7488_v30 = vmul.f32 %v7480_v52, %v7436_v42  ;;  %v7495_v63 = vadd.f32 %v7487_v12, %v7433_v28 }
 0xb20   : > { %v7505_v33 = vmul.f32 0.7978846, %v7497_v34  ;;  %v7498_v26 = vadd.f32 %v7490_v49, %v7444_v13 }
 0xb21   : > { %v7496_v5 = vadd.f32 %v7488_v30, %v7436_v42  ;;  %v7503_v11 = vmul.f32 0.7978846, %v7495_v63 }
 0xb22   : > { %16099 = vtanh.f32 %v7505_v33  ;;  %v7506_v46 = vmul.f32 0.7978846, %v7498_v26 }
 0xb23   : > { %v7504_v8 = vmul.f32 0.7978846, %v7496_v5  ;;  %16101 = vtanh.f32 %v7503_v11 }
 0xb24   : > { %16103 = vtanh.f32 %v7506_v46 }
 0xb25   : > { %16105 = vtanh.f32 %v7504_v8 }
 0xb2c   : > { %v16100_v60 = vpop.eup %16099 }
 0xb2d   : > { %v16102_v39 = vpop.eup %16101  ;;  %v7521_v19 = vadd.f32 1.0, %v16100_v60 }
 0xb2e   : > { %v16104_v50 = vpop.eup %16103  ;;  %v7519_v2 = vadd.f32 1.0, %v16102_v39 }
 0xb2f   : > { %v16106_v55 = vpop.eup %16105  ;;  %v7522_v22 = vadd.f32 1.0, %v16104_v50  ;;  %v7529_v20 = vmul.f32 %v7521_v19, %v7465_v15 }
 0xb30   : > { %v7520_v16 = vadd.f32 1.0, %v16106_v55  ;;  %v7527_v23 = vmul.f32 %v7519_v2, %v7463_v9 }
 0xb31   : > { %v7530_v38 = vmul.f32 %v7522_v22, %v7466_v14 }
 0xb32   : > { %v7528_v44 = vmul.f32 %v7520_v16, %v7464_v59  ;;  %v14939_v59 = vld [vmem:[%s21159_s15] ss:$0 sm:$0xff] }
 0xb33   : > { %v7536_v58 = vpack.c.bf16 %v7530_v38, %v7529_v20 }
 0xb34   : > { %v7535_v40 = vpack.c.bf16 %v7528_v44, %v7527_v23 }
 0xb36   : > { %15527 = vmatprep.mubr.bf16.mxu1 %v7535_v40 }
 0xb37   : > { %15528 = vmatmul.mubr.bf16.vlgmr.msra.gmra.mrb[40].mxu1 %v7536_v58 }
 0xb5d   : > { %v15509_v29 = vpop.f32.mrb[48].mxu0 }
 0xb5e   : > { %v7457_v36 = vadd.f32 %v15509_v29, %v14932_v43  ;;  %v7448_v7 = vpop.f32.mrb[49].mxu0 }
 0xb5f   : > { %v7449_v27 = vadd.f32 %v14932_v43, %v7448_v7  ;;  %v15510_v17 = vpop.f32.mrb[50].mxu0 }
 0xb60   : > { %v7477_v21 = vmul.f32 0.044715, %v7457_v36  ;;  %v7460_v47 = vadd.f32 %v15510_v17, %v14932_v43  ;;  %v7451_v3 = vpop.f32.mrb[51].mxu0  ;;  %v7469_v46 = vmul.f32 0.5, %v7457_v36 }
 0xb61   : > { %v7475_v53 = vmul.f32 0.044715, %v7449_v27  ;;  %v7452_v31 = vadd.f32 %v14932_v43, %v7451_v3  ;;  %v7467_v39 = vmul.f32 0.5, %v7449_v27 }
 0xb62   : > { %v7485_v28 = vmul.f32 %v7477_v21, %v7457_v36  ;;  %v7478_v61 = vmul.f32 0.044715, %v7460_v47  ;;  %v7470_v8 = vmul.f32 0.5, %v7460_v47 }
 0xb63   : > { %v7483_v45 = vmul.f32 %v7475_v53, %v7449_v27  ;;  %v7476_v13 = vmul.f32 0.044715, %v7452_v31  ;;  %v7468_v19 = vmul.f32 0.5, %v7452_v31 }
 0xb64   : > { %v7493_v32 = vmul.f32 %v7485_v28, %v7457_v36  ;;  %v7486_v57 = vmul.f32 %v7478_v61, %v7460_v47 }
 0xb65   : > { %v7491_v42 = vmul.f32 %v7483_v45, %v7449_v27  ;;  %v7484_v4 = vmul.f32 %v7476_v13, %v7452_v31 }
 0xb66   : > { %v7494_v1 = vmul.f32 %v7486_v57, %v7460_v47  ;;  %v7501_v41 = vadd.f32 %v7493_v32, %v7457_v36 }
 0xb67   : > { %v7492_v24 = vmul.f32 %v7484_v4, %v7452_v31  ;;  %v7499_v25 = vadd.f32 %v7491_v42, %v7449_v27 }
 0xb68   : > { %v7502_v6 = vadd.f32 %v7494_v1, %v7460_v47  ;;  %v7509_v12 = vmul.f32 0.7978846, %v7501_v41 }
 0xb69   : > { %v7500_v52 = vadd.f32 %v7492_v24, %v7452_v31  ;;  %v7507_v34 = vmul.f32 0.7978846, %v7499_v25 }
 0xb6a   : > { %v7510_v49 = vmul.f32 0.7978846, %v7502_v6  ;;  %16107 = vtanh.f32 %v7509_v12 }
 0xb6b   : > { %v7508_v30 = vmul.f32 0.7978846, %v7500_v52  ;;  %16109 = vtanh.f32 %v7507_v34 }
 0xb6c   : > { %16111 = vtanh.f32 %v7510_v49 }
 0xb6d   : > { %16113 = vtanh.f32 %v7508_v30 }
 0xb74   : > { %v16108_v43 = vpop.eup %16107 }
 0xb75   : > { %v16110_v63 = vpop.eup %16109  ;;  %v7525_v33 = vadd.f32 1.0, %v16108_v43 }
 0xb76   : > { %v16112_v26 = vpop.eup %16111  ;;  %v7523_v5 = vadd.f32 1.0, %v16110_v63 }
 0xb77   : > { %v16114_v11 = vpop.eup %16113  ;;  %v7526_v60 = vadd.f32 1.0, %v16112_v26  ;;  %v7533_v2 = vmul.f32 %v7525_v33, %v7469_v46 }
 0xb78   : > { %v7524_v50 = vadd.f32 1.0, %v16114_v11  ;;  %v7531_v15 = vmul.f32 %v7523_v5, %v7467_v39  ;;  %v15923_v39 = vld [vmem:[%s21150_s6 + $0x10] sm:$0xff]  }
 0xb79   : > { %v7534_v55 = vmul.f32 %v7526_v60, %v7470_v8  ;;  %15535 = vmatprep.subr.bf16.mxu0 %v15923_v39 }
 0xb7a   : > { %v7532_v14 = vmul.f32 %v7524_v50, %v7468_v19  ;;  %v15924_v19 = vld [vmem:[%s21150_s6 + $0x18] sm:$0xff]   ;;  %15536 = vmatpush3.bf16.msra.mxu0 %v15923_v39 }
 0xb7b   : > { %v7538_v22 = vpack.c.bf16 %v7534_v55, %v7533_v2  ;;  %15537 = vmatprep.subr.bf16.mxu0 %v15924_v19 }
 0xb7c   : > { %v7537_v9 = vpack.c.bf16 %v7532_v14, %v7531_v15 }
 0xb7e   : > { %15531 = vmatprep.mubr.bf16.mxu1 %v7537_v9  ;;  %15538 = vmatpush3.bf16.msra.mxu0 %v15924_v19 }
 0xb7f   : > { %15532 = vmatmul.mubr.bf16.gmra.mrb[44].mxu1 %v7538_v22 }
 0xc0a   : > { %v15529_v16 = vpop.f32.mrb[40].mxu1 }
 0xc0b   : > { %v7644_v20 = vpop.f32.mrb[41].mxu1  ;;  %v7653_v38 = vadd.f32 %v15529_v16, %v14939_v59 }
 0xc0c   : > { %v7645_v23 = vadd.f32 %v14939_v59, %v7644_v20  ;;  %v15530_v44 = vpop.f32.mrb[42].mxu1 }
 0xc0d   : > { %v7647_v58 = vpop.f32.mrb[43].mxu1  ;;  %v7656_v29 = vadd.f32 %v15530_v44, %v14939_v59  ;;  %v18827_v7 = vadd.f32 %v7653_v38, %v18691_v37 }
 0xc0e   : > { %v18824_v40 = vadd.f32 %v7645_v23, %v18689_v10  ;;  %v7648_v36 = vadd.f32 %v14939_v59, %v7647_v58 }
 0xc0f   : > { %21233 = vst [vmem:[#allocation6_spill] sm:$0xff] %v18827_v7  ;;  %v18835_v21 = vadd.f32 %v7656_v29, %v18699_v18  ;;  %v7693_v10 = vsel %vm764_vm0, %v18827_v7, 0.0 }
 0xc10   : > { %21232 = vst [vmem:[#allocation3_spill] sm:$0xff] %v18824_v40  ;;  %v18830_v27 = vadd.f32 %v7648_v36, %v18693_v35  ;;  %v7687_v17 = vsel %vm764_vm0, %v18824_v40, 0.0 }
 0xc11   : > { %7688 = vadd.xlane.f32.xlu0 %v7687_v17  ;;  %21235 = vst [vmem:[#allocation5_spill] sm:$0xff] %v18835_v21  ;;  %v7696_v37 = vsel %vm764_vm0, %v18835_v21, 0.0 }
 0xc12   : > { %21234 = vst [vmem:[#allocation4_spill] sm:$0xff] %v18830_v27  ;;  %v7690_v47 = vsel %vm764_vm0, %v18830_v27, 0.0 }
 0xc13   : > { %7691 = vadd.xlane.f32.xlu1 %v7690_v47 }
 0xc15   : > { %7694 = vadd.xlane.f32.xlu0 %v7693_v10 }
 0xc17   : > { %7697 = vadd.xlane.f32.xlu1 %v7696_v37 }
 0xc52   : > { %v15533_v35 = vpop.f32.mrb[44].mxu1 }
 0xc53   : > { %v7660_v3 = vpop.f32.mrb[45].mxu1  ;;  %v7669_v53 = vadd.f32 %v15533_v35, %v14939_v59 }
 0xc54   : > { %v7661_v31 = vadd.f32 %v14939_v59, %v7660_v3  ;;  %v15534_v28 = vpop.f32.mrb[46].mxu1 }
 0xc55   : > { %v7663_v61 = vpop.f32.mrb[47].mxu1  ;;  %v7672_v45 = vadd.f32 %v15534_v28, %v14939_v59  ;;  %v18847_v32 = vadd.f32 %v7669_v53, %v18707_v62 }
 0xc56   : > { %v18844_v18 = vadd.f32 %v7661_v31, %v18705_v51  ;;  %v7664_v13 = vadd.f32 %v14939_v59, %v7663_v61 }
 0xc57   : > { %21237 = vst [vmem:[#allocation8_spill] sm:$0xff] %v18847_v32  ;;  %v18855_v4 = vadd.f32 %v7672_v45, %v18713_v0  ;;  %v7705_v51 = vsel %vm764_vm0, %v18847_v32, 0.0 }
 0xc58   : > { %21236 = vst [vmem:[#allocation7_spill] sm:$0xff] %v18844_v18  ;;  %v18850_v57 = vadd.f32 %v7664_v13, %v18709_v54  ;;  %v7699_v42 = vsel %vm764_vm0, %v18844_v18, 0.0 }
 0xc59   : > { %7700 = vadd.xlane.f32.xlu0 %v7699_v42  ;;  %21239 = vst [vmem:[#allocation10_spill] sm:$0xff] %v18855_v4  ;;  %v7708_v62 = vsel %vm764_vm0, %v18855_v4, 0.0 }
 0xc5a   : > { %21238 = vst [vmem:[#allocation9_spill] sm:$0xff] %v18850_v57  ;;  %v7702_v1 = vsel %vm764_vm0, %v18850_v57, 0.0 }
 0xc5b   : > { %7703 = vadd.xlane.f32.xlu1 %v7702_v1 }
 0xc5d   : > { %7706 = vadd.xlane.f32.xlu0 %v7705_v51 }
 0xc5f   : > { %7709 = vadd.xlane.f32.xlu1 %v7708_v62 }
 0xc9e   : > { %v7689_v54 = vpop.xlane.xlu0 %7688 }
 0xc9f   : > { %v7711_v41 = vmul.f32 0.03125, %v7689_v54 }
 0xca0   : > { %v7692_v24 = vpop.xlane.xlu1 %7691 }
 0xca1   : > { %v18864_v25 = vsub.f32 %v18824_v40, %v7711_v41  ;;  %v7712_v0 = vmul.f32 0.03125, %v7692_v24  ;;  %v14950_v41 = vld [vmem:[%s21218_s27 + $0x1] ss:$0 sm:$0xff] }
 0xca2   : > { %v7695_v6 = vpop.xlane.xlu0 %7694 }
 0xca3   : > { %v18867_v12 = vsub.f32 %v18830_v27, %v7712_v0  ;;  %v7713_v52 = vmul.f32 0.03125, %v7695_v6  ;;  %v7727_v34 = vmul.f32 %v18864_v25, %v18864_v25 }
 0xca4   : > { %v7698_v49 = vpop.xlane.xlu1 %7697 }
 0xca5   : > { %v18872_v30 = vsub.f32 %v18827_v7, %v7713_v52  ;;  %v7714_v43 = vmul.f32 0.03125, %v7698_v49  ;;  %v7735_v63 = vsel %vm764_vm0, %v7727_v34, 0.0  ;;  %v7728_v33 = vmul.f32 %v18867_v12, %v18867_v12  ;;  %v14951_v49 = vld [vmem:[%s21149_s5 + $0x1] ss:$0 sm:$0xff] }
 0xca6   : > { %7736 = vadd.xlane.f32.xlu0 %v7735_v63 }
 0xca7   : > { %v18878_v26 = vsub.f32 %v18835_v21, %v7714_v43  ;;  %v7738_v5 = vsel %vm764_vm0, %v7728_v33, 0.0  ;;  %v7729_v11 = vmul.f32 %v18872_v30, %v18872_v30 }
 0xca8   : > { %7739 = vadd.xlane.f32.xlu1 %v7738_v5 }
 0xca9   : > { %v7741_v46 = vsel %vm764_vm0, %v7729_v11, 0.0  ;;  %v7730_v8 = vmul.f32 %v18878_v26, %v18878_v26 }
 0xcaa   : > { %7742 = vadd.xlane.f32.xlu0 %v7741_v46 }
 0xcab   : > { %v7744_v60 = vsel %vm764_vm0, %v7730_v8, 0.0 }
 0xcac   : > { %7745 = vadd.xlane.f32.xlu1 %v7744_v60 }
 0xce6   : > { %v7701_v50 = vpop.xlane.xlu0 %7700 }
 0xce7   : > { %v7715_v2 = vmul.f32 0.03125, %v7701_v50 }
 0xce8   : > { %v7704_v55 = vpop.xlane.xlu1 %7703 }
 0xce9   : > { %v18894_v15 = vsub.f32 %v18844_v18, %v7715_v2  ;;  %v7716_v14 = vmul.f32 0.03125, %v7704_v55 }
 0xcea   : > { %v7707_v22 = vpop.xlane.xlu0 %7706 }
 0xceb   : > { %v18897_v9 = vsub.f32 %v18850_v57, %v7716_v14  ;;  %v7717_v59 = vmul.f32 0.03125, %v7707_v22  ;;  %v7731_v16 = vmul.f32 %v18894_v15, %v18894_v15 }
 0xcec   : > { %v7710_v20 = vpop.xlane.xlu1 %7709 }
 0xced   : > { %v18902_v38 = vsub.f32 %v18847_v32, %v7717_v59  ;;  %v7718_v23 = vmul.f32 0.03125, %v7710_v20  ;;  %v7747_v44 = vsel %vm764_vm0, %v7731_v16, 0.0  ;;  %v7732_v58 = vmul.f32 %v18897_v9, %v18897_v9 }
 0xcee   : > { %7748 = vadd.xlane.f32.xlu0 %v7747_v44 }
 0xcef   : > { %v18908_v29 = vsub.f32 %v18855_v4, %v7718_v23  ;;  %v7750_v36 = vsel %vm764_vm0, %v7732_v58, 0.0  ;;  %v7733_v17 = vmul.f32 %v18902_v38, %v18902_v38 }
 0xcf0   : > { %7751 = vadd.xlane.f32.xlu1 %v7750_v36 }
 0xcf1   : > { %v7753_v47 = vsel %vm764_vm0, %v7733_v17, 0.0  ;;  %v7734_v10 = vmul.f32 %v18908_v29, %v18908_v29 }
 0xcf2   : > { %7754 = vadd.xlane.f32.xlu0 %v7753_v47 }
 0xcf3   : > { %v7756_v37 = vsel %vm764_vm0, %v7734_v10, 0.0 }
 0xcf4   : > { %7757 = vadd.xlane.f32.xlu1 %v7756_v37 }
 0xd33   : > { %v7737_v35 = vpop.xlane.xlu0 %7736 }
 0xd34   : > { %v7759_v3 = vmul.f32 0.03125, %v7737_v35 }
 0xd35   : > { %v7740_v53 = vpop.xlane.xlu1 %7739 }
 0xd36   : > { %v7767_v31 = vadd.f32 1e-05, %v7759_v3  ;;  %v7760_v28 = vmul.f32 0.03125, %v7740_v53 }
 0xd37   : > { %v7743_v61 = vpop.xlane.xlu0 %7742 }
 0xd38   : > { %16115 = vrsqrt.f32 %v7767_v31  ;;  %v7768_v45 = vadd.f32 1e-05, %v7760_v28  ;;  %v7761_v13 = vmul.f32 0.03125, %v7743_v61 }
 0xd39   : > { %v7746_v42 = vpop.xlane.xlu1 %7745 }
 0xd3a   : > { %16117 = vrsqrt.f32 %v7768_v45  ;;  %v7769_v1 = vadd.f32 1e-05, %v7761_v13  ;;  %v7762_v51 = vmul.f32 0.03125, %v7746_v42 }
 0xd3c   : > { %16119 = vrsqrt.f32 %v7769_v1  ;;  %v7770_v62 = vadd.f32 1e-05, %v7762_v51 }
 0xd3e   : > { %16121 = vrsqrt.f32 %v7770_v62 }
 0xd42   : > { %v16116_v54 = vpop.eup %16115 }
 0xd43   : > { %v7783_v24 = vmul.f32 %v16116_v54, %v18864_v25 }
 0xd44   : > { %v16118_v0 = vpop.eup %16117 }
 0xd45   : > { %v7784_v6 = vmul.f32 %v16118_v0, %v18867_v12  ;;  %v7797_v52 = vmul.f32 %v14950_v41, %v7783_v24 }
 0xd46   : > { %v16120_v34 = vpop.eup %16119 }
 0xd47   : > { %v7785_v43 = vmul.f32 %v16120_v34, %v18872_v30  ;;  %v7798_v63 = vmul.f32 %v14950_v41, %v7784_v6  ;;  %v7811_v46 = vadd.f32 %v14951_v49, %v7797_v52 }
 0xd48   : > { %v16122_v33 = vpop.eup %16121 }
 0xd49   : > { %v7799_v5 = vmul.f32 %v14950_v41, %v7785_v43  ;;  %v7786_v11 = vmul.f32 %v16122_v33, %v18878_v26  ;;  %v7812_v8 = vadd.f32 %v14951_v49, %v7798_v63 }
 0xd4b   : > { %v7800_v60 = vmul.f32 %v14950_v41, %v7786_v11  ;;  %v7819_v25 = vpack.c.bf16 %v7812_v8, %v7811_v46  ;;  %v7813_v39 = vadd.f32 %v14951_v49, %v7799_v5 }
 0xd4d   : > { %v7814_v19 = vadd.f32 %v14951_v49, %v7800_v60  ;;  %15539 = vmatprep.mubr.msk.bf16.mxu0 %vm764_vm0, %v7819_v25 }
 0xd4f   : > { %v7820_v12 = vpack.c.bf16 %v7814_v19, %v7813_v39 }
 0xd51   : > { %15540 = vmatmul.mubr.msk.bf16.vlgmr.msra.gmra.mrb[52].mxu0 %vm764_vm0, %v7820_v12 }
 0xd7b   : > { %v7749_v50 = vpop.xlane.xlu0 %7748 }
 0xd7c   : > { %v7763_v2 = vmul.f32 0.03125, %v7749_v50 }
 0xd7d   : > { %v7752_v55 = vpop.xlane.xlu1 %7751 }
 0xd7e   : > { %v7771_v30 = vadd.f32 1e-05, %v7763_v2  ;;  %v7764_v14 = vmul.f32 0.03125, %v7752_v55 }
 0xd7f   : > { %v7755_v22 = vpop.xlane.xlu0 %7754 }
 0xd80   : > { %16123 = vrsqrt.f32 %v7771_v30  ;;  %v7772_v59 = vadd.f32 1e-05, %v7764_v14  ;;  %v7765_v26 = vmul.f32 0.03125, %v7755_v22 }
 0xd81   : > { %v7758_v16 = vpop.xlane.xlu1 %7757 }
 0xd82   : > { %16125 = vrsqrt.f32 %v7772_v59  ;;  %v7773_v20 = vadd.f32 1e-05, %v7765_v26  ;;  %v7766_v23 = vmul.f32 0.03125, %v7758_v16 }
 0xd84   : > { %16127 = vrsqrt.f32 %v7773_v20  ;;  %v7774_v44 = vadd.f32 1e-05, %v7766_v23 }
 0xd86   : > { %16129 = vrsqrt.f32 %v7774_v44 }
 0xd8a   : > { %v16124_v58 = vpop.eup %16123 }
 0xd8b   : > { %v7787_v36 = vmul.f32 %v16124_v58, %v18894_v15 }
 0xd8c   : > { %v16126_v17 = vpop.eup %16125 }
 0xd8d   : > { %v7788_v47 = vmul.f32 %v16126_v17, %v18897_v9  ;;  %v7801_v10 = vmul.f32 %v14950_v41, %v7787_v36  ;;  %v14957_v9 = vld [vmem:[%s21151_s7 + $0x1] ss:$0 sm:$0xff] }
 0xd8e   : > { %v16128_v37 = vpop.eup %16127 }
 0xd8f   : > { %v7802_v35 = vmul.f32 %v14950_v41, %v7788_v47  ;;  %v7789_v3 = vmul.f32 %v16128_v37, %v18902_v38  ;;  %v7815_v31 = vadd.f32 %v14951_v49, %v7801_v10 }
 0xd90   : > { %v16130_v53 = vpop.eup %16129 }
 0xd91   : > { %v7816_v28 = vadd.f32 %v14951_v49, %v7802_v35  ;;  %v7790_v61 = vmul.f32 %v16130_v53, %v18908_v29  ;;  %v7803_v45 = vmul.f32 %v14950_v41, %v7789_v3 }
 0xd93   : > { %v7821_v13 = vpack.c.bf16 %v7816_v28, %v7815_v31  ;;  %v7804_v42 = vmul.f32 %v14950_v41, %v7790_v61  ;;  %v7817_v1 = vadd.f32 %v14951_v49, %v7803_v45 }
 0xd95   : > { %15543 = vmatprep.mubr.msk.bf16.mxu0 %vm764_vm0, %v7821_v13  ;;  %v7818_v15 = vadd.f32 %v14951_v49, %v7804_v42 }
 0xd97   : > { %v7822_v51 = vpack.c.bf16 %v7818_v15, %v7817_v1 }
 0xd99   : > { %15544 = vmatmul.mubr.msk.bf16.gmra.mrb[56].mxu0 %vm764_vm0, %v7822_v51 }
 0xe24   : > { %v15541_v38 = vpop.f32.mrb[52].mxu0 }
 0xe25   : > { %v18938_v62 = vadd.f32 %v15541_v38, %v14957_v9  ;;  %v7894_v54 = vpop.f32.mrb[53].mxu0 }
 0xe26   : > { %v18940_v24 = vadd.f32 %v14957_v9, %v7894_v54  ;;  %v15542_v29 = vpop.f32.mrb[54].mxu0 }
 0xe27   : > { %7937 = vrot.lane.b32.xlu0 %v18938_v62, %s16315_s23  ;;  %v7897_v41 = vpop.f32.mrb[55].mxu0  ;;  %v18946_v0 = vadd.f32 %v15542_v29, %v14957_v9 }
 0xe28   : > { %7957 = vrot.lane.b32.xlu1 %v18940_v24, %s21240_s3  ;;  %v18952_v6 = vadd.f32 %v14957_v9, %v7897_v41 }
 0xe2b   : > { %7933 = vrot.lane.b32.xlu0 %v18940_v24, %s16315_s23 }
 0xe2c   : > { %7939 = vrot.lane.b32.xlu1 %v18946_v0, %s16315_s23 }
 0xe2f   : > { %7981 = vrot.lane.b32.xlu0 %v18940_v24, %s21241_s26 }
 0xe30   : > { %7935 = vrot.lane.b32.xlu1 %v18952_v6, %s16315_s23 }
 0xe33   : > { %7961 = vrot.lane.b32.xlu0 %v18938_v62, %s21240_s3 }
 0xe34   : > { %7959 = vrot.lane.b32.xlu1 %v18952_v6, %s21240_s3 }
 0xe37   : > { %7985 = vrot.lane.b32.xlu0 %v18938_v62, %s21241_s26 }
 0xe38   : > { %7983 = vrot.lane.b32.xlu1 %v18952_v6, %s21241_s26 }
 0xe3c   : > { %7963 = vrot.lane.b32.xlu1 %v18946_v0, %s21240_s3 }
 0xe40   : > { %7987 = vrot.lane.b32.xlu1 %v18946_v0, %s21241_s26 }
 0xe6c   : > { %v15545_v52 = vpop.f32.mrb[56].mxu0 }
 0xe6d   : > { %v18970_v34 = vadd.f32 %v15545_v52, %v14957_v9  ;;  %v7910_v49 = vpop.f32.mrb[57].mxu0 }
 0xe6e   : > { %v15546_v43 = vpop.f32.mrb[58].mxu0  ;;  %v18980_v5 = vadd.f32 %v14957_v9, %v7910_v49 }
 0xe6f   : > { %v18972_v63 = vadd.f32 %v15546_v43, %v14957_v9  ;;  %7945 = vrot.lane.b32.xlu0 %v18970_v34, %s16315_s23  ;;  %v7913_v33 = vpop.f32.mrb[59].mxu0 }
 0xe70   : > { %v18984_v11 = vadd.f32 %v14957_v9, %v7913_v33 }
 0xe71   : > { %7947 = vrot.lane.b32.xlu1 %v18972_v63, %s16315_s23 }
 0xe73   : > { %7969 = vrot.lane.b32.xlu0 %v18970_v34, %s21240_s3 }
 0xe75   : > { %7971 = vrot.lane.b32.xlu1 %v18972_v63, %s21240_s3 }
 0xe77   : > { %7941 = vrot.lane.b32.xlu0 %v18980_v5, %s16315_s23 }
 0xe79   : > { %7943 = vrot.lane.b32.xlu1 %v18984_v11, %s16315_s23  ;;  %s21243_s23 = smov 64  }
 0xe7b   : > { %7965 = vrot.lane.b32.xlu0 %v18980_v5, %s21240_s3 }
 0xe7d   : > { %7967 = vrot.lane.b32.xlu1 %v18984_v11, %s21240_s3  ;;  %s21278_s3 = smov 16  }
 0xe7f   : > { %7989 = vrot.lane.b32.xlu0 %v18980_v5, %s21241_s26 }
 0xe81   : > { %7991 = vrot.lane.b32.xlu1 %v18984_v11, %s21241_s26 }
 0xe83   : > { %7993 = vrot.lane.b32.xlu0 %v18970_v34, %s21241_s26 }
 0xe85   : > { %7995 = vrot.lane.b32.xlu1 %v18972_v63, %s21241_s26  ;;  %s21279_s26 = smov 24  }
 0xe87   : > { %9109 = vrot.lane.b32.xlu0 %v18940_v24, %s21242_s4 }
 0xe89   : > { %9111 = vrot.lane.b32.xlu1 %v18952_v6, %s21242_s4 }
 0xe8b   : > { %9113 = vrot.lane.b32.xlu0 %v18938_v62, %s21242_s4 }
 0xe8d   : > { %9115 = vrot.lane.b32.xlu1 %v18946_v0, %s21242_s4 }
 0xe99   : > { %v19010_v46 = vpop.permute.xlu0 %7937 }
 0xe9a   : > { %v19012_v8 = vpop.permute.xlu1 %7957  ;;  %9129 = vrot.lane.b32.xlu0 %v19010_v46, %s21242_s4 }
 0xe9b   : > { %v8005_v39 = vcombine.low %v18940_v24, %v19012_v8  ;;  %v8006_v19 = vcombine.high %v18940_v24, %v19012_v8 }
 0xe9d   : > { %v19016_v60 = vpop.permute.xlu0 %7933  ;;  %v8013_v30 = vrot.slane %v8005_v39, %v16651_v48  ;;  %v8020_v14 = vrot.slane %v8006_v19, %v16651_v48 }
 0xe9e   : > { %v19018_v25 = vpop.permute.xlu1 %7939  ;;  %9125 = vrot.lane.b32.xlu0 %v19016_v60, %s21242_s4 }
 0xe9f   : > { %9131 = vrot.lane.b32.xlu1 %v19018_v25, %s21242_s4 }
 0xea1   : > { %v19028_v12 = vpop.permute.xlu0 %7981 }
 0xea2   : > { %v8021_v50 = vcombine.low %v19016_v60, %v19028_v12  ;;  %v8022_v2 = vcombine.high %v19016_v60, %v19028_v12  ;;  %v19034_v55 = vpop.permute.xlu1 %7935  ;;  %9141 = vrot.lane.b32.xlu0 %v19012_v8, %s21242_s4 }
 0xea3   : > { %9127 = vrot.lane.b32.xlu1 %v19034_v55, %s21242_s4 }
 0xea4   : > { %v8029_v22 = vrot.slane %v8021_v50, %v16651_v48  ;;  %v8036_v59 = vrot.slane %v8022_v2, %v16651_v48 }
 0xea5   : > { %v19048_v58 = vpop.permute.xlu0 %7961 }
 0xea6   : > { %v8037_v26 = vcombine.low %v8013_v30, %v8029_v22  ;;  %v8038_v16 = vcombine.high %v8013_v30, %v8029_v22  ;;  %v8053_v20 = vcombine.low %v8020_v14, %v8036_v59  ;;  %v8054_v23 = vcombine.high %v8020_v14, %v8036_v59  ;;  %v19044_v44 = vpop.permute.xlu1 %7959  ;;  %9157 = vrot.lane.b32.xlu0 %v19028_v12, %s21242_s4 }
 0xea7   : > { %9143 = vrot.lane.b32.xlu1 %v19044_v44, %s21242_s4  ;;  %v8073_v37 = vcombine.low %v18952_v6, %v19044_v44  ;;  %v8074_v35 = vcombine.high %v18952_v6, %v19044_v44 }
 0xea8   : > { %v8045_v36 = vrot.slane %v8037_v26, %v16669_v56  ;;  %v8052_v17 = vrot.slane %v8038_v16, %v16669_v56  ;;  %v8061_v47 = vrot.slane %v8053_v20, %v16669_v56  ;;  %v8068_v10 = vrot.slane %v8054_v23, %v16669_v56 }
 0xea9   : > { %v19074_v9 = vpop.permute.xlu0 %7985  ;;  %v8081_v29 = vrot.slane %v8073_v37, %v16651_v48  ;;  %v8088_v41 = vrot.slane %v8074_v35, %v16651_v48 }
 0xeaa   : > { %v8549_v3 = vcombine.low %v8045_v36, %v8052_v17  ;;  %v14964_v53 = vcombine.high %v8045_v36, %v8052_v17  ;;  %v8565_v31 = vcombine.low %v8061_v47, %v8068_v10  ;;  %v14965_v28 = vcombine.high %v8061_v47, %v8068_v10  ;;  %v19060_v61 = vpop.permute.xlu1 %7983  ;;  %9145 = vrot.lane.b32.xlu0 %v19048_v58, %s21242_s4 }
 0xeab   : > { %v8089_v45 = vcombine.low %v19034_v55, %v19060_v61  ;;  %v8090_v13 = vcombine.high %v19034_v55, %v19060_v61  ;;  %9159 = vrot.lane.b32.xlu1 %v19060_v61, %s21242_s4 }
 0xeac   : > { %v8556_v42 = vrot.slane %v8549_v3, %v16651_v48  ;;  %v8564_v1 = vrot.slane %v14964_v53, %v16651_v48  ;;  %v8572_v15 = vrot.slane %v8565_v31, %v16651_v48  ;;  %v8580_v51 = vrot.slane %v14965_v28, %v16651_v48 }
 0xead   : > { %v8097_v38 = vrot.slane %v8089_v45, %v16651_v48  ;;  %v8104_v54 = vrot.slane %v8090_v13, %v16651_v48 }
 0xeae   : > { %v19080_v52 = vpop.permute.xlu1 %7963  ;;  %9161 = vrot.lane.b32.xlu0 %v19074_v9, %s21242_s4  ;;  %v8582_v49 = vcombine.high %v8556_v42, %v8564_v1  ;;  %v8598_v43 = vcombine.high %v8572_v15, %v8580_v51  ;;  %v8581_v36 = vcombine.low %v8556_v42, %v8564_v1  ;;  %v8597_v17 = vcombine.low %v8572_v15, %v8580_v51 }
 0xeaf   : > { %9147 = vrot.lane.b32.xlu1 %v19080_v52, %s21242_s4  ;;  %v8105_v33 = vcombine.low %v8081_v29, %v8097_v38  ;;  %v8106_v39 = vcombine.high %v8081_v29, %v8097_v38  ;;  %v8121_v19 = vcombine.low %v8088_v41, %v8104_v54  ;;  %v8122_v50 = vcombine.high %v8088_v41, %v8104_v54 }
 0xeb0   : > { %v8589_v53 = vrot.slane %v8581_v36, %v16669_v56  ;;  %v8605_v31 = vrot.slane %v8597_v17, %v16669_v56  ;;  %v8596_v13 = vrot.slane %v8582_v49, %v16669_v56  ;;  %v8612_v1 = vrot.slane %v8598_v43, %v16669_v56 }
 0xeb1   : > { %v8113_v2 = vrot.slane %v8105_v33, %v16669_v56  ;;  %v8120_v30 = vrot.slane %v8106_v39, %v16669_v56  ;;  %v8129_v14 = vrot.slane %v8121_v19, %v16669_v56  ;;  %v8136_v22 = vrot.slane %v8122_v50, %v16669_v56 }
 0xeb2   : > { %v19090_v59 = vpop.permute.xlu1 %7987  ;;  %9117 = vrot.lane.b32.xlu0 %v18980_v5, %s21242_s4  ;;  %v8613_v15 = vcombine.low %v8589_v53, %v8605_v31  ;;  %v8614_v51 = vcombine.high %v8589_v53, %v8605_v31  ;;  %v8615_v29 = vcombine.low %v8596_v13, %v8612_v1  ;;  %v8616_v39 = vcombine.high %v8596_v13, %v8612_v1 }
 0xeb3   : > { %9163 = vrot.lane.b32.xlu1 %v19090_v59, %s21242_s4  ;;  %v8617_v26 = vcombine.low %v8113_v2, %v8120_v30  ;;  %v14966_v16 = vcombine.high %v8113_v2, %v8120_v30  ;;  %v8633_v20 = vcombine.low %v8129_v14, %v8136_v22  ;;  %v14967_v23 = vcombine.high %v8129_v14, %v8136_v22 }
 0xeb4   : > { %v8158_v1 = vcombine.high %v19010_v46, %v19074_v9 }
 0xeb5   : > { %v8624_v47 = vrot.slane %v8617_v26, %v16651_v48  ;;  %v8632_v10 = vrot.slane %v14966_v16, %v16651_v48  ;;  %v8640_v37 = vrot.slane %v8633_v20, %v16651_v48  ;;  %v8648_v35 = vrot.slane %v14967_v23, %v16651_v48 }
 0xeb6   : > { %9121 = vrot.lane.b32.xlu0 %v18970_v34, %s21242_s4 }
 0xeb7   : > { %9119 = vrot.lane.b32.xlu1 %v18984_v11, %s21242_s4  ;;  %v8649_v3 = vcombine.low %v8624_v47, %v8632_v10  ;;  %v8665_v45 = vcombine.low %v8640_v37, %v8648_v35  ;;  %v8650_v41 = vcombine.high %v8624_v47, %v8632_v10  ;;  %v8666_v33 = vcombine.high %v8640_v37, %v8648_v35 }
 0xeb9   : > { %v8657_v28 = vrot.slane %v8649_v3, %v16669_v56  ;;  %v8673_v42 = vrot.slane %v8665_v45, %v16669_v56  ;;  %v8664_v2 = vrot.slane %v8650_v41, %v16669_v56  ;;  %v8680_v30 = vrot.slane %v8666_v33, %v16669_v56 }
 0xebb   : > { %9123 = vrot.lane.b32.xlu1 %v18972_v63, %s21242_s4  ;;  %v8681_v38 = vcombine.low %v8657_v28, %v8673_v42  ;;  %v8682_v54 = vcombine.high %v8657_v28, %v8673_v42  ;;  %v8683_v49 = vcombine.low %v8664_v2, %v8680_v30  ;;  %v8684_v43 = vcombine.high %v8664_v2, %v8680_v30 }
 0xebc   : > { %v8157_v42 = vcombine.low %v19010_v46, %v19074_v9 }
 0xebd   : > { %v9093_v19 = vpack.c.bf16 %v8681_v38, %v8613_v15  ;;  %v9095_v50 = vpack.c.bf16 %v8682_v54, %v8614_v51  ;;  %v19116_v14 = vpack.c.bf16 %v8683_v49, %v8615_v29  ;;  %v19118_v22 = vpack.c.bf16 %v8684_v43, %v8616_v39 }
 0xebe   : > { %v8141_v38 = vcombine.low %v18938_v62, %v19048_v58  ;;  %v8142_v54 = vcombine.high %v18938_v62, %v19048_v58  ;;  %v8165_v43 = vrot.slane %v8157_v42, %v16651_v48 }
 0xebf   : > { %15551 = vmatprep.mubr.msk.bf16.mxu0 %vm4606_vm1, %v9093_v19  ;;  %15559 = vmatprep.mubr.msk.bf16.mxu1 %vm4606_vm1, %v9095_v50 }
 0xee1   : > { %v19120_v26 = vpop.permute.xlu0 %7945 }
 0xee2   : > { %9137 = vrot.lane.b32.xlu0 %v19120_v26, %s21242_s4 }
 0xee3   : > { %v19124_v16 = vpop.permute.xlu1 %7947 }
 0xee4   : > { %9139 = vrot.lane.b32.xlu1 %v19124_v16, %s21242_s4 }
 0xee5   : > { %v19128_v20 = vpop.permute.xlu0 %7969 }
 0xee7   : > { %v19130_v23 = vpop.permute.xlu1 %7971 }
 0xee9   : > { %v19132_v36 = vpop.permute.xlu0 %7941 }
 0xeea   : > { %9133 = vrot.lane.b32.xlu0 %v19132_v36, %s21242_s4 }
 0xeeb   : > { %v19136_v17 = vpop.permute.xlu1 %7943 }
 0xeec   : > { %9135 = vrot.lane.b32.xlu1 %v19136_v17, %s21242_s4 }
 0xeed   : > { %v19140_v47 = vpop.permute.xlu0 %7965 }
 0xeee   : > { %9149 = vrot.lane.b32.xlu0 %v19140_v47, %s21242_s4  ;;  %v8277_v53 = vcombine.low %v18980_v5, %v19140_v47  ;;  %v8278_v15 = vcombine.high %v18980_v5, %v19140_v47 }
 0xeef   : > { %v19144_v10 = vpop.permute.xlu1 %7967 }
 0xef0   : > { %9151 = vrot.lane.b32.xlu1 %v19144_v10, %s21242_s4  ;;  %v8345_v51 = vcombine.low %v18984_v11, %v19144_v10  ;;  %v8285_v29 = vrot.slane %v8277_v53, %v16651_v48  ;;  %v8346_v41 = vcombine.high %v18984_v11, %v19144_v10  ;;  %v8292_v53 = vrot.slane %v8278_v15, %v16651_v48 }
 0xef1   : > { %v19148_v37 = vpop.permute.xlu0 %7989 }
 0xef2   : > { %9165 = vrot.lane.b32.xlu0 %v19148_v37, %s21242_s4  ;;  %v8293_v35 = vcombine.low %v19132_v36, %v19148_v37  ;;  %v8294_v31 = vcombine.high %v19132_v36, %v19148_v37  ;;  %v8353_v4 = vrot.slane %v8345_v51, %v16651_v48 }
 0xef3   : > { %v19154_v3 = vpop.permute.xlu1 %7991 }
 0xef4   : > { %9167 = vrot.lane.b32.xlu1 %v19154_v3, %s21242_s4  ;;  %v8361_v28 = vcombine.low %v19136_v17, %v19154_v3  ;;  %v8301_v45 = vrot.slane %v8293_v35, %v16651_v48  ;;  %v8362_v13 = vcombine.high %v19136_v17, %v19154_v3  ;;  %v8308_v39 = vrot.slane %v8294_v31, %v16651_v48 }
 0xef5   : > { %v19186_v33 = vpop.permute.xlu0 %7993  ;;  %v8172_v35 = vrot.slane %v8158_v1, %v16651_v48  ;;  %v8149_v31 = vrot.slane %v8141_v38, %v16651_v48 }
 0xef6   : > { %9153 = vrot.lane.b32.xlu0 %v19128_v20, %s21242_s4  ;;  %v8369_v19 = vrot.slane %v8361_v28, %v16651_v48  ;;  %v8309_v50 = vcombine.low %v8285_v29, %v8301_v45  ;;  %v8310_v2 = vcombine.high %v8285_v29, %v8301_v45  ;;  %v8376_v30 = vrot.slane %v8362_v13, %v16651_v48 }
 0xef7   : > { %v19193_v49 = vpop.permute.xlu1 %7995  ;;  %v8156_v28 = vrot.slane %v8142_v54, %v16651_v48  ;;  %v8360_v45 = vrot.slane %v8346_v41, %v16651_v48  ;;  %v8325_v13 = vcombine.low %v8292_v53, %v8308_v39  ;;  %v8326_v29 = vcombine.high %v8292_v53, %v8308_v39 }
 0xef8   : > { %9155 = vrot.lane.b32.xlu1 %v19130_v23, %s21242_s4  ;;  %v8377_v57 = vcombine.low %v8353_v4, %v8369_v19  ;;  %v8378_v32 = vcombine.high %v8353_v4, %v8369_v19  ;;  %v8317_v42 = vrot.slane %v8309_v50, %v16669_v56  ;;  %v8324_v1 = vrot.slane %v8310_v2, %v16669_v56 }
 0xef9   : > { %v8393_v15 = vcombine.low %v8360_v45, %v8376_v30  ;;  %v8394_v51 = vcombine.high %v8360_v45, %v8376_v30  ;;  %v8173_v18 = vcombine.low %v8149_v31, %v8165_v43  ;;  %v8174_v21 = vcombine.high %v8149_v31, %v8165_v43  ;;  %v19218_v2 = vpop.permute.xlu0 %9109 }
 0xefa   : > { %9169 = vrot.lane.b32.xlu0 %v19186_v33, %s21242_s4  ;;  %v8189_v38 = vcombine.low %v8156_v28, %v8172_v35  ;;  %v8190_v54 = vcombine.high %v8156_v28, %v8172_v35  ;;  %v8209_v41 = vcombine.low %v18946_v0, %v19080_v52  ;;  %v8225_v4 = vcombine.low %v19018_v25, %v19090_v59 }
 0xefb   : > { %v8340_v39 = vrot.slane %v8326_v29, %v16669_v56  ;;  %v8385_v19 = vrot.slane %v8377_v57, %v16669_v56  ;;  %v8392_v50 = vrot.slane %v8378_v32, %v16669_v56  ;;  %v14972_v30 = vcombine.high %v8317_v42, %v8324_v1 }
 0xefc   : > { %9171 = vrot.lane.b32.xlu1 %v19193_v49, %s21242_s4  ;;  %v8401_v43 = vrot.slane %v8393_v15, %v16669_v56  ;;  %v8408_v35 = vrot.slane %v8394_v51, %v16669_v56  ;;  %v8181_v53 = vrot.slane %v8173_v18, %v16669_v56  ;;  %v8188_v31 = vrot.slane %v8174_v21, %v16669_v56  ;;  %v19238_v51 = vpop.permute.xlu1 %9111 }
 0xefd   : > { %v8197_v28 = vrot.slane %v8189_v38, %v16669_v56  ;;  %v8226_v32 = vcombine.high %v19018_v25, %v19090_v59  ;;  %v8204_v57 = vrot.slane %v8190_v54, %v16669_v56  ;;  %v8217_v45 = vrot.slane %v8209_v41, %v16651_v48 }
 0xefe   : > { %10309 = vrot.lane.b32.xlu0 %v18940_v24, %s21243_s23  ;;  %v8333_v24 = vrot.slane %v8325_v13, %v16669_v56  ;;  %v8233_v13 = vrot.slane %v8225_v4, %v16651_v48  ;;  %v8889_v21 = vcombine.low %v8385_v19, %v8392_v50  ;;  %v14975_v15 = vcombine.high %v8401_v43, %v8408_v35 }
 0xeff   : > { %v19244_v38 = vrot.slane %v14972_v30, %v16651_v48  ;;  %v8685_v54 = vcombine.low %v8181_v53, %v8188_v31  ;;  %v14968_v41 = vcombine.high %v8181_v53, %v8188_v31  ;;  %v8240_v4 = vrot.slane %v8226_v32, %v16651_v48 }
 0xf00   : > { %10311 = vrot.lane.b32.xlu1 %v18952_v6, %s21243_s23  ;;  %v8821_v6 = vcombine.low %v8317_v42, %v8324_v1  ;;  %v8837_v18 = vcombine.low %v8333_v24, %v8340_v39  ;;  %v14973_v29 = vcombine.high %v8333_v24, %v8340_v39  ;;  %v14974_v42 = vcombine.high %v8385_v19, %v8392_v50  ;;  %v19247_v24 = vpop.permute.xlu0 %9113 }
 0xf01   : > { %v8905_v1 = vcombine.low %v8401_v43, %v8408_v35  ;;  %v14969_v39 = vcombine.high %v8197_v28, %v8204_v57  ;;  %v8241_v50 = vcombine.low %v8217_v45, %v8233_v13  ;;  %v19261_v43 = vrot.slane %v8889_v21, %v16651_v48 }
 0xf02   : > { %10341 = vrot.lane.b32.xlu0 %v19012_v8, %s21243_s23  ;;  %v8210_v8 = vcombine.high %v18946_v0, %v19080_v52  ;;  %v19258_v30 = vrot.slane %v14973_v29, %v16651_v48  ;;  %v19264_v35 = vrot.slane %v14974_v42, %v16651_v48  ;;  %v19270_v31 = vrot.slane %v14975_v15, %v16651_v48 }
 0xf03   : > { %v19267_v53 = vrot.slane %v8905_v1, %v16651_v48  ;;  %v19290_v29 = vrot.slane %v14969_v39, %v16651_v48  ;;  %v8249_v1 = vrot.slane %v8241_v50, %v16669_v56 }
 0xf04   : > { %10325 = vrot.lane.b32.xlu1 %v19016_v60, %s21243_s23  ;;  %v19241_v60 = vrot.slane %v8821_v6, %v16651_v48  ;;  %v8224_v19 = vrot.slane %v8210_v8, %v16651_v48  ;;  %v19255_v6 = vrot.slane %v8837_v18, %v16651_v48  ;;  %21246 = vst [vmem:[#allocation13_spill] sm:$0xff] %v19258_v30  ;;  %v19287_v18 = vpop.permute.xlu1 %9115 }
 0xf05   : > { %v19279_v8 = vrot.slane %v8685_v54, %v16651_v48  ;;  %v8922_v42 = vcombine.high %v19261_v43, %v19264_v35  ;;  %v8938_v54 = vcombine.high %v19267_v53, %v19270_v31 }
 0xf06   : > { %10357 = vrot.lane.b32.xlu0 %v19028_v12, %s21243_s23  ;;  %21244 = vst [vmem:[#allocation11_spill] sm:$0xff] %v19241_v60  ;;  %v8701_v12 = vcombine.low %v8197_v28, %v8204_v57  ;;  %21245 = vst [vmem:[#allocation12_spill] sm:$0xff] %v19255_v6  ;;  %v8257_v28 = vcombine.low %v8224_v19, %v8240_v4  ;;  %v8258_v32 = vcombine.high %v8224_v19, %v8240_v4 }
 0xf07   : > { %v8870_v21 = vcombine.high %v19255_v6, %v19258_v30  ;;  %v8936_v39 = vrot.slane %v8922_v42, %v16669_v56  ;;  %v8952_v50 = vrot.slane %v8938_v54, %v16669_v56 }
 0xf08   : > { %10327 = vrot.lane.b32.xlu1 %v19034_v55, %s21243_s23  ;;  %v8242_v55 = vcombine.high %v8217_v45, %v8233_v13  ;;  %v19282_v45 = vrot.slane %v14968_v41, %v16651_v48  ;;  %v19285_v13 = vrot.slane %v8701_v12, %v16651_v48  ;;  %v8265_v41 = vrot.slane %v8257_v28, %v16669_v56 }
 0xf09   : > { %v8272_v4 = vrot.slane %v8258_v32, %v16669_v56  ;;  %v8884_v12 = vrot.slane %v8870_v21, %v16669_v56  ;;  %v8955_v32 = vcombine.low %v8936_v39, %v8952_v50  ;;  %v8956_v27 = vcombine.high %v8936_v39, %v8952_v50 }
 0xf0a   : > { %10313 = vrot.lane.b32.xlu0 %v18938_v62, %s21243_s23  ;;  %v8854_v62 = vcombine.high %v19241_v60, %v19244_v38  ;;  %v8256_v15 = vrot.slane %v8242_v55, %v16669_v56  ;;  %v8717_v55 = vcombine.low %v19279_v8, %v19282_v45 }
 0xf0b   : > { %v8769_v42 = vcombine.low %v8265_v41, %v8272_v4  ;;  %v14971_v40 = vcombine.high %v8265_v41, %v8272_v4 }
 0xf0c   : > { %10343 = vrot.lane.b32.xlu1 %v19044_v44, %s21243_s23  ;;  %v19276_v57 = vpop.permute.xlu0 %9129  ;;  %v8868_v44 = vrot.slane %v8854_v62, %v16669_v56  ;;  %v8733_v62 = vcombine.low %v19285_v13, %v19290_v29  ;;  %v8753_v21 = vcombine.low %v8249_v1, %v8256_v15  ;;  %v14970_v7 = vcombine.high %v8249_v1, %v8256_v15 }
 0xf0e   : > { %10329 = vrot.lane.b32.xlu0 %v19010_v46, %s21243_s23  ;;  %v8887_v28 = vcombine.low %v8868_v44, %v8884_v12  ;;  %v19338_v41 = vrot.slane %v14970_v7, %v16651_v48 }
 0xf10   : > { %10359 = vrot.lane.b32.xlu1 %v19060_v61, %s21243_s23  ;;  %v9126_v46 = vpop.permute.xlu0 %9125  ;;  %v8888_v61 = vcombine.high %v8868_v44, %v8884_v12  ;;  %v19320_v30 = vpack.c.bf16 %v8955_v32, %v8887_v28  ;;  %v19330_v44 = vrot.slane %v8733_v62, %v16669_v56 }
 0xf11   : > { %v19309_v19 = vpop.permute.xlu1 %9131 }
 0xf12   : > { %10345 = vrot.lane.b32.xlu0 %v19048_v58, %s21243_s23  ;;  %v19322_v60 = vpack.c.bf16 %v8956_v27, %v8888_v61  ;;  %v19327_v58 = vrot.slane %v8717_v55, %v16669_v56  ;;  %v19341_v27 = vrot.slane %v8769_v42, %v16651_v48 }
 0xf14   : > { %10315 = vrot.lane.b32.xlu1 %v18946_v0, %s21243_s23  ;;  %v9142_v54 = vpop.permute.xlu0 %9141  ;;  %21247 = vst [vmem:[#allocation14_spill] sm:$0xff] %v19322_v60  ;;  %v19335_v0 = vrot.slane %v8753_v21, %v16651_v48 }
 0xf15   : > { %v9128_v6 = vpop.permute.xlu1 %9127  ;;  %v9205_v1 = vcombine.low %v19218_v2, %v9142_v54  ;;  %v9206_v15 = vcombine.high %v19218_v2, %v9142_v54 }
 0xf16   : > { %10361 = vrot.lane.b32.xlu0 %v19074_v9, %s21243_s23  ;;  %v19344_v9 = vrot.slane %v14971_v40, %v16651_v48 }
 0xf17   : > { %v9213_v62 = vrot.slane %v9205_v1, %v16651_v48 }
 0xf18   : > { %10331 = vrot.lane.b32.xlu1 %v19018_v25, %s21243_s23  ;;  %v9158_v4 = vpop.permute.xlu0 %9157  ;;  %v9220_v25 = vrot.slane %v9206_v15, %v16651_v48 }
 0xf19   : > { %v9221_v12 = vcombine.low %v9126_v46, %v9158_v4  ;;  %v9222_v39 = vcombine.high %v9126_v46, %v9158_v4  ;;  %v9144_v50 = vpop.permute.xlu1 %9143 }
 0xf1a   : > { %10317 = vrot.lane.b32.xlu0 %v18980_v5, %s21243_s23  ;;  %v9273_v2 = vcombine.low %v19238_v51, %v9144_v50  ;;  %v9274_v7 = vcombine.high %v19238_v51, %v9144_v50 }
 0xf1b   : > { %v9229_v46 = vrot.slane %v9221_v12, %v16651_v48  ;;  %v9236_v28 = vrot.slane %v9222_v39, %v16651_v48 }
 0xf1c   : > { %v9281_v61 = vrot.slane %v9273_v2, %v16651_v48  ;;  %v9288_v32 = vrot.slane %v9274_v7, %v16651_v48  ;;  %10347 = vrot.lane.b32.xlu1 %v19080_v52, %s21243_s23  ;;  %v9146_v21 = vpop.permute.xlu0 %9145 }
 0xf1d   : > { %v9237_v42 = vcombine.low %v9213_v62, %v9229_v46  ;;  %v9238_v54 = vcombine.high %v9213_v62, %v9229_v46  ;;  %v9253_v1 = vcombine.low %v9220_v25, %v9236_v28  ;;  %v9254_v15 = vcombine.high %v9220_v25, %v9236_v28  ;;  %v9160_v4 = vpop.permute.xlu1 %9159 }
 0xf1e   : > { %10349 = vrot.lane.b32.xlu0 %v19140_v47, %s21243_s23  ;;  %v9341_v12 = vcombine.low %v19247_v24, %v9146_v21  ;;  %v9342_v39 = vcombine.high %v19247_v24, %v9146_v21  ;;  %v9289_v50 = vcombine.low %v9128_v6, %v9160_v4  ;;  %v9290_v2 = vcombine.high %v9128_v6, %v9160_v4 }
 0xf1f   : > { %v9245_v7 = vrot.slane %v9237_v42, %v16669_v56  ;;  %v9252_v40 = vrot.slane %v9238_v54, %v16669_v56  ;;  %v9261_v52 = vrot.slane %v9253_v1, %v16669_v56  ;;  %v9268_v62 = vrot.slane %v9254_v15, %v16669_v56 }
 0xf20   : > { %v9349_v25 = vrot.slane %v9341_v12, %v16651_v48  ;;  %v9356_v46 = vrot.slane %v9342_v39, %v16651_v48  ;;  %v9297_v47 = vrot.slane %v9289_v50, %v16651_v48  ;;  %v9304_v28 = vrot.slane %v9290_v2, %v16651_v48  ;;  %10363 = vrot.lane.b32.xlu1 %v19090_v59, %s21243_s23  ;;  %v9162_v12 = vpop.permute.xlu0 %9161 }
 0xf21   : > { %v9749_v24 = vcombine.low %v9245_v7, %v9252_v40  ;;  %v14980_v6 = vcombine.high %v9245_v7, %v9252_v40  ;;  %v9765_v21 = vcombine.low %v9261_v52, %v9268_v62  ;;  %v14981_v42 = vcombine.high %v9261_v52, %v9268_v62  ;;  %v9148_v54 = vpop.permute.xlu1 %9147 }
 0xf22   : > { %v9305_v4 = vcombine.low %v9281_v61, %v9297_v47  ;;  %v9306_v1 = vcombine.high %v9281_v61, %v9297_v47  ;;  %v9321_v55 = vcombine.low %v9288_v32, %v9304_v28  ;;  %v9322_v15 = vcombine.high %v9288_v32, %v9304_v28  ;;  %10365 = vrot.lane.b32.xlu0 %v19148_v37, %s21243_s23 }
 0xf23   : > { %v19385_v39 = vrot.slane %v9749_v24, %v16651_v48  ;;  %v19388_v50 = vrot.slane %v14980_v6, %v16651_v48  ;;  %v19391_v59 = vrot.slane %v9765_v21, %v16651_v48  ;;  %v19394_v40 = vrot.slane %v14981_v42, %v16651_v48 }
 0xf24   : > { %v9313_v61 = vrot.slane %v9305_v4, %v16669_v56  ;;  %v9320_v32 = vrot.slane %v9306_v1, %v16669_v56  ;;  %v9329_v2 = vrot.slane %v9321_v55, %v16669_v56  ;;  %v9336_v37 = vrot.slane %v9322_v15, %v16669_v56  ;;  %10319 = vrot.lane.b32.xlu1 %v18984_v11, %s21243_s23 }
 0xf25   : > { %v9357_v7 = vcombine.low %v19276_v57, %v9162_v12  ;;  %v9358_v52 = vcombine.high %v19276_v57, %v9162_v12  ;;  %v9409_v62 = vcombine.low %v19287_v18, %v9148_v54  ;;  %v9410_v47 = vcombine.high %v19287_v18, %v9148_v54  ;;  %v9164_v57 = vpop.permute.xlu1 %9163 }
 0xf26   : > { %v9817_v28 = vcombine.low %v9313_v61, %v9320_v32  ;;  %v14982_v24 = vcombine.high %v9313_v61, %v9320_v32  ;;  %v9833_v6 = vcombine.low %v9329_v2, %v9336_v37  ;;  %v14983_v21 = vcombine.high %v9329_v2, %v9336_v37  ;;  %10321 = vrot.lane.b32.xlu0 %v18970_v34, %s21243_s23 }
 0xf27   : > { %v9365_v55 = vrot.slane %v9357_v7, %v16651_v48  ;;  %v9372_v42 = vrot.slane %v9358_v52, %v16651_v48  ;;  %v9417_v11 = vrot.slane %v9409_v62, %v16651_v48  ;;  %v9424_v4 = vrot.slane %v9410_v47, %v16651_v48 }
 0xf28   : > { %v19413_v1 = vrot.slane %v9817_v28, %v16651_v48  ;;  %v19416_v18 = vrot.slane %v14982_v24, %v16651_v48  ;;  %v19419_v54 = vrot.slane %v9833_v6, %v16651_v48  ;;  %v19422_v15 = vrot.slane %v14983_v21, %v16651_v48  ;;  %10333 = vrot.lane.b32.xlu1 %v19132_v36, %s21243_s23 }
 0xf29   : > { %v9373_v12 = vcombine.low %v9349_v25, %v9365_v55  ;;  %v9374_v61 = vcombine.high %v9349_v25, %v9365_v55  ;;  %v9389_v32 = vcombine.low %v9356_v46, %v9372_v42  ;;  %v9390_v2 = vcombine.high %v9356_v46, %v9372_v42 }
 0xf2a   : > { %v9425_v37 = vcombine.low %v19309_v19, %v9164_v57  ;;  %v9426_v7 = vcombine.high %v19309_v19, %v9164_v57  ;;  %10337 = vrot.lane.b32.xlu0 %v19120_v26, %s21243_s23  ;;  %v9781_v52 = vcombine.low %v19385_v39, %v19388_v50  ;;  %v9797_v62 = vcombine.low %v19391_v59, %v19394_v40 }
 0xf2b   : > { %v9381_v47 = vrot.slane %v9373_v12, %v16669_v56  ;;  %v9388_v36 = vrot.slane %v9374_v61, %v16669_v56  ;;  %v9397_v25 = vrot.slane %v9389_v32, %v16669_v56  ;;  %v9404_v46 = vrot.slane %v9390_v2, %v16669_v56 }
 0xf2c   : > { %v9433_v28 = vrot.slane %v9425_v37, %v16651_v48  ;;  %v9440_v19 = vrot.slane %v9426_v7, %v16651_v48  ;;  %10323 = vrot.lane.b32.xlu1 %v18972_v63, %s21243_s23  ;;  %v9789_v24 = vrot.slane %v9781_v52, %v16669_v56  ;;  %v9805_v6 = vrot.slane %v9797_v62, %v16669_v56 }
 0xf2d   : > { %v9885_v21 = vcombine.low %v9381_v47, %v9388_v36  ;;  %v14984_v55 = vcombine.high %v9381_v47, %v9388_v36  ;;  %v9901_v42 = vcombine.low %v9397_v25, %v9404_v46  ;;  %v14985_v57 = vcombine.high %v9397_v25, %v9404_v46 }
 0xf2e   : > { %v9441_v12 = vcombine.low %v9417_v11, %v9433_v28  ;;  %v9442_v61 = vcombine.high %v9417_v11, %v9433_v28  ;;  %v9457_v32 = vcombine.low %v9424_v4, %v9440_v19  ;;  %v9458_v51 = vcombine.high %v9424_v4, %v9440_v19  ;;  %10353 = vrot.lane.b32.xlu0 %v19128_v20, %s21243_s23 }
 0xf2f   : > { %v19447_v2 = vrot.slane %v9885_v21, %v16651_v48  ;;  %v19450_v37 = vrot.slane %v14984_v55, %v16651_v48  ;;  %v19453_v7 = vrot.slane %v9901_v42, %v16651_v48  ;;  %v19456_v52 = vrot.slane %v14985_v57, %v16651_v48 }
 0xf30   : > { %v9449_v62 = vrot.slane %v9441_v12, %v16669_v56  ;;  %v9456_v11 = vrot.slane %v9442_v61, %v16669_v56  ;;  %v9465_v4 = vrot.slane %v9457_v32, %v16669_v56  ;;  %v9472_v47 = vrot.slane %v9458_v51, %v16669_v56  ;;  %10339 = vrot.lane.b32.xlu1 %v19124_v16, %s21243_s23 }
 0xf31   : > { %v9813_v36 = vcombine.low %v9789_v24, %v9805_v6  ;;  %v9849_v25 = vcombine.low %v19413_v1, %v19416_v18  ;;  %v9865_v46 = vcombine.low %v19419_v54, %v19422_v15  ;;  %v9814_v28 = vcombine.high %v9789_v24, %v9805_v6 }
 0xf32   : > { %v9953_v19 = vcombine.low %v9449_v62, %v9456_v11  ;;  %v14986_v21 = vcombine.high %v9449_v62, %v9456_v11  ;;  %v9969_v55 = vcombine.low %v9465_v4, %v9472_v47  ;;  %v14987_v42 = vcombine.high %v9465_v4, %v9472_v47 }
 0xf33   : > { %v9857_v57 = vrot.slane %v9849_v25, %v16669_v56  ;;  %v9873_v12 = vrot.slane %v9865_v46, %v16669_v56  ;;  %v9917_v51 = vcombine.low %v19447_v2, %v19450_v37  ;;  %v9933_v61 = vcombine.low %v19453_v7, %v19456_v52 }
 0xf34   : > { %v19475_v32 = vrot.slane %v9953_v19, %v16651_v48  ;;  %v19478_v5 = vrot.slane %v14986_v21, %v16651_v48  ;;  %v19481_v24 = vrot.slane %v9969_v55, %v16651_v48  ;;  %v19484_v6 = vrot.slane %v14987_v42, %v16651_v48  ;;  %10355 = vrot.lane.b32.xlu1 %v19130_v23, %s21243_s23 }
 0xf35   : > { %v9881_v62 = vcombine.low %v9857_v57, %v9873_v12  ;;  %v9882_v11 = vcombine.high %v9857_v57, %v9873_v12  ;;  %v9925_v4 = vrot.slane %v9917_v51, %v16669_v56  ;;  %v9941_v47 = vrot.slane %v9933_v61, %v16669_v56 }
 0xf36   : > { %v9985_v25 = vcombine.low %v19475_v32, %v19478_v5  ;;  %v10001_v46 = vcombine.low %v19481_v24, %v19484_v6  ;;  %v21248_v19 = vcombine.low %v19335_v0, %v19338_v41  ;;  %v9782_v12 = vcombine.high %v19385_v39, %v19388_v50 }
 0xf37   : > { %v10293_v42 = vpack.c.bf16 %v9881_v62, %v9813_v36  ;;  %v10295_v57 = vpack.c.bf16 %v9882_v11, %v9814_v28  ;;  %v9798_v51 = vcombine.high %v19391_v59, %v19394_v40  ;;  %v9949_v61 = vcombine.low %v9925_v4, %v9941_v47 }
 0xf38   : > { %v19498_v21 = vrot.slane %v21248_v19, %v16669_v56  ;;  %10335 = vrot.lane.b32.xlu1 %v19136_v17, %s21243_s23  ;;  %v9993_v60 = vrot.slane %v9985_v25, %v16669_v56  ;;  %v10009_v19 = vrot.slane %v10001_v46, %v16669_v56  ;;  %v21249_v55 = vcombine.low %v19341_v27, %v19344_v9 }
 0xf39   : > { %15747 = vmatprep.subr.msk.bf16.mxu0 %vm4606_vm1, %v10293_v42  ;;  %15749 = vmatprep.subr.msk.bf16.mxu1 %vm4606_vm1, %v10295_v57  ;;  %v11516_v39 = vsel %vm4606_vm1, %v10293_v42, 0  ;;  %v11577_v50 = vsel %vm4606_vm1, %v10295_v57, 0  ;;  %v9850_v17 = vcombine.high %v19413_v1, %v19416_v18  ;;  %v9866_v59 = vcombine.high %v19419_v54, %v19422_v15 }
 0xf3a   : > { %v19514_v36 = vrot.slane %v21249_v55, %v16669_v56  ;;  %15548 = vmatpush3.bf16.xpose.msra.mxu0 %v11516_v39  ;;  %15556 = vmatpush3.bf16.xpose.msra.mxu1 %v11577_v50  ;;  %v10017_v40 = vcombine.low %v9993_v60, %v10009_v19  ;;  %v9950_v28 = vcombine.high %v9925_v4, %v9941_v47 }
 0xf3b   : > { %v10018_v62 = vcombine.high %v9993_v60, %v10009_v19  ;;  %v9796_v11 = vrot.slane %v9782_v12, %v16669_v56  ;;  %v9812_v25 = vrot.slane %v9798_v51, %v16669_v56  ;;  %v9864_v46 = vrot.slane %v9850_v17, %v16669_v56 }
 0xf3c   : > { %v9880_v55 = vrot.slane %v9866_v59, %v16669_v56  ;;  %10351 = vrot.lane.b32.xlu1 %v19144_v10, %s21243_s23  ;;  %v10294_v1 = vpack.c.bf16 %v10017_v40, %v9949_v61  ;;  %v8734_v54 = vcombine.high %v19285_v13, %v19290_v29  ;;  %v8786_v15 = vcombine.high %v19335_v0, %v19338_v41 }
 0xf3d   : > { %v10296_v18 = vpack.c.bf16 %v10018_v62, %v9950_v28  ;;  %v8817_v47 = vcombine.low %v19498_v21, %v19514_v36  ;;  %v8802_v42 = vcombine.high %v19341_v27, %v19344_v9  ;;  %v8497_v57 = vcombine.low %v19124_v16, %v19193_v49 }
 0xf3e   : > { %v9883_v60 = vcombine.low %v9864_v46, %v9880_v55  ;;  %v9884_v4 = vcombine.high %v9864_v46, %v9880_v55  ;;  %15748 = vmatprep.subr.msk.bf16.mxu0 %vm4606_vm1, %v10294_v1  ;;  %v9986_v10 = vcombine.high %v19475_v32, %v19478_v5  ;;  %v10002_v0 = vcombine.high %v19481_v24, %v19484_v6 }
 0xf3f   : > { %15750 = vmatprep.subr.msk.bf16.mxu1 %vm4606_vm1, %v10296_v18  ;;  %v11519_v41 = vsel %vm4606_vm1, %v10294_v1, 0  ;;  %v11580_v12 = vsel %vm4606_vm1, %v10296_v18, 0  ;;  %v9815_v51 = vcombine.low %v9796_v11, %v9812_v25  ;;  %v9816_v61 = vcombine.high %v9796_v11, %v9812_v25 }
 0xf40   : > { %v8481_v27 = vcombine.low %v18972_v63, %v19130_v23  ;;  %10367 = vrot.lane.b32.xlu1 %v19154_v3, %s21243_s23  ;;  %v8818_v9 = vcombine.high %v19498_v21, %v19514_v36  ;;  %v9918_v5 = vcombine.high %v19447_v2, %v19450_v37  ;;  %v9934_v32 = vcombine.high %v19453_v7, %v19456_v52 }
 0xf41   : > { %v8429_v24 = vcombine.low %v19120_v26, %v19186_v33  ;;  %v8498_v6 = vcombine.high %v19124_v16, %v19193_v49  ;;  %v10297_v19 = vpack.c.bf16 %v9883_v60, %v9815_v51  ;;  %v10299_v39 = vpack.c.bf16 %v9884_v4, %v9816_v61 }
 0xf42   : > { %v8413_v3 = vcombine.low %v18970_v34, %v19128_v20  ;;  %15550 = vmatpush3.bf16.xpose.msra.mxu0 %v11519_v41  ;;  %15558 = vmatpush3.bf16.xpose.msra.mxu1 %v11580_v12  ;;  %v10000_v21 = vrot.slane %v9986_v10, %v16669_v56  ;;  %v10016_v2 = vrot.slane %v10002_v0, %v16669_v56 }
 0xf43   : > { %v8482_v37 = vcombine.high %v18972_v63, %v19130_v23  ;;  %v8430_v7 = vcombine.high %v19120_v26, %v19186_v33  ;;  %v8505_v52 = vrot.slane %v8497_v57, %v16651_v48  ;;  %15751 = vmatprep.subr.msk.bf16.mxu0 %vm4606_vm1, %v10297_v19  ;;  %15753 = vmatprep.subr.msk.bf16.mxu1 %vm4606_vm1, %v10299_v39  ;;  %v11699_v10 = vsel %vm4606_vm1, %v10299_v39, 0 }
 0xf44   : > { %v8414_v16 = vcombine.high %v18970_v34, %v19128_v20  ;;  %v9932_v36 = vrot.slane %v9918_v5, %v16669_v56  ;;  %v9948_v50 = vrot.slane %v9934_v32, %v16669_v56  ;;  %v19578_v17 = vrot.slane %v8786_v15, %v16669_v56 }
 0xf45   : > { %v8489_v63 = vrot.slane %v8481_v27, %v16651_v48  ;;  %v8437_v26 = vrot.slane %v8429_v24, %v16651_v48  ;;  %v8512_v23 = vrot.slane %v8498_v6, %v16651_v48  ;;  %v19584_v59 = vrot.slane %v8802_v42, %v16669_v56  ;;  %v19616_v6 = vpop.permute.xlu0 %9117 }
 0xf46   : > { %v21250_v40 = vcombine.low %v19327_v58, %v19330_v44  ;;  %v21251_v20 = vcombine.high %v19327_v58, %v19330_v44  ;;  %v10019_v62 = vcombine.low %v10000_v21, %v10016_v2  ;;  %v10020_v11 = vcombine.high %v10000_v21, %v10016_v2  ;;  %v21254_v21 = vld [vmem:[#allocation12_spill] sm:$0xff] }
 0xf47   : > { %v8421_v25 = vrot.slane %v8413_v3, %v16651_v48  ;;  %v8496_v46 = vrot.slane %v8482_v37, %v16651_v48  ;;  %v8444_v55 = vrot.slane %v8430_v7, %v16651_v48  ;;  %v8513_v1 = vcombine.low %v8489_v63, %v8505_v52  ;;  %v21253_v3 = vld [vmem:[#allocation13_spill] sm:$0xff] }
 0xf48   : > { %v9094_v34 = vpack.c.bf16 %v8817_v47, %v21250_v40  ;;  %v9096_v28 = vpack.c.bf16 %v8818_v9, %v21251_v20  ;;  %v8428_v18 = vrot.slane %v8414_v16, %v16651_v48  ;;  %v8514_v15 = vcombine.high %v8489_v63, %v8505_v52  ;;  %v19632_v52 = vpop.permute.xlu1 %9119 }
 0xf49   : > { %v9951_v60 = vcombine.low %v9932_v36, %v9948_v50  ;;  %v9952_v4 = vcombine.high %v9932_v36, %v9948_v50  ;;  %v8445_v42 = vcombine.low %v8421_v25, %v8437_v26  ;;  %v8529_v47 = vcombine.low %v8496_v46, %v8512_v23 }
 0xf4a   : > { %v8530_v57 = vcombine.high %v8496_v46, %v8512_v23  ;;  %15552 = vmatmul.mubr.msk.bf16.vlgmr.msra.gmra.mrb[60].mxu0 %vm4606_vm1, %v9094_v34  ;;  %15560 = vmatmul.mubr.msk.bf16.vlgmr.msra.gmra.mrb[48].mxu1 %vm4606_vm1, %v9096_v28  ;;  %v11638_v58 = vsel %vm4606_vm1, %v10297_v19, 0  ;;  %v8446_v44 = vcombine.high %v8421_v25, %v8437_v26  ;;  %v8461_v12 = vcombine.low %v8428_v18, %v8444_v55  ;;  %v21252_v19 = vld [vmem:[#allocation11_spill] sm:$0xff]  ;;  %v19645_v28 = vpop.permute.xlu0 %9121 }
 0xf4b   : > { %15564 = vmatpush3.bf16.xpose.msra.mxu0 %v11638_v58  ;;  %15567 = vmatprep.mubr.msk.bf16.mxu0 %vm4606_vm1, %v19116_v14  ;;  %v10298_v0 = vpack.c.bf16 %v10019_v62, %v9951_v60  ;;  %v10300_v41 = vpack.c.bf16 %v10020_v11, %v9952_v4  ;;  %v8462_v51 = vcombine.high %v8428_v18, %v8444_v55 }
 0xf4c   : > { %v8521_v61 = vrot.slane %v8513_v1, %v16669_v56  ;;  %15572 = vmatpush3.bf16.xpose.msra.mxu1 %v11699_v10  ;;  %15575 = vmatprep.mubr.msk.bf16.mxu1 %vm4606_vm1, %v19118_v22  ;;  %v8528_v27 = vrot.slane %v8514_v15, %v16669_v56  ;;  %v8921_v14 = vcombine.low %v19261_v43, %v19264_v35  ;;  %v19653_v60 = vpop.permute.xlu1 %9123 }
 0xf4d   : > { %15752 = vmatprep.subr.msk.bf16.mxu0 %vm4606_vm1, %v10298_v0  ;;  %15754 = vmatprep.subr.msk.bf16.mxu1 %vm4606_vm1, %v10300_v41  ;;  %v8937_v9 = vcombine.low %v19267_v53, %v19270_v31  ;;  %v8537_v5 = vrot.slane %v8529_v47, %v16669_v56  ;;  %v8544_v32 = vrot.slane %v8530_v57, %v16669_v56  ;;  %v11702_v13 = vsel %vm4606_vm1, %v10300_v41, 0 }
 0xf4e   : > { %v8453_v24 = vrot.slane %v8445_v42, %v16669_v56  ;;  %v8460_v22 = vrot.slane %v8446_v44, %v16669_v56  ;;  %v8853_v39 = vcombine.low %v21252_v19, %v19244_v38  ;;  %v8869_v2 = vcombine.low %v21254_v21, %v21253_v3 }
 0xf4f   : > { %v8469_v43 = vrot.slane %v8461_v12, %v16669_v56  ;;  %v8476_v35 = vrot.slane %v8462_v51, %v16669_v56  ;;  %v21255_v53 = vcombine.high %v19279_v8, %v19282_v45  ;;  %v8748_v37 = vrot.slane %v8734_v54, %v16669_v56 }
 0xf50   : > { %v9025_v7 = vcombine.low %v8521_v61, %v8528_v27  ;;  %v8819_v38 = vcombine.low %v19578_v17, %v19584_v59  ;;  %v8929_v16 = vrot.slane %v8921_v14, %v16669_v56  ;;  %v8945_v36 = vrot.slane %v8937_v9, %v16669_v56 }
 0xf51   : > { %v8732_v31 = vrot.slane %v21255_v53, %v16669_v56  ;;  %v14978_v50 = vcombine.high %v8521_v61, %v8528_v27  ;;  %v9041_v63 = vcombine.low %v8537_v5, %v8544_v32  ;;  %v14979_v26 = vcombine.high %v8537_v5, %v8544_v32 }
 0xf52   : > { %v11641_v8 = vsel %vm4606_vm1, %v10298_v0, 0  ;;  %v8957_v45 = vcombine.low %v8453_v24, %v8460_v22  ;;  %v8861_v29 = vrot.slane %v8853_v39, %v16669_v56  ;;  %v8877_v54 = vrot.slane %v8869_v2, %v16669_v56 }
 0xf53   : > { %15566 = vmatpush3.bf16.xpose.msra.mxu0 %v11641_v8  ;;  %v14976_v23 = vcombine.high %v8453_v24, %v8460_v22  ;;  %v8973_v40 = vcombine.low %v8469_v43, %v8476_v35  ;;  %v14977_v34 = vcombine.high %v8469_v43, %v8476_v35  ;;  %v19643_v20 = vrot.slane %v9025_v7, %v16651_v48 }
 0xf54   : > { %15574 = vmatpush3.bf16.xpose.msra.mxu1 %v11702_v13  ;;  %v8751_v62 = vcombine.low %v8732_v31, %v8748_v37  ;;  %v8820_v11 = vcombine.high %v19578_v17, %v19584_v59  ;;  %v8953_v25 = vcombine.low %v8929_v16, %v8945_v36  ;;  %v9040_v46 = vrot.slane %v14978_v50, %v16651_v48  ;;  %v19658_v10 = vpop.permute.xlu0 %9137 }
 0xf55   : > { %v9048_v55 = vrot.slane %v9041_v63, %v16651_v48  ;;  %v9056_v1 = vrot.slane %v14979_v26, %v16651_v48  ;;  %v8954_v18 = vcombine.high %v8929_v16, %v8945_v36  ;;  %v8964_v15 = vrot.slane %v8957_v45, %v16651_v48 }
 0xf56   : > { %v9098_v4 = vpack.c.bf16 %v8819_v38, %v8751_v62  ;;  %v8752_v42 = vcombine.high %v8732_v31, %v8748_v37  ;;  %v8885_v47 = vcombine.low %v8861_v29, %v8877_v54  ;;  %v8972_v57 = vrot.slane %v14976_v23, %v16651_v48  ;;  %v19664_v61 = vpop.permute.xlu1 %9139 }
 0xf57   : > { %v8980_v58 = vrot.slane %v8973_v40, %v16651_v48  ;;  %v8988_v17 = vrot.slane %v14977_v34, %v16651_v48  ;;  %v8886_v59 = vcombine.high %v8861_v29, %v8877_v54  ;;  %v9057_v41 = vcombine.low %v19643_v20, %v9040_v46 }
 0xf58   : > { %v9100_v44 = vpack.c.bf16 %v8820_v11, %v8752_v42  ;;  %v9101_v0 = vpack.c.bf16 %v8953_v25, %v8885_v47  ;;  %v9073_v12 = vcombine.low %v9048_v55, %v9056_v1  ;;  %v8989_v27 = vcombine.low %v8964_v15, %v8972_v57 }
 0xf59   : > { %v9103_v51 = vpack.c.bf16 %v8954_v18, %v8886_v59  ;;  %v9005_v14 = vcombine.low %v8980_v58, %v8988_v17  ;;  %v9065_v5 = vrot.slane %v9057_v41, %v16669_v56  ;;  %v9058_v37 = vcombine.high %v19643_v20, %v9040_v46 }
 0xf5a   : > { %15568 = vmatmul.mubr.msk.bf16.vlgmr.msra.gmra.mrb[64].mxu0 %vm4606_vm1, %v9098_v4  ;;  %v9081_v32 = vrot.slane %v9073_v12, %v16669_v56  ;;  %v8997_v22 = vrot.slane %v8989_v27, %v16669_v56  ;;  %v9074_v7 = vcombine.high %v9048_v55, %v9056_v1  ;;  %v8990_v16 = vcombine.high %v8964_v15, %v8972_v57 }
 0xf5b   : > { %15576 = vmatmul.mubr.msk.bf16.vlgmr.msra.gmra.mrb[52].mxu1 %vm4606_vm1, %v9100_v44  ;;  %15583 = vmatprep.mubr.msk.bf16.mxu0 %vm4606_vm1, %v9101_v0  ;;  %v9013_v19 = vrot.slane %v9005_v14, %v16669_v56  ;;  %v9006_v36 = vcombine.high %v8980_v58, %v8988_v17  ;;  %v19691_v46 = vrot.slane %v9058_v37, %v16669_v56 }
 0xf5c   : > { %15591 = vmatprep.mubr.msk.bf16.mxu1 %vm4606_vm1, %v9103_v51  ;;  %v9134_v9 = vpop.permute.xlu0 %9133  ;;  %v9089_v3 = vcombine.low %v9065_v5, %v9081_v32  ;;  %v9090_v21 = vcombine.high %v9065_v5, %v9081_v32  ;;  %v19685_v11 = vrot.slane %v8990_v16, %v16669_v56  ;;  %v19694_v55 = vrot.slane %v9074_v7, %v16669_v56 }
 0xf5d   : > { %v9021_v53 = vcombine.low %v8997_v22, %v9013_v19  ;;  %v9022_v31 = vcombine.high %v8997_v22, %v9013_v19  ;;  %v19688_v25 = vrot.slane %v9006_v36, %v16669_v56 }
 0xf5e   : > { %v9136_v24 = vpop.permute.xlu1 %9135 }
 0xf5f   : > { %v19674_v26 = vpack.c.bf16 %v9089_v3, %v9021_v53  ;;  %v19676_v8 = vpack.c.bf16 %v9090_v21, %v9022_v31  ;;  %v9092_v53 = vcombine.high %v19691_v46, %v19694_v55  ;;  %v9024_v16 = vcombine.high %v19685_v11, %v19688_v25 }
 0xf60   : > { %v9150_v39 = vpop.permute.xlu0 %9149 }
 0xf61   : > { %v9477_v2 = vcombine.low %v19616_v6, %v9150_v39  ;;  %v9478_v43 = vcombine.high %v19616_v6, %v9150_v39 }
 0xf62   : > { %v9152_v35 = vpop.permute.xlu1 %9151 }
 0xf63   : > { %v9485_v45 = vrot.slane %v9477_v2, %v16651_v48  ;;  %v9492_v13 = vrot.slane %v9478_v43, %v16651_v48  ;;  %v9545_v6 = vcombine.low %v19632_v52, %v9152_v35  ;;  %v9546_v29 = vcombine.high %v19632_v52, %v9152_v35 }
 0xf64   : > { %v9166_v38 = vpop.permute.xlu0 %9165  ;;  %v9091_v35 = vcombine.low %v19691_v46, %v19694_v55 }
 0xf65   : > { %v9493_v50 = vcombine.low %v9134_v9, %v9166_v38  ;;  %v9494_v63 = vcombine.high %v9134_v9, %v9166_v38  ;;  %v9553_v4 = vrot.slane %v9545_v6, %v16651_v48  ;;  %v9560_v42 = vrot.slane %v9546_v29, %v16651_v48 }
 0xf66   : > { %v9168_v54 = vpop.permute.xlu1 %9167  ;;  %v9023_v38 = vcombine.low %v19685_v11, %v19688_v25 }
 0xf67   : > { %v9501_v23 = vrot.slane %v9493_v50, %v16651_v48  ;;  %v9508_v40 = vrot.slane %v9494_v63, %v16651_v48  ;;  %v9561_v34 = vcombine.low %v9136_v24, %v9168_v54  ;;  %v9562_v20 = vcombine.high %v9136_v24, %v9168_v54 }
 0xf68   : > { %v9154_v62 = vpop.permute.xlu0 %9153 }
 0xf69   : > { %v9509_v52 = vcombine.low %v9485_v45, %v9501_v23  ;;  %v9510_v1 = vcombine.high %v9485_v45, %v9501_v23  ;;  %v9525_v18 = vcombine.low %v9492_v13, %v9508_v40  ;;  %v9526_v15 = vcombine.high %v9492_v13, %v9508_v40 }
 0xf6a   : > { %v9569_v47 = vrot.slane %v9561_v34, %v16651_v48  ;;  %v9576_v57 = vrot.slane %v9562_v20, %v16651_v48  ;;  %v9156_v58 = vpop.permute.xlu1 %9155  ;;  %v9613_v2 = vcombine.low %v19645_v28, %v9154_v62  ;;  %v9614_v43 = vcombine.high %v19645_v28, %v9154_v62 }
 0xf6b   : > { %v9517_v17 = vrot.slane %v9509_v52, %v16669_v56  ;;  %v9524_v59 = vrot.slane %v9510_v1, %v16669_v56  ;;  %v9533_v44 = vrot.slane %v9525_v18, %v16669_v56  ;;  %v9540_v0 = vrot.slane %v9526_v15, %v16669_v56 }
 0xf6c   : > { %v9577_v41 = vcombine.low %v9553_v4, %v9569_v47  ;;  %v9578_v12 = vcombine.high %v9553_v4, %v9569_v47  ;;  %v9593_v51 = vcombine.low %v9560_v42, %v9576_v57  ;;  %v9594_v27 = vcombine.high %v9560_v42, %v9576_v57  ;;  %v9170_v14 = vpop.permute.xlu0 %9169 }
 0xf6d   : > { %v10021_v9 = vcombine.low %v9517_v17, %v9524_v59  ;;  %v14988_v5 = vcombine.high %v9517_v17, %v9524_v59  ;;  %v10037_v32 = vcombine.low %v9533_v44, %v9540_v0  ;;  %v14989_v24 = vcombine.high %v9533_v44, %v9540_v0 }
 0xf6e   : > { %v9585_v22 = vrot.slane %v9577_v41, %v16669_v56  ;;  %v9592_v19 = vrot.slane %v9578_v12, %v16669_v56  ;;  %v19707_v39 = vrot.slane %v9593_v51, %v16669_v56  ;;  %v9608_v3 = vrot.slane %v9594_v27, %v16669_v56  ;;  %v9172_v21 = vpop.permute.xlu1 %9171 }
 0xf6f   : > { %v19723_v36 = vrot.slane %v10021_v9, %v16651_v48  ;;  %v19726_v28 = vrot.slane %v14988_v5, %v16651_v48  ;;  %v9681_v50 = vcombine.low %v19653_v60, %v9156_v58  ;;  %v9682_v63 = vcombine.high %v19653_v60, %v9156_v58 }
 0xf70   : > { %v10089_v31 = vcombine.low %v9585_v22, %v9592_v19  ;;  %v14990_v37 = vcombine.high %v9585_v22, %v9592_v19  ;;  %v19716_v7 = vpop.permute.xlu0 %10309  ;;  %v19731_v45 = vrot.slane %v10037_v32, %v16651_v48  ;;  %v19734_v13 = vrot.slane %v14989_v24, %v16651_v48 }
 0xf71   : > { %v10105_v6 = vcombine.low %v19707_v39, %v9608_v3  ;;  %v14991_v29 = vcombine.high %v19707_v39, %v9608_v3  ;;  %v9621_v23 = vrot.slane %v9613_v2, %v16651_v48  ;;  %v9628_v40 = vrot.slane %v9614_v43, %v16651_v48 }
 0xf72   : > { %v19738_v54 = vpop.permute.xlu1 %10311  ;;  %v9629_v34 = vcombine.low %v19658_v10, %v9170_v14  ;;  %v9630_v60 = vcombine.high %v19658_v10, %v9170_v14  ;;  %v19745_v20 = vrot.slane %v10089_v31, %v16651_v48  ;;  %v19748_v62 = vrot.slane %v14990_v37, %v16651_v48 }
 0xf73   : > { %v9697_v52 = vcombine.low %v19664_v61, %v9172_v21  ;;  %v9698_v1 = vcombine.high %v19664_v61, %v9172_v21  ;;  %v9689_v15 = vrot.slane %v9681_v50, %v16651_v48  ;;  %v9696_v4 = vrot.slane %v9682_v63, %v16651_v48 }
 0xf74   : > { %v10342_v18 = vpop.permute.xlu0 %10341  ;;  %v9637_v42 = vrot.slane %v9629_v34, %v16651_v48  ;;  %v9644_v47 = vrot.slane %v9630_v60, %v16651_v48  ;;  %v10053_v17 = vcombine.low %v19723_v36, %v19726_v28  ;;  %v10069_v61 = vcombine.low %v19731_v45, %v19734_v13 }
 0xf75   : > { %v9705_v10 = vrot.slane %v9697_v52, %v16651_v48  ;;  %v9712_v57 = vrot.slane %v9698_v1, %v16651_v48  ;;  %v19773_v63 = vrot.slane %v10105_v6, %v16651_v48  ;;  %v10405_v1 = vcombine.low %v19716_v7, %v10342_v18 }
 0xf76   : > { %v10326_v58 = vpop.permute.xlu1 %10325  ;;  %v9645_v59 = vcombine.low %v9621_v23, %v9637_v42  ;;  %v9646_v44 = vcombine.high %v9621_v23, %v9637_v42  ;;  %v9661_v0 = vcombine.low %v9628_v40, %v9644_v47  ;;  %v9662_v41 = vcombine.high %v9628_v40, %v9644_v47 }
 0xf77   : > { %v9713_v12 = vcombine.low %v9689_v15, %v9705_v10  ;;  %v9714_v51 = vcombine.high %v9689_v15, %v9705_v10  ;;  %v9729_v27 = vcombine.low %v9696_v4, %v9712_v57  ;;  %v9730_v14 = vcombine.high %v9696_v4, %v9712_v57 }
 0xf78   : > { %v10358_v9 = vpop.permute.xlu0 %10357  ;;  %v9653_v5 = vrot.slane %v9645_v59, %v16669_v56  ;;  %v9660_v32 = vrot.slane %v9646_v44, %v16669_v56  ;;  %v9669_v24 = vrot.slane %v9661_v0, %v16669_v56  ;;  %v9676_v22 = vrot.slane %v9662_v41, %v16669_v56 }
 0xf79   : > { %v9721_v19 = vrot.slane %v9713_v12, %v16669_v56  ;;  %v9728_v39 = vrot.slane %v9714_v51, %v16669_v56  ;;  %v9737_v3 = vrot.slane %v9729_v27, %v16669_v56  ;;  %v9744_v21 = vrot.slane %v9730_v14, %v16669_v56 }
 0xf7a   : > { %v19770_v2 = vpop.permute.xlu1 %10327  ;;  %v10157_v43 = vcombine.low %v9653_v5, %v9660_v32  ;;  %v14992_v31 = vcombine.high %v9653_v5, %v9660_v32  ;;  %v10173_v37 = vcombine.low %v9669_v24, %v9676_v22  ;;  %v14993_v50 = vcombine.high %v9669_v24, %v9676_v22 }
 0xf7b   : > { %v19776_v23 = vrot.slane %v14991_v29, %v16651_v48  ;;  %v10225_v40 = vcombine.low %v9721_v19, %v9728_v39  ;;  %v14994_v34 = vcombine.high %v9721_v19, %v9728_v39  ;;  %v10241_v52 = vcombine.low %v9737_v3, %v9744_v21 }
 0xf7c   : > { %v19778_v60 = vpop.permute.xlu0 %10313  ;;  %v10406_v15 = vcombine.high %v19716_v7, %v10342_v18  ;;  %v10061_v4 = vrot.slane %v10053_v17, %v16669_v56  ;;  %v19784_v42 = vrot.slane %v10157_v43, %v16651_v48  ;;  %v19787_v6 = vrot.slane %v14992_v31, %v16651_v48 }
 0xf7d   : > { %v14995_v47 = vcombine.high %v9737_v3, %v9744_v21  ;;  %v10077_v29 = vrot.slane %v10069_v61, %v16669_v56  ;;  %v19791_v57 = vrot.slane %v10173_v37, %v16651_v48  ;;  %v19794_v59 = vrot.slane %v14993_v50, %v16651_v48 }
 0xf7e   : > { %v10344_v10 = vpop.permute.xlu1 %10343  ;;  %v10421_v44 = vcombine.low %v10326_v58, %v10358_v9  ;;  %v10422_v7 = vcombine.high %v10326_v58, %v10358_v9  ;;  %v19797_v18 = vrot.slane %v10225_v40, %v16651_v48  ;;  %v19800_v17 = vrot.slane %v14994_v34, %v16651_v48 }
 0xf7f   : > { %v10121_v0 = vcombine.low %v19745_v20, %v19748_v62  ;;  %v10137_v61 = vcombine.low %v19773_v63, %v19776_v23  ;;  %v19807_v41 = vrot.slane %v10241_v52, %v16651_v48  ;;  %v10413_v12 = vrot.slane %v10405_v1, %v16651_v48 }
 0xf80   : > { %v10429_v51 = vrot.slane %v10421_v44, %v16651_v48  ;;  %v10436_v58 = vrot.slane %v10422_v7, %v16651_v48  ;;  %v19813_v27 = vrot.slane %v14995_v47, %v16651_v48  ;;  %v10420_v14 = vrot.slane %v10406_v15, %v16651_v48  ;;  %v19818_v32 = vpop.permute.xlu0 %10329 }
 0xf81   : > { %v10129_v9 = vrot.slane %v10121_v0, %v16669_v56  ;;  %v10145_v5 = vrot.slane %v10137_v61, %v16669_v56  ;;  %v10473_v39 = vcombine.low %v19738_v54, %v10344_v10  ;;  %v10474_v3 = vcombine.high %v19738_v54, %v10344_v10 }
 0xf82   : > { %v10360_v24 = vpop.permute.xlu1 %10359  ;;  %v10437_v22 = vcombine.low %v10413_v12, %v10429_v51  ;;  %v10438_v19 = vcombine.high %v10413_v12, %v10429_v51  ;;  %v10085_v21 = vcombine.low %v10061_v4, %v10077_v29  ;;  %v10086_v31 = vcombine.high %v10061_v4, %v10077_v29 }
 0xf83   : > { %v10153_v43 = vcombine.low %v10129_v9, %v10145_v5  ;;  %v10154_v37 = vcombine.high %v10129_v9, %v10145_v5  ;;  %v10453_v50 = vcombine.low %v10420_v14, %v10436_v58  ;;  %v10454_v40 = vcombine.high %v10420_v14, %v10436_v58 }
 0xf84   : > { %v10189_v34 = vcombine.low %v19784_v42, %v19787_v6  ;;  %v10205_v52 = vcombine.low %v19791_v57, %v19794_v59  ;;  %v10489_v47 = vcombine.low %v19770_v2, %v10360_v24  ;;  %v10490_v44 = vcombine.high %v19770_v2, %v10360_v24  ;;  %v10346_v51 = vpop.permute.xlu0 %10345 }
 0xf85   : > { %v10301_v1 = vpack.c.bf16 %v10153_v43, %v10085_v21  ;;  %v10303_v15 = vpack.c.bf16 %v10154_v37, %v10086_v31  ;;  %v19831_v54 = vrot.slane %v10437_v22, %v16669_v56  ;;  %v19834_v4 = vrot.slane %v10438_v19, %v16669_v56 }
 0xf86   : > { %v19828_v7 = vpop.permute.xlu1 %10315  ;;  %v10481_v29 = vrot.slane %v10473_v39, %v16651_v48  ;;  %v19838_v10 = vrot.slane %v10474_v3, %v16651_v48  ;;  %v10497_v61 = vrot.slane %v10489_v47, %v16651_v48  ;;  %v19846_v12 = vrot.slane %v10490_v44, %v16651_v48 }
 0xf87   : > { %15755 = vmatprep.subr.msk.bf16.mxu0 %vm4606_vm1, %v10301_v1  ;;  %15757 = vmatprep.subr.msk.bf16.mxu1 %vm4606_vm1, %v10303_v15  ;;  %v11760_v0 = vsel %vm4606_vm1, %v10301_v1, 0  ;;  %v11821_v2 = vsel %vm4606_vm1, %v10303_v15, 0  ;;  %v10197_v58 = vrot.slane %v10189_v34, %v16669_v56  ;;  %v10213_v14 = vrot.slane %v10205_v52, %v16669_v56 }
 0xf88   : > { %15580 = vmatpush3.bf16.xpose.msra.mxu0 %v11760_v0  ;;  %15588 = vmatpush3.bf16.xpose.msra.mxu1 %v11821_v2  ;;  %v10257_v9 = vcombine.low %v19797_v18, %v19800_v17  ;;  %v10505_v5 = vcombine.low %v10481_v29, %v10497_v61  ;;  %v10506_v24 = vcombine.high %v10481_v29, %v10497_v61  ;;  %v10362_v52 = vpop.permute.xlu0 %10361 }
 0xf89   : > { %v10521_v22 = vcombine.low %v19838_v10, %v19846_v12  ;;  %v19862_v39 = vpack.c.bf16 %v9091_v35, %v9023_v38  ;;  %v19865_v3 = vrot.slane %v10453_v50, %v16669_v56  ;;  %v10273_v43 = vcombine.low %v19807_v41, %v19813_v27 }
 0xf8a   : > { %v19854_v19 = vpop.permute.xlu1 %10331  ;;  %v10265_v21 = vrot.slane %v10257_v9, %v16669_v56  ;;  %v19876_v31 = vpack.c.bf16 %v9092_v53, %v9024_v16  ;;  %v19879_v37 = vrot.slane %v10454_v40, %v16669_v56  ;;  %v10949_v35 = vcombine.low %v19831_v54, %v19834_v4 }
 0xf8b   : > { %v14996_v38 = vcombine.high %v19831_v54, %v19834_v4  ;;  %v10522_v50 = vcombine.high %v19838_v10, %v19846_v12  ;;  %v10221_v34 = vcombine.low %v10197_v58, %v10213_v14  ;;  %v10281_v11 = vrot.slane %v10273_v43, %v16669_v56 }
 0xf8c   : > { %v10541_v25 = vcombine.low %v19778_v60, %v10346_v51  ;;  %v10054_v46 = vcombine.high %v19723_v36, %v19726_v28  ;;  %v19892_v55 = vrot.slane %v10505_v5, %v16669_v56  ;;  %v19895_v53 = vrot.slane %v10506_v24, %v16669_v56 }
 0xf8d   : > { %v19898_v16 = vrot.slane %v10521_v22, %v16669_v56  ;;  %v10222_v40 = vcombine.high %v10197_v58, %v10213_v14  ;;  %v10289_v15 = vcombine.low %v10265_v21, %v10281_v11  ;;  %v10290_v47 = vcombine.high %v10265_v21, %v10281_v11  ;;  %v19927_v21 = vpop.permute.xlu0 %10317 }
 0xf8e   : > { %v19900_v1 = vpop.permute.xlu1 %10347  ;;  %v10542_v44 = vcombine.high %v19778_v60, %v10346_v51  ;;  %v10549_v29 = vrot.slane %v10541_v25, %v16651_v48  ;;  %v10068_v36 = vrot.slane %v10054_v46, %v16669_v56  ;;  %v10070_v28 = vcombine.high %v19731_v45, %v19734_v13 }
 0xf8f   : > { %v10122_v10 = vcombine.high %v19745_v20, %v19748_v62  ;;  %v10138_v0 = vcombine.high %v19773_v63, %v19776_v23  ;;  %v10302_v2 = vpack.c.bf16 %v10289_v15, %v10221_v34  ;;  %v10304_v61 = vpack.c.bf16 %v10290_v47, %v10222_v40 }
 0xf90   : > { %v10557_v12 = vcombine.low %v19818_v32, %v10362_v52  ;;  %v10558_v58 = vcombine.high %v19818_v32, %v10362_v52  ;;  %v10084_v60 = vrot.slane %v10070_v28, %v16669_v56  ;;  %v10190_v45 = vcombine.high %v19784_v42, %v19787_v6 }
 0xf91   : > { %v10136_v51 = vrot.slane %v10122_v10, %v16669_v56  ;;  %v10152_v14 = vrot.slane %v10138_v0, %v16669_v56  ;;  %15756 = vmatprep.subr.msk.bf16.mxu0 %vm4606_vm1, %v10302_v2  ;;  %15758 = vmatprep.subr.msk.bf16.mxu1 %vm4606_vm1, %v10304_v61  ;;  %v11763_v20 = vsel %vm4606_vm1, %v10302_v2, 0  ;;  %v11824_v62 = vsel %vm4606_vm1, %v10304_v61, 0 }
 0xf92   : > { %v19918_v13 = vpop.permute.xlu1 %10363  ;;  %v10565_v63 = vrot.slane %v10557_v12, %v16651_v48  ;;  %v10572_v23 = vrot.slane %v10558_v58, %v16651_v48  ;;  %15582 = vmatpush3.bf16.xpose.msra.mxu0 %v11763_v20  ;;  %15590 = vmatpush3.bf16.xpose.msra.mxu1 %v11824_v62  ;;  %v10556_v32 = vrot.slane %v10542_v44, %v16651_v48  ;;  %v21256_v12 = vld [vmem:[#allocation14_spill] sm:$0xff] }
 0xf93   : > { %v10087_v9 = vcombine.low %v10068_v36, %v10084_v60  ;;  %v10155_v42 = vcombine.low %v10136_v51, %v10152_v14  ;;  %v10088_v6 = vcombine.high %v10068_v36, %v10084_v60  ;;  %v10156_v5 = vcombine.high %v10136_v51, %v10152_v14 }
 0xf94   : > { %v10573_v24 = vcombine.low %v10549_v29, %v10565_v63  ;;  %v10574_v22 = vcombine.high %v10549_v29, %v10565_v63  ;;  %v19930_v43 = vrot.slane %v10522_v50, %v16669_v56  ;;  %v10589_v11 = vcombine.low %v10556_v32, %v10572_v23 }
 0xf95   : > { %v10305_v34 = vpack.c.bf16 %v10155_v42, %v10087_v9  ;;  %v10206_v25 = vcombine.high %v19791_v57, %v19794_v59  ;;  %v10965_v40 = vcombine.low %v19865_v3, %v19879_v37  ;;  %v10307_v52 = vpack.c.bf16 %v10156_v5, %v10088_v6 }
 0xf96   : > { %v19934_v46 = vpop.permute.xlu1 %10319  ;;  %v10590_v15 = vcombine.high %v10556_v32, %v10572_v23  ;;  %v10204_v47 = vrot.slane %v10190_v45, %v16669_v56  ;;  %v19941_v44 = vrot.slane %v10573_v24, %v16669_v56  ;;  %v19944_v50 = vrot.slane %v10574_v22, %v16669_v56 }
 0xf97   : > { %15759 = vmatprep.subr.msk.bf16.mxu0 %vm4606_vm1, %v10305_v34  ;;  %v10220_v29 = vrot.slane %v10206_v25, %v16669_v56  ;;  %v10258_v57 = vcombine.high %v19797_v18, %v19800_v17  ;;  %v14997_v59 = vcombine.high %v19865_v3, %v19879_v37  ;;  %v11017_v36 = vcombine.low %v19892_v55, %v19895_v53 }
 0xf98   : > { %v14998_v28 = vcombine.high %v19892_v55, %v19895_v53  ;;  %15761 = vmatprep.subr.msk.bf16.mxu1 %vm4606_vm1, %v10307_v52  ;;  %v10274_v10 = vcombine.high %v19807_v41, %v19813_v27  ;;  %v11033_v0 = vcombine.low %v19898_v16, %v19930_v43  ;;  %v14999_v18 = vcombine.high %v19898_v16, %v19930_v43  ;;  %v10350_v16 = vpop.permute.xlu0 %10349 }
 0xf99   : > { %v19963_v17 = vrot.slane %v10589_v11, %v16669_v56  ;;  %v10272_v3 = vrot.slane %v10258_v57, %v16669_v56  ;;  %v19969_v55 = vrot.slane %v10590_v15, %v16669_v56  ;;  %15584 = vmatmul.mubr.msk.bf16.vlgmr.msra.gmra.mrb[68].mxu0 %vm4606_vm1, %v19674_v26  ;;  %15592 = vmatmul.mubr.msk.bf16.vlgmr.msra.gmra.mrb[56].mxu1 %vm4606_vm1, %v19676_v8  ;;  %v11882_v41 = vsel %vm4606_vm1, %v10305_v34, 0 }
 0xf9a   : > { %v19966_v37 = vpop.permute.xlu1 %10333  ;;  %v10288_v27 = vrot.slane %v10274_v10, %v16669_v56  ;;  %v10609_v53 = vcombine.low %v19828_v7, %v19900_v1  ;;  %v11085_v2 = vcombine.low %v19941_v44, %v19944_v50  ;;  %v15000_v61 = vcombine.high %v19941_v44, %v19944_v50  ;;  %15596 = vmatpush3.bf16.xpose.msra.mxu0 %v11882_v41 }
 0xf9b   : > { %15599 = vmatprep.mubr.msk.bf16.mxu0 %vm4606_vm1, %v19320_v30  ;;  %v11943_v26 = vsel %vm4606_vm1, %v10307_v52, 0  ;;  %v10223_v8 = vcombine.low %v10204_v47, %v10220_v29  ;;  %15607 = vmatprep.mubr.msk.bf16.mxu1 %vm4606_vm1, %v21256_v12  ;;  %v10224_v60 = vcombine.high %v10204_v47, %v10220_v29  ;;  %v10610_v14 = vcombine.high %v19828_v7, %v19900_v1 }
 0xf9c   : > { %15604 = vmatpush3.bf16.xpose.msra.mxu1 %v11943_v26  ;;  %v10291_v58 = vcombine.low %v10272_v3, %v10288_v27  ;;  %v10292_v51 = vcombine.high %v10272_v3, %v10288_v27  ;;  %v10617_v45 = vrot.slane %v10609_v53, %v16651_v48  ;;  %v10677_v20 = vcombine.low %v19927_v21, %v10350_v16 }
 0xf9d   : > { %v10625_v30 = vcombine.low %v19854_v19, %v19918_v13  ;;  %v10626_v32 = vcombine.high %v19854_v19, %v19918_v13  ;;  %v10956_v9 = vrot.slane %v10949_v35, %v16651_v48  ;;  %v10964_v1 = vrot.slane %v14996_v38, %v16651_v48 }
 0xf9e   : > { %v19994_v62 = vpop.permute.xlu1 %10323  ;;  %v10306_v63 = vpack.c.bf16 %v10291_v58, %v10223_v8  ;;  %v10308_v23 = vpack.c.bf16 %v10292_v51, %v10224_v60  ;;  %v10972_v42 = vrot.slane %v10965_v40, %v16651_v48  ;;  %v10980_v6 = vrot.slane %v14997_v59, %v16651_v48 }
 0xf9f   : > { %v10633_v7 = vrot.slane %v10625_v30, %v16651_v48  ;;  %v10678_v19 = vcombine.high %v19927_v21, %v10350_v16  ;;  %v10640_v13 = vrot.slane %v10626_v32, %v16651_v48  ;;  %v11024_v35 = vrot.slane %v11017_v36, %v16651_v48 }
 0xfa0   : > { %15760 = vmatprep.subr.msk.bf16.mxu0 %vm4606_vm1, %v10306_v63  ;;  %15762 = vmatprep.subr.msk.bf16.mxu1 %vm4606_vm1, %v10308_v23  ;;  %v10624_v5 = vrot.slane %v10610_v14, %v16651_v48  ;;  %v11885_v54 = vsel %vm4606_vm1, %v10306_v63, 0  ;;  %v10981_v38 = vcombine.low %v10956_v9, %v10964_v1  ;;  %v10997_v43 = vcombine.low %v10972_v42, %v10980_v6 }
 0xfa1   : > { %v10641_v24 = vcombine.low %v10617_v45, %v10633_v7  ;;  %v10642_v22 = vcombine.high %v10617_v45, %v10633_v7  ;;  %v11032_v34 = vrot.slane %v14998_v28, %v16651_v48  ;;  %v11040_v11 = vrot.slane %v11033_v0, %v16651_v48 }
 0xfa2   : > { %v20016_v4 = vpop.permute.xlu1 %10339  ;;  %v11101_v21 = vcombine.low %v19963_v17, %v19969_v55  ;;  %v15001_v25 = vcombine.high %v19963_v17, %v19969_v55  ;;  %v10685_v40 = vrot.slane %v10677_v20, %v16651_v48  ;;  %15598 = vmatpush3.bf16.xpose.msra.mxu0 %v11885_v54  ;;  %v11946_v52 = vsel %vm4606_vm1, %v10308_v23, 0 }
 0xfa3   : > { %v10692_v15 = vrot.slane %v10678_v19, %v16651_v48  ;;  %v10657_v47 = vcombine.low %v10624_v5, %v10640_v13  ;;  %v11048_v29 = vrot.slane %v14999_v18, %v16651_v48  ;;  %v11049_v57 = vcombine.low %v11024_v35, %v11032_v34  ;;  %v10366_v18 = vpop.permute.xlu0 %10365 }
 0xfa4   : > { %15606 = vmatpush3.bf16.xpose.msra.mxu1 %v11946_v52  ;;  %v10649_v59 = vrot.slane %v10641_v24, %v16669_v56  ;;  %v10656_v36 = vrot.slane %v10642_v22, %v16669_v56  ;;  %v10658_v28 = vcombine.high %v10624_v5, %v10640_v13  ;;  %v10982_v10 = vcombine.high %v10956_v9, %v10964_v1 }
 0xfa5   : > { %v20033_v3 = vrot.slane %v10981_v38, %v16669_v56  ;;  %v20036_v41 = vrot.slane %v10997_v43, %v16669_v56  ;;  %v20039_v27 = vrot.slane %v11049_v57, %v16669_v56  ;;  %v11065_v53 = vcombine.low %v11040_v11, %v11048_v29 }
 0xfa6   : > { %v20030_v0 = vpop.permute.xlu1 %10355  ;;  %v20042_v16 = vrot.slane %v10982_v10, %v16669_v56  ;;  %v10998_v26 = vcombine.high %v10972_v42, %v10980_v6  ;;  %v11050_v8 = vcombine.high %v11024_v35, %v11032_v34  ;;  %v11066_v12 = vcombine.high %v11040_v11, %v11048_v29 }
 0xfa7   : > { %v10665_v58 = vrot.slane %v10657_v47, %v16669_v56  ;;  %v20046_v60 = vrot.slane %v11065_v53, %v16669_v56  ;;  %v10693_v51 = vcombine.low %v19966_v37, %v10366_v18  ;;  %v10694_v14 = vcombine.high %v19966_v37, %v10366_v18 }
 0xfa8   : > { %v10672_v45 = vrot.slane %v10658_v28, %v16669_v56  ;;  %v20052_v20 = vrot.slane %v10998_v26, %v16669_v56  ;;  %v20055_v30 = vrot.slane %v11050_v8, %v16669_v56  ;;  %v20058_v63 = vrot.slane %v11066_v12, %v16669_v56 }
 0xfa9   : > { %v11013_v32 = vcombine.low %v20033_v3, %v20036_v41  ;;  %v11081_v9 = vcombine.low %v20039_v27, %v20046_v60  ;;  %v10701_v37 = vrot.slane %v10693_v51, %v16651_v48  ;;  %v10708_v7 = vrot.slane %v10694_v14, %v16651_v48  ;;  %15600 = vmatmul.mubr.msk.bf16.vlgmr.msra.gmra.mrb[72].mxu0 %vm4606_vm1, %v19862_v39 }
 0xfaa   : > { %v20060_v23 = vpop.permute.xlu1 %10335  ;;  %v11153_v1 = vcombine.low %v10649_v59, %v10656_v36  ;;  %v15002_v42 = vcombine.high %v10649_v59, %v10656_v36  ;;  %v11015_v6 = vcombine.low %v20042_v16, %v20052_v20  ;;  %v11083_v19 = vcombine.low %v20055_v30, %v20058_v63 }
 0xfab   : > { %15608 = vmatmul.mubr.msk.bf16.vlgmr.msra.gmra.mrb[60].mxu1 %vm4606_vm1, %v19876_v31  ;;  %v11493_v13 = vpack.c.bf16 %v11081_v9, %v11013_v32  ;;  %v10709_v35 = vcombine.low %v10685_v40, %v10701_v37  ;;  %v10710_v5 = vcombine.high %v10685_v40, %v10701_v37  ;;  %v10725_v24 = vcombine.low %v10692_v15, %v10708_v7 }
 0xfac   : > { %v11169_v22 = vcombine.low %v10665_v58, %v10672_v45  ;;  %v15003_v54 = vcombine.high %v10665_v58, %v10672_v45  ;;  %v11497_v38 = vpack.c.bf16 %v11083_v19, %v11015_v6  ;;  %v10726_v43 = vcombine.high %v10692_v15, %v10708_v7 }
 0xfad   : > { %15611 = vmatprep.subr.bf16.mxu0 %v11493_v13  ;;  %v10717_v39 = vrot.slane %v10709_v35, %v16669_v56  ;;  %v10724_v34 = vrot.slane %v10710_v5, %v16669_v56  ;;  %v10733_v11 = vrot.slane %v10725_v24, %v16669_v56  ;;  %v11092_v31 = vrot.slane %v11085_v2, %v16651_v48 }
 0xfae   : > { %15627 = vmatprep.subr.bf16.mxu1 %v11497_v38  ;;  %v10740_v40 = vrot.slane %v10726_v43, %v16669_v56  ;;  %15612 = vmatpush3.bf16.msra.mxu0 %v11493_v13  ;;  %v11100_v52 = vrot.slane %v15000_v61, %v16651_v48  ;;  %v10352_v15 = vpop.permute.xlu1 %10351  ;;  %v11108_v57 = vrot.slane %v11101_v21, %v16651_v48 }
 0xfaf   : > { %v11221_v47 = vcombine.low %v10717_v39, %v10724_v34  ;;  %v15004_v29 = vcombine.high %v10717_v39, %v10724_v34  ;;  %15628 = vmatpush3.bf16.msra.mxu1 %v11497_v38  ;;  %v11116_v2 = vrot.slane %v15001_v25, %v16651_v48  ;;  %v11160_v44 = vrot.slane %v11153_v1, %v16651_v48 }
 0xfb0   : > { %v11237_v59 = vcombine.low %v10733_v11, %v10740_v40  ;;  %v15005_v36 = vcombine.high %v10733_v11, %v10740_v40  ;;  %v11117_v28 = vcombine.low %v11092_v31, %v11100_v52  ;;  %v11168_v61 = vrot.slane %v15002_v42, %v16651_v48 }
 0xfb1   : > { %v11133_v50 = vcombine.low %v11108_v57, %v11116_v2  ;;  %v11176_v10 = vrot.slane %v11169_v22, %v16651_v48  ;;  %v11184_v53 = vrot.slane %v15003_v54, %v16651_v48  ;;  %v11118_v21 = vcombine.high %v11092_v31, %v11100_v52 }
 0xfb2   : > { %v20101_v18 = vrot.slane %v11117_v28, %v16669_v56  ;;  %v11134_v26 = vcombine.high %v11108_v57, %v11116_v2  ;;  %v11014_v17 = vcombine.high %v20033_v3, %v20036_v41  ;;  %v11185_v25 = vcombine.low %v11160_v44, %v11168_v61  ;;  %v10368_v32 = vpop.permute.xlu1 %10367 }
 0xfb3   : > { %v11141_v55 = vrot.slane %v11133_v50, %v16669_v56  ;;  %v11201_v8 = vcombine.low %v11176_v10, %v11184_v53  ;;  %v11186_v12 = vcombine.high %v11160_v44, %v11168_v61  ;;  %v20107_v58 = vrot.slane %v11118_v21, %v16669_v56 }
 0xfb4   : > { %v20110_v51 = vrot.slane %v11134_v26, %v16669_v56  ;;  %v11202_v14 = vcombine.high %v11176_v10, %v11184_v53  ;;  %v11082_v45 = vcombine.high %v20039_v27, %v20046_v60  ;;  %v11193_v3 = vrot.slane %v11185_v25, %v16669_v56 }
 0xfb5   : > { %v11149_v9 = vcombine.low %v20101_v18, %v11141_v55  ;;  %v11209_v41 = vrot.slane %v11201_v8, %v16669_v56  ;;  %v11200_v37 = vrot.slane %v11186_v12, %v16669_v56  ;;  %v10745_v6 = vcombine.low %v19934_v46, %v10352_v15 }
 0xfb6   : > { %v11151_v7 = vcombine.low %v20107_v58, %v20110_v51  ;;  %v11216_v1 = vrot.slane %v11202_v14, %v16669_v56  ;;  %v20121_v42 = vpack.c.bf16 %v11082_v45, %v11014_v17  ;;  %v10746_v27 = vcombine.high %v19934_v46, %v10352_v15 }
 0xfb7   : > { %v11217_v19 = vcombine.low %v11193_v3, %v11209_v41  ;;  %v10761_v60 = vcombine.low %v20060_v23, %v10368_v32  ;;  %v10762_v13 = vcombine.high %v20060_v23, %v10368_v32  ;;  %v10753_v5 = vrot.slane %v10745_v6, %v16651_v48 }
 0xfb8   : > { %v11219_v35 = vcombine.low %v11200_v37, %v11216_v1  ;;  %v11228_v24 = vrot.slane %v11221_v47, %v16651_v48  ;;  %v11236_v22 = vrot.slane %v15004_v29, %v16651_v48  ;;  %v10760_v38 = vrot.slane %v10746_v27, %v16651_v48 }
 0xfb9   : > { %v11494_v54 = vpack.c.bf16 %v11217_v19, %v11149_v9  ;;  %v10769_v43 = vrot.slane %v10761_v60, %v16651_v48  ;;  %v10776_v39 = vrot.slane %v10762_v13, %v16651_v48  ;;  %v11244_v46 = vrot.slane %v11237_v59, %v16651_v48 }
 0xfba   : > { %v11498_v34 = vpack.c.bf16 %v11219_v35, %v11151_v7  ;;  %v11252_v11 = vrot.slane %v15005_v36, %v16651_v48  ;;  %v11253_v23 = vcombine.low %v11228_v24, %v11236_v22  ;;  %v11150_v57 = vcombine.high %v20101_v18, %v11141_v55 }
 0xfbb   : > { %15613 = vmatprep.subr.bf16.mxu0 %v11494_v54  ;;  %v10777_v31 = vcombine.low %v10753_v5, %v10769_v43  ;;  %v10778_v40 = vcombine.high %v10753_v5, %v10769_v43  ;;  %v10793_v52 = vcombine.low %v10760_v38, %v10776_v39  ;;  %v10794_v15 = vcombine.high %v10760_v38, %v10776_v39 }
 0xfbc   : > { %15629 = vmatprep.subr.bf16.mxu1 %v11498_v34  ;;  %15614 = vmatpush3.bf16.msra.mxu0 %v11494_v54  ;;  %v11261_v47 = vrot.slane %v11253_v23, %v16669_v56  ;;  %v11269_v29 = vcombine.low %v11244_v46, %v11252_v11  ;;  %v11218_v50 = vcombine.high %v11193_v3, %v11209_v41 }
 0xfbd   : > { %15630 = vmatpush3.bf16.msra.mxu1 %v11498_v34  ;;  %15619 = vmatprep.subr.bf16.mxu0 %v20121_v42  ;;  %v10785_v2 = vrot.slane %v10777_v31, %v16669_v56  ;;  %v10792_v59 = vrot.slane %v10778_v40, %v16669_v56  ;;  %v10801_v36 = vrot.slane %v10793_v52, %v16669_v56 }
 0xfbe   : > { %v10808_v28 = vrot.slane %v10794_v15, %v16669_v56  ;;  %v11277_v44 = vrot.slane %v11269_v29, %v16669_v56  ;;  %v11016_v61 = vcombine.high %v20042_v16, %v20052_v20  ;;  %v11084_v18 = vcombine.high %v20055_v30, %v20058_v63 }
 0xfbf   : > { %v11289_v10 = vcombine.low %v10785_v2, %v10792_v59  ;;  %v15006_v53 = vcombine.high %v10785_v2, %v10792_v59  ;;  %v11152_v21 = vcombine.high %v20107_v58, %v20110_v51  ;;  %v20149_v55 = vpack.c.bf16 %v11218_v50, %v11150_v57 }
 0xfc0   : > { %v11305_v26 = vcombine.low %v10801_v36, %v10808_v28  ;;  %v15007_v17 = vcombine.high %v10801_v36, %v10808_v28  ;;  %v20153_v12 = vpack.c.bf16 %v11084_v18, %v11016_v61  ;;  %v11220_v14 = vcombine.high %v11200_v37, %v11216_v1 }
 0xfc1   : > { %v11296_v25 = vrot.slane %v11289_v10, %v16651_v48  ;;  %v11304_v8 = vrot.slane %v15006_v53, %v16651_v48  ;;  %v11286_v45 = vcombine.high %v11261_v47, %v11277_v44  ;;  %v11254_v30 = vcombine.high %v11228_v24, %v11236_v22 }
 0xfc2   : > { %v11312_v16 = vrot.slane %v11305_v26, %v16651_v48  ;;  %v11320_v20 = vrot.slane %v15007_v17, %v16651_v48  ;;  %v20157_v32 = vpack.c.bf16 %v11220_v14, %v11152_v21  ;;  %v11270_v58 = vcombine.high %v11244_v46, %v11252_v11 }
 0xfc3   : > { %v11321_v63 = vcombine.low %v11296_v25, %v11304_v8  ;;  %v11322_v51 = vcombine.high %v11296_v25, %v11304_v8  ;;  %v11268_v3 = vrot.slane %v11254_v30, %v16669_v56  ;;  %v11285_v27 = vcombine.low %v11261_v47, %v11277_v44 }
 0xfc4   : > { %v11337_v9 = vcombine.low %v11312_v16, %v11320_v20  ;;  %v11338_v41 = vcombine.high %v11312_v16, %v11320_v20  ;;  %v11284_v6 = vrot.slane %v11270_v58, %v16669_v56 }
 0xfc5   : > { %v11329_v7 = vrot.slane %v11321_v63, %v16669_v56  ;;  %v11336_v37 = vrot.slane %v11322_v51, %v16669_v56 }
 0xfc6   : > { %v11345_v1 = vrot.slane %v11337_v9, %v16669_v56  ;;  %v11352_v19 = vrot.slane %v11338_v41, %v16669_v56  ;;  %v11287_v60 = vcombine.low %v11268_v3, %v11284_v6  ;;  %v11288_v13 = vcombine.high %v11268_v3, %v11284_v6 }
 0xfc8   : > { %v11353_v35 = vcombine.low %v11329_v7, %v11345_v1  ;;  %v11354_v5 = vcombine.high %v11329_v7, %v11345_v1  ;;  %v11355_v24 = vcombine.low %v11336_v37, %v11352_v19  ;;  %v11356_v22 = vcombine.high %v11336_v37, %v11352_v19 }
 0xfca   : > { %v20165_v54 = vpack.c.bf16 %v11353_v35, %v11285_v27  ;;  %v20167_v38 = vpack.c.bf16 %v11354_v5, %v11286_v45  ;;  %v20169_v43 = vpack.c.bf16 %v11355_v24, %v11287_v60  ;;  %v20171_v39 = vpack.c.bf16 %v11356_v22, %v11288_v13 }
 0xfcc   : > { %15643 = vmatprep.subr.bf16.mxu1 %v20165_v54 }
0x101d   : > { %v20174_v34 = vpop.f32.mrb[60].mxu0  ;;  %v20176_v46 = vpop.f32.mrb[48].mxu1 }
0x101e   : > { %v20178_v11 = vpop.f32.mrb[61].mxu0  ;;  %v20180_v23 = vpop.f32.mrb[49].mxu1  ;;  %v12003_v31 = vsel %vm764_vm0, %v20174_v34, -inf  ;;  %v12015_v57 = vsel %vm764_vm0, %v20176_v46, -inf }
0x101f   : > { %v20184_v40 = vpop.f32.mrb[50].mxu1  ;;  %12004 = vmax.xlane.f32.xlu0 %v12003_v31  ;;  %v20186_v52 = vpop.f32.mrb[62].mxu0  ;;  %v11997_v59 = vsel %vm764_vm0, %v20178_v11, -inf  ;;  %v12009_v28 = vsel %vm764_vm0, %v20180_v23, -inf }
0x1020   : > { %v20188_v15 = vpop.f32.mrb[63].mxu0  ;;  %v20190_v47 = vpop.f32.mrb[51].mxu1  ;;  %v12018_v29 = vsel %vm764_vm0, %v20184_v40, -inf  ;;  %v12006_v10 = vsel %vm764_vm0, %v20186_v52, -inf }
0x1021   : > { %12019 = vmax.xlane.f32.xlu1 %v12018_v29  ;;  %v12000_v2 = vsel %vm764_vm0, %v20188_v15, -inf  ;;  %v12012_v36 = vsel %vm764_vm0, %v20190_v47, -inf }
0x1023   : > { %12016 = vmax.xlane.f32.xlu0 %v12015_v57 }
0x1025   : > { %12001 = vmax.xlane.f32.xlu1 %v12000_v2 }
0x1027   : > { %11998 = vmax.xlane.f32.xlu0 %v11997_v59 }
0x1029   : > { %12013 = vmax.xlane.f32.xlu1 %v12012_v36 }
0x102b   : > { %12010 = vmax.xlane.f32.xlu0 %v12009_v28 }
0x102d   : > { %v20204_v44 = vpop.f32.mrb[64].mxu0 }
0x102e   : > { %v20206_v50 = vpop.f32.mrb[52].mxu1  ;;  %v20208_v61 = vpop.f32.mrb[65].mxu0  ;;  %v12027_v8 = vsel %vm764_vm0, %v20204_v44, -inf }
0x102f   : > { %v20212_v53 = vpop.f32.mrb[53].mxu1  ;;  %12007 = vmax.xlane.f32.xlu0 %v12006_v10  ;;  %v20214_v18 = vpop.f32.mrb[66].mxu0  ;;  %v12039_v16 = vsel %vm764_vm0, %v20206_v50, -inf  ;;  %v12021_v45 = vsel %vm764_vm0, %v20208_v61, -inf }
0x1030   : > { %v20216_v21 = vpop.f32.mrb[54].mxu1  ;;  %v20218_v26 = vpop.f32.mrb[67].mxu0  ;;  %v12030_v17 = vsel %vm764_vm0, %v20214_v18, -inf  ;;  %v12033_v63 = vsel %vm764_vm0, %v20212_v53, -inf }
0x1031   : > { %v20222_v25 = vpop.f32.mrb[55].mxu1  ;;  %12031 = vmax.xlane.f32.xlu1 %v12030_v17  ;;  %v12042_v14 = vsel %vm764_vm0, %v20216_v21, -inf  ;;  %v12024_v20 = vsel %vm764_vm0, %v20218_v26, -inf }
0x1032   : > { %v12036_v30 = vsel %vm764_vm0, %v20222_v25, -inf }
0x1033   : > { %12028 = vmax.xlane.f32.xlu0 %v12027_v8 }
0x1035   : > { %12043 = vmax.xlane.f32.xlu1 %v12042_v14 }
0x1037   : > { %12040 = vmax.xlane.f32.xlu0 %v12039_v16 }
0x1039   : > { %12025 = vmax.xlane.f32.xlu1 %v12024_v20 }
0x103b   : > { %12022 = vmax.xlane.f32.xlu0 %v12021_v45 }
0x103d   : > { %12037 = vmax.xlane.f32.xlu1 %v12036_v30 }
0x103f   : > { %12034 = vmax.xlane.f32.xlu0 %v12033_v63  ;;  %v20302_v63 = vpop.permute.xlu0 %10321 }
0x106c   : > { %v20238_v58 = vpop.f32.mrb[68].mxu0  ;;  %v20240_v51 = vpop.f32.mrb[56].mxu1 }
0x106d   : > { %v20242_v9 = vpop.f32.mrb[69].mxu0  ;;  %v20244_v3 = vpop.f32.mrb[57].mxu1  ;;  %v12051_v41 = vsel %vm764_vm0, %v20238_v58, -inf  ;;  %v12063_v27 = vsel %vm764_vm0, %v20240_v51, -inf }
0x106e   : > { %v20248_v7 = vpop.f32.mrb[58].mxu1  ;;  %12052 = vmax.xlane.f32.xlu0 %v12051_v41  ;;  %v20250_v6 = vpop.f32.mrb[70].mxu0  ;;  %v12045_v13 = vsel %vm764_vm0, %v20242_v9, -inf  ;;  %v12057_v5 = vsel %vm764_vm0, %v20244_v3, -inf }
0x106f   : > { %v20252_v37 = vpop.f32.mrb[71].mxu0  ;;  %v20254_v1 = vpop.f32.mrb[59].mxu1  ;;  %v12054_v19 = vsel %vm764_vm0, %v20250_v6, -inf  ;;  %v12066_v60 = vsel %vm764_vm0, %v20248_v7, -inf }
0x1070   : > { %12055 = vmax.xlane.f32.xlu1 %v12054_v19  ;;  %v12048_v35 = vsel %vm764_vm0, %v20252_v37, -inf  ;;  %v12060_v24 = vsel %vm764_vm0, %v20254_v1, -inf  ;;  %v20306_v41 = vpop.permute.xlu0 %10337 }
0x1072   : > { %12064 = vmax.xlane.f32.xlu0 %v12063_v27 }
0x1074   : > { %12067 = vmax.xlane.f32.xlu1 %v12066_v60  ;;  %v20310_v19 = vpop.permute.xlu0 %10353 }
0x1076   : > { %12046 = vmax.xlane.f32.xlu0 %v12045_v13 }
0x1078   : > { %12049 = vmax.xlane.f32.xlu1 %v12048_v35 }
0x107a   : > { %12058 = vmax.xlane.f32.xlu0 %v12057_v5 }
0x107c   : > { %12061 = vmax.xlane.f32.xlu1 %v12060_v24  ;;  %v20270_v22 = vpop.f32.mrb[72].mxu0 }
0x107d   : > { %v20274_v29 = vpop.f32.mrb[73].mxu0  ;;  %v12075_v57 = vsel %vm764_vm0, %v20270_v22, -inf }
0x107e   : > { %v20272_v31 = vpop.f32.mrb[60].mxu1  ;;  %12076 = vmax.xlane.f32.xlu0 %v12075_v57  ;;  %v20280_v59 = vpop.f32.mrb[74].mxu0  ;;  %v12069_v16 = vsel %vm764_vm0, %v20274_v29, -inf }
0x107f   : > { %v20278_v2 = vpop.f32.mrb[61].mxu1  ;;  %v20284_v28 = vpop.f32.mrb[75].mxu0  ;;  %v12078_v10 = vsel %vm764_vm0, %v20280_v59, -inf  ;;  %v12087_v8 = vsel %vm764_vm0, %v20272_v31, -inf }
0x1080   : > { %v20282_v36 = vpop.f32.mrb[62].mxu1  ;;  %12079 = vmax.xlane.f32.xlu1 %v12078_v10  ;;  %v12072_v20 = vsel %vm764_vm0, %v20284_v28, -inf  ;;  %v12081_v45 = vsel %vm764_vm0, %v20278_v2, -inf }
0x1081   : > { %v20288_v17 = vpop.f32.mrb[63].mxu1  ;;  %v12090_v14 = vsel %vm764_vm0, %v20282_v36, -inf }
0x1082   : > { %12088 = vmax.xlane.f32.xlu0 %v12087_v8  ;;  %v12084_v30 = vsel %vm764_vm0, %v20288_v17, -inf }
0x1084   : > { %12091 = vmax.xlane.f32.xlu1 %v12090_v14 }
0x1086   : > { %12070 = vmax.xlane.f32.xlu0 %v12069_v16 }
0x1088   : > { %12073 = vmax.xlane.f32.xlu1 %v12072_v20 }
0x108a   : > { %12082 = vmax.xlane.f32.xlu0 %v12081_v45 }
0x108c   : > { %12085 = vmax.xlane.f32.xlu1 %v12084_v30 }
0x109d   : > { %10371 = vrot.lane.b32.xlu1 %v19193_v49, %s21243_s23 }
0x10a0   : > { %10369 = vrot.lane.b32.xlu0 %v19186_v33, %s21243_s23 }
0x10ac   : > { %v12005_v27 = vpop.xlane.xlu0 %12004 }
0x10ad   : > { %v12095_v60 = vsub.f32 %v20174_v34, %v12005_v27 }
0x10ae   : > { %v12020_v13 = vpop.xlane.xlu1 %12019 }
0x10af   : > { %v12129_v35 = vmul.f32 1.442695, %v12095_v60 }
0x10b0   : > { %v12017_v5 = vpop.xlane.xlu0 %12016 }
0x10b1   : > { %v12099_v24 = vsub.f32 %v20176_v46, %v12017_v5  ;;  %16131 = vpow2.f32 %v12129_v35  ;;  %v12100_v46 = vsub.f32 %v20184_v40, %v12020_v13 }
0x10b2   : > { %v12002_v10 = vpop.xlane.xlu1 %12001 }
0x10b3   : > { %v12137_v57 = vmul.f32 1.442695, %v12099_v24  ;;  %v12094_v34 = vsub.f32 %v20188_v15, %v12002_v10  ;;  %v12139_v15 = vmul.f32 1.442695, %v12100_v46 }
0x10b4   : > { %v11999_v8 = vpop.xlane.xlu0 %11998 }
0x10b5   : > { %v12093_v49 = vsub.f32 %v20178_v11, %v11999_v8  ;;  %16133 = vpow2.f32 %v12137_v57  ;;  %v12127_v11 = vmul.f32 1.442695, %v12094_v34 }
0x10b6   : > { %v12014_v20 = vpop.xlane.xlu1 %12013 }
0x10b7   : > { %v12125_v14 = vmul.f32 1.442695, %v12093_v49  ;;  %v12098_v5 = vsub.f32 %v20190_v47, %v12014_v20 }
0x10b8   : > { %v12011_v16 = vpop.xlane.xlu0 %12010 }
0x10b9   : > { %v12097_v33 = vsub.f32 %v20180_v23, %v12011_v16  ;;  %16135 = vpow2.f32 %v12125_v14  ;;  %v12135_v13 = vmul.f32 1.442695, %v12098_v5 }
0x10bb   : > { %v12133_v45 = vmul.f32 1.442695, %v12097_v33  ;;  %v20317_v30 = vpop.eup %16131 }
0x10bc   : > { %v12008_v27 = vpop.xlane.xlu0 %12007  ;;  %v12195_v23 = vsel %vm764_vm0, %v20317_v30, 0.0 }
0x10bd   : > { %v12096_v60 = vsub.f32 %v20186_v52, %v12008_v27  ;;  %16137 = vpow2.f32 %v12133_v45 }
0x10be   : > { %v12032_v35 = vpop.xlane.xlu1 %12031 }
0x10bf   : > { %v12131_v24 = vmul.f32 1.442695, %v12096_v60  ;;  %v20324_v57 = vpop.eup %16133  ;;  %v12104_v8 = vsub.f32 %v20214_v18, %v12032_v35  ;;  %12196 = vadd.xlane.f32.xlu0 %v12195_v23 }
0x10c0   : > { %v12029_v10 = vpop.xlane.xlu0 %12028  ;;  %v12207_v47 = vsel %vm764_vm0, %v20324_v57, 0.0 }
0x10c1   : > { %16139 = vpow2.f32 %v12131_v24  ;;  %v12103_v40 = vsub.f32 %v20204_v44, %v12029_v10  ;;  %v12147_v33 = vmul.f32 1.442695, %v12104_v8 }
0x10c2   : > { %v12044_v52 = vpop.xlane.xlu1 %12043  ;;  %16141 = vpow2.f32 %v12127_v11 }
0x10c3   : > { %v12145_v49 = vmul.f32 1.442695, %v12103_v40  ;;  %v20330_v14 = vpop.eup %16135  ;;  %16143 = vpow2.f32 %v12139_v15  ;;  %12208 = vadd.xlane.f32.xlu0 %v12207_v47  ;;  %v12108_v44 = vsub.f32 %v20216_v21, %v12044_v52 }
0x10c4   : > { %v12041_v16 = vpop.xlane.xlu0 %12040  ;;  %v12189_v45 = vsel %vm764_vm0, %v20330_v14, 0.0 }
0x10c5   : > { %v12107_v20 = vsub.f32 %v20206_v50, %v12041_v16  ;;  %16145 = vpow2.f32 %v12145_v49  ;;  %v12155_v50 = vmul.f32 1.442695, %v12108_v44 }
0x10c6   : > { %v12026_v18 = vpop.xlane.xlu1 %12025  ;;  %16147 = vpow2.f32 %v12135_v13 }
0x10c7   : > { %v12153_v34 = vmul.f32 1.442695, %v12107_v20  ;;  %v20336_v46 = vpop.eup %16137  ;;  %16149 = vpow2.f32 %v12147_v33  ;;  %12190 = vadd.xlane.f32.xlu0 %v12189_v45  ;;  %v12102_v11 = vsub.f32 %v20218_v26, %v12026_v18 }
0x10c8   : > { %v12023_v27 = vpop.xlane.xlu0 %12022  ;;  %v12201_v21 = vsel %vm764_vm0, %v20336_v46, 0.0 }
0x10c9   : > { %v12101_v60 = vsub.f32 %v20208_v61, %v12023_v27  ;;  %16151 = vpow2.f32 %v12153_v34  ;;  %v12143_v26 = vmul.f32 1.442695, %v12102_v11 }
0x10ca   : > { %v12038_v24 = vpop.xlane.xlu1 %12037 }
0x10cb   : > { %v20339_v35 = vpop.eup %16139  ;;  %v12141_v5 = vmul.f32 1.442695, %v12101_v60  ;;  %12202 = vadd.xlane.f32.xlu0 %v12201_v21  ;;  %v12106_v40 = vsub.f32 %v20222_v25, %v12038_v24 }
0x10cc   : > { %v12035_v23 = vpop.xlane.xlu0 %12034  ;;  %v12198_v15 = vsel %vm764_vm0, %v20339_v35, 0.0  ;;  %v20346_v10 = vpop.eup %16141 }
0x10cd   : > { %v12105_v61 = vsub.f32 %v20212_v53, %v12035_v23  ;;  %12199 = vadd.xlane.f32.xlu1 %v12198_v15  ;;  %v20349_v8 = vpop.eup %16143  ;;  %16153 = vpow2.f32 %v12141_v5  ;;  %v12192_v49 = vsel %vm764_vm0, %v20346_v10, 0.0  ;;  %v12151_v33 = vmul.f32 1.442695, %v12106_v40 }
0x10ce   : > { %16155 = vpow2.f32 %v12155_v50  ;;  %v12210_v53 = vsel %vm764_vm0, %v20349_v8, 0.0 }
0x10cf   : > { %v12149_v52 = vmul.f32 1.442695, %v12105_v61  ;;  %v20352_v13 = vpop.eup %16145  ;;  %12211 = vadd.xlane.f32.xlu0 %v12210_v53 }
0x10d0   : > { %v20356_v47 = vpop.eup %16147  ;;  %v12219_v25 = vsel %vm764_vm0, %v20352_v13, 0.0 }
0x10d1   : > { %12193 = vadd.xlane.f32.xlu1 %v12192_v49  ;;  %16157 = vpow2.f32 %v12149_v52  ;;  %v20360_v16 = vpop.eup %16149  ;;  %v12204_v18 = vsel %vm764_vm0, %v20356_v47, 0.0 }
0x10d2   : > { %16159 = vpow2.f32 %v12143_v26  ;;  %v12222_v45 = vsel %vm764_vm0, %v20360_v16, 0.0 }
0x10d3   : > { %v20364_v20 = vpop.eup %16151  ;;  %12220 = vadd.xlane.f32.xlu0 %v12219_v25  ;;  %16161 = vpow2.f32 %v12151_v33 }
0x10d4   : > { %v12231_v44 = vsel %vm764_vm0, %v20364_v20, 0.0 }
0x10d5   : > { %12205 = vadd.xlane.f32.xlu1 %v12204_v18 }
0x10d7   : > { %v20370_v34 = vpop.eup %16153  ;;  %12232 = vadd.xlane.f32.xlu0 %v12231_v44 }
0x10d8   : > { %v20374_v27 = vpop.eup %16155  ;;  %v12213_v60 = vsel %vm764_vm0, %v20370_v34, 0.0 }
0x10d9   : > { %12223 = vadd.xlane.f32.xlu1 %v12222_v45  ;;  %v12234_v11 = vsel %vm764_vm0, %v20374_v27, 0.0 }
0x10db   : > { %v20378_v50 = vpop.eup %16157  ;;  %12214 = vadd.xlane.f32.xlu0 %v12213_v60 }
0x10dc   : > { %v20382_v5 = vpop.eup %16159  ;;  %v12225_v21 = vsel %vm764_vm0, %v20378_v50, 0.0 }
0x10dd   : > { %12235 = vadd.xlane.f32.xlu1 %v12234_v11  ;;  %v12216_v24 = vsel %vm764_vm0, %v20382_v5, 0.0  ;;  %v20388_v23 = vpop.eup %16161 }
0x10de   : > { %v12228_v15 = vsel %vm764_vm0, %v20388_v23, 0.0 }
0x10df   : > { %12226 = vadd.xlane.f32.xlu0 %v12225_v21 }
0x10e1   : > { %12217 = vadd.xlane.f32.xlu1 %v12216_v24 }
0x10e5   : > { %12229 = vadd.xlane.f32.xlu1 %v12228_v15 }
0x10fb   : > { %v12053_v61 = vpop.xlane.xlu0 %12052 }
0x10fc   : > { %v12111_v26 = vsub.f32 %v20238_v58, %v12053_v61 }
0x10fd   : > { %v12056_v40 = vpop.xlane.xlu1 %12055 }
0x10fe   : > { %v12161_v52 = vmul.f32 1.442695, %v12111_v26  ;;  %v12112_v49 = vsub.f32 %v20250_v6, %v12056_v40 }
0x10ff   : > { %v12065_v53 = vpop.xlane.xlu0 %12064 }
0x1100   : > { %16163 = vpow2.f32 %v12161_v52  ;;  %v12163_v33 = vmul.f32 1.442695, %v12112_v49  ;;  %v12115_v25 = vsub.f32 %v20240_v51, %v12065_v53 }
0x1101   : > { %v12068_v18 = vpop.xlane.xlu1 %12067 }
0x1102   : > { %16165 = vpow2.f32 %v12163_v33  ;;  %v12169_v44 = vmul.f32 1.442695, %v12115_v25  ;;  %v12116_v45 = vsub.f32 %v20248_v7, %v12068_v18 }
0x1103   : > { %v12047_v60 = vpop.xlane.xlu0 %12046 }
0x1104   : > { %16167 = vpow2.f32 %v12169_v44  ;;  %v12171_v11 = vmul.f32 1.442695, %v12116_v45  ;;  %v12109_v21 = vsub.f32 %v20242_v9, %v12047_v60 }
0x1105   : > { %v12050_v58 = vpop.xlane.xlu1 %12049 }
0x1106   : > { %16169 = vpow2.f32 %v12171_v11  ;;  %v12157_v24 = vmul.f32 1.442695, %v12109_v21  ;;  %v12110_v6 = vsub.f32 %v20252_v37, %v12050_v58 }
0x1107   : > { %v12059_v15 = vpop.xlane.xlu0 %12058 }
0x1108   : > { %16171 = vpow2.f32 %v12157_v24  ;;  %v12159_v61 = vmul.f32 1.442695, %v12110_v6  ;;  %v12113_v51 = vsub.f32 %v20244_v3, %v12059_v15 }
0x1109   : > { %v12062_v26 = vpop.xlane.xlu1 %12061 }
0x110a   : > { %v20399_v40 = vpop.eup %16163  ;;  %16173 = vpow2.f32 %v12159_v61  ;;  %v12165_v7 = vmul.f32 1.442695, %v12113_v51  ;;  %v12114_v52 = vsub.f32 %v20254_v1, %v12062_v26 }
0x110b   : > { %v12077_v49 = vpop.xlane.xlu0 %12076  ;;  %v12243_v9 = vsel %vm764_vm0, %v20399_v40, 0.0 }
0x110c   : > { %v20404_v53 = vpop.eup %16165  ;;  %16175 = vpow2.f32 %v12165_v7  ;;  %v12167_v37 = vmul.f32 1.442695, %v12114_v52  ;;  %v12119_v33 = vsub.f32 %v20270_v22, %v12077_v49  ;;  %12244 = vadd.xlane.f32.xlu0 %v12243_v9 }
0x110d   : > { %v12080_v25 = vpop.xlane.xlu1 %12079  ;;  %v12246_v3 = vsel %vm764_vm0, %v20404_v53, 0.0 }
0x110e   : > { %v20409_v18 = vpop.eup %16167  ;;  %16177 = vpow2.f32 %v12167_v37  ;;  %v12177_v44 = vmul.f32 1.442695, %v12119_v33  ;;  %v12120_v1 = vsub.f32 %v20280_v59, %v12080_v25  ;;  %12247 = vadd.xlane.f32.xlu1 %v12246_v3 }
0x110f   : > { %21257 = vst [vmem:[#allocation11_spill] sm:$0xff] %v20409_v18  ;;  %v12089_v45 = vpop.xlane.xlu0 %12088  ;;  %v12255_v60 = vsel %vm764_vm0, %v20409_v18, 0.0 }
0x1110   : > { %v20414_v11 = vpop.eup %16169  ;;  %16179 = vpow2.f32 %v12177_v44  ;;  %v12179_v22 = vmul.f32 1.442695, %v12120_v1  ;;  %12256 = vadd.xlane.f32.xlu0 %v12255_v60 }
0x1111   : > { %v12092_v21 = vpop.xlane.xlu1 %12091  ;;  %v12258_v58 = vsel %vm764_vm0, %v20414_v11, 0.0 }
0x1112   : > { %v20418_v24 = vpop.eup %16171  ;;  %16181 = vpow2.f32 %v12179_v22  ;;  %12259 = vadd.xlane.f32.xlu1 %v12258_v58  ;;  %v12124_v25 = vsub.f32 %v20282_v36, %v12092_v21 }
0x1113   : > { %v12071_v6 = vpop.xlane.xlu0 %12070  ;;  %v12237_v59 = vsel %vm764_vm0, %v20418_v24, 0.0 }
0x1114   : > { %v20422_v15 = vpop.eup %16173  ;;  %v12117_v61 = vsub.f32 %v20274_v29, %v12071_v6  ;;  %12238 = vadd.xlane.f32.xlu0 %v12237_v59  ;;  %v12187_v21 = vmul.f32 1.442695, %v12124_v25  ;;  %v12123_v6 = vsub.f32 %v20272_v31, %v12089_v45 }
0x1115   : > { %v12074_v51 = vpop.xlane.xlu1 %12073  ;;  %v12240_v26 = vsel %vm764_vm0, %v20422_v15, 0.0 }
0x1116   : > { %v20427_v7 = vpop.eup %16175  ;;  %v12173_v52 = vmul.f32 1.442695, %v12117_v61  ;;  %v12118_v49 = vsub.f32 %v20284_v28, %v12074_v51  ;;  %12241 = vadd.xlane.f32.xlu1 %v12240_v26  ;;  %v12185_v61 = vmul.f32 1.442695, %v12123_v6 }
0x1117   : > { %v12083_v9 = vpop.xlane.xlu0 %12082  ;;  %v12249_v37 = vsel %vm764_vm0, %v20427_v7, 0.0 }
0x1118   : > { %v20432_v33 = vpop.eup %16177  ;;  %v12175_v29 = vmul.f32 1.442695, %v12118_v49  ;;  %v12121_v3 = vsub.f32 %v20278_v2, %v12083_v9  ;;  %12250 = vadd.xlane.f32.xlu0 %v12249_v37  ;;  %16183 = vpow2.f32 %v12173_v52 }
0x1119   : > { %21258 = vst [vmem:[#allocation13_spill] sm:$0xff] %v20432_v33  ;;  %v12086_v44 = vpop.xlane.xlu1 %12085  ;;  %v12252_v1 = vsel %vm764_vm0, %v20432_v33, 0.0 }
0x111a   : > { %v20438_v60 = vpop.eup %16179  ;;  %v12181_v28 = vmul.f32 1.442695, %v12121_v3  ;;  %12253 = vadd.xlane.f32.xlu1 %v12252_v1  ;;  %16185 = vpow2.f32 %v12175_v29  ;;  %v12122_v22 = vsub.f32 %v20288_v17, %v12086_v44 }
0x111b   : > { %21259 = vst [vmem:[#allocation12_spill] sm:$0xff] %v20438_v60  ;;  %v12267_v58 = vsel %vm764_vm0, %v20438_v60, 0.0  ;;  %v10370_v44 = vpop.permute.xlu0 %10369 }
0x111c   : > { %v20443_v36 = vpop.eup %16181  ;;  %12268 = vadd.xlane.f32.xlu0 %v12267_v58  ;;  %16187 = vpow2.f32 %v12181_v28  ;;  %v12183_v59 = vmul.f32 1.442695, %v12122_v22 }
0x111d   : > { %21260 = vst [vmem:[#allocation14_spill] sm:$0xff] %v20443_v36  ;;  %v12270_v2 = vsel %vm764_vm0, %v20443_v36, 0.0  ;;  %16189 = vpow2.f32 %v12187_v21  ;;  %v10372_v22 = vpop.permute.xlu1 %10371 }
0x111e   : > { %12271 = vadd.xlane.f32.xlu1 %v12270_v2  ;;  %16191 = vpow2.f32 %v12183_v59  ;;  %v10897_v21 = vcombine.low %v20016_v4, %v10372_v22  ;;  %v10898_v6 = vcombine.high %v20016_v4, %v10372_v22 }
0x111f   : > { %16193 = vpow2.f32 %v12185_v61  ;;  %v10881_v61 = vcombine.low %v19994_v62, %v20030_v0 }
0x1120   : > { %v10912_v22 = vrot.slane %v10898_v6, %v16651_v48 }
0x1122   : > { %v20448_v51 = vpop.eup %16183 }
0x1123   : > { %21261 = vst [vmem:[#allocation15_spill] sm:$0xff] %v20448_v51  ;;  %v12261_v52 = vsel %vm764_vm0, %v20448_v51, 0.0 }
0x1124   : > { %v20450_v17 = vpop.eup %16185  ;;  %12262 = vadd.xlane.f32.xlu0 %v12261_v52  ;;  %v10829_v52 = vcombine.low %v20306_v41, %v10370_v44 }
0x1125   : > { %21262 = vst [vmem:[#allocation16_spill] sm:$0xff] %v20450_v17  ;;  %v12264_v49 = vsel %vm764_vm0, %v20450_v17, 0.0 }
0x1126   : > { %v20452_v26 = vpop.eup %16187  ;;  %12265 = vadd.xlane.f32.xlu1 %v12264_v49  ;;  %v10882_v49 = vcombine.high %v19994_v62, %v20030_v0  ;;  %v10837_v62 = vrot.slane %v10829_v52, %v16651_v48 }
0x1127   : > { %21263 = vst [vmem:[#allocation17_spill] sm:$0xff] %v20452_v26  ;;  %v20458_v9 = vpop.eup %16189  ;;  %v12273_v31 = vsel %vm764_vm0, %v20452_v26, 0.0 }
0x1128   : > { %21264 = vst [vmem:[#allocation18_spill] sm:$0xff] %v20458_v9  ;;  %v20462_v45 = vpop.eup %16191  ;;  %12274 = vadd.xlane.f32.xlu0 %v12273_v31  ;;  %v12282_v37 = vsel %vm764_vm0, %v20458_v9, 0.0  ;;  %v10830_v31 = vcombine.high %v20306_v41, %v10370_v44  ;;  %v10896_v0 = vrot.slane %v10882_v49, %v16651_v48 }
0x1129   : > { %21265 = vst [vmem:[#allocation19_spill] sm:$0xff] %v20462_v45  ;;  %v12276_v25 = vsel %vm764_vm0, %v20462_v45, 0.0  ;;  %v20468_v29 = vpop.eup %16193 }
0x112a   : > { %12283 = vadd.xlane.f32.xlu1 %v12282_v37  ;;  %21266 = vst [vmem:[#allocation20_spill] sm:$0xff] %v20468_v29  ;;  %v12279_v3 = vsel %vm764_vm0, %v20468_v29, 0.0  ;;  %v10813_v37 = vcombine.low %v20302_v63, %v20310_v19  ;;  %v10844_v41 = vrot.slane %v10830_v31, %v16651_v48  ;;  %v10930_v6 = vcombine.high %v10896_v0, %v10912_v22 }
0x112c   : > { %12277 = vadd.xlane.f32.xlu0 %v12276_v25  ;;  %v10905_v25 = vrot.slane %v10897_v21, %v16651_v48  ;;  %v10821_v44 = vrot.slane %v10813_v37, %v16651_v48 }
0x1130   : > { %12280 = vadd.xlane.f32.xlu0 %v12279_v3  ;;  %v10814_v3 = vcombine.high %v20302_v63, %v20310_v19  ;;  %v10929_v19 = vcombine.low %v10896_v0, %v10912_v22 }
0x1132   : > { %v10828_v63 = vrot.slane %v10814_v3, %v16651_v48  ;;  %v10944_v3 = vrot.slane %v10930_v6, %v16669_v56 }
0x1134   : > { %v10861_v52 = vcombine.low %v10828_v63, %v10844_v41  ;;  %v10862_v45 = vcombine.high %v10828_v63, %v10844_v41 }
0x1136   : > { %v10869_v41 = vrot.slane %v10861_v52, %v16669_v56 }
0x114c   : > { %v12197_v1 = vpop.xlane.xlu0 %12196 }
0x1150   : > { %v12209_v28 = vpop.xlane.xlu0 %12208 }
0x1154   : > { %v12191_v58 = vpop.xlane.xlu0 %12190 }
0x1158   : > { %v12203_v59 = vpop.xlane.xlu0 %12202 }
0x115a   : > { %v12200_v2 = vpop.xlane.xlu1 %12199 }
0x115b   : > { %16195 = vrcp.f32 %v12200_v2  ;;  %v10889_v2 = vrot.slane %v10881_v61, %v16651_v48  ;;  %v10846_v61 = vcombine.high %v10821_v44, %v10837_v62 }
0x115c   : > { %16197 = vrcp.f32 %v12191_v58  ;;  %v12212_v29 = vpop.xlane.xlu0 %12211 }
0x115d   : > { %16199 = vrcp.f32 %v12197_v1  ;;  %v10913_v1 = vcombine.low %v10889_v2, %v10905_v25  ;;  %v10914_v58 = vcombine.high %v10889_v2, %v10905_v25  ;;  %v10937_v2 = vrot.slane %v10929_v19, %v16669_v56 }
0x115e   : > { %v12194_v4 = vpop.xlane.xlu1 %12193 }
0x115f   : > { %16201 = vrcp.f32 %v12194_v4  ;;  %v10845_v4 = vcombine.low %v10821_v44, %v10837_v62  ;;  %v10921_v31 = vrot.slane %v10913_v1, %v16669_v56  ;;  %v10876_v44 = vrot.slane %v10862_v45, %v16669_v56 }
0x1160   : > { %16203 = vrcp.f32 %v12203_v59  ;;  %v12221_v9 = vpop.xlane.xlu0 %12220  ;;  %v10928_v59 = vrot.slane %v10914_v58, %v16669_v56  ;;  %v11441_v60 = vcombine.low %v10937_v2, %v10944_v3  ;;  %v15011_v17 = vcombine.high %v10937_v2, %v10944_v3 }
0x1161   : > { %v11373_v18 = vcombine.low %v10869_v41, %v10876_v44 }
0x1162   : > { %v12206_v21 = vpop.xlane.xlu1 %12205  ;;  %v15010_v26 = vcombine.high %v10921_v31, %v10928_v59 }
0x1163   : > { %16205 = vrcp.f32 %v12206_v21  ;;  %v10853_v21 = vrot.slane %v10845_v4, %v16669_v56 }
0x1164   : > { %16207 = vrcp.f32 %v12212_v29  ;;  %v12233_v22 = vpop.xlane.xlu0 %12232  ;;  %v10860_v29 = vrot.slane %v10846_v61, %v16669_v56 }
0x1165   : > { %v16196_v49 = vpop.eup %16195  ;;  %16209 = vrcp.f32 %v12209_v28  ;;  %v11425_v28 = vcombine.low %v10921_v31, %v10928_v59  ;;  %v20511_v59 = vrot.slane %v15010_v26, %v16651_v48 }
0x1166   : > { %v12224_v37 = vpop.xlane.xlu1 %12223  ;;  %v16198_v25 = vpop.eup %16197  ;;  %v12320_v1 = vmul.f32 %v16196_v49, %v20339_v35  ;;  %v11357_v51 = vcombine.low %v10853_v21, %v10860_v29  ;;  %v15008_v36 = vcombine.high %v10853_v21, %v10860_v29  ;;  %v15009_v35 = vcombine.high %v10869_v41, %v10876_v44 }
0x1167   : > { %v16200_v0 = vpop.eup %16199  ;;  %v12317_v63 = vmul.f32 %v16198_v25, %v20330_v14  ;;  %16211 = vrcp.f32 %v12224_v37  ;;  %v20505_v14 = vrot.slane %v11425_v28, %v16651_v48  ;;  %v20514_v37 = vrot.slane %v11441_v60, %v16651_v48 }
0x1168   : > { %v12319_v4 = vmul.f32 %v16200_v0, %v20317_v30  ;;  %v12215_v61 = vpop.xlane.xlu0 %12214  ;;  %v20517_v25 = vrot.slane %v15011_v17, %v16651_v48  ;;  %v20521_v3 = vrot.slane %v11357_v51, %v16651_v48  ;;  %v20528_v60 = vrot.slane %v11373_v18, %v16651_v48 }
0x1169   : > { %v16202_v62 = vpop.eup %16201  ;;  %16213 = vrcp.f32 %v12215_v61  ;;  %v20531_v17 = vrot.slane %v15009_v35, %v16651_v48 }
0x116a   : > { %v12236_v58 = vpop.xlane.xlu1 %12235  ;;  %v12318_v19 = vmul.f32 %v16202_v62, %v20346_v10  ;;  %v16204_v6 = vpop.eup %16203  ;;  %v12350_v49 = vpack.c.bf16 %v12320_v1, %v12319_v4  ;;  %16215 = vrcp.f32 %v12221_v9  ;;  %v11473_v18 = vcombine.low %v20514_v37, %v20517_v25 }
0x116b   : > { %v12321_v30 = vmul.f32 %v16204_v6, %v20336_v46  ;;  %v20524_v46 = vrot.slane %v15008_v36, %v16651_v48 }
0x116c   : > { %v12349_v52 = vpack.c.bf16 %v12318_v19, %v12317_v63  ;;  %v12227_v2 = vpop.xlane.xlu0 %12226  ;;  %v11481_v29 = vrot.slane %v11473_v18, %v16669_v56 }
0x116d   : > { %v16206_v45 = vpop.eup %16205 }
0x116e   : > { %v16208_v33 = vpop.eup %16207  ;;  %v12218_v10 = vpop.xlane.xlu1 %12217  ;;  %15615 = vmatprep.mubr.msk.bf16.mxu0 %vm764_vm0, %v12349_v52  ;;  %v12322_v31 = vmul.f32 %v16206_v45, %v20356_v47 }
0x116f   : > { %16217 = vrcp.f32 %v12218_v10  ;;  %15616 = vmatmul.mubr.msk.bf16.vlgmr.msra.gmra.mrb[76].mxu0 %vm764_vm0, %v12350_v49  ;;  %v16210_v9 = vpop.eup %16209  ;;  %v12324_v26 = vmul.f32 %v16208_v33, %v20349_v8  ;;  %v11389_v33 = vcombine.low %v20521_v3, %v20524_v46 }
0x1170   : > { %16219 = vrcp.f32 %v12236_v58  ;;  %15620 = vmatpush3.bf16.msra.mxu0 %v20121_v42  ;;  %v12351_v47 = vpack.c.bf16 %v12322_v31, %v12321_v30  ;;  %v12323_v36 = vmul.f32 %v16210_v9, %v20324_v57  ;;  %v11457_v42 = vcombine.low %v20505_v14, %v20511_v59 }
0x1171   : > { %16221 = vrcp.f32 %v12227_v2  ;;  %15621 = vmatprep.subr.bf16.mxu0 %v20149_v55  ;;  %v16212_v0 = vpop.eup %16211  ;;  %v11397_v44 = vrot.slane %v11389_v33, %v16669_v56 }
0x1172   : > { %16223 = vrcp.f32 %v12233_v22  ;;  %v12230_v51 = vpop.xlane.xlu1 %12229  ;;  %15623 = vmatprep.mubr.msk.bf16.mxu0 %vm764_vm0, %v12351_v47  ;;  %v12352_v8 = vpack.c.bf16 %v12324_v26, %v12323_v36  ;;  %v11405_v22 = vcombine.low %v20528_v60, %v20531_v17  ;;  %v11465_v21 = vrot.slane %v11457_v42, %v16669_v56 }
0x1173   : > { %16225 = vrcp.f32 %v12230_v51  ;;  %v16214_v57 = vpop.eup %16213  ;;  %v12328_v41 = vmul.f32 %v16212_v0, %v20360_v16  ;;  %v11458_v26 = vcombine.high %v20505_v14, %v20511_v59  ;;  %v11474_v51 = vcombine.high %v20514_v37, %v20517_v25 }
0x1174   : > { %15622 = vmatpush3.bf16.msra.mxu0 %v20149_v55  ;;  %v16216_v62 = vpop.eup %16215  ;;  %v11413_v1 = vrot.slane %v11405_v22, %v16669_v56  ;;  %v12325_v58 = vmul.f32 %v16214_v57, %v20370_v34  ;;  %v11489_v4 = vcombine.low %v11465_v21, %v11481_v29  ;;  %v11390_v36 = vcombine.high %v20521_v3, %v20524_v46 }
0x1175   : > { %15635 = vmatprep.subr.bf16.mxu0 %v20153_v12  ;;  %v12327_v6 = vmul.f32 %v16216_v62, %v20352_v13  ;;  %v11406_v42 = vcombine.high %v20528_v60, %v20531_v17  ;;  %v11472_v33 = vrot.slane %v11458_v26, %v16669_v56  ;;  %v11488_v22 = vrot.slane %v11474_v51, %v16669_v56  ;;  %v21274_v26 = vld [vmem:[#allocation19_spill] sm:$0xff] }
0x1176   : > { %v11421_v35 = vcombine.low %v11397_v44, %v11413_v1  ;;  %v11422_v30 = vcombine.high %v11397_v44, %v11413_v1  ;;  %v11404_v14 = vrot.slane %v11390_v36, %v16669_v56 }
0x1177   : > { %15624 = vmatmul.mubr.msk.bf16.vlgmr.msra.gmra.mrb[80].mxu0 %vm764_vm0, %v12352_v8  ;;  %v12354_v45 = vpack.c.bf16 %v12328_v41, %v12327_v6  ;;  %v11420_v59 = vrot.slane %v11406_v42, %v16669_v56  ;;  %v11491_v17 = vcombine.low %v11472_v33, %v11488_v22  ;;  %v11492_v6 = vcombine.high %v11472_v33, %v11488_v22  ;;  %v21276_v22 = vld [vmem:[#allocation20_spill] sm:$0xff] }
0x1178   : > { %15636 = vmatpush3.bf16.msra.mxu0 %v20153_v12  ;;  %v11502_v49 = vpack.c.bf16 %v11489_v4, %v11421_v35 }
0x1179   : > { %v16218_v55 = vpop.eup %16217  ;;  %15637 = vmatprep.subr.bf16.mxu0 %v20157_v32 }
0x117a   : > { %v16220_v28 = vpop.eup %16219  ;;  %v12326_v63 = vmul.f32 %v16218_v55, %v20382_v5 }
0x117b   : > { %v16222_v19 = vpop.eup %16221  ;;  %v12332_v52 = vmul.f32 %v16220_v28, %v20374_v27  ;;  %v11423_v28 = vcombine.low %v11404_v14, %v11420_v59 }
0x117c   : > { %v16224_v61 = vpop.eup %16223  ;;  %15638 = vmatpush3.bf16.msra.mxu0 %v20157_v32  ;;  %v12353_v12 = vpack.c.bf16 %v12326_v63, %v12325_v58  ;;  %v12329_v34 = vmul.f32 %v16222_v19, %v20378_v50  ;;  %v11490_v32 = vcombine.high %v11465_v21, %v11481_v29 }
0x117d   : > { %v16226_v16 = vpop.eup %16225  ;;  %15651 = vmatprep.subr.bf16.mxu0 %v20167_v38  ;;  %v12331_v13 = vmul.f32 %v16224_v61, %v20364_v20 }
0x117e   : > { %15631 = vmatprep.mubr.msk.bf16.mxu1 %vm764_vm0, %v12353_v12  ;;  %v12330_v5 = vmul.f32 %v16226_v16, %v20388_v23  ;;  %v11504_v31 = vpack.c.bf16 %v11490_v32, %v11422_v30  ;;  %v11424_v12 = vcombine.high %v11404_v14, %v11420_v59 }
0x117f   : > { %15632 = vmatmul.mubr.msk.bf16.vlgmr.msra.gmra.mrb[64].mxu1 %vm764_vm0, %v12354_v45  ;;  %v12356_v27 = vpack.c.bf16 %v12332_v52, %v12331_v13 }
0x1180   : > { %15644 = vmatpush3.bf16.msra.mxu1 %v20165_v54  ;;  %v12355_v10 = vpack.c.bf16 %v12330_v5, %v12329_v34 }
0x1181   : > { %15645 = vmatprep.subr.bf16.mxu1 %v11502_v49 }
0x1182   : > { %15639 = vmatprep.mubr.msk.bf16.mxu0 %vm764_vm0, %v12355_v10 }
0x1183   : > { %15640 = vmatmul.mubr.msk.bf16.vlgmr.msra.gmra.mrb[84].mxu0 %vm764_vm0, %v12356_v27  ;;  %v21270_v27 = vld [vmem:[#allocation15_spill] sm:$0xff] }
0x1184   : > { %15646 = vmatpush3.bf16.msra.mxu1 %v11502_v49  ;;  %15652 = vmatpush3.bf16.msra.mxu0 %v20167_v38  ;;  %v21269_v49 = vld [vmem:[#allocation14_spill] sm:$0xff] }
0x1185   : > { %15653 = vmatprep.subr.bf16.mxu0 %v11504_v31  ;;  %15659 = vmatprep.subr.bf16.mxu1 %v20169_v43 }
0x1188   : > { %15654 = vmatpush3.bf16.msra.mxu0 %v11504_v31  ;;  %v21271_v31 = vld [vmem:[#allocation16_spill] sm:$0xff] }
0x1189   : > { %15667 = vmatprep.subr.bf16.mxu0 %v20171_v39 }
0x1199   : > { %v12245_v20 = vpop.xlane.xlu0 %12244 }
0x119b   : > { %v12248_v54 = vpop.xlane.xlu1 %12247 }
0x119c   : > { %16227 = vrcp.f32 %v12248_v54 }
0x119d   : > { %v12257_v50 = vpop.xlane.xlu0 %12256 }
0x119f   : > { %v12260_v23 = vpop.xlane.xlu1 %12259 }
0x11a1   : > { %v12239_v2 = vpop.xlane.xlu0 %12238 }
0x11a2   : > { %16229 = vrcp.f32 %v12239_v2 }
0x11a3   : > { %16231 = vrcp.f32 %v12245_v20  ;;  %v12242_v9 = vpop.xlane.xlu1 %12241  ;;  %v21272_v20 = vld [vmem:[#allocation12_spill] sm:$0xff] }
0x11a4   : > { %16233 = vrcp.f32 %v12242_v9 }
0x11a5   : > { %16235 = vrcp.f32 %v12260_v23  ;;  %v12251_v47 = vpop.xlane.xlu0 %12250 }
0x11a6   : > { %16237 = vrcp.f32 %v12251_v47  ;;  %v16228_v18 = vpop.eup %16227  ;;  %v21273_v47 = vld [vmem:[#allocation17_spill] sm:$0xff] }
0x11a7   : > { %16239 = vrcp.f32 %v12257_v50  ;;  %v12254_v38 = vpop.xlane.xlu1 %12253  ;;  %v12336_v21 = vmul.f32 %v16228_v18, %v20404_v53 }
0x11a8   : > { %16241 = vrcp.f32 %v12254_v38 }
0x11a9   : > { %v12269_v44 = vpop.xlane.xlu0 %12268 }
0x11ab   : > { %v12272_v53 = vpop.xlane.xlu1 %12271 }
0x11ac   : > { %v16230_v8 = vpop.eup %16229  ;;  %16243 = vrcp.f32 %v12272_v53 }
0x11ad   : > { %v16232_v0 = vpop.eup %16231  ;;  %v12333_v25 = vmul.f32 %v16230_v8, %v20418_v24  ;;  %v21267_v24 = vld [vmem:[#allocation13_spill] sm:$0xff]  ;;  %16245 = vrcp.f32 %v12269_v44  ;;  %v21275_v8 = vld [vmem:[#allocation18_spill] sm:$0xff] }
0x11ae   : > { %v16234_v57 = vpop.eup %16233  ;;  %v12335_v60 = vmul.f32 %v16232_v0, %v20399_v40  ;;  %v11506_v40 = vpack.c.bf16 %v11491_v17, %v11423_v28 }
0x11af   : > { %v16236_v37 = vpop.eup %16235  ;;  %v12334_v3 = vmul.f32 %v16234_v57, %v20422_v15  ;;  %v21268_v15 = vld [vmem:[#allocation11_spill] sm:$0xff] }
0x11b0   : > { %v16238_v46 = vpop.eup %16237  ;;  %v12340_v41 = vmul.f32 %v16236_v37, %v20414_v11  ;;  %v12358_v1 = vpack.c.bf16 %v12336_v21, %v12335_v60 }
0x11b1   : > { %v16240_v29 = vpop.eup %16239  ;;  %v12357_v62 = vpack.c.bf16 %v12334_v3, %v12333_v25  ;;  %v12337_v58 = vmul.f32 %v16238_v46, %v20427_v7  ;;  %v12263_v4 = vpop.xlane.xlu0 %12262  ;;  %v11508_v7 = vpack.c.bf16 %v11492_v6, %v11424_v12 }
0x11b2   : > { %v16242_v55 = vpop.eup %16241  ;;  %v12339_v19 = vmul.f32 %v16240_v29, %v21268_v15  ;;  %16247 = vrcp.f32 %v12263_v4 }
0x11b3   : > { %15647 = vmatprep.mubr.msk.bf16.mxu1 %vm764_vm0, %v12357_v62  ;;  %v12338_v63 = vmul.f32 %v16242_v55, %v21267_v24  ;;  %v12266_v16 = vpop.xlane.xlu1 %12265 }
0x11b4   : > { %15648 = vmatmul.mubr.msk.bf16.vlgmr.msra.gmra.mrb[68].mxu1 %vm764_vm0, %v12358_v1  ;;  %v12360_v61 = vpack.c.bf16 %v12340_v41, %v12339_v19  ;;  %16249 = vrcp.f32 %v12266_v16 }
0x11b5   : > { %15660 = vmatpush3.bf16.msra.mxu1 %v20169_v43  ;;  %v12359_v11 = vpack.c.bf16 %v12338_v63, %v12337_v58  ;;  %v12275_v52 = vpop.xlane.xlu0 %12274 }
0x11b6   : > { %15661 = vmatprep.subr.bf16.mxu1 %v11506_v40  ;;  %16251 = vrcp.f32 %v12275_v52  ;;  %v16244_v35 = vpop.eup %16243 }
0x11b7   : > { %15655 = vmatprep.mubr.msk.bf16.mxu0 %vm764_vm0, %v12359_v11  ;;  %v12284_v43 = vpop.xlane.xlu1 %12283  ;;  %v16246_v34 = vpop.eup %16245  ;;  %v12344_v32 = vmul.f32 %v16244_v35, %v21269_v49 }
0x11b8   : > { %15656 = vmatmul.mubr.msk.bf16.vlgmr.msra.gmra.mrb[88].mxu0 %vm764_vm0, %v12360_v61  ;;  %v12343_v54 = vmul.f32 %v16246_v34, %v21272_v20 }
0x11b9   : > { %15662 = vmatpush3.bf16.msra.mxu1 %v11506_v40  ;;  %15668 = vmatpush3.bf16.msra.mxu0 %v20171_v39  ;;  %v12278_v45 = vpop.xlane.xlu0 %12277 }
0x11ba   : > { %15669 = vmatprep.subr.bf16.mxu0 %v11508_v7  ;;  %16253 = vrcp.f32 %v12278_v45  ;;  %v12362_v23 = vpack.c.bf16 %v12344_v32, %v12343_v54 }
0x11bb   : > { %16255 = vrcp.f32 %v12284_v43 }
0x11bc   : > { %v16248_v5 = vpop.eup %16247 }
0x11bd   : > { %15670 = vmatpush3.bf16.msra.mxu0 %v11508_v7  ;;  %v12281_v10 = vpop.xlane.xlu0 %12280  ;;  %v12341_v30 = vmul.f32 %v16248_v5, %v21270_v27 }
0x11be   : > { %v16250_v13 = vpop.eup %16249  ;;  %16257 = vrcp.f32 %v12281_v10 }
0x11bf   : > { %v12342_v39 = vmul.f32 %v16250_v13, %v21271_v31 }
0x11c0   : > { %v16252_v2 = vpop.eup %16251 }
0x11c1   : > { %v12361_v50 = vpack.c.bf16 %v12342_v39, %v12341_v30  ;;  %v12345_v38 = vmul.f32 %v16252_v2, %v21273_v47 }
0x11c3   : > { %15663 = vmatprep.mubr.msk.bf16.mxu1 %vm764_vm0, %v12361_v50 }
0x11c4   : > { %15664 = vmatmul.mubr.msk.bf16.vlgmr.msra.gmra.mrb[72].mxu1 %vm764_vm0, %v12362_v23  ;;  %v16254_v9 = vpop.eup %16253 }
0x11c5   : > { %v12346_v51 = vmul.f32 %v16254_v9, %v21274_v26  ;;  %v16256_v36 = vpop.eup %16255 }
0x11c6   : > { %v12348_v33 = vmul.f32 %v16256_v36, %v21275_v8 }
0x11c7   : > { %v12363_v42 = vpack.c.bf16 %v12346_v51, %v12345_v38 }
0x11c8   : > { %v16258_v18 = vpop.eup %16257 }
0x11c9   : > { %v12347_v0 = vmul.f32 %v16258_v18, %v21276_v22  ;;  %15671 = vmatprep.mubr.msk.bf16.mxu0 %vm764_vm0, %v12363_v42 }
0x11cb   : > { %v12364_v57 = vpack.c.bf16 %v12348_v33, %v12347_v0 }
0x11cd   : > { %15672 = vmatmul.mubr.msk.bf16.vlgmr.msra.gmra.mrb[92].mxu0 %vm764_vm0, %v12364_v57 }
0x1242   : > { %v15617_v21 = vpop.f32.mrb[76].mxu0 }
0x1243   : > { %v12405_v14 = vpop.f32.mrb[77].mxu0 }
0x1244   : > { %v15618_v59 = vpop.f32.mrb[78].mxu0 }
0x1245   : > { %v12408_v37 = vpop.f32.mrb[79].mxu0 }
0x124a   : > { %v15625_v25 = vpop.f32.mrb[80].mxu0 }
0x124b   : > { %v12460_v3 = vpop.f32.mrb[81].mxu0 }
0x124c   : > { %v20610_v46 = vpop.f32.mrb[82].mxu0 }
0x124d   : > { %v20612_v60 = vpop.f32.mrb[83].mxu0 }
0x1252   : > { %v15633_v17 = vpop.f32.mrb[64].mxu1 }
0x1253   : > { %v12941_v29 = vcombine.low %v15617_v21, %v15633_v17  ;;  %v12942_v62 = vcombine.high %v15617_v21, %v15633_v17  ;;  %v12515_v55 = vpop.f32.mrb[65].mxu1 }
0x1254   : > { %v12805_v41 = vcombine.low %v12405_v14, %v12515_v55  ;;  %v12806_v44 = vcombine.high %v12405_v14, %v12515_v55  ;;  %v15634_v53 = vpop.f32.mrb[66].mxu1 }
0x1255   : > { %v12949_v1 = vrot.slane %v12941_v29, %v16651_v48  ;;  %v12956_v28 = vrot.slane %v12942_v62, %v16651_v48  ;;  %v13009_v58 = vcombine.low %v15618_v59, %v15634_v53  ;;  %v13010_v24 = vcombine.high %v15618_v59, %v15634_v53  ;;  %v12518_v63 = vpop.f32.mrb[67].mxu1 }
0x1256   : > { %v12813_v15 = vrot.slane %v12805_v41, %v16651_v48  ;;  %v12820_v19 = vrot.slane %v12806_v44, %v16651_v48  ;;  %v12873_v40 = vcombine.low %v12408_v37, %v12518_v63  ;;  %v12874_v6 = vcombine.high %v12408_v37, %v12518_v63  ;;  %v15641_v11 = vpop.f32.mrb[84].mxu0 }
0x1257   : > { %v20619_v4 = vrot.slane %v13009_v58, %v16651_v48  ;;  %v20622_v61 = vrot.slane %v13010_v24, %v16651_v48  ;;  %v12957_v12 = vcombine.low %v15625_v25, %v15641_v11  ;;  %v12958_v16 = vcombine.high %v15625_v25, %v15641_v11  ;;  %v12570_v7 = vpop.f32.mrb[85].mxu0 }
0x1258   : > { %v20625_v52 = vrot.slane %v12873_v40, %v16651_v48  ;;  %v20628_v43 = vrot.slane %v12874_v6, %v16651_v48  ;;  %v12821_v45 = vcombine.low %v12460_v3, %v12570_v7  ;;  %v12822_v35 = vcombine.high %v12460_v3, %v12570_v7  ;;  %v15642_v34 = vpop.f32.mrb[86].mxu0 }
0x1259   : > { %v12965_v5 = vrot.slane %v12957_v12, %v16651_v48  ;;  %v12972_v13 = vrot.slane %v12958_v16, %v16651_v48  ;;  %v13025_v49 = vcombine.low %v20610_v46, %v15642_v34  ;;  %v13026_v32 = vcombine.high %v20610_v46, %v15642_v34  ;;  %v12573_v10 = vpop.f32.mrb[87].mxu0 }
0x125a   : > { %v12829_v27 = vrot.slane %v12821_v45, %v16651_v48  ;;  %v12836_v30 = vrot.slane %v12822_v35, %v16651_v48  ;;  %v12889_v31 = vcombine.low %v20612_v60, %v12573_v10  ;;  %v12890_v39 = vcombine.high %v20612_v60, %v12573_v10 }
0x125b   : > { %v12973_v20 = vcombine.low %v12949_v1, %v12965_v5  ;;  %v12974_v54 = vcombine.high %v12949_v1, %v12965_v5  ;;  %v12989_v50 = vcombine.low %v12956_v28, %v12972_v13  ;;  %v12990_v23 = vcombine.high %v12956_v28, %v12972_v13 }
0x125c   : > { %v12837_v2 = vcombine.low %v12813_v15, %v12829_v27  ;;  %v12838_v9 = vcombine.high %v12813_v15, %v12829_v27  ;;  %v12853_v47 = vcombine.low %v12820_v19, %v12836_v30  ;;  %v12854_v38 = vcombine.high %v12820_v19, %v12836_v30 }
0x125d   : > { %v12981_v26 = vrot.slane %v12973_v20, %v16669_v56  ;;  %v12988_v51 = vrot.slane %v12974_v54, %v16669_v56  ;;  %v12997_v36 = vrot.slane %v12989_v50, %v16669_v56  ;;  %v13004_v42 = vrot.slane %v12990_v23, %v16669_v56 }
0x125e   : > { %v12845_v18 = vrot.slane %v12837_v2, %v16669_v56  ;;  %v12852_v8 = vrot.slane %v12838_v9, %v16669_v56  ;;  %v12861_v33 = vrot.slane %v12853_v47, %v16669_v56  ;;  %v12868_v22 = vrot.slane %v12854_v38, %v16669_v56 }
0x125f   : > { %v13485_v0 = vcombine.low %v12981_v26, %v12988_v51  ;;  %v15048_v57 = vcombine.high %v12981_v26, %v12988_v51  ;;  %v13501_v21 = vcombine.low %v12997_v36, %v13004_v42  ;;  %v15049_v14 = vcombine.high %v12997_v36, %v13004_v42 }
0x1260   : > { %v13349_v59 = vcombine.low %v12845_v18, %v12852_v8  ;;  %v15044_v37 = vcombine.high %v12845_v18, %v12852_v8  ;;  %v13365_v25 = vcombine.low %v12861_v33, %v12868_v22  ;;  %v15045_v3 = vcombine.high %v12861_v33, %v12868_v22 }
0x1261   : > { %v20647_v46 = vrot.slane %v13485_v0, %v16651_v48  ;;  %v20650_v60 = vrot.slane %v15048_v57, %v16651_v48  ;;  %v20653_v17 = vrot.slane %v13501_v21, %v16651_v48  ;;  %v20656_v29 = vrot.slane %v15049_v14, %v16651_v48 }
0x1262   : > { %v20659_v62 = vrot.slane %v13349_v59, %v16651_v48  ;;  %v20662_v55 = vrot.slane %v15044_v37, %v16651_v48  ;;  %v20665_v41 = vrot.slane %v13365_v25, %v16651_v48  ;;  %v20668_v44 = vrot.slane %v15045_v3, %v16651_v48 }
0x1263   : > { %v13033_v53 = vrot.slane %v13025_v49, %v16651_v48  ;;  %v13040_v1 = vrot.slane %v13026_v32, %v16651_v48  ;;  %v12897_v28 = vrot.slane %v12889_v31, %v16651_v48  ;;  %v12904_v58 = vrot.slane %v12890_v39, %v16651_v48 }
0x1264   : > { %v13517_v24 = vcombine.low %v20647_v46, %v20650_v60  ;;  %v13533_v63 = vcombine.low %v20653_v17, %v20656_v29  ;;  %v13381_v15 = vcombine.low %v20659_v62, %v20662_v55  ;;  %v13397_v19 = vcombine.low %v20665_v41, %v20668_v44 }
0x1265   : > { %v13041_v40 = vcombine.low %v20619_v4, %v13033_v53  ;;  %v13042_v6 = vcombine.high %v20619_v4, %v13033_v53  ;;  %v13057_v11 = vcombine.low %v20622_v61, %v13040_v1  ;;  %v13058_v12 = vcombine.high %v20622_v61, %v13040_v1 }
0x1266   : > { %v12905_v16 = vcombine.low %v20625_v52, %v12897_v28  ;;  %v12906_v7 = vcombine.high %v20625_v52, %v12897_v28  ;;  %v12921_v45 = vcombine.low %v20628_v43, %v12904_v58  ;;  %v12922_v35 = vcombine.high %v20628_v43, %v12904_v58 }
0x1267   : > { %v13049_v34 = vrot.slane %v13041_v40, %v16669_v56  ;;  %v13056_v5 = vrot.slane %v13042_v6, %v16669_v56  ;;  %v13065_v13 = vrot.slane %v13057_v11, %v16669_v56  ;;  %v13072_v4 = vrot.slane %v13058_v12, %v16669_v56 }
0x1268   : > { %v12913_v49 = vrot.slane %v12905_v16, %v16669_v56  ;;  %v12920_v61 = vrot.slane %v12906_v7, %v16669_v56  ;;  %v12929_v32 = vrot.slane %v12921_v45, %v16669_v56  ;;  %v12936_v52 = vrot.slane %v12922_v35, %v16669_v56 }
0x1269   : > { %v13553_v10 = vcombine.low %v13049_v34, %v13056_v5  ;;  %v15050_v27 = vcombine.high %v13049_v34, %v13056_v5  ;;  %v13569_v30 = vcombine.low %v13065_v13, %v13072_v4  ;;  %v15051_v43 = vcombine.high %v13065_v13, %v13072_v4  ;;  %v15925_v13 = vld [vmem:[%s21152_s8 + $0x10] sm:$0xff]   ;;  %v15926_v4 = vld [vmem:[%s21152_s8 + $0x18] sm:$0xff]  }
0x126a   : > { %v13417_v31 = vcombine.low %v12913_v49, %v12920_v61  ;;  %v15046_v39 = vcombine.high %v12913_v49, %v12920_v61  ;;  %v13433_v20 = vcombine.low %v12929_v32, %v12936_v52  ;;  %v15047_v54 = vcombine.high %v12929_v32, %v12936_v52  ;;  %15675 = vmatprep.subr.bf16.mxu1 %v15925_v13 }
0x126b   : > { %v13560_v50 = vrot.slane %v13553_v10, %v16651_v48  ;;  %v13568_v23 = vrot.slane %v15050_v27, %v16651_v48  ;;  %v13576_v2 = vrot.slane %v13569_v30, %v16651_v48  ;;  %v13584_v9 = vrot.slane %v15051_v43, %v16651_v48  ;;  %15676 = vmatpush3.bf16.msra.mxu1 %v15925_v13 }
0x126c   : > { %v13424_v47 = vrot.slane %v13417_v31, %v16651_v48  ;;  %v13432_v38 = vrot.slane %v15046_v39, %v16651_v48  ;;  %v13440_v26 = vrot.slane %v13433_v20, %v16651_v48  ;;  %v13448_v51 = vrot.slane %v15047_v54, %v16651_v48  ;;  %15677 = vmatprep.subr.bf16.mxu1 %v15926_v4 }
0x126d   : > { %v20707_v36 = vrot.slane %v13517_v24, %v16669_v56  ;;  %v20710_v42 = vrot.slane %v13533_v63, %v16669_v56  ;;  %v13585_v18 = vcombine.low %v13560_v50, %v13568_v23  ;;  %v13601_v8 = vcombine.low %v13576_v2, %v13584_v9 }
0x126e   : > { %v20713_v33 = vrot.slane %v13381_v15, %v16669_v56  ;;  %v20716_v22 = vrot.slane %v13397_v19, %v16669_v56  ;;  %v13449_v0 = vcombine.low %v13424_v47, %v13432_v38  ;;  %v13465_v57 = vcombine.low %v13440_v26, %v13448_v51 }
0x126f   : > { %v13550_v21 = vcombine.high %v20707_v36, %v20710_v42  ;;  %v20721_v14 = vrot.slane %v13585_v18, %v16669_v56  ;;  %v20724_v59 = vrot.slane %v13601_v8, %v16669_v56  ;;  %v13518_v37 = vcombine.high %v20647_v46, %v20650_v60  ;;  %15678 = vmatpush3.bf16.msra.mxu1 %v15926_v4 }
0x1270   : > { %v13414_v25 = vcombine.high %v20713_v33, %v20716_v22  ;;  %v20731_v3 = vrot.slane %v13449_v0, %v16669_v56  ;;  %v20734_v53 = vrot.slane %v13465_v57, %v16669_v56  ;;  %v13534_v1 = vcombine.high %v20653_v17, %v20656_v29 }
0x1271   : > { %v13618_v28 = vcombine.high %v20721_v14, %v20724_v59  ;;  %v13532_v58 = vrot.slane %v13518_v37, %v16669_v56  ;;  %v13586_v24 = vcombine.high %v13560_v50, %v13568_v23  ;;  %v13602_v63 = vcombine.high %v13576_v2, %v13584_v9 }
0x1272   : > { %v13482_v46 = vcombine.high %v20731_v3, %v20734_v53  ;;  %v13548_v60 = vrot.slane %v13534_v1, %v16669_v56  ;;  %v13382_v15 = vcombine.high %v20659_v62, %v20662_v55  ;;  %v13398_v19 = vcombine.high %v20665_v41, %v20668_v44 }
0x1273   : > { %v15841_v40 = vpack.i.bf16 %v13618_v28, %v13550_v21  ;;  %v13600_v17 = vrot.slane %v13586_v24, %v16669_v56  ;;  %v13616_v29 = vrot.slane %v13602_v63, %v16669_v56  ;;  %v13450_v6 = vcombine.high %v13424_v47, %v13432_v38 }
0x1274   : > { %v15856_v11 = vpack.i.bf16 %v13482_v46, %v13414_v25  ;;  %v13551_v12 = vcombine.low %v13532_v58, %v13548_v60  ;;  %v13396_v16 = vrot.slane %v13382_v15, %v16669_v56  ;;  %v13412_v7 = vrot.slane %v13398_v19, %v16669_v56 }
0x1275   : > { %15842 = vrot.lane.b32.xlu1 %v15841_v40, %s21277_s29  ;;  %v13619_v45 = vcombine.low %v13600_v17, %v13616_v29  ;;  %v13464_v62 = vrot.slane %v13450_v6, %v16669_v56  ;;  %v13466_v55 = vcombine.high %v13440_v26, %v13448_v51  ;;  %v13552_v35 = vcombine.high %v13532_v58, %v13548_v60 }
0x1276   : > { %15857 = vrot.lane.b32.xlu0 %v15856_v11, %s21277_s29  ;;  %v13416_v41 = vcombine.high %v13396_v16, %v13412_v7  ;;  %v13620_v44 = vcombine.high %v13600_v17, %v13616_v29  ;;  %v13415_v34 = vcombine.low %v13396_v16, %v13412_v7  ;;  %v13549_v5 = vcombine.low %v20707_v36, %v20710_v42 }
0x1277   : > { %v15846_v49 = vpack.i.bf16 %v13619_v45, %v13551_v12  ;;  %v13480_v61 = vrot.slane %v13466_v55, %v16669_v56  ;;  %v13617_v32 = vcombine.low %v20721_v14, %v20724_v59  ;;  %v13413_v52 = vcombine.low %v20713_v33, %v20716_v22 }
0x1278   : > { %v15851_v10 = vpack.i.bf16 %v13620_v44, %v13552_v35  ;;  %v13481_v27 = vcombine.low %v20731_v3, %v20734_v53 }
0x1279   : > { %15847 = vrot.lane.b32.xlu1 %v15846_v49, %s21278_s3  ;;  %v13484_v30 = vcombine.high %v13464_v62, %v13480_v61  ;;  %v13483_v43 = vcombine.low %v13464_v62, %v13480_v61 }
0x127b   : > { %v15866_v31 = vpack.i.bf16 %v13484_v30, %v13416_v41  ;;  %v15861_v39 = vpack.i.bf16 %v13483_v43, %v13415_v34 }
0x127d   : > { %15867 = vrot.lane.b32.xlu0 %v15866_v31, %s21279_s26  ;;  %15852 = vrot.lane.b32.xlu1 %v15851_v10, %s21279_s26 }
0x1281   : > { %15862 = vrot.lane.b32.xlu1 %v15861_v39, %s21278_s3 }
0x1287   : > { %v15649_v20 = vpop.f32.mrb[68].mxu1 }
0x1288   : > { %v12625_v54 = vpop.f32.mrb[69].mxu1 }
0x1289   : > { %v15650_v50 = vpop.f32.mrb[70].mxu1 }
0x128a   : > { %v12628_v23 = vpop.f32.mrb[71].mxu1 }
0x128b   : > { %v15657_v2 = vpop.f32.mrb[88].mxu0 }
0x128c   : > { %v12680_v9 = vpop.f32.mrb[89].mxu0 }
0x128d   : > { %v20774_v47 = vpop.f32.mrb[90].mxu0 }
0x128e   : > { %v20776_v38 = vpop.f32.mrb[91].mxu0 }
0x1297   : > { %v15665_v26 = vpop.f32.mrb[72].mxu1 }
0x1298   : > { %v13213_v51 = vcombine.low %v15649_v20, %v15665_v26  ;;  %v13214_v18 = vcombine.high %v15649_v20, %v15665_v26  ;;  %v12735_v8 = vpop.f32.mrb[73].mxu1 }
0x1299   : > { %v13077_v0 = vcombine.low %v12625_v54, %v12735_v8  ;;  %v13078_v57 = vcombine.high %v12625_v54, %v12735_v8  ;;  %v15666_v21 = vpop.f32.mrb[74].mxu1 }
0x129a   : > { %v13281_v37 = vcombine.low %v15650_v50, %v15666_v21  ;;  %v13282_v25 = vcombine.high %v15650_v50, %v15666_v21  ;;  %v12738_v1 = vpop.f32.mrb[75].mxu1  ;;  %v13221_v24 = vrot.slane %v13213_v51, %v16651_v48  ;;  %v13228_v63 = vrot.slane %v13214_v18, %v16651_v48 }
0x129b   : > { %v13145_v28 = vcombine.low %v12628_v23, %v12738_v1  ;;  %v13146_v58 = vcombine.high %v12628_v23, %v12738_v1  ;;  %v13085_v46 = vrot.slane %v13077_v0, %v16651_v48  ;;  %v13092_v60 = vrot.slane %v13078_v57, %v16651_v48 }
0x129c   : > { %v20783_v19 = vrot.slane %v13281_v37, %v16651_v48  ;;  %v20786_v40 = vrot.slane %v13282_v25, %v16651_v48 }
0x129d   : > { %v20789_v11 = vrot.slane %v13145_v28, %v16651_v48  ;;  %v20792_v12 = vrot.slane %v13146_v58, %v16651_v48 }
0x12a0   : > { %v15673_v15 = vpop.f32.mrb[92].mxu0 }
0x12a1   : > { %v13229_v17 = vcombine.low %v15657_v2, %v15673_v15  ;;  %v13230_v29 = vcombine.high %v15657_v2, %v15673_v15  ;;  %v12790_v6 = vpop.f32.mrb[93].mxu0 }
0x12a2   : > { %v13093_v16 = vcombine.low %v12680_v9, %v12790_v6  ;;  %v13094_v7 = vcombine.high %v12680_v9, %v12790_v6  ;;  %v15674_v45 = vpop.f32.mrb[94].mxu0 }
0x12a3   : > { %v13237_v62 = vrot.slane %v13229_v17, %v16651_v48  ;;  %v13244_v55 = vrot.slane %v13230_v29, %v16651_v48  ;;  %v13297_v35 = vcombine.low %v20774_v47, %v15674_v45  ;;  %v13298_v41 = vcombine.high %v20774_v47, %v15674_v45  ;;  %v12793_v44 = vpop.f32.mrb[95].mxu0 }
0x12a4   : > { %v13101_v34 = vrot.slane %v13093_v16, %v16651_v48  ;;  %v13108_v13 = vrot.slane %v13094_v7, %v16651_v48  ;;  %v13161_v4 = vcombine.low %v20776_v38, %v12793_v44  ;;  %v13162_v49 = vcombine.high %v20776_v38, %v12793_v44 }
0x12a5   : > { %v13245_v61 = vcombine.low %v13221_v24, %v13237_v62  ;;  %v13246_v10 = vcombine.high %v13221_v24, %v13237_v62  ;;  %v13261_v30 = vcombine.low %v13228_v63, %v13244_v55  ;;  %v13262_v43 = vcombine.high %v13228_v63, %v13244_v55 }
0x12a6   : > { %v13109_v31 = vcombine.low %v13085_v46, %v13101_v34  ;;  %v13110_v39 = vcombine.high %v13085_v46, %v13101_v34  ;;  %v13125_v20 = vcombine.low %v13092_v60, %v13108_v13  ;;  %v13126_v54 = vcombine.high %v13092_v60, %v13108_v13 }
0x12a7   : > { %v13253_v50 = vrot.slane %v13245_v61, %v16669_v56  ;;  %v13260_v23 = vrot.slane %v13246_v10, %v16669_v56  ;;  %v13269_v2 = vrot.slane %v13261_v30, %v16669_v56  ;;  %v13276_v9 = vrot.slane %v13262_v43, %v16669_v56 }
0x12a8   : > { %v13117_v47 = vrot.slane %v13109_v31, %v16669_v56  ;;  %v13124_v38 = vrot.slane %v13110_v39, %v16669_v56  ;;  %v13133_v26 = vrot.slane %v13125_v20, %v16669_v56  ;;  %v13140_v51 = vrot.slane %v13126_v54, %v16669_v56 }
0x12a9   : > { %v13757_v18 = vcombine.low %v13253_v50, %v13260_v23  ;;  %v15056_v8 = vcombine.high %v13253_v50, %v13260_v23  ;;  %v13773_v0 = vcombine.low %v13269_v2, %v13276_v9  ;;  %v15057_v57 = vcombine.high %v13269_v2, %v13276_v9 }
0x12aa   : > { %v13621_v21 = vcombine.low %v13117_v47, %v13124_v38  ;;  %v15052_v37 = vcombine.high %v13117_v47, %v13124_v38  ;;  %v13637_v25 = vcombine.low %v13133_v26, %v13140_v51  ;;  %v15053_v1 = vcombine.high %v13133_v26, %v13140_v51 }
0x12ab   : > { %v20811_v28 = vrot.slane %v13757_v18, %v16651_v48  ;;  %v20814_v58 = vrot.slane %v15056_v8, %v16651_v48  ;;  %v20817_v24 = vrot.slane %v13773_v0, %v16651_v48  ;;  %v20820_v63 = vrot.slane %v15057_v57, %v16651_v48 }
0x12ac   : > { %v20823_v46 = vrot.slane %v13621_v21, %v16651_v48  ;;  %v20826_v60 = vrot.slane %v15052_v37, %v16651_v48  ;;  %v20829_v15 = vrot.slane %v13637_v25, %v16651_v48  ;;  %v20832_v17 = vrot.slane %v15053_v1, %v16651_v48 }
0x12ad   : > { %v13305_v29 = vrot.slane %v13297_v35, %v16651_v48  ;;  %v13312_v6 = vrot.slane %v13298_v41, %v16651_v48  ;;  %v13169_v16 = vrot.slane %v13161_v4, %v16651_v48  ;;  %v13176_v7 = vrot.slane %v13162_v49, %v16651_v48 }
0x12ae   : > { %v13789_v45 = vcombine.low %v20811_v28, %v20814_v58  ;;  %v13805_v62 = vcombine.low %v20817_v24, %v20820_v63  ;;  %v13653_v55 = vcombine.low %v20823_v46, %v20826_v60  ;;  %v13669_v44 = vcombine.low %v20829_v15, %v20832_v17 }
0x12af   : > { %v13313_v35 = vcombine.low %v20783_v19, %v13305_v29  ;;  %v13314_v41 = vcombine.high %v20783_v19, %v13305_v29  ;;  %v13329_v34 = vcombine.low %v20786_v40, %v13312_v6  ;;  %v13330_v13 = vcombine.high %v20786_v40, %v13312_v6 }
0x12b0   : > { %v13177_v4 = vcombine.low %v20789_v11, %v13169_v16  ;;  %v13178_v49 = vcombine.high %v20789_v11, %v13169_v16  ;;  %v13193_v61 = vcombine.low %v20792_v12, %v13176_v7  ;;  %v13194_v10 = vcombine.high %v20792_v12, %v13176_v7 }
0x12b1   : > { %v13321_v30 = vrot.slane %v13313_v35, %v16669_v56  ;;  %v13328_v43 = vrot.slane %v13314_v41, %v16669_v56  ;;  %v13337_v31 = vrot.slane %v13329_v34, %v16669_v56  ;;  %v13344_v19 = vrot.slane %v13330_v13, %v16669_v56 }
0x12b2   : > { %v13185_v39 = vrot.slane %v13177_v4, %v16669_v56  ;;  %v13192_v40 = vrot.slane %v13178_v49, %v16669_v56  ;;  %v13201_v20 = vrot.slane %v13193_v61, %v16669_v56  ;;  %v13208_v11 = vrot.slane %v13194_v10, %v16669_v56 }
0x12b3   : > { %v13825_v54 = vcombine.low %v13321_v30, %v13328_v43  ;;  %v15058_v50 = vcombine.high %v13321_v30, %v13328_v43  ;;  %v13841_v23 = vcombine.low %v13337_v31, %v13344_v19  ;;  %v15059_v12 = vcombine.high %v13337_v31, %v13344_v19 }
0x12b4   : > { %v13689_v2 = vcombine.low %v13185_v39, %v13192_v40  ;;  %v15054_v9 = vcombine.high %v13185_v39, %v13192_v40  ;;  %v13705_v47 = vcombine.low %v13201_v20, %v13208_v11  ;;  %v15055_v38 = vcombine.high %v13201_v20, %v13208_v11 }
0x12b5   : > { %v13832_v26 = vrot.slane %v13825_v54, %v16651_v48  ;;  %v13840_v51 = vrot.slane %v15058_v50, %v16651_v48  ;;  %v13848_v18 = vrot.slane %v13841_v23, %v16651_v48  ;;  %v13856_v8 = vrot.slane %v15059_v12, %v16651_v48 }
0x12b6   : > { %v13696_v0 = vrot.slane %v13689_v2, %v16651_v48  ;;  %v13704_v57 = vrot.slane %v15054_v9, %v16651_v48  ;;  %v13712_v21 = vrot.slane %v13705_v47, %v16651_v48  ;;  %v13720_v37 = vrot.slane %v15055_v38, %v16651_v48 }
0x12b7   : > { %v20871_v25 = vrot.slane %v13789_v45, %v16669_v56  ;;  %v20874_v1 = vrot.slane %v13805_v62, %v16669_v56  ;;  %v13857_v29 = vcombine.low %v13832_v26, %v13840_v51  ;;  %v13873_v6 = vcombine.low %v13848_v18, %v13856_v8 }
0x12b8   : > { %v20877_v16 = vrot.slane %v13653_v55, %v16669_v56  ;;  %v20880_v7 = vrot.slane %v13669_v44, %v16669_v56  ;;  %v13721_v35 = vcombine.low %v13696_v0, %v13704_v57  ;;  %v13737_v41 = vcombine.low %v13712_v21, %v13720_v37 }
0x12b9   : > { %v13822_v34 = vcombine.high %v20871_v25, %v20874_v1  ;;  %v20885_v48 = vrot.slane %v13857_v29, %v16669_v56  ;;  %v20888_v45 = vrot.slane %v13873_v6, %v16669_v56  ;;  %v13790_v62 = vcombine.high %v20811_v28, %v20814_v58 }
0x12ba   : > { %v13686_v55 = vcombine.high %v20877_v16, %v20880_v7  ;;  %v20895_v44 = vrot.slane %v13721_v35, %v16669_v56  ;;  %v20898_v13 = vrot.slane %v13737_v41, %v16669_v56  ;;  %v13806_v4 = vcombine.high %v20817_v24, %v20820_v63 }
0x12bb   : > { %v13890_v49 = vcombine.high %v20885_v48, %v20888_v45  ;;  %v13804_v61 = vrot.slane %v13790_v62, %v16669_v56  ;;  %v13858_v10 = vcombine.high %v13832_v26, %v13840_v51  ;;  %v13874_v30 = vcombine.high %v13848_v18, %v13856_v8 }
0x12bc   : > { %v13754_v28 = vcombine.high %v20895_v44, %v20898_v13  ;;  %v13820_v58 = vrot.slane %v13806_v4, %v16669_v56  ;;  %v13654_v43 = vcombine.high %v20823_v46, %v20826_v60  ;;  %v13670_v31 = vcombine.high %v20829_v15, %v20832_v17 }
0x12bd   : > { %v15871_v19 = vpack.i.bf16 %v13890_v49, %v13822_v34  ;;  %v13872_v24 = vrot.slane %v13858_v10, %v16669_v56  ;;  %v13888_v63 = vrot.slane %v13874_v30, %v16669_v56  ;;  %v13722_v39 = vcombine.high %v13696_v0, %v13704_v57 }
0x12be   : > { %v15881_v40 = vpack.i.bf16 %v13754_v28, %v13686_v55  ;;  %v13823_v20 = vcombine.low %v13804_v61, %v13820_v58  ;;  %v13668_v11 = vrot.slane %v13654_v43, %v16669_v56  ;;  %v13684_v54 = vrot.slane %v13670_v31, %v16669_v56 }
0x12bf   : > { %15872 = vrot.lane.b32.xlu1 %v15871_v19, %s21277_s29  ;;  %v13891_v50 = vcombine.low %v13872_v24, %v13888_v63  ;;  %v13736_v46 = vrot.slane %v13722_v39, %v16669_v56  ;;  %v13738_v60 = vcombine.high %v13712_v21, %v13720_v37  ;;  %v13824_v23 = vcombine.high %v13804_v61, %v13820_v58 }
0x12c0   : > { %15882 = vrot.lane.b32.xlu0 %v15881_v40, %s21277_s29  ;;  %v13687_v15 = vcombine.low %v13668_v11, %v13684_v54  ;;  %v13892_v17 = vcombine.high %v13872_v24, %v13888_v63  ;;  %v13688_v12 = vcombine.high %v13668_v11, %v13684_v54  ;;  %v13821_v2 = vcombine.low %v20871_v25, %v20874_v1 }
0x12c1   : > { %v15876_v9 = vpack.i.bf16 %v13891_v50, %v13823_v20  ;;  %v13752_v47 = vrot.slane %v13738_v60, %v16669_v56  ;;  %v13889_v38 = vcombine.low %v20885_v48, %v20888_v45  ;;  %v13685_v26 = vcombine.low %v20877_v16, %v20880_v7  ;;  %v15065_v16 = vld [vmem:[%s21153_s9 + $0x1] ss:$0 sm:$0xff] }
0x12c2   : > { %v15896_v51 = vpack.i.bf16 %v13892_v17, %v13824_v23  ;;  %v13753_v18 = vcombine.low %v20895_v44, %v20898_v13 }
0x12c3   : > { %15877 = vrot.lane.b32.xlu1 %v15876_v9, %s21278_s3  ;;  %v13755_v8 = vcombine.low %v13736_v46, %v13752_v47  ;;  %v13756_v0 = vcombine.high %v13736_v46, %v13752_v47 }
0x12c5   : > { %v15886_v57 = vpack.i.bf16 %v13755_v8, %v13687_v15  ;;  %v15891_v21 = vpack.i.bf16 %v13756_v0, %v13688_v12 }
0x12c7   : > { %15887 = vrot.lane.b32.xlu0 %v15886_v57, %s21278_s3  ;;  %15897 = vrot.lane.b32.xlu1 %v15896_v51, %s21279_s26  ;;  %s636_s3 = scalar_lea.vmem %s21164_s20, %s21288_s0 }
0x12cb   : > { %15892 = vrot.lane.b32.xlu0 %v15891_v21, %s21279_s26 }
0x12e7   : > { %v15843_v56 = vpop.permute.xlu1 %15842 }
0x12e8   : > { %v15845_v25 = vunpack.i.h.bf16 %v15843_v56  ;;  %v15844_v1 = vunpack.i.l.bf16 %v15843_v56  ;;  %v15858_v29 = vpop.permute.xlu0 %15857 }
0x12e9   : > { %v15860_v55 = vunpack.i.h.bf16 %v15858_v29  ;;  %v15859_v4 = vunpack.i.l.bf16 %v15858_v29 }
0x12ea   : > { %v13991_v34 = vsel %vm4606_vm1, %v13549_v5, %v15844_v1  ;;  %v13992_v48 = vsel %vm4606_vm1, %v13617_v32, %v15845_v25 }
0x12eb   : > { %v15848_v37 = vpop.permute.xlu1 %15847  ;;  %v13990_v14 = vsel %vm4606_vm1, %v13481_v27, %v15860_v55  ;;  %v13989_v59 = vsel %vm4606_vm1, %v13413_v52, %v15859_v4  ;;  %v21282_v4 = vld [vmem:[#allocation4_spill] sm:$0xff] }
0x12ec   : > { %v15850_v6 = vunpack.i.h.bf16 %v15848_v37  ;;  %v15849_v35 = vunpack.i.l.bf16 %v15848_v37 }
0x12ee   : > { %v13999_v49 = vsel %vm7095_vm2, %v13991_v34, %v15849_v35  ;;  %v14000_v61 = vsel %vm7095_vm2, %v13992_v48, %v15850_v6 }
0x12ef   : > { %v15853_v41 = vpop.permute.xlu1 %15852  ;;  %v15868_v10 = vpop.permute.xlu0 %15867 }
0x12f0   : > { %v15855_v45 = vunpack.i.h.bf16 %v15853_v41  ;;  %v15854_v62 = vunpack.i.l.bf16 %v15853_v41  ;;  %v15870_v32 = vunpack.i.h.bf16 %v15868_v10  ;;  %v15869_v43 = vunpack.i.l.bf16 %v15868_v10  ;;  %v21280_v41 = vld [vmem:[#allocation3_spill] sm:$0xff] }
0x12f2   : > { %v14007_v30 = vsel %vm7104_vm3, %v13999_v49, %v15854_v62  ;;  %v14008_v36 = vsel %vm7104_vm3, %v14000_v61, %v15855_v45  ;;  %v21281_v45 = vld [vmem:[#allocation6_spill] sm:$0xff] }
0x12f3   : > { %v14014_v42 = vpack.c.bf16 %v14008_v36, %v14007_v30  ;;  %v15863_v5 = vpop.permute.xlu1 %15862  ;;  %v21283_v30 = vld [vmem:[#allocation5_spill] sm:$0xff] }
0x12f4   : > { %v15865_v28 = vunpack.i.h.bf16 %v15863_v5  ;;  %v15864_v58 = vunpack.i.l.bf16 %v15863_v5 }
0x12f6   : > { %v13997_v31 = vsel %vm7095_vm2, %v13989_v59, %v15864_v58  ;;  %v13998_v19 = vsel %vm7095_vm2, %v13990_v14, %v15865_v28 }
0x12f7   : > { %v14005_v24 = vsel %vm7104_vm3, %v13997_v31, %v15869_v43  ;;  %v14006_v63 = vsel %vm7104_vm3, %v13998_v19, %v15870_v32  ;;  %v21284_v31 = vld [vmem:[#allocation7_spill] sm:$0xff] }
0x12f8   : > { %v14013_v39 = vpack.c.bf16 %v14006_v63, %v14005_v24 }
0x12fa   : > { %15679 = vmatprep.mubr.msk.bf16.mxu1 %vm764_vm0, %v14013_v39  ;;  %v21285_v39 = vld [vmem:[#allocation8_spill] sm:$0xff] }
0x12fb   : > { %15680 = vmatmul.mubr.msk.bf16.vlgmr.msra.gmra.mrb[76].mxu1 %vm764_vm0, %v14014_v42 }
0x1331   : > { %v15873_v3 = vpop.permute.xlu1 %15872 }
0x1332   : > { %v15883_v53 = vpop.permute.xlu0 %15882  ;;  %v15875_v22 = vunpack.i.h.bf16 %v15873_v3  ;;  %v15874_v52 = vunpack.i.l.bf16 %v15873_v3 }
0x1333   : > { %v15885_v20 = vunpack.i.h.bf16 %v15883_v53  ;;  %v15884_v11 = vunpack.i.l.bf16 %v15883_v53  ;;  %v21286_v53 = vld [vmem:[#allocation9_spill] sm:$0xff] }
0x1334   : > { %v13995_v46 = vsel %vm4606_vm1, %v13821_v2, %v15874_v52  ;;  %v13996_v60 = vsel %vm4606_vm1, %v13889_v38, %v15875_v22  ;;  %v21287_v52 = vld [vmem:[#allocation10_spill] sm:$0xff] }
0x1335   : > { %v15878_v33 = vpop.permute.xlu1 %15877  ;;  %v13994_v2 = vsel %vm4606_vm1, %v13753_v18, %v15885_v20  ;;  %v13993_v38 = vsel %vm4606_vm1, %v13685_v26, %v15884_v11 }
0x1336   : > { %v15880_v27 = vunpack.i.h.bf16 %v15878_v33  ;;  %v15879_v40 = vunpack.i.l.bf16 %v15878_v33 }
0x1338   : > { %v14003_v17 = vsel %vm7095_vm2, %v13995_v46, %v15879_v40  ;;  %v14004_v12 = vsel %vm7095_vm2, %v13996_v60, %v15880_v27 }
0x1339   : > { %v15888_v54 = vpop.permute.xlu0 %15887  ;;  %v15898_v50 = vpop.permute.xlu1 %15897 }
0x133a   : > { %v15900_v23 = vunpack.i.h.bf16 %v15898_v50  ;;  %v15899_v15 = vunpack.i.l.bf16 %v15898_v50  ;;  %v15890_v9 = vunpack.i.h.bf16 %v15888_v54  ;;  %v15889_v47 = vunpack.i.l.bf16 %v15888_v54 }
0x133c   : > { %v14011_v51 = vsel %vm7104_vm3, %v14003_v17, %v15899_v15  ;;  %v14012_v8 = vsel %vm7104_vm3, %v14004_v12, %v15900_v23  ;;  %v14001_v37 = vsel %vm7095_vm2, %v13993_v38, %v15889_v47  ;;  %v14002_v25 = vsel %vm7095_vm2, %v13994_v2, %v15890_v9 }
0x133d   : > { %v14016_v0 = vpack.c.bf16 %v14012_v8, %v14011_v51  ;;  %v15893_v57 = vpop.permute.xlu0 %15892 }
0x133e   : > { %v15895_v21 = vunpack.i.h.bf16 %v15893_v57  ;;  %v15894_v56 = vunpack.i.l.bf16 %v15893_v57 }
0x1340   : > { %v14009_v1 = vsel %vm7104_vm3, %v14001_v37, %v15894_v56  ;;  %v14010_v29 = vsel %vm7104_vm3, %v14002_v25, %v15895_v21 }
0x1341   : > { %v14015_v6 = vpack.c.bf16 %v14010_v29, %v14009_v1  ;;  %v15927_v1 = vld [vmem:[%s21156_s12 + $0x10] sm:$0xff]   ;;  %v15928_v29 = vld [vmem:[%s21156_s12 + $0x18] sm:$0xff]  }
0x1342   : > { %15687 = vmatprep.subr.bf16.mxu0 %v15927_v1 }
0x1343   : > { %15683 = vmatprep.mubr.msk.bf16.mxu1 %vm764_vm0, %v14015_v6  ;;  %15688 = vmatpush3.bf16.msra.mxu0 %v15927_v1 }
0x1344   : > { %15684 = vmatmul.mubr.msk.bf16.gmra.mrb[80].mxu1 %vm764_vm0, %v14016_v0  ;;  %15689 = vmatprep.subr.bf16.mxu0 %v15928_v29 }
0x1347   : > { %15690 = vmatpush3.bf16.msra.mxu0 %v15928_v29 }
0x13ce   : > { %v15681_v7 = vpop.f32.mrb[76].mxu1 }
0x13cf   : > { %v14088_v44 = vpop.f32.mrb[77].mxu1  ;;  %v14097_v13 = vadd.f32 %v15681_v7, %v15065_v16 }
0x13d0   : > { %v14089_v26 = vadd.f32 %v15065_v16, %v14088_v44  ;;  %v15682_v18 = vpop.f32.mrb[78].mxu1 }
0x13d1   : > { %v14091_v35 = vpop.f32.mrb[79].mxu1  ;;  %v20983_v62 = vadd.f32 %v14097_v13, %v21281_v45  ;;  %v14100_v55 = vadd.f32 %v15682_v18, %v15065_v16 }
0x13d2   : > { %v14119_v34 = vadd.f32 %v14089_v26, %v21280_v41  ;;  %v14092_v48 = vadd.f32 %v15065_v16, %v14091_v35 }
0x13d3   : > { %v20989_v36 = vadd.f32 %v14100_v55, %v21283_v30  ;;  %v14137_v42 = vsel %vm764_vm0, %v20983_v62, 0.0 }
0x13d4   : > { %v14120_v49 = vadd.f32 %v14092_v48, %v21282_v4  ;;  %v14131_v61 = vsel %vm764_vm0, %v14119_v34, 0.0 }
0x13d5   : > { %14132 = vadd.xlane.f32.xlu0 %v14131_v61  ;;  %v14140_v5 = vsel %vm764_vm0, %v20989_v36, 0.0 }
0x13d6   : > { %v14134_v10 = vsel %vm764_vm0, %v14120_v49, 0.0 }
0x13d7   : > { %14135 = vadd.xlane.f32.xlu1 %v14134_v10 }
0x13d9   : > { %14138 = vadd.xlane.f32.xlu0 %v14137_v42 }
0x13dd   : > { %14141 = vadd.xlane.f32.xlu0 %v14140_v5 }
0x1417   : > { %v15685_v28 = vpop.f32.mrb[80].mxu1 }
0x1418   : > { %v14104_v58 = vpop.f32.mrb[81].mxu1  ;;  %v14113_v14 = vadd.f32 %v15685_v28, %v15065_v16 }
0x1419   : > { %v14105_v59 = vadd.f32 %v15065_v16, %v14104_v58  ;;  %v15686_v32 = vpop.f32.mrb[82].mxu1 }
0x141a   : > { %v14107_v43 = vpop.f32.mrb[83].mxu1  ;;  %v14116_v24 = vadd.f32 %v15686_v32, %v15065_v16  ;;  %v20997_v3 = vadd.f32 %v14113_v14, %v21285_v39 }
0x141b   : > { %v14123_v19 = vadd.f32 %v14105_v59, %v21284_v31  ;;  %v14108_v63 = vadd.f32 %v15065_v16, %v14107_v43 }
0x141c   : > { %v21002_v27 = vadd.f32 %v14116_v24, %v21287_v52  ;;  %v14149_v20 = vsel %vm764_vm0, %v20997_v3, 0.0 }
0x141d   : > { %v14124_v33 = vadd.f32 %v14108_v63, %v21286_v53  ;;  %v14143_v22 = vsel %vm764_vm0, %v14123_v19, 0.0 }
0x141e   : > { %14144 = vadd.xlane.f32.xlu0 %v14143_v22  ;;  %v14152_v11 = vsel %vm764_vm0, %v21002_v27, 0.0  ;;  %v15074_v22 = vld [vmem:[%s21154_s10 + $0x1] ss:$0 sm:$0xff] }
0x141f   : > { %v14146_v40 = vsel %vm764_vm0, %v14124_v33, 0.0 }
0x1420   : > { %14147 = vadd.xlane.f32.xlu1 %v14146_v40 }
0x1422   : > { %14150 = vadd.xlane.f32.xlu0 %v14149_v20 }
0x1424   : > { %14153 = vadd.xlane.f32.xlu1 %v14152_v11 }
0x1462   : > { %v14133_v54 = vpop.xlane.xlu0 %14132 }
0x1463   : > { %v14155_v50 = vmul.f32 0.03125, %v14133_v54 }
0x1464   : > { %v14136_v46 = vpop.xlane.xlu1 %14135 }
0x1465   : > { %v21009_v60 = vsub.f32 %v14119_v34, %v14155_v50  ;;  %v14156_v23 = vmul.f32 0.03125, %v14136_v46  ;;  %v15075_v50 = vld [vmem:[%s21155_s11 + $0x1] ss:$0 sm:$0xff] }
0x1466   : > { %v14139_v15 = vpop.xlane.xlu0 %14138 }
0x1467   : > { %v21011_v17 = vsub.f32 %v14120_v49, %v14156_v23  ;;  %v14157_v12 = vmul.f32 0.03125, %v14139_v15  ;;  %v14171_v9 = vmul.f32 %v21009_v60, %v21009_v60 }
0x1469   : > { %v21016_v47 = vsub.f32 %v20983_v62, %v14157_v12  ;;  %v14179_v51 = vsel %vm764_vm0, %v14171_v9, 0.0  ;;  %v14172_v8 = vmul.f32 %v21011_v17, %v21011_v17 }
0x146a   : > { %14180 = vadd.xlane.f32.xlu0 %v14179_v51  ;;  %v14142_v0 = vpop.xlane.xlu0 %14141 }
0x146b   : > { %v14158_v57 = vmul.f32 0.03125, %v14142_v0  ;;  %v14182_v2 = vsel %vm764_vm0, %v14172_v8, 0.0  ;;  %v14173_v38 = vmul.f32 %v21016_v47, %v21016_v47 }
0x146c   : > { %14183 = vadd.xlane.f32.xlu1 %v14182_v2 }
0x146d   : > { %v21025_v21 = vsub.f32 %v20989_v36, %v14158_v57  ;;  %v14185_v56 = vsel %vm764_vm0, %v14173_v38, 0.0 }
0x146e   : > { %14186 = vadd.xlane.f32.xlu0 %v14185_v56 }
0x146f   : > { %v14174_v37 = vmul.f32 %v21025_v21, %v21025_v21 }
0x1471   : > { %v14188_v25 = vsel %vm764_vm0, %v14174_v37, 0.0 }
0x1472   : > { %14189 = vadd.xlane.f32.xlu1 %v14188_v25 }
0x14ab   : > { %v14145_v6 = vpop.xlane.xlu0 %14144 }
0x14ac   : > { %v14159_v16 = vmul.f32 0.03125, %v14145_v6 }
0x14ad   : > { %v14148_v7 = vpop.xlane.xlu1 %14147 }
0x14ae   : > { %v21037_v44 = vsub.f32 %v14123_v19, %v14159_v16  ;;  %v14160_v13 = vmul.f32 0.03125, %v14148_v7 }
0x14af   : > { %v14151_v26 = vpop.xlane.xlu0 %14150 }
0x14b0   : > { %v21039_v18 = vsub.f32 %v14124_v33, %v14160_v13  ;;  %v14161_v35 = vmul.f32 0.03125, %v14151_v26  ;;  %v14175_v41 = vmul.f32 %v21037_v44, %v21037_v44 }
0x14b1   : > { %v14154_v34 = vpop.xlane.xlu1 %14153 }
0x14b2   : > { %v21044_v48 = vsub.f32 %v20997_v3, %v14161_v35  ;;  %v14162_v45 = vmul.f32 0.03125, %v14154_v34  ;;  %v14191_v55 = vsel %vm764_vm0, %v14175_v41, 0.0  ;;  %v14176_v4 = vmul.f32 %v21039_v18, %v21039_v18 }
0x14b3   : > { %14192 = vadd.xlane.f32.xlu0 %v14191_v55 }
0x14b4   : > { %v21050_v49 = vsub.f32 %v21002_v27, %v14162_v45  ;;  %v14194_v61 = vsel %vm764_vm0, %v14176_v4, 0.0  ;;  %v14177_v10 = vmul.f32 %v21044_v48, %v21044_v48 }
0x14b5   : > { %14195 = vadd.xlane.f32.xlu1 %v14194_v61 }
0x14b6   : > { %v14197_v30 = vsel %vm764_vm0, %v14177_v10, 0.0  ;;  %v14178_v42 = vmul.f32 %v21050_v49, %v21050_v49 }
0x14b7   : > { %14198 = vadd.xlane.f32.xlu0 %v14197_v30 }
0x14b8   : > { %v14200_v5 = vsel %vm764_vm0, %v14178_v42, 0.0 }
0x14b9   : > { %14201 = vadd.xlane.f32.xlu1 %v14200_v5 }
0x14f7   : > { %v14181_v28 = vpop.xlane.xlu0 %14180 }
0x14f8   : > { %v14203_v58 = vmul.f32 0.03125, %v14181_v28 }
0x14f9   : > { %v14184_v14 = vpop.xlane.xlu1 %14183 }
0x14fa   : > { %v14211_v59 = vadd.f32 1e-05, %v14203_v58  ;;  %v14204_v32 = vmul.f32 0.03125, %v14184_v14 }
0x14fb   : > { %v14187_v43 = vpop.xlane.xlu0 %14186 }
0x14fc   : > { %16259 = vrsqrt.f32 %v14211_v59  ;;  %v14212_v31 = vadd.f32 1e-05, %v14204_v32  ;;  %v14205_v19 = vmul.f32 0.03125, %v14187_v43  ;;  %v15932_v43 = vld [vmem:[%s21158_s14 + $0x58] sm:$0xff]  }
0x14fe   : > { %16261 = vrsqrt.f32 %v14212_v31  ;;  %v14213_v24 = vadd.f32 1e-05, %v14205_v19  ;;  %v15933_v31 = vld [vmem:[%s21158_s14 + $0x60] sm:$0xff]   ;;  %v15934_v19 = vld [vmem:[%s21158_s14 + $0x68] sm:$0xff]  }
0x14ff   : > { %v14190_v63 = vpop.xlane.xlu1 %14189 }
0x1500   : > { %16263 = vrsqrt.f32 %v14213_v24  ;;  %v14206_v39 = vmul.f32 0.03125, %v14190_v63  ;;  %v15935_v24 = vld [vmem:[%s21158_s14 + $0x70] sm:$0xff]   ;;  %v15936_v63 = vld [vmem:[%s21158_s14 + $0x78] sm:$0xff]  }
0x1502   : > { %v14214_v53 = vadd.f32 1e-05, %v14206_v39  ;;  %v15081_v39 = vld [vmem:[%s21157_s13 + $0x1] ss:$0 sm:$0xff] }
0x1504   : > { %16265 = vrsqrt.f32 %v14214_v53 }
0x1506   : > { %v16260_v33 = vpop.eup %16259 }
0x1507   : > { %v14227_v52 = vmul.f32 %v16260_v33, %v21009_v60 }
0x1508   : > { %v16262_v40 = vpop.eup %16261 }
0x1509   : > { %v14228_v20 = vmul.f32 %v16262_v40, %v21011_v17  ;;  %v14241_v11 = vmul.f32 %v15074_v22, %v14227_v52 }
0x150a   : > { %v16264_v54 = vpop.eup %16263 }
0x150b   : > { %v14229_v46 = vmul.f32 %v16264_v54, %v21016_v47  ;;  %v14242_v23 = vmul.f32 %v15074_v22, %v14228_v20  ;;  %v14255_v15 = vadd.f32 %v15075_v50, %v14241_v11 }
0x150d   : > { %v14256_v12 = vadd.f32 %v15075_v50, %v14242_v23  ;;  %v14243_v51 = vmul.f32 %v15074_v22, %v14229_v46 }
0x150e   : > { %v16266_v9 = vpop.eup %16265 }
0x150f   : > { %v14230_v8 = vmul.f32 %v16266_v9, %v21025_v21  ;;  %v14263_v0 = vpack.c.bf16 %v14256_v12, %v14255_v15  ;;  %v14257_v17 = vadd.f32 %v15075_v50, %v14243_v51 }
0x1511   : > { %v14244_v60 = vmul.f32 %v15074_v22, %v14230_v8  ;;  %15691 = vmatprep.mubr.msk.bf16.mxu0 %vm764_vm0, %v14263_v0 }
0x1513   : > { %v14258_v57 = vadd.f32 %v15075_v50, %v14244_v60 }
0x1515   : > { %v14264_v2 = vpack.c.bf16 %v14258_v57, %v14257_v17 }
0x1517   : > { %15692 = vmatmul.mubr.msk.bf16.vlgmr.msra.gmra.mrb[96].mxu0 %vm764_vm0, %v14264_v2 }
0x1540   : > { %v14193_v38 = vpop.xlane.xlu0 %14192 }
0x1541   : > { %v14207_v56 = vmul.f32 0.03125, %v14193_v38 }
0x1542   : > { %v14196_v37 = vpop.xlane.xlu1 %14195 }
0x1543   : > { %v14215_v47 = vadd.f32 1e-05, %v14207_v56  ;;  %v14208_v25 = vmul.f32 0.03125, %v14196_v37 }
0x1544   : > { %v14199_v1 = vpop.xlane.xlu0 %14198 }
0x1545   : > { %16267 = vrsqrt.f32 %v14215_v47  ;;  %v14216_v29 = vadd.f32 1e-05, %v14208_v25  ;;  %v14209_v6 = vmul.f32 0.03125, %v14199_v1 }
0x1546   : > { %v14202_v16 = vpop.xlane.xlu1 %14201 }
0x1547   : > { %16269 = vrsqrt.f32 %v14216_v29  ;;  %v14217_v21 = vadd.f32 1e-05, %v14209_v6  ;;  %v14210_v7 = vmul.f32 0.03125, %v14202_v16 }
0x1549   : > { %16271 = vrsqrt.f32 %v14217_v21  ;;  %v14218_v13 = vadd.f32 1e-05, %v14210_v7 }
0x154b   : > { %16273 = vrsqrt.f32 %v14218_v13 }
0x154f   : > { %v16268_v26 = vpop.eup %16267 }
0x1550   : > { %v14231_v35 = vmul.f32 %v16268_v26, %v21037_v44 }
0x1551   : > { %v16270_v41 = vpop.eup %16269 }
0x1552   : > { %v14232_v34 = vmul.f32 %v16270_v41, %v21039_v18  ;;  %v14245_v45 = vmul.f32 %v15074_v22, %v14231_v35  ;;  %v15929_v18 = vld [vmem:[%s21158_s14 + $0x40] sm:$0xff]  }
0x1553   : > { %v16272_v55 = vpop.eup %16271  ;;  %15699 = vmatprep.subr.bf16.mxu1 %v15929_v18 }
0x1554   : > { %v14233_v4 = vmul.f32 %v16272_v55, %v21044_v48  ;;  %v14246_v61 = vmul.f32 %v15074_v22, %v14232_v34  ;;  %v14259_v42 = vadd.f32 %v15075_v50, %v14245_v45  ;;  %v15930_v48 = vld [vmem:[%s21158_s14 + $0x48] sm:$0xff]   ;;  %15700 = vmatpush3.bf16.msra.mxu1 %v15929_v18 }
0x1555   : > { %v16274_v10 = vpop.eup %16273  ;;  %15701 = vmatprep.subr.bf16.mxu1 %v15930_v48 }
0x1556   : > { %v14234_v30 = vmul.f32 %v16274_v10, %v21050_v49  ;;  %v14260_v5 = vadd.f32 %v15075_v50, %v14246_v61  ;;  %v14247_v28 = vmul.f32 %v15074_v22, %v14233_v4  ;;  %v15931_v49 = vld [vmem:[%s21158_s14 + $0x50] sm:$0xff]  }
0x1558   : > { %v14265_v58 = vpack.c.bf16 %v14260_v5, %v14259_v42  ;;  %v14248_v14 = vmul.f32 %v15074_v22, %v14234_v30  ;;  %v14261_v59 = vadd.f32 %v15075_v50, %v14247_v28  ;;  %15702 = vmatpush3.bf16.msra.mxu1 %v15930_v48 }
0x1559   : > { %15703 = vmatprep.subr.bf16.mxu1 %v15931_v49 }
0x155a   : > { %15695 = vmatprep.mubr.msk.bf16.mxu0 %vm764_vm0, %v14265_v58  ;;  %v14262_v44 = vadd.f32 %v15075_v50, %v14248_v14 }
0x155c   : > { %v14266_v32 = vpack.c.bf16 %v14262_v44, %v14261_v59  ;;  %15704 = vmatpush3.bf16.msra.mxu1 %v15931_v49 }
0x155d   : > { %15705 = vmatprep.subr.bf16.mxu1 %v15932_v43 }
0x155e   : > { %15696 = vmatmul.mubr.msk.bf16.gmra.mrb[100].mxu0 %vm764_vm0, %v14266_v32 }
0x1560   : > { %15706 = vmatpush3.bf16.msra.mxu1 %v15932_v43 }
0x1561   : > { %15707 = vmatprep.subr.bf16.mxu1 %v15933_v31 }
0x1564   : > { %15708 = vmatpush3.bf16.msra.mxu1 %v15933_v31 }
0x1565   : > { %15709 = vmatprep.subr.bf16.mxu1 %v15934_v19 }
0x1568   : > { %15710 = vmatpush3.bf16.msra.mxu1 %v15934_v19 }
0x1569   : > { %15711 = vmatprep.subr.bf16.mxu1 %v15935_v24 }
0x156c   : > { %15712 = vmatpush3.bf16.msra.mxu1 %v15935_v24 }
0x156d   : > { %15713 = vmatprep.subr.bf16.mxu1 %v15936_v63 }
0x1570   : > { %15714 = vmatpush3.bf16.msra.mxu1 %v15936_v63 }
0x15ea   : > { %v15693_v53 = vpop.f32.mrb[96].mxu0 }
0x15eb   : > { %v14347_v33 = vadd.f32 %v15693_v53, %v15081_v39  ;;  %v14338_v22 = vpop.f32.mrb[97].mxu0 }
0x15ec   : > { %v14339_v52 = vadd.f32 %v15081_v39, %v14338_v22  ;;  %v15694_v40 = vpop.f32.mrb[98].mxu0 }
0x15ed   : > { %v14379_v20 = vmul.f32 0.044715, %v14347_v33  ;;  %v14350_v11 = vadd.f32 %v15694_v40, %v15081_v39  ;;  %v14341_v54 = vpop.f32.mrb[99].mxu0  ;;  %v14371_v35 = vmul.f32 0.5, %v14347_v33 }
0x15ee   : > { %v14377_v50 = vmul.f32 0.044715, %v14339_v52  ;;  %v14342_v46 = vadd.f32 %v15081_v39, %v14341_v54  ;;  %v14369_v45 = vmul.f32 0.5, %v14339_v52 }
0x15ef   : > { %v14387_v23 = vmul.f32 %v14379_v20, %v14347_v33  ;;  %v14380_v15 = vmul.f32 0.044715, %v14350_v11  ;;  %v14372_v41 = vmul.f32 0.5, %v14350_v11 }
0x15f0   : > { %v14385_v12 = vmul.f32 %v14377_v50, %v14339_v52  ;;  %v14378_v9 = vmul.f32 0.044715, %v14342_v46  ;;  %v14370_v55 = vmul.f32 0.5, %v14342_v46 }
0x15f1   : > { %v14395_v51 = vmul.f32 %v14387_v23, %v14347_v33  ;;  %v14388_v8 = vmul.f32 %v14380_v15, %v14350_v11 }
0x15f2   : > { %v14393_v0 = vmul.f32 %v14385_v12, %v14339_v52  ;;  %v14386_v60 = vmul.f32 %v14378_v9, %v14342_v46 }
0x15f3   : > { %v14403_v17 = vadd.f32 %v14395_v51, %v14347_v33  ;;  %v14396_v57 = vmul.f32 %v14388_v8, %v14350_v11 }
0x15f4   : > { %v14394_v2 = vmul.f32 %v14386_v60, %v14342_v46  ;;  %v14401_v38 = vadd.f32 %v14393_v0, %v14339_v52 }
0x15f5   : > { %v14411_v56 = vmul.f32 0.7978846, %v14403_v17  ;;  %v14404_v37 = vadd.f32 %v14396_v57, %v14350_v11 }
0x15f6   : > { %v14402_v47 = vadd.f32 %v14394_v2, %v14342_v46  ;;  %v14409_v25 = vmul.f32 0.7978846, %v14401_v38 }
0x15f7   : > { %16275 = vtanh.f32 %v14411_v56  ;;  %v14412_v1 = vmul.f32 0.7978846, %v14404_v37 }
0x15f8   : > { %v14410_v29 = vmul.f32 0.7978846, %v14402_v47  ;;  %16277 = vtanh.f32 %v14409_v25 }
0x15f9   : > { %16279 = vtanh.f32 %v14412_v1 }
0x15fa   : > { %16281 = vtanh.f32 %v14410_v29 }
0x1601   : > { %v16276_v6 = vpop.eup %16275 }
0x1602   : > { %v16278_v16 = vpop.eup %16277  ;;  %v14427_v21 = vadd.f32 1.0, %v16276_v6 }
0x1603   : > { %v16280_v7 = vpop.eup %16279  ;;  %v14425_v13 = vadd.f32 1.0, %v16278_v16 }
0x1604   : > { %v16282_v26 = vpop.eup %16281  ;;  %v14428_v34 = vadd.f32 1.0, %v16280_v7  ;;  %v14435_v61 = vmul.f32 %v14427_v21, %v14371_v35 }
0x1605   : > { %v14426_v4 = vadd.f32 1.0, %v16282_v26  ;;  %v14433_v30 = vmul.f32 %v14425_v13, %v14369_v45  ;;  %v15105_v13 = vld [vmem:[%s21159_s15 + $0x1] ss:$0 sm:$0xff] }
0x1606   : > { %v14436_v10 = vmul.f32 %v14428_v34, %v14372_v41 }
0x1607   : > { %v14434_v42 = vmul.f32 %v14426_v4, %v14370_v55 }
0x1608   : > { %v14442_v5 = vpack.c.bf16 %v14436_v10, %v14435_v61 }
0x1609   : > { %v14441_v28 = vpack.c.bf16 %v14434_v42, %v14433_v30 }
0x160b   : > { %15715 = vmatprep.mubr.bf16.mxu1 %v14441_v28 }
0x160c   : > { %15716 = vmatmul.mubr.bf16.vlgmr.msra.gmra.mrb[84].mxu1 %v14442_v5 }
0x1631   : > { %v15697_v58 = vpop.f32.mrb[100].mxu0 }
0x1632   : > { %v14363_v14 = vadd.f32 %v15697_v58, %v15081_v39  ;;  %v14354_v59 = vpop.f32.mrb[101].mxu0 }
0x1633   : > { %v14355_v44 = vadd.f32 %v15081_v39, %v14354_v59  ;;  %v15698_v32 = vpop.f32.mrb[102].mxu0 }
0x1634   : > { %v14383_v18 = vmul.f32 0.044715, %v14363_v14  ;;  %v14366_v48 = vadd.f32 %v15698_v32, %v15081_v39  ;;  %v14357_v49 = vpop.f32.mrb[103].mxu0  ;;  %v14375_v2 = vmul.f32 0.5, %v14363_v14 }
0x1635   : > { %v14381_v43 = vmul.f32 0.044715, %v14355_v44  ;;  %v14358_v31 = vadd.f32 %v15081_v39, %v14357_v49  ;;  %v14373_v37 = vmul.f32 0.5, %v14355_v44 }
0x1636   : > { %v14391_v19 = vmul.f32 %v14383_v18, %v14363_v14  ;;  %v14384_v24 = vmul.f32 0.044715, %v14366_v48  ;;  %v14376_v38 = vmul.f32 0.5, %v14366_v48 }
0x1637   : > { %v14389_v63 = vmul.f32 %v14381_v43, %v14355_v44  ;;  %v14382_v53 = vmul.f32 0.044715, %v14358_v31  ;;  %v14374_v47 = vmul.f32 0.5, %v14358_v31 }
0x1638   : > { %v14399_v33 = vmul.f32 %v14391_v19, %v14363_v14  ;;  %v14392_v22 = vmul.f32 %v14384_v24, %v14366_v48 }
0x1639   : > { %v14397_v52 = vmul.f32 %v14389_v63, %v14355_v44  ;;  %v14390_v40 = vmul.f32 %v14382_v53, %v14358_v31 }
0x163a   : > { %v14400_v20 = vmul.f32 %v14392_v22, %v14366_v48  ;;  %v14407_v11 = vadd.f32 %v14399_v33, %v14363_v14 }
0x163b   : > { %v14398_v54 = vmul.f32 %v14390_v40, %v14358_v31  ;;  %v14405_v50 = vadd.f32 %v14397_v52, %v14355_v44 }
0x163c   : > { %v14408_v46 = vadd.f32 %v14400_v20, %v14366_v48  ;;  %v14415_v23 = vmul.f32 0.7978846, %v14407_v11 }
0x163d   : > { %v14406_v15 = vadd.f32 %v14398_v54, %v14358_v31  ;;  %v14413_v12 = vmul.f32 0.7978846, %v14405_v50 }
0x163e   : > { %v14416_v9 = vmul.f32 0.7978846, %v14408_v46  ;;  %16283 = vtanh.f32 %v14415_v23  ;;  %v15937_v23 = vld [vmem:[%s21162_s18] sm:$0xff]  }
0x163f   : > { %v14414_v51 = vmul.f32 0.7978846, %v14406_v15  ;;  %16285 = vtanh.f32 %v14413_v12  ;;  %v15938_v15 = vld [vmem:[%s21162_s18 + $0x8] sm:$0xff]   ;;  %15723 = vmatprep.subr.bf16.mxu0 %v15937_v23 }
0x1640   : > { %16287 = vtanh.f32 %v14416_v9  ;;  %15724 = vmatpush3.bf16.msra.mxu0 %v15937_v23 }
0x1641   : > { %16289 = vtanh.f32 %v14414_v51  ;;  %15725 = vmatprep.subr.bf16.mxu0 %v15938_v15 }
0x1644   : > { %15726 = vmatpush3.bf16.msra.mxu0 %v15938_v15 }
0x1648   : > { %v16284_v39 = vpop.eup %16283 }
0x1649   : > { %v16286_v8 = vpop.eup %16285  ;;  %v14431_v0 = vadd.f32 1.0, %v16284_v39 }
0x164a   : > { %v16288_v60 = vpop.eup %16287  ;;  %v14429_v17 = vadd.f32 1.0, %v16286_v8 }
0x164b   : > { %v16290_v57 = vpop.eup %16289  ;;  %v14432_v56 = vadd.f32 1.0, %v16288_v60  ;;  %v14439_v1 = vmul.f32 %v14431_v0, %v14375_v2 }
0x164c   : > { %v14430_v25 = vadd.f32 1.0, %v16290_v57  ;;  %v14437_v6 = vmul.f32 %v14429_v17, %v14373_v37  ;;  %v15114_v17 = vld [vmem:[%s21160_s16] ss:$0 sm:$0xff] }
0x164d   : > { %v14440_v29 = vmul.f32 %v14432_v56, %v14376_v38  ;;  %v15115_v37 = vld [vmem:[%s21161_s17] ss:$0 sm:$0xff] }
0x164e   : > { %v14438_v16 = vmul.f32 %v14430_v25, %v14374_v47 }
0x164f   : > { %v14444_v21 = vpack.c.bf16 %v14440_v29, %v14439_v1 }
0x1650   : > { %v14443_v7 = vpack.c.bf16 %v14438_v16, %v14437_v6 }
0x1652   : > { %15719 = vmatprep.mubr.bf16.mxu1 %v14443_v7 }
0x1653   : > { %15720 = vmatmul.mubr.bf16.gmra.mrb[88].mxu1 %v14444_v21 }
0x16df   : > { %v15717_v26 = vpop.f32.mrb[84].mxu1 }
0x16e0   : > { %v14559_v35 = vadd.f32 %v15717_v26, %v15105_v13  ;;  %v14552_v41 = vpop.f32.mrb[85].mxu1 }
0x16e1   : > { %v15718_v34 = vpop.f32.mrb[86].mxu1 }
0x16e2   : > { %v14579_v45 = vadd.f32 %v14559_v35, %v20983_v62  ;;  %v14562_v55 = vadd.f32 %v15718_v34, %v15105_v13  ;;  %v14554_v4 = vpop.f32.mrb[87].mxu1 }
0x16e4   : > { %v14580_v61 = vadd.f32 %v14562_v55, %v20989_v36  ;;  %v14585_v10 = vsel %vm764_vm0, %v14579_v45, 0.0 }
0x16e5   : > { %14586 = vadd.xlane.f32.xlu0 %v14585_v10 }
0x16e6   : > { %v14588_v30 = vsel %vm764_vm0, %v14580_v61, 0.0 }
0x16e7   : > { %14589 = vadd.xlane.f32.xlu1 %v14588_v30 }
0x1726   : > { %v15721_v42 = vpop.f32.mrb[88].mxu1 }
0x1727   : > { %v14573_v5 = vadd.f32 %v15721_v42, %v15105_v13  ;;  %v14566_v28 = vpop.f32.mrb[89].mxu1  ;;  %v15116_v42 = vld [vmem:[%s21163_s19] ss:$0 sm:$0xff] }
0x1728   : > { %v15722_v58 = vpop.f32.mrb[90].mxu1 }
0x1729   : > { %v14581_v14 = vadd.f32 %v14573_v5, %v20997_v3  ;;  %v14576_v59 = vadd.f32 %v15722_v58, %v15105_v13  ;;  %v14568_v44 = vpop.f32.mrb[91].mxu1 }
0x172b   : > { %v14582_v62 = vadd.f32 %v14576_v59, %v21002_v27  ;;  %v14591_v32 = vsel %vm764_vm0, %v14581_v14, 0.0 }
0x172c   : > { %14592 = vadd.xlane.f32.xlu0 %v14591_v32 }
0x172d   : > { %v14594_v36 = vsel %vm764_vm0, %v14582_v62, 0.0 }
0x172e   : > { %14595 = vadd.xlane.f32.xlu1 %v14594_v36 }
0x1772   : > { %v14587_v18 = vpop.xlane.xlu0 %14586 }
0x1773   : > { %v14597_v48 = vmul.f32 0.03125, %v14587_v18 }
0x1774   : > { %v14590_v49 = vpop.xlane.xlu1 %14589 }
0x1775   : > { %v14601_v43 = vsub.f32 %v14579_v45, %v14597_v48  ;;  %v14598_v31 = vmul.f32 0.03125, %v14590_v49 }
0x1777   : > { %v14602_v19 = vsub.f32 %v14580_v61, %v14598_v31  ;;  %v14605_v24 = vmul.f32 %v14601_v43, %v14601_v43 }
0x1779   : > { %v14609_v63 = vsel %vm764_vm0, %v14605_v24, 0.0  ;;  %v14606_v3 = vmul.f32 %v14602_v19, %v14602_v19 }
0x177a   : > { %14610 = vadd.xlane.f32.xlu0 %v14609_v63 }
0x177b   : > { %v14612_v53 = vsel %vm764_vm0, %v14606_v3, 0.0 }
0x177c   : > { %14613 = vadd.xlane.f32.xlu1 %v14612_v53 }
0x17b9   : > { %v14593_v27 = vpop.xlane.xlu0 %14592 }
0x17ba   : > { %v14599_v33 = vmul.f32 0.03125, %v14593_v27 }
0x17bb   : > { %v14596_v22 = vpop.xlane.xlu1 %14595 }
0x17bc   : > { %v14603_v52 = vsub.f32 %v14581_v14, %v14599_v33  ;;  %v14600_v40 = vmul.f32 0.03125, %v14596_v22 }
0x17be   : > { %v14604_v20 = vsub.f32 %v14582_v62, %v14600_v40  ;;  %v14607_v11 = vmul.f32 %v14603_v52, %v14603_v52 }
0x17c0   : > { %v14615_v54 = vsel %vm764_vm0, %v14607_v11, 0.0  ;;  %v14608_v50 = vmul.f32 %v14604_v20, %v14604_v20 }
0x17c1   : > { %14616 = vadd.xlane.f32.xlu0 %v14615_v54 }
0x17c2   : > { %v14618_v46 = vsel %vm764_vm0, %v14608_v50, 0.0 }
0x17c3   : > { %14619 = vadd.xlane.f32.xlu1 %v14618_v46 }
0x1807   : > { %v14611_v12 = vpop.xlane.xlu0 %14610 }
0x1808   : > { %v14621_v9 = vmul.f32 0.03125, %v14611_v12 }
0x1809   : > { %v14614_v51 = vpop.xlane.xlu1 %14613 }
0x180a   : > { %v14625_v39 = vadd.f32 1e-05, %v14621_v9  ;;  %v14622_v8 = vmul.f32 0.03125, %v14614_v51 }
0x180c   : > { %16291 = vrsqrt.f32 %v14625_v39  ;;  %v14626_v0 = vadd.f32 1e-05, %v14622_v8 }
0x180e   : > { %16293 = vrsqrt.f32 %v14626_v0 }
0x1816   : > { %v16292_v60 = vpop.eup %16291 }
0x1817   : > { %v14633_v57 = vmul.f32 %v16292_v60, %v14601_v43 }
0x1818   : > { %v16294_v2 = vpop.eup %16293 }
0x1819   : > { %v14634_v38 = vmul.f32 %v16294_v2, %v14602_v19  ;;  %v14643_v56 = vmul.f32 %v15114_v17, %v14633_v57 }
0x181b   : > { %v14644_v47 = vmul.f32 %v15114_v17, %v14634_v38  ;;  %v14653_v25 = vadd.f32 %v15115_v37, %v14643_v56 }
0x181d   : > { %v14654_v1 = vadd.f32 %v15115_v37, %v14644_v47 }
0x181f   : > { %v14657_v29 = vpack.c.bf16 %v14654_v1, %v14653_v25 }
0x1821   : > { %15727 = vmatprep.mubr.msk.bf16.mxu0 %vm764_vm0, %v14657_v29 }
0x184e   : > { %v14617_v6 = vpop.xlane.xlu0 %14616 }
0x184f   : > { %v14623_v16 = vmul.f32 0.03125, %v14617_v6 }
0x1850   : > { %v14620_v21 = vpop.xlane.xlu1 %14619 }
0x1851   : > { %v14627_v7 = vadd.f32 1e-05, %v14623_v16  ;;  %v14624_v13 = vmul.f32 0.03125, %v14620_v21 }
0x1853   : > { %16295 = vrsqrt.f32 %v14627_v7  ;;  %v14628_v26 = vadd.f32 1e-05, %v14624_v13 }
0x1855   : > { %16297 = vrsqrt.f32 %v14628_v26 }
0x185d   : > { %v16296_v35 = vpop.eup %16295 }
0x185e   : > { %v14635_v41 = vmul.f32 %v16296_v35, %v14603_v52 }
0x185f   : > { %v16298_v34 = vpop.eup %16297 }
0x1860   : > { %v14645_v45 = vmul.f32 %v15114_v17, %v14635_v41  ;;  %v14636_v55 = vmul.f32 %v16298_v34, %v14604_v20 }
0x1862   : > { %v14646_v4 = vmul.f32 %v15114_v17, %v14636_v55  ;;  %v14655_v61 = vadd.f32 %v15115_v37, %v14645_v45 }
0x1864   : > { %v14656_v10 = vadd.f32 %v15115_v37, %v14646_v4 }
0x1866   : > { %v14658_v30 = vpack.c.bf16 %v14656_v10, %v14655_v61 }
0x1868   : > { %15728 = vmatmul.mubr.msk.bf16.vlgmr.msra.gmra.mrb[104].mxu0 %vm764_vm0, %v14658_v30 }
0x193b   : > { %v15729_v5 = vpop.f32.mrb[104].mxu0 }
0x193c   : > { %v14722_v28 = vpop.f32.mrb[105].mxu0  ;;  %v14731_v59 = vadd.f32 %v15729_v5, %v15116_v42 }
0x193d   : > { %v14723_v58 = vadd.f32 %v15116_v42, %v14722_v28  ;;  %v15730_v14 = vpop.f32.mrb[106].mxu0 }
0x193e   : > { %v14725_v44 = vpop.f32.mrb[107].mxu0  ;;  %14739 = vst [vmem:[%s636_s3 + $0x10] sm:$0xff] %v14731_v59  ;;  %v14734_v32 = vadd.f32 %v15730_v14, %v15116_v42 }
0x193f   : > { %14737 = vst [vmem:[%s636_s3] sm:$0xff] %v14723_v58  ;;  %v14726_v62 = vadd.f32 %v15116_v42, %v14725_v44 }
0x1940   : > { %14740 = vst [vmem:[%s636_s3 + $0x18] sm:$0xff] %v14734_v32 }
0x1941   : > { %14738 = vst [vmem:[%s636_s3 + $0x8] sm:$0xff] %v14726_v62 }
0x1942 PF: > { %s30_s1 = sadd.s32 1, %s16313_s1  }
0x1943   : > { %p27_p4 = scmp.ge.s32.totalorder %s30_s1, 4  }
0x1945   :  { %29 = sbr.rel (!%p27_p4) target bundleno = 6 (0x6), region = 142 }

</bundles_post_ra>
